<compile_context>
chip_gen: v7x
topology: tpu7x:2x2x1
jax: 0.10.0
libtpu: 0.0.40
codegen_flags: <defaults>
</compile_context>

<pallas_src>
import jax
import jax.numpy as jnp
from jax import lax
from jax.experimental import pallas as pl
from jax.experimental.pallas import tpu as pltpu


# ----------------------------- fused forward pass -----------------------------

def pnet_forward(x_nchw, params):
    """PNet forward. Input NCHW float32; returns (offset NCHW, confidence NCHW)."""
    x = jnp.transpose(x_nchw, (0, 2, 3, 1)).astype(jnp.float32)    # NCHW -> NHWC
    N, H, W, Cin = x.shape
    assert Cin == 3

    # ---- static geometry ----
    Hp, Wp = H + 2, W + 2                                # conv1 padding=1
    OH1, OW1 = H, W                                      # conv1 output
    PH, PW = (OH1 - 3) // 2 + 1, (OW1 - 3) // 2 + 1      # MaxPool2d(3, stride=2)
    OH2, OW2 = PH - 2, PW - 2                            # conv2 (3x3 valid)
    OH3, OW3 = OH2 - 2, OW2 - 2                          # conv3 (3x3 valid)
    M1, MP, M2, M3 = OH1 * OW1, PH * PW, OH2 * OW2, OH3 * OW3
    K1, K2, K3 = 9 * 3, 9 * 10, 9 * 16

    def kernel(x_ref, w1_ref, p1_ref, w2_ref, p2_ref, w3_ref, p3_ref,
               wh_ref, bh_ref, off_ref, conf_ref,
               pat1, act1, pool, pat2, act2, pat3):
        # ---------- conv1 (3x3, pad already applied) + PReLU ----------
        # im2col directly into VMEM scratch: pure static ref-to-ref copies.
        for oh in range(OH1):
            for i in range(3):
                for j in range(3):
                    c0 = (i * 3 + j) * 3
                    pat1[oh * OW1:(oh + 1) * OW1, c0:c0 + 3] = \
                        x_ref[0, oh + i, j:j + OW1, :]
        y = jnp.dot(pat1[...].astype(jnp.bfloat16), w1_ref[...],
                    preferred_element_type=jnp.float32)            # (M1, 10)
        y = y + p1_ref[0:1, :]
        act1[...] = jnp.where(y >= 0.0, y, p1_ref[1:2, :] * y)

        # ---------- MaxPool2d(kernel_size=3, stride=2), floor mode ----------
        for ph in range(PH):
            r0 = act1[(2 * ph + 0) * OW1:(2 * ph + 1) * OW1, :]
            r1 = act1[(2 * ph + 1) * OW1:(2 * ph + 2) * OW1, :]
            r2 = act1[(2 * ph + 2) * OW1:(2 * ph + 3) * OW1, :]
            m = jnp.maximum(jnp.maximum(r0, r1), r2)               # (OW1, 10)
            # sliding 3-wide max along the row, then pick stride-2 starts
            p = jnp.maximum(jnp.maximum(m[0:OW1 - 2, :], m[1:OW1 - 1, :]),
                            m[2:OW1, :])                           # (OW1-2, 10)
            for pw in range(PW):
                pool[ph * PW + pw:ph * PW + pw + 1, :] = p[2 * pw:2 * pw + 1, :]

        # ---------- conv2 (3x3 valid) + PReLU ----------
        for oh in range(OH2):
            for i in range(3):
                for j in range(3):
                    c0 = (i * 3 + j) * 10
                    src = (oh + i) * PW + j
                    pat2[oh * OW2:(oh + 1) * OW2, c0:c0 + 10] = pool[src:src + OW2, :]
        y = jnp.dot(pat2[...].astype(jnp.bfloat16), w2_ref[...],
                    preferred_element_type=jnp.float32)            # (M2, 16)
        y = y + p2_ref[0:1, :]
        act2[...] = jnp.where(y >= 0.0, y, p2_ref[1:2, :] * y)

        # ---------- conv3 (3x3 valid) + PReLU ----------
        for oh in range(OH3):
            for i in range(3):
                for j in range(3):
                    c0 = (i * 3 + j) * 16
                    src = (oh + i) * OW2 + j
                    pat3[oh * OW3:(oh + 1) * OW3, c0:c0 + 16] = act2[src:src + OW3, :]
        y = jnp.dot(pat3[...].astype(jnp.bfloat16), w3_ref[...],
                    preferred_element_type=jnp.float32)            # (M3, 32)
        y = y + p3_ref[0:1, :]
        feat = jnp.where(y >= 0.0, y, p3_ref[1:2, :] * y)

        # ---------- fused 1x1 heads: one matmul, split, sigmoid on conf ----------
        z = jnp.dot(feat.astype(jnp.bfloat16), wh_ref[...],
                    preferred_element_type=jnp.float32) + bh_ref[...]   # (M3, 5)
        off_ref[0] = z[:, 0:4]
        conf_ref[0] = 1.0 / (1.0 + jnp.exp(-z[:, 4:5]))

    # ---- host-side parameter packing (tiny, one-time, fuses under jit) ----
    bf = jnp.bfloat16
    xp = jnp.pad(x, ((0, 0), (1, 1), (1, 1), (0, 0)))              # conv1 pad=1
    w1 = params['w1'].reshape(K1, 10).astype(bf)
    w2 = params['w2'].reshape(K2, 16).astype(bf)
    w3 = params['w3'].reshape(K3, 32).astype(bf)
    wh = jnp.concatenate([params['wo'], params['wc']], axis=1).astype(bf)   # (32, 5)
    bh = jnp.concatenate([params['bo'], params['bc']], axis=1)              # (1, 5)
    # row 0 = bias, row 1 = PReLU slope (broadcast): one small tile per layer
    p1 = jnp.concatenate([params['b1'], jnp.broadcast_to(params['a1'], (1, 10))], 0)
    p2 = jnp.concatenate([params['b2'], jnp.broadcast_to(params['a2'], (1, 16))], 0)
    p3 = jnp.concatenate([params['b3'], jnp.broadcast_to(params['a3'], (1, 32))], 0)

    def full(shape):
        return pl.BlockSpec(shape, lambda n, _nd=len(shape): (0,) * _nd)

    off_flat, conf_flat = pl.pallas_call(
        kernel,
        out_shape=(jax.ShapeDtypeStruct((N, M3, 4), jnp.float32),
                   jax.ShapeDtypeStruct((N, M3, 1), jnp.float32)),
        grid=(N,),
        in_specs=[
            pl.BlockSpec((1, Hp, Wp, 3), lambda n: (n, 0, 0, 0)),   # padded image
            full((K1, 10)), full((2, 10)),                          # conv1 w, bias/slope
            full((K2, 16)), full((2, 16)),                          # conv2
            full((K3, 32)), full((2, 32)),                          # conv3
            full((32, 5)), full((1, 5)),                            # fused heads
        ],
        out_specs=(pl.BlockSpec((1, M3, 4), lambda n: (n, 0, 0)),
                   pl.BlockSpec((1, M3, 1), lambda n: (n, 0, 0))),
        scratch_shapes=[
            pltpu.VMEM((M1, K1), jnp.float32),   # conv1 im2col patches
            pltpu.VMEM((M1, 10), jnp.float32),   # conv1 activations
            pltpu.VMEM((MP, 10), jnp.float32),   # pooled activations
            pltpu.VMEM((M2, K2), jnp.float32),   # conv2 patches
            pltpu.VMEM((M2, 16), jnp.float32),   # conv2 activations
            pltpu.VMEM((M3, K3), jnp.float32),   # conv3 patches
        ],
        compiler_params=pltpu.CompilerParams(
            dimension_semantics=("parallel",)),
    )(xp, w1, p1, w2, p2, w3, p3, wh, bh)

    off = off_flat.reshape(N, OH3, OW3, 4).transpose(0, 3, 1, 2)   # back to NCHW
    conf = conf_flat.reshape(N, OH3, OW3, 1).transpose(0, 3, 1, 2)
    return off, conf


# ----------------------------- deterministic parameter init -----------------------------

def init_params(key):
    ks = jax.random.split(key, 10)

    def conv_w(k, kh, kw, cin, cout):
        return (jax.random.normal(k, (kh, kw, cin, cout), jnp.float32)
                / jnp.sqrt(float(kh * kw * cin)))

    return {
        'w1': conv_w(ks[0], 3, 3, 3, 10),
        'b1': 0.1 * jax.random.normal(ks[1], (1, 10), jnp.float32),
        'a1': jnp.full((1, 1), 0.25, jnp.float32),   # nn.PReLU() default init
        'w2': conv_w(ks[2], 3, 3, 10, 16),
        'b2': 0.1 * jax.random.normal(ks[3], (1, 16), jnp.float32),
        'a2': jnp.full((1, 1), 0.25, jnp.float32),
        'w3': conv_w(ks[4], 3, 3, 16, 32),
        'b3': 0.1 * jax.random.normal(ks[5], (1, 32), jnp.float32),
        'a3': jnp.full((1, 1), 0.25, jnp.float32),
        'wo': jax.random.normal(ks[6], (32, 4), jnp.float32) / jnp.sqrt(32.0),
        'bo': 0.1 * jax.random.normal(ks[7], (1, 4), jnp.float32),
        'wc': jax.random.normal(ks[8], (32, 1), jnp.float32) / jnp.sqrt(32.0),
        'bc': 0.1 * jax.random.normal(ks[9], (1, 1), jnp.float32),
    }


# ----------------------------- pure-JAX reference (correctness check) -----------------------------

def pnet_reference(x_nchw, params):
    def conv(x, w, b, padding):
        y = lax.conv_general_dilated(
            x, w, window_strides=(1, 1), padding=padding,
            dimension_numbers=('NHWC', 'HWIO', 'NHWC'),
            precision=lax.Precision.HIGHEST)
        return y + b.reshape(1, 1, 1, -1)

    def prelu(x, a):
        return jnp.where(x >= 0, x, a * x)

    x = jnp.transpose(x_nchw, (0, 2, 3, 1)).astype(jnp.float32)
    h = prelu(conv(x, params['w1'], params['b1'], [(1, 1), (1, 1)]), params['a1'][0, 0])
    h = lax.reduce_window(h, -jnp.inf, lax.max, (1, 3, 3, 1), (1, 2, 2, 1), 'VALID')
    h = prelu(conv(h, params['w2'], params['b2'], 'VALID'), params['a2'][0, 0])
    h = prelu(conv(h, params['w3'], params['b3'], 'VALID'), params['a3'][0, 0])
    off = conv(h, params['wo'].reshape(1, 1, 32, 4), params['bo'], 'VALID')
    conf = jax.nn.sigmoid(conv(h, params['wc'].reshape(1, 1, 32, 1), params['bc'], 'VALID'))
    return jnp.transpose(off, (0, 3, 1, 2)), jnp.transpose(conf, (0, 3, 1, 2))


# ----------------------------- main -----------------------------

if __name__ == "__main__":
    x = jax.random.normal(jax.random.PRNGKey(0), (2, 3, 16, 16), jnp.float32)  # NCHW like PyTorch
    params = init_params(jax.random.PRNGKey(1))

    fwd = jax.jit(pnet_forward)
    off, conf = jax.block_until_ready(fwd(x, params))

    assert off.shape == (2, 4, 3, 3), off.shape
    assert conf.shape == (2, 1, 3, 3), conf.shape

    off_ref, conf_ref = pnet_reference(x, params)
    # bf16 MXU operands (per perf guidance) -> compare against the f32
    # reference at a correspondingly looser tolerance.
    assert jnp.allclose(off, off_ref, atol=5e-2, rtol=5e-2), \
        float(jnp.max(jnp.abs(off - off_ref)))
    assert jnp.allclose(conf, conf_ref, atol=5e-2, rtol=5e-2), \
        float(jnp.max(jnp.abs(conf - conf_ref)))

    print("KERNEL_OK")
</pallas_src>

<mosaic_0001>
module attributes {stable_mosaic.version = 11 : i64} {
  func.func @kernel(%arg0: i32, %arg1: memref<1x18x18x3xf32, #tpu.memory_space<vmem>>, %arg2: memref<27x10xbf16, #tpu.memory_space<vmem>>, %arg3: memref<2x10xf32, #tpu.memory_space<vmem>>, %arg4: memref<90x16xbf16, #tpu.memory_space<vmem>>, %arg5: memref<2x16xf32, #tpu.memory_space<vmem>>, %arg6: memref<144x32xbf16, #tpu.memory_space<vmem>>, %arg7: memref<2x32xf32, #tpu.memory_space<vmem>>, %arg8: memref<32x5xbf16, #tpu.memory_space<vmem>>, %arg9: memref<1x5xf32, #tpu.memory_space<vmem>>, %arg10: memref<1x9x4xf32, #tpu.memory_space<vmem>>, %arg11: memref<1x9x1xf32, #tpu.memory_space<vmem>>, %arg12: memref<256x27xf32, #tpu.memory_space<vmem>>, %arg13: memref<256x10xf32, #tpu.memory_space<vmem>>, %arg14: memref<49x10xf32, #tpu.memory_space<vmem>>, %arg15: memref<25x90xf32, #tpu.memory_space<vmem>>, %arg16: memref<25x16xf32, #tpu.memory_space<vmem>>, %arg17: memref<9x144xf32, #tpu.memory_space<vmem>>) attributes {dimension_semantics = [#tpu.dimension_semantics<parallel>], iteration_bounds = array<i64: 2>, scalar_prefetch = 0 : i64, scratch_operands = 6 : i64, tpu.core_type = #tpu.core_type<tc>, window_params = [{transform_indices = @transform_0, window_bounds = array<i64: 1, 18, 18, 3>}, {pipeline_mode = #tpu.pipeline_mode<synchronous>, transform_indices = @transform_1, window_bounds = array<i64: 27, 10>}, {pipeline_mode = #tpu.pipeline_mode<synchronous>, transform_indices = @transform_2, window_bounds = array<i64: 2, 10>}, {pipeline_mode = #tpu.pipeline_mode<synchronous>, transform_indices = @transform_3, window_bounds = array<i64: 90, 16>}, {pipeline_mode = #tpu.pipeline_mode<synchronous>, transform_indices = @transform_4, window_bounds = array<i64: 2, 16>}, {pipeline_mode = #tpu.pipeline_mode<synchronous>, transform_indices = @transform_5, window_bounds = array<i64: 144, 32>}, {pipeline_mode = #tpu.pipeline_mode<synchronous>, transform_indices = @transform_6, window_bounds = array<i64: 2, 32>}, {pipeline_mode = #tpu.pipeline_mode<synchronous>, transform_indices = @transform_7, window_bounds = array<i64: 32, 5>}, {pipeline_mode = #tpu.pipeline_mode<synchronous>, transform_indices = @transform_8, window_bounds = array<i64: 1, 5>}, {transform_indices = @transform_9, window_bounds = array<i64: 1, 9, 4>}, {transform_indices = @transform_10, window_bounds = array<i64: 1, 9, 1>}]} {
    %c0 = arith.constant 0 : index
    %c0_0 = arith.constant 0 : index
    %c0_1 = arith.constant 0 : index
    %c0_2 = arith.constant 0 : index
    %0 = vector.load %arg1[%c0, %c0_0, %c0_1, %c0_2] : memref<1x18x18x3xf32, #tpu.memory_space<vmem>>, vector<1x1x16x3xf32>
    %1 = vector.shape_cast %0 : vector<1x1x16x3xf32> to vector<16x3xf32>
    %c0_3 = arith.constant 0 : index
    %c0_4 = arith.constant 0 : index
    %2 = vector.load %arg12[%c0_3, %c0_4] : memref<256x27xf32, #tpu.memory_space<vmem>>, vector<16x3xf32>
    tpu.vector_store %arg12[%c0_3, %c0_4], %1 {strides = array<i32>} : memref<256x27xf32, #tpu.memory_space<vmem>>, vector<16x3xf32>,
    %c0_5 = arith.constant 0 : index
    %c0_6 = arith.constant 0 : index
    %c1 = arith.constant 1 : index
    %c0_7 = arith.constant 0 : index
    %3 = vector.load %arg1[%c0_5, %c0_6, %c1, %c0_7] : memref<1x18x18x3xf32, #tpu.memory_space<vmem>>, vector<1x1x16x3xf32>
    %4 = vector.shape_cast %3 : vector<1x1x16x3xf32> to vector<16x3xf32>
    %c0_8 = arith.constant 0 : index
    %c3 = arith.constant 3 : index
    %5 = vector.load %arg12[%c0_8, %c3] : memref<256x27xf32, #tpu.memory_space<vmem>>, vector<16x3xf32>
    tpu.vector_store %arg12[%c0_8, %c3], %4 {strides = array<i32>} : memref<256x27xf32, #tpu.memory_space<vmem>>, vector<16x3xf32>,
    %c0_9 = arith.constant 0 : index
    %c0_10 = arith.constant 0 : index
    %c2 = arith.constant 2 : index
    %c0_11 = arith.constant 0 : index
    %6 = vector.load %arg1[%c0_9, %c0_10, %c2, %c0_11] : memref<1x18x18x3xf32, #tpu.memory_space<vmem>>, vector<1x1x16x3xf32>
    %7 = vector.shape_cast %6 : vector<1x1x16x3xf32> to vector<16x3xf32>
    %c0_12 = arith.constant 0 : index
    %c6 = arith.constant 6 : index
    %8 = vector.load %arg12[%c0_12, %c6] : memref<256x27xf32, #tpu.memory_space<vmem>>, vector<16x3xf32>
    tpu.vector_store %arg12[%c0_12, %c6], %7 {strides = array<i32>} : memref<256x27xf32, #tpu.memory_space<vmem>>, vector<16x3xf32>,
    %c0_13 = arith.constant 0 : index
    %c1_14 = arith.constant 1 : index
    %c0_15 = arith.constant 0 : index
    %c0_16 = arith.constant 0 : index
    %9 = vector.load %arg1[%c0_13, %c1_14, %c0_15, %c0_16] : memref<1x18x18x3xf32, #tpu.memory_space<vmem>>, vector<1x1x16x3xf32>
    %10 = vector.shape_cast %9 : vector<1x1x16x3xf32> to vector<16x3xf32>
    %c0_17 = arith.constant 0 : index
    %c9 = arith.constant 9 : index
    %11 = vector.load %arg12[%c0_17, %c9] : memref<256x27xf32, #tpu.memory_space<vmem>>, vector<16x3xf32>
    tpu.vector_store %arg12[%c0_17, %c9], %10 {strides = array<i32>} : memref<256x27xf32, #tpu.memory_space<vmem>>, vector<16x3xf32>,
    %c0_18 = arith.constant 0 : index
    %c1_19 = arith.constant 1 : index
    %c1_20 = arith.constant 1 : index
    %c0_21 = arith.constant 0 : index
    %12 = vector.load %arg1[%c0_18, %c1_19, %c1_20, %c0_21] : memref<1x18x18x3xf32, #tpu.memory_space<vmem>>, vector<1x1x16x3xf32>
    %13 = vector.shape_cast %12 : vector<1x1x16x3xf32> to vector<16x3xf32>
    %c0_22 = arith.constant 0 : index
    %c12 = arith.constant 12 : index
    %14 = vector.load %arg12[%c0_22, %c12] : memref<256x27xf32, #tpu.memory_space<vmem>>, vector<16x3xf32>
    tpu.vector_store %arg12[%c0_22, %c12], %13 {strides = array<i32>} : memref<256x27xf32, #tpu.memory_space<vmem>>, vector<16x3xf32>,
    %c0_23 = arith.constant 0 : index
    %c1_24 = arith.constant 1 : index
    %c2_25 = arith.constant 2 : index
    %c0_26 = arith.constant 0 : index
    %15 = vector.load %arg1[%c0_23, %c1_24, %c2_25, %c0_26] : memref<1x18x18x3xf32, #tpu.memory_space<vmem>>, vector<1x1x16x3xf32>
    %16 = vector.shape_cast %15 : vector<1x1x16x3xf32> to vector<16x3xf32>
    %c0_27 = arith.constant 0 : index
    %c15 = arith.constant 15 : index
    %17 = vector.load %arg12[%c0_27, %c15] : memref<256x27xf32, #tpu.memory_space<vmem>>, vector<16x3xf32>
    tpu.vector_store %arg12[%c0_27, %c15], %16 {strides = array<i32>} : memref<256x27xf32, #tpu.memory_space<vmem>>, vector<16x3xf32>,
    %c0_28 = arith.constant 0 : index
    %c2_29 = arith.constant 2 : index
    %c0_30 = arith.constant 0 : index
    %c0_31 = arith.constant 0 : index
    %18 = vector.load %arg1[%c0_28, %c2_29, %c0_30, %c0_31] : memref<1x18x18x3xf32, #tpu.memory_space<vmem>>, vector<1x1x16x3xf32>
    %19 = vector.shape_cast %18 : vector<1x1x16x3xf32> to vector<16x3xf32>
    %c0_32 = arith.constant 0 : index
    %c18 = arith.constant 18 : index
    %20 = vector.load %arg12[%c0_32, %c18] : memref<256x27xf32, #tpu.memory_space<vmem>>, vector<16x3xf32>
    tpu.vector_store %arg12[%c0_32, %c18], %19 {strides = array<i32>} : memref<256x27xf32, #tpu.memory_space<vmem>>, vector<16x3xf32>,
    %c0_33 = arith.constant 0 : index
    %c2_34 = arith.constant 2 : index
    %c1_35 = arith.constant 1 : index
    %c0_36 = arith.constant 0 : index
    %21 = vector.load %arg1[%c0_33, %c2_34, %c1_35, %c0_36] : memref<1x18x18x3xf32, #tpu.memory_space<vmem>>, vector<1x1x16x3xf32>
    %22 = vector.shape_cast %21 : vector<1x1x16x3xf32> to vector<16x3xf32>
    %c0_37 = arith.constant 0 : index
    %c21 = arith.constant 21 : index
    %23 = vector.load %arg12[%c0_37, %c21] : memref<256x27xf32, #tpu.memory_space<vmem>>, vector<16x3xf32>
    tpu.vector_store %arg12[%c0_37, %c21], %22 {strides = array<i32>} : memref<256x27xf32, #tpu.memory_space<vmem>>, vector<16x3xf32>,
    %c0_38 = arith.constant 0 : index
    %c2_39 = arith.constant 2 : index
    %c2_40 = arith.constant 2 : index
    %c0_41 = arith.constant 0 : index
    %24 = vector.load %arg1[%c0_38, %c2_39, %c2_40, %c0_41] : memref<1x18x18x3xf32, #tpu.memory_space<vmem>>, vector<1x1x16x3xf32>
    %25 = vector.shape_cast %24 : vector<1x1x16x3xf32> to vector<16x3xf32>
    %c0_42 = arith.constant 0 : index
    %c24 = arith.constant 24 : index
    %26 = vector.load %arg12[%c0_42, %c24] : memref<256x27xf32, #tpu.memory_space<vmem>>, vector<16x3xf32>
    tpu.vector_store %arg12[%c0_42, %c24], %25 {strides = array<i32>} : memref<256x27xf32, #tpu.memory_space<vmem>>, vector<16x3xf32>,
    %c0_43 = arith.constant 0 : index
    %c1_44 = arith.constant 1 : index
    %c0_45 = arith.constant 0 : index
    %c0_46 = arith.constant 0 : index
    %27 = vector.load %arg1[%c0_43, %c1_44, %c0_45, %c0_46] : memref<1x18x18x3xf32, #tpu.memory_space<vmem>>, vector<1x1x16x3xf32>
    %28 = vector.shape_cast %27 : vector<1x1x16x3xf32> to vector<16x3xf32>
    %c16 = arith.constant 16 : index
    %c0_47 = arith.constant 0 : index
    %29 = vector.load %arg12[%c16, %c0_47] : memref<256x27xf32, #tpu.memory_space<vmem>>, vector<16x3xf32>
    tpu.vector_store %arg12[%c16, %c0_47], %28 {strides = array<i32>} : memref<256x27xf32, #tpu.memory_space<vmem>>, vector<16x3xf32>,
    %c0_48 = arith.constant 0 : index
    %c1_49 = arith.constant 1 : index
    %c1_50 = arith.constant 1 : index
    %c0_51 = arith.constant 0 : index
    %30 = vector.load %arg1[%c0_48, %c1_49, %c1_50, %c0_51] : memref<1x18x18x3xf32, #tpu.memory_space<vmem>>, vector<1x1x16x3xf32>
    %31 = vector.shape_cast %30 : vector<1x1x16x3xf32> to vector<16x3xf32>
    %c16_52 = arith.constant 16 : index
    %c3_53 = arith.constant 3 : index
    %32 = vector.load %arg12[%c16_52, %c3_53] : memref<256x27xf32, #tpu.memory_space<vmem>>, vector<16x3xf32>
    tpu.vector_store %arg12[%c16_52, %c3_53], %31 {strides = array<i32>} : memref<256x27xf32, #tpu.memory_space<vmem>>, vector<16x3xf32>,
    %c0_54 = arith.constant 0 : index
    %c1_55 = arith.constant 1 : index
    %c2_56 = arith.constant 2 : index
    %c0_57 = arith.constant 0 : index
    %33 = vector.load %arg1[%c0_54, %c1_55, %c2_56, %c0_57] : memref<1x18x18x3xf32, #tpu.memory_space<vmem>>, vector<1x1x16x3xf32>
    %34 = vector.shape_cast %33 : vector<1x1x16x3xf32> to vector<16x3xf32>
    %c16_58 = arith.constant 16 : index
    %c6_59 = arith.constant 6 : index
    %35 = vector.load %arg12[%c16_58, %c6_59] : memref<256x27xf32, #tpu.memory_space<vmem>>, vector<16x3xf32>
    tpu.vector_store %arg12[%c16_58, %c6_59], %34 {strides = array<i32>} : memref<256x27xf32, #tpu.memory_space<vmem>>, vector<16x3xf32>,
    %c0_60 = arith.constant 0 : index
    %c2_61 = arith.constant 2 : index
    %c0_62 = arith.constant 0 : index
    %c0_63 = arith.constant 0 : index
    %36 = vector.load %arg1[%c0_60, %c2_61, %c0_62, %c0_63] : memref<1x18x18x3xf32, #tpu.memory_space<vmem>>, vector<1x1x16x3xf32>
    %37 = vector.shape_cast %36 : vector<1x1x16x3xf32> to vector<16x3xf32>
    %c16_64 = arith.constant 16 : index
    %c9_65 = arith.constant 9 : index
    %38 = vector.load %arg12[%c16_64, %c9_65] : memref<256x27xf32, #tpu.memory_space<vmem>>, vector<16x3xf32>
    tpu.vector_store %arg12[%c16_64, %c9_65], %37 {strides = array<i32>} : memref<256x27xf32, #tpu.memory_space<vmem>>, vector<16x3xf32>,
    %c0_66 = arith.constant 0 : index
    %c2_67 = arith.constant 2 : index
    %c1_68 = arith.constant 1 : index
    %c0_69 = arith.constant 0 : index
    %39 = vector.load %arg1[%c0_66, %c2_67, %c1_68, %c0_69] : memref<1x18x18x3xf32, #tpu.memory_space<vmem>>, vector<1x1x16x3xf32>
    %40 = vector.shape_cast %39 : vector<1x1x16x3xf32> to vector<16x3xf32>
    %c16_70 = arith.constant 16 : index
    %c12_71 = arith.constant 12 : index
    %41 = vector.load %arg12[%c16_70, %c12_71] : memref<256x27xf32, #tpu.memory_space<vmem>>, vector<16x3xf32>
    tpu.vector_store %arg12[%c16_70, %c12_71], %40 {strides = array<i32>} : memref<256x27xf32, #tpu.memory_space<vmem>>, vector<16x3xf32>,
    %c0_72 = arith.constant 0 : index
    %c2_73 = arith.constant 2 : index
    %c2_74 = arith.constant 2 : index
    %c0_75 = arith.constant 0 : index
    %42 = vector.load %arg1[%c0_72, %c2_73, %c2_74, %c0_75] : memref<1x18x18x3xf32, #tpu.memory_space<vmem>>, vector<1x1x16x3xf32>
    %43 = vector.shape_cast %42 : vector<1x1x16x3xf32> to vector<16x3xf32>
    %c16_76 = arith.constant 16 : index
    %c15_77 = arith.constant 15 : index
    %44 = vector.load %arg12[%c16_76, %c15_77] : memref<256x27xf32, #tpu.memory_space<vmem>>, vector<16x3xf32>
    tpu.vector_store %arg12[%c16_76, %c15_77], %43 {strides = array<i32>} : memref<256x27xf32, #tpu.memory_space<vmem>>, vector<16x3xf32>,
    %c0_78 = arith.constant 0 : index
    %c3_79 = arith.constant 3 : index
    %c0_80 = arith.constant 0 : index
    %c0_81 = arith.constant 0 : index
    %45 = vector.load %arg1[%c0_78, %c3_79, %c0_80, %c0_81] : memref<1x18x18x3xf32, #tpu.memory_space<vmem>>, vector<1x1x16x3xf32>
    %46 = vector.shape_cast %45 : vector<1x1x16x3xf32> to vector<16x3xf32>
    %c16_82 = arith.constant 16 : index
    %c18_83 = arith.constant 18 : index
    %47 = vector.load %arg12[%c16_82, %c18_83] : memref<256x27xf32, #tpu.memory_space<vmem>>, vector<16x3xf32>
    tpu.vector_store %arg12[%c16_82, %c18_83], %46 {strides = array<i32>} : memref<256x27xf32, #tpu.memory_space<vmem>>, vector<16x3xf32>,
    %c0_84 = arith.constant 0 : index
    %c3_85 = arith.constant 3 : index
    %c1_86 = arith.constant 1 : index
    %c0_87 = arith.constant 0 : index
    %48 = vector.load %arg1[%c0_84, %c3_85, %c1_86, %c0_87] : memref<1x18x18x3xf32, #tpu.memory_space<vmem>>, vector<1x1x16x3xf32>
    %49 = vector.shape_cast %48 : vector<1x1x16x3xf32> to vector<16x3xf32>
    %c16_88 = arith.constant 16 : index
    %c21_89 = arith.constant 21 : index
    %50 = vector.load %arg12[%c16_88, %c21_89] : memref<256x27xf32, #tpu.memory_space<vmem>>, vector<16x3xf32>
    tpu.vector_store %arg12[%c16_88, %c21_89], %49 {strides = array<i32>} : memref<256x27xf32, #tpu.memory_space<vmem>>, vector<16x3xf32>,
    %c0_90 = arith.constant 0 : index
    %c3_91 = arith.constant 3 : index
    %c2_92 = arith.constant 2 : index
    %c0_93 = arith.constant 0 : index
    %51 = vector.load %arg1[%c0_90, %c3_91, %c2_92, %c0_93] : memref<1x18x18x3xf32, #tpu.memory_space<vmem>>, vector<1x1x16x3xf32>
    %52 = vector.shape_cast %51 : vector<1x1x16x3xf32> to vector<16x3xf32>
    %c16_94 = arith.constant 16 : index
    %c24_95 = arith.constant 24 : index
    %53 = vector.load %arg12[%c16_94, %c24_95] : memref<256x27xf32, #tpu.memory_space<vmem>>, vector<16x3xf32>
    tpu.vector_store %arg12[%c16_94, %c24_95], %52 {strides = array<i32>} : memref<256x27xf32, #tpu.memory_space<vmem>>, vector<16x3xf32>,
    %c0_96 = arith.constant 0 : index
    %c2_97 = arith.constant 2 : index
    %c0_98 = arith.constant 0 : index
    %c0_99 = arith.constant 0 : index
    %54 = vector.load %arg1[%c0_96, %c2_97, %c0_98, %c0_99] : memref<1x18x18x3xf32, #tpu.memory_space<vmem>>, vector<1x1x16x3xf32>
    %55 = vector.shape_cast %54 : vector<1x1x16x3xf32> to vector<16x3xf32>
    %c32 = arith.constant 32 : index
    %c0_100 = arith.constant 0 : index
    %56 = vector.load %arg12[%c32, %c0_100] : memref<256x27xf32, #tpu.memory_space<vmem>>, vector<16x3xf32>
    tpu.vector_store %arg12[%c32, %c0_100], %55 {strides = array<i32>} : memref<256x27xf32, #tpu.memory_space<vmem>>, vector<16x3xf32>,
    %c0_101 = arith.constant 0 : index
    %c2_102 = arith.constant 2 : index
    %c1_103 = arith.constant 1 : index
    %c0_104 = arith.constant 0 : index
    %57 = vector.load %arg1[%c0_101, %c2_102, %c1_103, %c0_104] : memref<1x18x18x3xf32, #tpu.memory_space<vmem>>, vector<1x1x16x3xf32>
    %58 = vector.shape_cast %57 : vector<1x1x16x3xf32> to vector<16x3xf32>
    %c32_105 = arith.constant 32 : index
    %c3_106 = arith.constant 3 : index
    %59 = vector.load %arg12[%c32_105, %c3_106] : memref<256x27xf32, #tpu.memory_space<vmem>>, vector<16x3xf32>
    tpu.vector_store %arg12[%c32_105, %c3_106], %58 {strides = array<i32>} : memref<256x27xf32, #tpu.memory_space<vmem>>, vector<16x3xf32>,
    %c0_107 = arith.constant 0 : index
    %c2_108 = arith.constant 2 : index
    %c2_109 = arith.constant 2 : index
    %c0_110 = arith.constant 0 : index
    %60 = vector.load %arg1[%c0_107, %c2_108, %c2_109, %c0_110] : memref<1x18x18x3xf32, #tpu.memory_space<vmem>>, vector<1x1x16x3xf32>
    %61 = vector.shape_cast %60 : vector<1x1x16x3xf32> to vector<16x3xf32>
    %c32_111 = arith.constant 32 : index
    %c6_112 = arith.constant 6 : index
    %62 = vector.load %arg12[%c32_111, %c6_112] : memref<256x27xf32, #tpu.memory_space<vmem>>, vector<16x3xf32>
    tpu.vector_store %arg12[%c32_111, %c6_112], %61 {strides = array<i32>} : memref<256x27xf32, #tpu.memory_space<vmem>>, vector<16x3xf32>,
    %c0_113 = arith.constant 0 : index
    %c3_114 = arith.constant 3 : index
    %c0_115 = arith.constant 0 : index
    %c0_116 = arith.constant 0 : index
    %63 = vector.load %arg1[%c0_113, %c3_114, %c0_115, %c0_116] : memref<1x18x18x3xf32, #tpu.memory_space<vmem>>, vector<1x1x16x3xf32>
    %64 = vector.shape_cast %63 : vector<1x1x16x3xf32> to vector<16x3xf32>
    %c32_117 = arith.constant 32 : index
    %c9_118 = arith.constant 9 : index
    %65 = vector.load %arg12[%c32_117, %c9_118] : memref<256x27xf32, #tpu.memory_space<vmem>>, vector<16x3xf32>
    tpu.vector_store %arg12[%c32_117, %c9_118], %64 {strides = array<i32>} : memref<256x27xf32, #tpu.memory_space<vmem>>, vector<16x3xf32>,
    %c0_119 = arith.constant 0 : index
    %c3_120 = arith.constant 3 : index
    %c1_121 = arith.constant 1 : index
    %c0_122 = arith.constant 0 : index
    %66 = vector.load %arg1[%c0_119, %c3_120, %c1_121, %c0_122] : memref<1x18x18x3xf32, #tpu.memory_space<vmem>>, vector<1x1x16x3xf32>
    %67 = vector.shape_cast %66 : vector<1x1x16x3xf32> to vector<16x3xf32>
    %c32_123 = arith.constant 32 : index
    %c12_124 = arith.constant 12 : index
    %68 = vector.load %arg12[%c32_123, %c12_124] : memref<256x27xf32, #tpu.memory_space<vmem>>, vector<16x3xf32>
    tpu.vector_store %arg12[%c32_123, %c12_124], %67 {strides = array<i32>} : memref<256x27xf32, #tpu.memory_space<vmem>>, vector<16x3xf32>,
    %c0_125 = arith.constant 0 : index
    %c3_126 = arith.constant 3 : index
    %c2_127 = arith.constant 2 : index
    %c0_128 = arith.constant 0 : index
    %69 = vector.load %arg1[%c0_125, %c3_126, %c2_127, %c0_128] : memref<1x18x18x3xf32, #tpu.memory_space<vmem>>, vector<1x1x16x3xf32>
    %70 = vector.shape_cast %69 : vector<1x1x16x3xf32> to vector<16x3xf32>
    %c32_129 = arith.constant 32 : index
    %c15_130 = arith.constant 15 : index
    %71 = vector.load %arg12[%c32_129, %c15_130] : memref<256x27xf32, #tpu.memory_space<vmem>>, vector<16x3xf32>
    tpu.vector_store %arg12[%c32_129, %c15_130], %70 {strides = array<i32>} : memref<256x27xf32, #tpu.memory_space<vmem>>, vector<16x3xf32>,
    %c0_131 = arith.constant 0 : index
    %c4 = arith.constant 4 : index
    %c0_132 = arith.constant 0 : index
    %c0_133 = arith.constant 0 : index
    %72 = vector.load %arg1[%c0_131, %c4, %c0_132, %c0_133] : memref<1x18x18x3xf32, #tpu.memory_space<vmem>>, vector<1x1x16x3xf32>
    %73 = vector.shape_cast %72 : vector<1x1x16x3xf32> to vector<16x3xf32>
    %c32_134 = arith.constant 32 : index
    %c18_135 = arith.constant 18 : index
    %74 = vector.load %arg12[%c32_134, %c18_135] : memref<256x27xf32, #tpu.memory_space<vmem>>, vector<16x3xf32>
    tpu.vector_store %arg12[%c32_134, %c18_135], %73 {strides = array<i32>} : memref<256x27xf32, #tpu.memory_space<vmem>>, vector<16x3xf32>,
    %c0_136 = arith.constant 0 : index
    %c4_137 = arith.constant 4 : index
    %c1_138 = arith.constant 1 : index
    %c0_139 = arith.constant 0 : index
    %75 = vector.load %arg1[%c0_136, %c4_137, %c1_138, %c0_139] : memref<1x18x18x3xf32, #tpu.memory_space<vmem>>, vector<1x1x16x3xf32>
    %76 = vector.shape_cast %75 : vector<1x1x16x3xf32> to vector<16x3xf32>
    %c32_140 = arith.constant 32 : index
    %c21_141 = arith.constant 21 : index
    %77 = vector.load %arg12[%c32_140, %c21_141] : memref<256x27xf32, #tpu.memory_space<vmem>>, vector<16x3xf32>
    tpu.vector_store %arg12[%c32_140, %c21_141], %76 {strides = array<i32>} : memref<256x27xf32, #tpu.memory_space<vmem>>, vector<16x3xf32>,
    %c0_142 = arith.constant 0 : index
    %c4_143 = arith.constant 4 : index
    %c2_144 = arith.constant 2 : index
    %c0_145 = arith.constant 0 : index
    %78 = vector.load %arg1[%c0_142, %c4_143, %c2_144, %c0_145] : memref<1x18x18x3xf32, #tpu.memory_space<vmem>>, vector<1x1x16x3xf32>
    %79 = vector.shape_cast %78 : vector<1x1x16x3xf32> to vector<16x3xf32>
    %c32_146 = arith.constant 32 : index
    %c24_147 = arith.constant 24 : index
    %80 = vector.load %arg12[%c32_146, %c24_147] : memref<256x27xf32, #tpu.memory_space<vmem>>, vector<16x3xf32>
    tpu.vector_store %arg12[%c32_146, %c24_147], %79 {strides = array<i32>} : memref<256x27xf32, #tpu.memory_space<vmem>>, vector<16x3xf32>,
    %c0_148 = arith.constant 0 : index
    %c3_149 = arith.constant 3 : index
    %c0_150 = arith.constant 0 : index
    %c0_151 = arith.constant 0 : index
    %81 = vector.load %arg1[%c0_148, %c3_149, %c0_150, %c0_151] : memref<1x18x18x3xf32, #tpu.memory_space<vmem>>, vector<1x1x16x3xf32>
    %82 = vector.shape_cast %81 : vector<1x1x16x3xf32> to vector<16x3xf32>
    %c48 = arith.constant 48 : index
    %c0_152 = arith.constant 0 : index
    %83 = vector.load %arg12[%c48, %c0_152] : memref<256x27xf32, #tpu.memory_space<vmem>>, vector<16x3xf32>
    tpu.vector_store %arg12[%c48, %c0_152], %82 {strides = array<i32>} : memref<256x27xf32, #tpu.memory_space<vmem>>, vector<16x3xf32>,
    %c0_153 = arith.constant 0 : index
    %c3_154 = arith.constant 3 : index
    %c1_155 = arith.constant 1 : index
    %c0_156 = arith.constant 0 : index
    %84 = vector.load %arg1[%c0_153, %c3_154, %c1_155, %c0_156] : memref<1x18x18x3xf32, #tpu.memory_space<vmem>>, vector<1x1x16x3xf32>
    %85 = vector.shape_cast %84 : vector<1x1x16x3xf32> to vector<16x3xf32>
    %c48_157 = arith.constant 48 : index
    %c3_158 = arith.constant 3 : index
    %86 = vector.load %arg12[%c48_157, %c3_158] : memref<256x27xf32, #tpu.memory_space<vmem>>, vector<16x3xf32>
    tpu.vector_store %arg12[%c48_157, %c3_158], %85 {strides = array<i32>} : memref<256x27xf32, #tpu.memory_space<vmem>>, vector<16x3xf32>,
    %c0_159 = arith.constant 0 : index
    %c3_160 = arith.constant 3 : index
    %c2_161 = arith.constant 2 : index
    %c0_162 = arith.constant 0 : index
    %87 = vector.load %arg1[%c0_159, %c3_160, %c2_161, %c0_162] : memref<1x18x18x3xf32, #tpu.memory_space<vmem>>, vector<1x1x16x3xf32>
    %88 = vector.shape_cast %87 : vector<1x1x16x3xf32> to vector<16x3xf32>
    %c48_163 = arith.constant 48 : index
    %c6_164 = arith.constant 6 : index
    %89 = vector.load %arg12[%c48_163, %c6_164] : memref<256x27xf32, #tpu.memory_space<vmem>>, vector<16x3xf32>
    tpu.vector_store %arg12[%c48_163, %c6_164], %88 {strides = array<i32>} : memref<256x27xf32, #tpu.memory_space<vmem>>, vector<16x3xf32>,
    %c0_165 = arith.constant 0 : index
    %c4_166 = arith.constant 4 : index
    %c0_167 = arith.constant 0 : index
    %c0_168 = arith.constant 0 : index
    %90 = vector.load %arg1[%c0_165, %c4_166, %c0_167, %c0_168] : memref<1x18x18x3xf32, #tpu.memory_space<vmem>>, vector<1x1x16x3xf32>
    %91 = vector.shape_cast %90 : vector<1x1x16x3xf32> to vector<16x3xf32>
    %c48_169 = arith.constant 48 : index
    %c9_170 = arith.constant 9 : index
    %92 = vector.load %arg12[%c48_169, %c9_170] : memref<256x27xf32, #tpu.memory_space<vmem>>, vector<16x3xf32>
    tpu.vector_store %arg12[%c48_169, %c9_170], %91 {strides = array<i32>} : memref<256x27xf32, #tpu.memory_space<vmem>>, vector<16x3xf32>,
    %c0_171 = arith.constant 0 : index
    %c4_172 = arith.constant 4 : index
    %c1_173 = arith.constant 1 : index
    %c0_174 = arith.constant 0 : index
    %93 = vector.load %arg1[%c0_171, %c4_172, %c1_173, %c0_174] : memref<1x18x18x3xf32, #tpu.memory_space<vmem>>, vector<1x1x16x3xf32>
    %94 = vector.shape_cast %93 : vector<1x1x16x3xf32> to vector<16x3xf32>
    %c48_175 = arith.constant 48 : index
    %c12_176 = arith.constant 12 : index
    %95 = vector.load %arg12[%c48_175, %c12_176] : memref<256x27xf32, #tpu.memory_space<vmem>>, vector<16x3xf32>
    tpu.vector_store %arg12[%c48_175, %c12_176], %94 {strides = array<i32>} : memref<256x27xf32, #tpu.memory_space<vmem>>, vector<16x3xf32>,
    %c0_177 = arith.constant 0 : index
    %c4_178 = arith.constant 4 : index
    %c2_179 = arith.constant 2 : index
    %c0_180 = arith.constant 0 : index
    %96 = vector.load %arg1[%c0_177, %c4_178, %c2_179, %c0_180] : memref<1x18x18x3xf32, #tpu.memory_space<vmem>>, vector<1x1x16x3xf32>
    %97 = vector.shape_cast %96 : vector<1x1x16x3xf32> to vector<16x3xf32>
    %c48_181 = arith.constant 48 : index
    %c15_182 = arith.constant 15 : index
    %98 = vector.load %arg12[%c48_181, %c15_182] : memref<256x27xf32, #tpu.memory_space<vmem>>, vector<16x3xf32>
    tpu.vector_store %arg12[%c48_181, %c15_182], %97 {strides = array<i32>} : memref<256x27xf32, #tpu.memory_space<vmem>>, vector<16x3xf32>,
    %c0_183 = arith.constant 0 : index
    %c5 = arith.constant 5 : index
    %c0_184 = arith.constant 0 : index
    %c0_185 = arith.constant 0 : index
    %99 = vector.load %arg1[%c0_183, %c5, %c0_184, %c0_185] : memref<1x18x18x3xf32, #tpu.memory_space<vmem>>, vector<1x1x16x3xf32>
    %100 = vector.shape_cast %99 : vector<1x1x16x3xf32> to vector<16x3xf32>
    %c48_186 = arith.constant 48 : index
    %c18_187 = arith.constant 18 : index
    %101 = vector.load %arg12[%c48_186, %c18_187] : memref<256x27xf32, #tpu.memory_space<vmem>>, vector<16x3xf32>
    tpu.vector_store %arg12[%c48_186, %c18_187], %100 {strides = array<i32>} : memref<256x27xf32, #tpu.memory_space<vmem>>, vector<16x3xf32>,
    %c0_188 = arith.constant 0 : index
    %c5_189 = arith.constant 5 : index
    %c1_190 = arith.constant 1 : index
    %c0_191 = arith.constant 0 : index
    %102 = vector.load %arg1[%c0_188, %c5_189, %c1_190, %c0_191] : memref<1x18x18x3xf32, #tpu.memory_space<vmem>>, vector<1x1x16x3xf32>
    %103 = vector.shape_cast %102 : vector<1x1x16x3xf32> to vector<16x3xf32>
    %c48_192 = arith.constant 48 : index
    %c21_193 = arith.constant 21 : index
    %104 = vector.load %arg12[%c48_192, %c21_193] : memref<256x27xf32, #tpu.memory_space<vmem>>, vector<16x3xf32>
    tpu.vector_store %arg12[%c48_192, %c21_193], %103 {strides = array<i32>} : memref<256x27xf32, #tpu.memory_space<vmem>>, vector<16x3xf32>,
    %c0_194 = arith.constant 0 : index
    %c5_195 = arith.constant 5 : index
    %c2_196 = arith.constant 2 : index
    %c0_197 = arith.constant 0 : index
    %105 = vector.load %arg1[%c0_194, %c5_195, %c2_196, %c0_197] : memref<1x18x18x3xf32, #tpu.memory_space<vmem>>, vector<1x1x16x3xf32>
    %106 = vector.shape_cast %105 : vector<1x1x16x3xf32> to vector<16x3xf32>
    %c48_198 = arith.constant 48 : index
    %c24_199 = arith.constant 24 : index
    %107 = vector.load %arg12[%c48_198, %c24_199] : memref<256x27xf32, #tpu.memory_space<vmem>>, vector<16x3xf32>
    tpu.vector_store %arg12[%c48_198, %c24_199], %106 {strides = array<i32>} : memref<256x27xf32, #tpu.memory_space<vmem>>, vector<16x3xf32>,
    %c0_200 = arith.constant 0 : index
    %c4_201 = arith.constant 4 : index
    %c0_202 = arith.constant 0 : index
    %c0_203 = arith.constant 0 : index
    %108 = vector.load %arg1[%c0_200, %c4_201, %c0_202, %c0_203] : memref<1x18x18x3xf32, #tpu.memory_space<vmem>>, vector<1x1x16x3xf32>
    %109 = vector.shape_cast %108 : vector<1x1x16x3xf32> to vector<16x3xf32>
    %c64 = arith.constant 64 : index
    %c0_204 = arith.constant 0 : index
    %110 = vector.load %arg12[%c64, %c0_204] : memref<256x27xf32, #tpu.memory_space<vmem>>, vector<16x3xf32>
    tpu.vector_store %arg12[%c64, %c0_204], %109 {strides = array<i32>} : memref<256x27xf32, #tpu.memory_space<vmem>>, vector<16x3xf32>,
    %c0_205 = arith.constant 0 : index
    %c4_206 = arith.constant 4 : index
    %c1_207 = arith.constant 1 : index
    %c0_208 = arith.constant 0 : index
    %111 = vector.load %arg1[%c0_205, %c4_206, %c1_207, %c0_208] : memref<1x18x18x3xf32, #tpu.memory_space<vmem>>, vector<1x1x16x3xf32>
    %112 = vector.shape_cast %111 : vector<1x1x16x3xf32> to vector<16x3xf32>
    %c64_209 = arith.constant 64 : index
    %c3_210 = arith.constant 3 : index
    %113 = vector.load %arg12[%c64_209, %c3_210] : memref<256x27xf32, #tpu.memory_space<vmem>>, vector<16x3xf32>
    tpu.vector_store %arg12[%c64_209, %c3_210], %112 {strides = array<i32>} : memref<256x27xf32, #tpu.memory_space<vmem>>, vector<16x3xf32>,
    %c0_211 = arith.constant 0 : index
    %c4_212 = arith.constant 4 : index
    %c2_213 = arith.constant 2 : index
    %c0_214 = arith.constant 0 : index
    %114 = vector.load %arg1[%c0_211, %c4_212, %c2_213, %c0_214] : memref<1x18x18x3xf32, #tpu.memory_space<vmem>>, vector<1x1x16x3xf32>
    %115 = vector.shape_cast %114 : vector<1x1x16x3xf32> to vector<16x3xf32>
    %c64_215 = arith.constant 64 : index
    %c6_216 = arith.constant 6 : index
    %116 = vector.load %arg12[%c64_215, %c6_216] : memref<256x27xf32, #tpu.memory_space<vmem>>, vector<16x3xf32>
    tpu.vector_store %arg12[%c64_215, %c6_216], %115 {strides = array<i32>} : memref<256x27xf32, #tpu.memory_space<vmem>>, vector<16x3xf32>,
    %c0_217 = arith.constant 0 : index
    %c5_218 = arith.constant 5 : index
    %c0_219 = arith.constant 0 : index
    %c0_220 = arith.constant 0 : index
    %117 = vector.load %arg1[%c0_217, %c5_218, %c0_219, %c0_220] : memref<1x18x18x3xf32, #tpu.memory_space<vmem>>, vector<1x1x16x3xf32>
    %118 = vector.shape_cast %117 : vector<1x1x16x3xf32> to vector<16x3xf32>
    %c64_221 = arith.constant 64 : index
    %c9_222 = arith.constant 9 : index
    %119 = vector.load %arg12[%c64_221, %c9_222] : memref<256x27xf32, #tpu.memory_space<vmem>>, vector<16x3xf32>
    tpu.vector_store %arg12[%c64_221, %c9_222], %118 {strides = array<i32>} : memref<256x27xf32, #tpu.memory_space<vmem>>, vector<16x3xf32>,
    %c0_223 = arith.constant 0 : index
    %c5_224 = arith.constant 5 : index
    %c1_225 = arith.constant 1 : index
    %c0_226 = arith.constant 0 : index
    %120 = vector.load %arg1[%c0_223, %c5_224, %c1_225, %c0_226] : memref<1x18x18x3xf32, #tpu.memory_space<vmem>>, vector<1x1x16x3xf32>
    %121 = vector.shape_cast %120 : vector<1x1x16x3xf32> to vector<16x3xf32>
    %c64_227 = arith.constant 64 : index
    %c12_228 = arith.constant 12 : index
    %122 = vector.load %arg12[%c64_227, %c12_228] : memref<256x27xf32, #tpu.memory_space<vmem>>, vector<16x3xf32>
    tpu.vector_store %arg12[%c64_227, %c12_228], %121 {strides = array<i32>} : memref<256x27xf32, #tpu.memory_space<vmem>>, vector<16x3xf32>,
    %c0_229 = arith.constant 0 : index
    %c5_230 = arith.constant 5 : index
    %c2_231 = arith.constant 2 : index
    %c0_232 = arith.constant 0 : index
    %123 = vector.load %arg1[%c0_229, %c5_230, %c2_231, %c0_232] : memref<1x18x18x3xf32, #tpu.memory_space<vmem>>, vector<1x1x16x3xf32>
    %124 = vector.shape_cast %123 : vector<1x1x16x3xf32> to vector<16x3xf32>
    %c64_233 = arith.constant 64 : index
    %c15_234 = arith.constant 15 : index
    %125 = vector.load %arg12[%c64_233, %c15_234] : memref<256x27xf32, #tpu.memory_space<vmem>>, vector<16x3xf32>
    tpu.vector_store %arg12[%c64_233, %c15_234], %124 {strides = array<i32>} : memref<256x27xf32, #tpu.memory_space<vmem>>, vector<16x3xf32>,
    %c0_235 = arith.constant 0 : index
    %c6_236 = arith.constant 6 : index
    %c0_237 = arith.constant 0 : index
    %c0_238 = arith.constant 0 : index
    %126 = vector.load %arg1[%c0_235, %c6_236, %c0_237, %c0_238] : memref<1x18x18x3xf32, #tpu.memory_space<vmem>>, vector<1x1x16x3xf32>
    %127 = vector.shape_cast %126 : vector<1x1x16x3xf32> to vector<16x3xf32>
    %c64_239 = arith.constant 64 : index
    %c18_240 = arith.constant 18 : index
    %128 = vector.load %arg12[%c64_239, %c18_240] : memref<256x27xf32, #tpu.memory_space<vmem>>, vector<16x3xf32>
    tpu.vector_store %arg12[%c64_239, %c18_240], %127 {strides = array<i32>} : memref<256x27xf32, #tpu.memory_space<vmem>>, vector<16x3xf32>,
    %c0_241 = arith.constant 0 : index
    %c6_242 = arith.constant 6 : index
    %c1_243 = arith.constant 1 : index
    %c0_244 = arith.constant 0 : index
    %129 = vector.load %arg1[%c0_241, %c6_242, %c1_243, %c0_244] : memref<1x18x18x3xf32, #tpu.memory_space<vmem>>, vector<1x1x16x3xf32>
    %130 = vector.shape_cast %129 : vector<1x1x16x3xf32> to vector<16x3xf32>
    %c64_245 = arith.constant 64 : index
    %c21_246 = arith.constant 21 : index
    %131 = vector.load %arg12[%c64_245, %c21_246] : memref<256x27xf32, #tpu.memory_space<vmem>>, vector<16x3xf32>
    tpu.vector_store %arg12[%c64_245, %c21_246], %130 {strides = array<i32>} : memref<256x27xf32, #tpu.memory_space<vmem>>, vector<16x3xf32>,
    %c0_247 = arith.constant 0 : index
    %c6_248 = arith.constant 6 : index
    %c2_249 = arith.constant 2 : index
    %c0_250 = arith.constant 0 : index
    %132 = vector.load %arg1[%c0_247, %c6_248, %c2_249, %c0_250] : memref<1x18x18x3xf32, #tpu.memory_space<vmem>>, vector<1x1x16x3xf32>
    %133 = vector.shape_cast %132 : vector<1x1x16x3xf32> to vector<16x3xf32>
    %c64_251 = arith.constant 64 : index
    %c24_252 = arith.constant 24 : index
    %134 = vector.load %arg12[%c64_251, %c24_252] : memref<256x27xf32, #tpu.memory_space<vmem>>, vector<16x3xf32>
    tpu.vector_store %arg12[%c64_251, %c24_252], %133 {strides = array<i32>} : memref<256x27xf32, #tpu.memory_space<vmem>>, vector<16x3xf32>,
    %c0_253 = arith.constant 0 : index
    %c5_254 = arith.constant 5 : index
    %c0_255 = arith.constant 0 : index
    %c0_256 = arith.constant 0 : index
    %135 = vector.load %arg1[%c0_253, %c5_254, %c0_255, %c0_256] : memref<1x18x18x3xf32, #tpu.memory_space<vmem>>, vector<1x1x16x3xf32>
    %136 = vector.shape_cast %135 : vector<1x1x16x3xf32> to vector<16x3xf32>
    %c80 = arith.constant 80 : index
    %c0_257 = arith.constant 0 : index
    %137 = vector.load %arg12[%c80, %c0_257] : memref<256x27xf32, #tpu.memory_space<vmem>>, vector<16x3xf32>
    tpu.vector_store %arg12[%c80, %c0_257], %136 {strides = array<i32>} : memref<256x27xf32, #tpu.memory_space<vmem>>, vector<16x3xf32>,
    %c0_258 = arith.constant 0 : index
    %c5_259 = arith.constant 5 : index
    %c1_260 = arith.constant 1 : index
    %c0_261 = arith.constant 0 : index
    %138 = vector.load %arg1[%c0_258, %c5_259, %c1_260, %c0_261] : memref<1x18x18x3xf32, #tpu.memory_space<vmem>>, vector<1x1x16x3xf32>
    %139 = vector.shape_cast %138 : vector<1x1x16x3xf32> to vector<16x3xf32>
    %c80_262 = arith.constant 80 : index
    %c3_263 = arith.constant 3 : index
    %140 = vector.load %arg12[%c80_262, %c3_263] : memref<256x27xf32, #tpu.memory_space<vmem>>, vector<16x3xf32>
    tpu.vector_store %arg12[%c80_262, %c3_263], %139 {strides = array<i32>} : memref<256x27xf32, #tpu.memory_space<vmem>>, vector<16x3xf32>,
    %c0_264 = arith.constant 0 : index
    %c5_265 = arith.constant 5 : index
    %c2_266 = arith.constant 2 : index
    %c0_267 = arith.constant 0 : index
    %141 = vector.load %arg1[%c0_264, %c5_265, %c2_266, %c0_267] : memref<1x18x18x3xf32, #tpu.memory_space<vmem>>, vector<1x1x16x3xf32>
    %142 = vector.shape_cast %141 : vector<1x1x16x3xf32> to vector<16x3xf32>
    %c80_268 = arith.constant 80 : index
    %c6_269 = arith.constant 6 : index
    %143 = vector.load %arg12[%c80_268, %c6_269] : memref<256x27xf32, #tpu.memory_space<vmem>>, vector<16x3xf32>
    tpu.vector_store %arg12[%c80_268, %c6_269], %142 {strides = array<i32>} : memref<256x27xf32, #tpu.memory_space<vmem>>, vector<16x3xf32>,
    %c0_270 = arith.constant 0 : index
    %c6_271 = arith.constant 6 : index
    %c0_272 = arith.constant 0 : index
    %c0_273 = arith.constant 0 : index
    %144 = vector.load %arg1[%c0_270, %c6_271, %c0_272, %c0_273] : memref<1x18x18x3xf32, #tpu.memory_space<vmem>>, vector<1x1x16x3xf32>
    %145 = vector.shape_cast %144 : vector<1x1x16x3xf32> to vector<16x3xf32>
    %c80_274 = arith.constant 80 : index
    %c9_275 = arith.constant 9 : index
    %146 = vector.load %arg12[%c80_274, %c9_275] : memref<256x27xf32, #tpu.memory_space<vmem>>, vector<16x3xf32>
    tpu.vector_store %arg12[%c80_274, %c9_275], %145 {strides = array<i32>} : memref<256x27xf32, #tpu.memory_space<vmem>>, vector<16x3xf32>,
    %c0_276 = arith.constant 0 : index
    %c6_277 = arith.constant 6 : index
    %c1_278 = arith.constant 1 : index
    %c0_279 = arith.constant 0 : index
    %147 = vector.load %arg1[%c0_276, %c6_277, %c1_278, %c0_279] : memref<1x18x18x3xf32, #tpu.memory_space<vmem>>, vector<1x1x16x3xf32>
    %148 = vector.shape_cast %147 : vector<1x1x16x3xf32> to vector<16x3xf32>
    %c80_280 = arith.constant 80 : index
    %c12_281 = arith.constant 12 : index
    %149 = vector.load %arg12[%c80_280, %c12_281] : memref<256x27xf32, #tpu.memory_space<vmem>>, vector<16x3xf32>
    tpu.vector_store %arg12[%c80_280, %c12_281], %148 {strides = array<i32>} : memref<256x27xf32, #tpu.memory_space<vmem>>, vector<16x3xf32>,
    %c0_282 = arith.constant 0 : index
    %c6_283 = arith.constant 6 : index
    %c2_284 = arith.constant 2 : index
    %c0_285 = arith.constant 0 : index
    %150 = vector.load %arg1[%c0_282, %c6_283, %c2_284, %c0_285] : memref<1x18x18x3xf32, #tpu.memory_space<vmem>>, vector<1x1x16x3xf32>
    %151 = vector.shape_cast %150 : vector<1x1x16x3xf32> to vector<16x3xf32>
    %c80_286 = arith.constant 80 : index
    %c15_287 = arith.constant 15 : index
    %152 = vector.load %arg12[%c80_286, %c15_287] : memref<256x27xf32, #tpu.memory_space<vmem>>, vector<16x3xf32>
    tpu.vector_store %arg12[%c80_286, %c15_287], %151 {strides = array<i32>} : memref<256x27xf32, #tpu.memory_space<vmem>>, vector<16x3xf32>,
    %c0_288 = arith.constant 0 : index
    %c7 = arith.constant 7 : index
    %c0_289 = arith.constant 0 : index
    %c0_290 = arith.constant 0 : index
    %153 = vector.load %arg1[%c0_288, %c7, %c0_289, %c0_290] : memref<1x18x18x3xf32, #tpu.memory_space<vmem>>, vector<1x1x16x3xf32>
    %154 = vector.shape_cast %153 : vector<1x1x16x3xf32> to vector<16x3xf32>
    %c80_291 = arith.constant 80 : index
    %c18_292 = arith.constant 18 : index
    %155 = vector.load %arg12[%c80_291, %c18_292] : memref<256x27xf32, #tpu.memory_space<vmem>>, vector<16x3xf32>
    tpu.vector_store %arg12[%c80_291, %c18_292], %154 {strides = array<i32>} : memref<256x27xf32, #tpu.memory_space<vmem>>, vector<16x3xf32>,
    %c0_293 = arith.constant 0 : index
    %c7_294 = arith.constant 7 : index
    %c1_295 = arith.constant 1 : index
    %c0_296 = arith.constant 0 : index
    %156 = vector.load %arg1[%c0_293, %c7_294, %c1_295, %c0_296] : memref<1x18x18x3xf32, #tpu.memory_space<vmem>>, vector<1x1x16x3xf32>
    %157 = vector.shape_cast %156 : vector<1x1x16x3xf32> to vector<16x3xf32>
    %c80_297 = arith.constant 80 : index
    %c21_298 = arith.constant 21 : index
    %158 = vector.load %arg12[%c80_297, %c21_298] : memref<256x27xf32, #tpu.memory_space<vmem>>, vector<16x3xf32>
    tpu.vector_store %arg12[%c80_297, %c21_298], %157 {strides = array<i32>} : memref<256x27xf32, #tpu.memory_space<vmem>>, vector<16x3xf32>,
    %c0_299 = arith.constant 0 : index
    %c7_300 = arith.constant 7 : index
    %c2_301 = arith.constant 2 : index
    %c0_302 = arith.constant 0 : index
    %159 = vector.load %arg1[%c0_299, %c7_300, %c2_301, %c0_302] : memref<1x18x18x3xf32, #tpu.memory_space<vmem>>, vector<1x1x16x3xf32>
    %160 = vector.shape_cast %159 : vector<1x1x16x3xf32> to vector<16x3xf32>
    %c80_303 = arith.constant 80 : index
    %c24_304 = arith.constant 24 : index
    %161 = vector.load %arg12[%c80_303, %c24_304] : memref<256x27xf32, #tpu.memory_space<vmem>>, vector<16x3xf32>
    tpu.vector_store %arg12[%c80_303, %c24_304], %160 {strides = array<i32>} : memref<256x27xf32, #tpu.memory_space<vmem>>, vector<16x3xf32>,
    %c0_305 = arith.constant 0 : index
    %c6_306 = arith.constant 6 : index
    %c0_307 = arith.constant 0 : index
    %c0_308 = arith.constant 0 : index
    %162 = vector.load %arg1[%c0_305, %c6_306, %c0_307, %c0_308] : memref<1x18x18x3xf32, #tpu.memory_space<vmem>>, vector<1x1x16x3xf32>
    %163 = vector.shape_cast %162 : vector<1x1x16x3xf32> to vector<16x3xf32>
    %c96 = arith.constant 96 : index
    %c0_309 = arith.constant 0 : index
    %164 = vector.load %arg12[%c96, %c0_309] : memref<256x27xf32, #tpu.memory_space<vmem>>, vector<16x3xf32>
    tpu.vector_store %arg12[%c96, %c0_309], %163 {strides = array<i32>} : memref<256x27xf32, #tpu.memory_space<vmem>>, vector<16x3xf32>,
    %c0_310 = arith.constant 0 : index
    %c6_311 = arith.constant 6 : index
    %c1_312 = arith.constant 1 : index
    %c0_313 = arith.constant 0 : index
    %165 = vector.load %arg1[%c0_310, %c6_311, %c1_312, %c0_313] : memref<1x18x18x3xf32, #tpu.memory_space<vmem>>, vector<1x1x16x3xf32>
    %166 = vector.shape_cast %165 : vector<1x1x16x3xf32> to vector<16x3xf32>
    %c96_314 = arith.constant 96 : index
    %c3_315 = arith.constant 3 : index
    %167 = vector.load %arg12[%c96_314, %c3_315] : memref<256x27xf32, #tpu.memory_space<vmem>>, vector<16x3xf32>
    tpu.vector_store %arg12[%c96_314, %c3_315], %166 {strides = array<i32>} : memref<256x27xf32, #tpu.memory_space<vmem>>, vector<16x3xf32>,
    %c0_316 = arith.constant 0 : index
    %c6_317 = arith.constant 6 : index
    %c2_318 = arith.constant 2 : index
    %c0_319 = arith.constant 0 : index
    %168 = vector.load %arg1[%c0_316, %c6_317, %c2_318, %c0_319] : memref<1x18x18x3xf32, #tpu.memory_space<vmem>>, vector<1x1x16x3xf32>
    %169 = vector.shape_cast %168 : vector<1x1x16x3xf32> to vector<16x3xf32>
    %c96_320 = arith.constant 96 : index
    %c6_321 = arith.constant 6 : index
    %170 = vector.load %arg12[%c96_320, %c6_321] : memref<256x27xf32, #tpu.memory_space<vmem>>, vector<16x3xf32>
    tpu.vector_store %arg12[%c96_320, %c6_321], %169 {strides = array<i32>} : memref<256x27xf32, #tpu.memory_space<vmem>>, vector<16x3xf32>,
    %c0_322 = arith.constant 0 : index
    %c7_323 = arith.constant 7 : index
    %c0_324 = arith.constant 0 : index
    %c0_325 = arith.constant 0 : index
    %171 = vector.load %arg1[%c0_322, %c7_323, %c0_324, %c0_325] : memref<1x18x18x3xf32, #tpu.memory_space<vmem>>, vector<1x1x16x3xf32>
    %172 = vector.shape_cast %171 : vector<1x1x16x3xf32> to vector<16x3xf32>
    %c96_326 = arith.constant 96 : index
    %c9_327 = arith.constant 9 : index
    %173 = vector.load %arg12[%c96_326, %c9_327] : memref<256x27xf32, #tpu.memory_space<vmem>>, vector<16x3xf32>
    tpu.vector_store %arg12[%c96_326, %c9_327], %172 {strides = array<i32>} : memref<256x27xf32, #tpu.memory_space<vmem>>, vector<16x3xf32>,
    %c0_328 = arith.constant 0 : index
    %c7_329 = arith.constant 7 : index
    %c1_330 = arith.constant 1 : index
    %c0_331 = arith.constant 0 : index
    %174 = vector.load %arg1[%c0_328, %c7_329, %c1_330, %c0_331] : memref<1x18x18x3xf32, #tpu.memory_space<vmem>>, vector<1x1x16x3xf32>
    %175 = vector.shape_cast %174 : vector<1x1x16x3xf32> to vector<16x3xf32>
    %c96_332 = arith.constant 96 : index
    %c12_333 = arith.constant 12 : index
    %176 = vector.load %arg12[%c96_332, %c12_333] : memref<256x27xf32, #tpu.memory_space<vmem>>, vector<16x3xf32>
    tpu.vector_store %arg12[%c96_332, %c12_333], %175 {strides = array<i32>} : memref<256x27xf32, #tpu.memory_space<vmem>>, vector<16x3xf32>,
    %c0_334 = arith.constant 0 : index
    %c7_335 = arith.constant 7 : index
    %c2_336 = arith.constant 2 : index
    %c0_337 = arith.constant 0 : index
    %177 = vector.load %arg1[%c0_334, %c7_335, %c2_336, %c0_337] : memref<1x18x18x3xf32, #tpu.memory_space<vmem>>, vector<1x1x16x3xf32>
    %178 = vector.shape_cast %177 : vector<1x1x16x3xf32> to vector<16x3xf32>
    %c96_338 = arith.constant 96 : index
    %c15_339 = arith.constant 15 : index
    %179 = vector.load %arg12[%c96_338, %c15_339] : memref<256x27xf32, #tpu.memory_space<vmem>>, vector<16x3xf32>
    tpu.vector_store %arg12[%c96_338, %c15_339], %178 {strides = array<i32>} : memref<256x27xf32, #tpu.memory_space<vmem>>, vector<16x3xf32>,
    %c0_340 = arith.constant 0 : index
    %c8 = arith.constant 8 : index
    %c0_341 = arith.constant 0 : index
    %c0_342 = arith.constant 0 : index
    %180 = vector.load %arg1[%c0_340, %c8, %c0_341, %c0_342] : memref<1x18x18x3xf32, #tpu.memory_space<vmem>>, vector<1x1x16x3xf32>
    %181 = vector.shape_cast %180 : vector<1x1x16x3xf32> to vector<16x3xf32>
    %c96_343 = arith.constant 96 : index
    %c18_344 = arith.constant 18 : index
    %182 = vector.load %arg12[%c96_343, %c18_344] : memref<256x27xf32, #tpu.memory_space<vmem>>, vector<16x3xf32>
    tpu.vector_store %arg12[%c96_343, %c18_344], %181 {strides = array<i32>} : memref<256x27xf32, #tpu.memory_space<vmem>>, vector<16x3xf32>,
    %c0_345 = arith.constant 0 : index
    %c8_346 = arith.constant 8 : index
    %c1_347 = arith.constant 1 : index
    %c0_348 = arith.constant 0 : index
    %183 = vector.load %arg1[%c0_345, %c8_346, %c1_347, %c0_348] : memref<1x18x18x3xf32, #tpu.memory_space<vmem>>, vector<1x1x16x3xf32>
    %184 = vector.shape_cast %183 : vector<1x1x16x3xf32> to vector<16x3xf32>
    %c96_349 = arith.constant 96 : index
    %c21_350 = arith.constant 21 : index
    %185 = vector.load %arg12[%c96_349, %c21_350] : memref<256x27xf32, #tpu.memory_space<vmem>>, vector<16x3xf32>
    tpu.vector_store %arg12[%c96_349, %c21_350], %184 {strides = array<i32>} : memref<256x27xf32, #tpu.memory_space<vmem>>, vector<16x3xf32>,
    %c0_351 = arith.constant 0 : index
    %c8_352 = arith.constant 8 : index
    %c2_353 = arith.constant 2 : index
    %c0_354 = arith.constant 0 : index
    %186 = vector.load %arg1[%c0_351, %c8_352, %c2_353, %c0_354] : memref<1x18x18x3xf32, #tpu.memory_space<vmem>>, vector<1x1x16x3xf32>
    %187 = vector.shape_cast %186 : vector<1x1x16x3xf32> to vector<16x3xf32>
    %c96_355 = arith.constant 96 : index
    %c24_356 = arith.constant 24 : index
    %188 = vector.load %arg12[%c96_355, %c24_356] : memref<256x27xf32, #tpu.memory_space<vmem>>, vector<16x3xf32>
    tpu.vector_store %arg12[%c96_355, %c24_356], %187 {strides = array<i32>} : memref<256x27xf32, #tpu.memory_space<vmem>>, vector<16x3xf32>,
    %c0_357 = arith.constant 0 : index
    %c7_358 = arith.constant 7 : index
    %c0_359 = arith.constant 0 : index
    %c0_360 = arith.constant 0 : index
    %189 = vector.load %arg1[%c0_357, %c7_358, %c0_359, %c0_360] : memref<1x18x18x3xf32, #tpu.memory_space<vmem>>, vector<1x1x16x3xf32>
    %190 = vector.shape_cast %189 : vector<1x1x16x3xf32> to vector<16x3xf32>
    %c112 = arith.constant 112 : index
    %c0_361 = arith.constant 0 : index
    %191 = vector.load %arg12[%c112, %c0_361] : memref<256x27xf32, #tpu.memory_space<vmem>>, vector<16x3xf32>
    tpu.vector_store %arg12[%c112, %c0_361], %190 {strides = array<i32>} : memref<256x27xf32, #tpu.memory_space<vmem>>, vector<16x3xf32>,
    %c0_362 = arith.constant 0 : index
    %c7_363 = arith.constant 7 : index
    %c1_364 = arith.constant 1 : index
    %c0_365 = arith.constant 0 : index
    %192 = vector.load %arg1[%c0_362, %c7_363, %c1_364, %c0_365] : memref<1x18x18x3xf32, #tpu.memory_space<vmem>>, vector<1x1x16x3xf32>
    %193 = vector.shape_cast %192 : vector<1x1x16x3xf32> to vector<16x3xf32>
    %c112_366 = arith.constant 112 : index
    %c3_367 = arith.constant 3 : index
    %194 = vector.load %arg12[%c112_366, %c3_367] : memref<256x27xf32, #tpu.memory_space<vmem>>, vector<16x3xf32>
    tpu.vector_store %arg12[%c112_366, %c3_367], %193 {strides = array<i32>} : memref<256x27xf32, #tpu.memory_space<vmem>>, vector<16x3xf32>,
    %c0_368 = arith.constant 0 : index
    %c7_369 = arith.constant 7 : index
    %c2_370 = arith.constant 2 : index
    %c0_371 = arith.constant 0 : index
    %195 = vector.load %arg1[%c0_368, %c7_369, %c2_370, %c0_371] : memref<1x18x18x3xf32, #tpu.memory_space<vmem>>, vector<1x1x16x3xf32>
    %196 = vector.shape_cast %195 : vector<1x1x16x3xf32> to vector<16x3xf32>
    %c112_372 = arith.constant 112 : index
    %c6_373 = arith.constant 6 : index
    %197 = vector.load %arg12[%c112_372, %c6_373] : memref<256x27xf32, #tpu.memory_space<vmem>>, vector<16x3xf32>
    tpu.vector_store %arg12[%c112_372, %c6_373], %196 {strides = array<i32>} : memref<256x27xf32, #tpu.memory_space<vmem>>, vector<16x3xf32>,
    %c0_374 = arith.constant 0 : index
    %c8_375 = arith.constant 8 : index
    %c0_376 = arith.constant 0 : index
    %c0_377 = arith.constant 0 : index
    %198 = vector.load %arg1[%c0_374, %c8_375, %c0_376, %c0_377] : memref<1x18x18x3xf32, #tpu.memory_space<vmem>>, vector<1x1x16x3xf32>
    %199 = vector.shape_cast %198 : vector<1x1x16x3xf32> to vector<16x3xf32>
    %c112_378 = arith.constant 112 : index
    %c9_379 = arith.constant 9 : index
    %200 = vector.load %arg12[%c112_378, %c9_379] : memref<256x27xf32, #tpu.memory_space<vmem>>, vector<16x3xf32>
    tpu.vector_store %arg12[%c112_378, %c9_379], %199 {strides = array<i32>} : memref<256x27xf32, #tpu.memory_space<vmem>>, vector<16x3xf32>,
    %c0_380 = arith.constant 0 : index
    %c8_381 = arith.constant 8 : index
    %c1_382 = arith.constant 1 : index
    %c0_383 = arith.constant 0 : index
    %201 = vector.load %arg1[%c0_380, %c8_381, %c1_382, %c0_383] : memref<1x18x18x3xf32, #tpu.memory_space<vmem>>, vector<1x1x16x3xf32>
    %202 = vector.shape_cast %201 : vector<1x1x16x3xf32> to vector<16x3xf32>
    %c112_384 = arith.constant 112 : index
    %c12_385 = arith.constant 12 : index
    %203 = vector.load %arg12[%c112_384, %c12_385] : memref<256x27xf32, #tpu.memory_space<vmem>>, vector<16x3xf32>
    tpu.vector_store %arg12[%c112_384, %c12_385], %202 {strides = array<i32>} : memref<256x27xf32, #tpu.memory_space<vmem>>, vector<16x3xf32>,
    %c0_386 = arith.constant 0 : index
    %c8_387 = arith.constant 8 : index
    %c2_388 = arith.constant 2 : index
    %c0_389 = arith.constant 0 : index
    %204 = vector.load %arg1[%c0_386, %c8_387, %c2_388, %c0_389] : memref<1x18x18x3xf32, #tpu.memory_space<vmem>>, vector<1x1x16x3xf32>
    %205 = vector.shape_cast %204 : vector<1x1x16x3xf32> to vector<16x3xf32>
    %c112_390 = arith.constant 112 : index
    %c15_391 = arith.constant 15 : index
    %206 = vector.load %arg12[%c112_390, %c15_391] : memref<256x27xf32, #tpu.memory_space<vmem>>, vector<16x3xf32>
    tpu.vector_store %arg12[%c112_390, %c15_391], %205 {strides = array<i32>} : memref<256x27xf32, #tpu.memory_space<vmem>>, vector<16x3xf32>,
    %c0_392 = arith.constant 0 : index
    %c9_393 = arith.constant 9 : index
    %c0_394 = arith.constant 0 : index
    %c0_395 = arith.constant 0 : index
    %207 = vector.load %arg1[%c0_392, %c9_393, %c0_394, %c0_395] : memref<1x18x18x3xf32, #tpu.memory_space<vmem>>, vector<1x1x16x3xf32>
    %208 = vector.shape_cast %207 : vector<1x1x16x3xf32> to vector<16x3xf32>
    %c112_396 = arith.constant 112 : index
    %c18_397 = arith.constant 18 : index
    %209 = vector.load %arg12[%c112_396, %c18_397] : memref<256x27xf32, #tpu.memory_space<vmem>>, vector<16x3xf32>
    tpu.vector_store %arg12[%c112_396, %c18_397], %208 {strides = array<i32>} : memref<256x27xf32, #tpu.memory_space<vmem>>, vector<16x3xf32>,
    %c0_398 = arith.constant 0 : index
    %c9_399 = arith.constant 9 : index
    %c1_400 = arith.constant 1 : index
    %c0_401 = arith.constant 0 : index
    %210 = vector.load %arg1[%c0_398, %c9_399, %c1_400, %c0_401] : memref<1x18x18x3xf32, #tpu.memory_space<vmem>>, vector<1x1x16x3xf32>
    %211 = vector.shape_cast %210 : vector<1x1x16x3xf32> to vector<16x3xf32>
    %c112_402 = arith.constant 112 : index
    %c21_403 = arith.constant 21 : index
    %212 = vector.load %arg12[%c112_402, %c21_403] : memref<256x27xf32, #tpu.memory_space<vmem>>, vector<16x3xf32>
    tpu.vector_store %arg12[%c112_402, %c21_403], %211 {strides = array<i32>} : memref<256x27xf32, #tpu.memory_space<vmem>>, vector<16x3xf32>,
    %c0_404 = arith.constant 0 : index
    %c9_405 = arith.constant 9 : index
    %c2_406 = arith.constant 2 : index
    %c0_407 = arith.constant 0 : index
    %213 = vector.load %arg1[%c0_404, %c9_405, %c2_406, %c0_407] : memref<1x18x18x3xf32, #tpu.memory_space<vmem>>, vector<1x1x16x3xf32>
    %214 = vector.shape_cast %213 : vector<1x1x16x3xf32> to vector<16x3xf32>
    %c112_408 = arith.constant 112 : index
    %c24_409 = arith.constant 24 : index
    %215 = vector.load %arg12[%c112_408, %c24_409] : memref<256x27xf32, #tpu.memory_space<vmem>>, vector<16x3xf32>
    tpu.vector_store %arg12[%c112_408, %c24_409], %214 {strides = array<i32>} : memref<256x27xf32, #tpu.memory_space<vmem>>, vector<16x3xf32>,
    %c0_410 = arith.constant 0 : index
    %c8_411 = arith.constant 8 : index
    %c0_412 = arith.constant 0 : index
    %c0_413 = arith.constant 0 : index
    %216 = vector.load %arg1[%c0_410, %c8_411, %c0_412, %c0_413] : memref<1x18x18x3xf32, #tpu.memory_space<vmem>>, vector<1x1x16x3xf32>
    %217 = vector.shape_cast %216 : vector<1x1x16x3xf32> to vector<16x3xf32>
    %c128 = arith.constant 128 : index
    %c0_414 = arith.constant 0 : index
    %218 = vector.load %arg12[%c128, %c0_414] : memref<256x27xf32, #tpu.memory_space<vmem>>, vector<16x3xf32>
    tpu.vector_store %arg12[%c128, %c0_414], %217 {strides = array<i32>} : memref<256x27xf32, #tpu.memory_space<vmem>>, vector<16x3xf32>,
    %c0_415 = arith.constant 0 : index
    %c8_416 = arith.constant 8 : index
    %c1_417 = arith.constant 1 : index
    %c0_418 = arith.constant 0 : index
    %219 = vector.load %arg1[%c0_415, %c8_416, %c1_417, %c0_418] : memref<1x18x18x3xf32, #tpu.memory_space<vmem>>, vector<1x1x16x3xf32>
    %220 = vector.shape_cast %219 : vector<1x1x16x3xf32> to vector<16x3xf32>
    %c128_419 = arith.constant 128 : index
    %c3_420 = arith.constant 3 : index
    %221 = vector.load %arg12[%c128_419, %c3_420] : memref<256x27xf32, #tpu.memory_space<vmem>>, vector<16x3xf32>
    tpu.vector_store %arg12[%c128_419, %c3_420], %220 {strides = array<i32>} : memref<256x27xf32, #tpu.memory_space<vmem>>, vector<16x3xf32>,
    %c0_421 = arith.constant 0 : index
    %c8_422 = arith.constant 8 : index
    %c2_423 = arith.constant 2 : index
    %c0_424 = arith.constant 0 : index
    %222 = vector.load %arg1[%c0_421, %c8_422, %c2_423, %c0_424] : memref<1x18x18x3xf32, #tpu.memory_space<vmem>>, vector<1x1x16x3xf32>
    %223 = vector.shape_cast %222 : vector<1x1x16x3xf32> to vector<16x3xf32>
    %c128_425 = arith.constant 128 : index
    %c6_426 = arith.constant 6 : index
    %224 = vector.load %arg12[%c128_425, %c6_426] : memref<256x27xf32, #tpu.memory_space<vmem>>, vector<16x3xf32>
    tpu.vector_store %arg12[%c128_425, %c6_426], %223 {strides = array<i32>} : memref<256x27xf32, #tpu.memory_space<vmem>>, vector<16x3xf32>,
    %c0_427 = arith.constant 0 : index
    %c9_428 = arith.constant 9 : index
    %c0_429 = arith.constant 0 : index
    %c0_430 = arith.constant 0 : index
    %225 = vector.load %arg1[%c0_427, %c9_428, %c0_429, %c0_430] : memref<1x18x18x3xf32, #tpu.memory_space<vmem>>, vector<1x1x16x3xf32>
    %226 = vector.shape_cast %225 : vector<1x1x16x3xf32> to vector<16x3xf32>
    %c128_431 = arith.constant 128 : index
    %c9_432 = arith.constant 9 : index
    %227 = vector.load %arg12[%c128_431, %c9_432] : memref<256x27xf32, #tpu.memory_space<vmem>>, vector<16x3xf32>
    tpu.vector_store %arg12[%c128_431, %c9_432], %226 {strides = array<i32>} : memref<256x27xf32, #tpu.memory_space<vmem>>, vector<16x3xf32>,
    %c0_433 = arith.constant 0 : index
    %c9_434 = arith.constant 9 : index
    %c1_435 = arith.constant 1 : index
    %c0_436 = arith.constant 0 : index
    %228 = vector.load %arg1[%c0_433, %c9_434, %c1_435, %c0_436] : memref<1x18x18x3xf32, #tpu.memory_space<vmem>>, vector<1x1x16x3xf32>
    %229 = vector.shape_cast %228 : vector<1x1x16x3xf32> to vector<16x3xf32>
    %c128_437 = arith.constant 128 : index
    %c12_438 = arith.constant 12 : index
    %230 = vector.load %arg12[%c128_437, %c12_438] : memref<256x27xf32, #tpu.memory_space<vmem>>, vector<16x3xf32>
    tpu.vector_store %arg12[%c128_437, %c12_438], %229 {strides = array<i32>} : memref<256x27xf32, #tpu.memory_space<vmem>>, vector<16x3xf32>,
    %c0_439 = arith.constant 0 : index
    %c9_440 = arith.constant 9 : index
    %c2_441 = arith.constant 2 : index
    %c0_442 = arith.constant 0 : index
    %231 = vector.load %arg1[%c0_439, %c9_440, %c2_441, %c0_442] : memref<1x18x18x3xf32, #tpu.memory_space<vmem>>, vector<1x1x16x3xf32>
    %232 = vector.shape_cast %231 : vector<1x1x16x3xf32> to vector<16x3xf32>
    %c128_443 = arith.constant 128 : index
    %c15_444 = arith.constant 15 : index
    %233 = vector.load %arg12[%c128_443, %c15_444] : memref<256x27xf32, #tpu.memory_space<vmem>>, vector<16x3xf32>
    tpu.vector_store %arg12[%c128_443, %c15_444], %232 {strides = array<i32>} : memref<256x27xf32, #tpu.memory_space<vmem>>, vector<16x3xf32>,
    %c0_445 = arith.constant 0 : index
    %c10 = arith.constant 10 : index
    %c0_446 = arith.constant 0 : index
    %c0_447 = arith.constant 0 : index
    %234 = vector.load %arg1[%c0_445, %c10, %c0_446, %c0_447] : memref<1x18x18x3xf32, #tpu.memory_space<vmem>>, vector<1x1x16x3xf32>
    %235 = vector.shape_cast %234 : vector<1x1x16x3xf32> to vector<16x3xf32>
    %c128_448 = arith.constant 128 : index
    %c18_449 = arith.constant 18 : index
    %236 = vector.load %arg12[%c128_448, %c18_449] : memref<256x27xf32, #tpu.memory_space<vmem>>, vector<16x3xf32>
    tpu.vector_store %arg12[%c128_448, %c18_449], %235 {strides = array<i32>} : memref<256x27xf32, #tpu.memory_space<vmem>>, vector<16x3xf32>,
    %c0_450 = arith.constant 0 : index
    %c10_451 = arith.constant 10 : index
    %c1_452 = arith.constant 1 : index
    %c0_453 = arith.constant 0 : index
    %237 = vector.load %arg1[%c0_450, %c10_451, %c1_452, %c0_453] : memref<1x18x18x3xf32, #tpu.memory_space<vmem>>, vector<1x1x16x3xf32>
    %238 = vector.shape_cast %237 : vector<1x1x16x3xf32> to vector<16x3xf32>
    %c128_454 = arith.constant 128 : index
    %c21_455 = arith.constant 21 : index
    %239 = vector.load %arg12[%c128_454, %c21_455] : memref<256x27xf32, #tpu.memory_space<vmem>>, vector<16x3xf32>
    tpu.vector_store %arg12[%c128_454, %c21_455], %238 {strides = array<i32>} : memref<256x27xf32, #tpu.memory_space<vmem>>, vector<16x3xf32>,
    %c0_456 = arith.constant 0 : index
    %c10_457 = arith.constant 10 : index
    %c2_458 = arith.constant 2 : index
    %c0_459 = arith.constant 0 : index
    %240 = vector.load %arg1[%c0_456, %c10_457, %c2_458, %c0_459] : memref<1x18x18x3xf32, #tpu.memory_space<vmem>>, vector<1x1x16x3xf32>
    %241 = vector.shape_cast %240 : vector<1x1x16x3xf32> to vector<16x3xf32>
    %c128_460 = arith.constant 128 : index
    %c24_461 = arith.constant 24 : index
    %242 = vector.load %arg12[%c128_460, %c24_461] : memref<256x27xf32, #tpu.memory_space<vmem>>, vector<16x3xf32>
    tpu.vector_store %arg12[%c128_460, %c24_461], %241 {strides = array<i32>} : memref<256x27xf32, #tpu.memory_space<vmem>>, vector<16x3xf32>,
    %c0_462 = arith.constant 0 : index
    %c9_463 = arith.constant 9 : index
    %c0_464 = arith.constant 0 : index
    %c0_465 = arith.constant 0 : index
    %243 = vector.load %arg1[%c0_462, %c9_463, %c0_464, %c0_465] : memref<1x18x18x3xf32, #tpu.memory_space<vmem>>, vector<1x1x16x3xf32>
    %244 = vector.shape_cast %243 : vector<1x1x16x3xf32> to vector<16x3xf32>
    %c144 = arith.constant 144 : index
    %c0_466 = arith.constant 0 : index
    %245 = vector.load %arg12[%c144, %c0_466] : memref<256x27xf32, #tpu.memory_space<vmem>>, vector<16x3xf32>
    tpu.vector_store %arg12[%c144, %c0_466], %244 {strides = array<i32>} : memref<256x27xf32, #tpu.memory_space<vmem>>, vector<16x3xf32>,
    %c0_467 = arith.constant 0 : index
    %c9_468 = arith.constant 9 : index
    %c1_469 = arith.constant 1 : index
    %c0_470 = arith.constant 0 : index
    %246 = vector.load %arg1[%c0_467, %c9_468, %c1_469, %c0_470] : memref<1x18x18x3xf32, #tpu.memory_space<vmem>>, vector<1x1x16x3xf32>
    %247 = vector.shape_cast %246 : vector<1x1x16x3xf32> to vector<16x3xf32>
    %c144_471 = arith.constant 144 : index
    %c3_472 = arith.constant 3 : index
    %248 = vector.load %arg12[%c144_471, %c3_472] : memref<256x27xf32, #tpu.memory_space<vmem>>, vector<16x3xf32>
    tpu.vector_store %arg12[%c144_471, %c3_472], %247 {strides = array<i32>} : memref<256x27xf32, #tpu.memory_space<vmem>>, vector<16x3xf32>,
    %c0_473 = arith.constant 0 : index
    %c9_474 = arith.constant 9 : index
    %c2_475 = arith.constant 2 : index
    %c0_476 = arith.constant 0 : index
    %249 = vector.load %arg1[%c0_473, %c9_474, %c2_475, %c0_476] : memref<1x18x18x3xf32, #tpu.memory_space<vmem>>, vector<1x1x16x3xf32>
    %250 = vector.shape_cast %249 : vector<1x1x16x3xf32> to vector<16x3xf32>
    %c144_477 = arith.constant 144 : index
    %c6_478 = arith.constant 6 : index
    %251 = vector.load %arg12[%c144_477, %c6_478] : memref<256x27xf32, #tpu.memory_space<vmem>>, vector<16x3xf32>
    tpu.vector_store %arg12[%c144_477, %c6_478], %250 {strides = array<i32>} : memref<256x27xf32, #tpu.memory_space<vmem>>, vector<16x3xf32>,
    %c0_479 = arith.constant 0 : index
    %c10_480 = arith.constant 10 : index
    %c0_481 = arith.constant 0 : index
    %c0_482 = arith.constant 0 : index
    %252 = vector.load %arg1[%c0_479, %c10_480, %c0_481, %c0_482] : memref<1x18x18x3xf32, #tpu.memory_space<vmem>>, vector<1x1x16x3xf32>
    %253 = vector.shape_cast %252 : vector<1x1x16x3xf32> to vector<16x3xf32>
    %c144_483 = arith.constant 144 : index
    %c9_484 = arith.constant 9 : index
    %254 = vector.load %arg12[%c144_483, %c9_484] : memref<256x27xf32, #tpu.memory_space<vmem>>, vector<16x3xf32>
    tpu.vector_store %arg12[%c144_483, %c9_484], %253 {strides = array<i32>} : memref<256x27xf32, #tpu.memory_space<vmem>>, vector<16x3xf32>,
    %c0_485 = arith.constant 0 : index
    %c10_486 = arith.constant 10 : index
    %c1_487 = arith.constant 1 : index
    %c0_488 = arith.constant 0 : index
    %255 = vector.load %arg1[%c0_485, %c10_486, %c1_487, %c0_488] : memref<1x18x18x3xf32, #tpu.memory_space<vmem>>, vector<1x1x16x3xf32>
    %256 = vector.shape_cast %255 : vector<1x1x16x3xf32> to vector<16x3xf32>
    %c144_489 = arith.constant 144 : index
    %c12_490 = arith.constant 12 : index
    %257 = vector.load %arg12[%c144_489, %c12_490] : memref<256x27xf32, #tpu.memory_space<vmem>>, vector<16x3xf32>
    tpu.vector_store %arg12[%c144_489, %c12_490], %256 {strides = array<i32>} : memref<256x27xf32, #tpu.memory_space<vmem>>, vector<16x3xf32>,
    %c0_491 = arith.constant 0 : index
    %c10_492 = arith.constant 10 : index
    %c2_493 = arith.constant 2 : index
    %c0_494 = arith.constant 0 : index
    %258 = vector.load %arg1[%c0_491, %c10_492, %c2_493, %c0_494] : memref<1x18x18x3xf32, #tpu.memory_space<vmem>>, vector<1x1x16x3xf32>
    %259 = vector.shape_cast %258 : vector<1x1x16x3xf32> to vector<16x3xf32>
    %c144_495 = arith.constant 144 : index
    %c15_496 = arith.constant 15 : index
    %260 = vector.load %arg12[%c144_495, %c15_496] : memref<256x27xf32, #tpu.memory_space<vmem>>, vector<16x3xf32>
    tpu.vector_store %arg12[%c144_495, %c15_496], %259 {strides = array<i32>} : memref<256x27xf32, #tpu.memory_space<vmem>>, vector<16x3xf32>,
    %c0_497 = arith.constant 0 : index
    %c11 = arith.constant 11 : index
    %c0_498 = arith.constant 0 : index
    %c0_499 = arith.constant 0 : index
    %261 = vector.load %arg1[%c0_497, %c11, %c0_498, %c0_499] : memref<1x18x18x3xf32, #tpu.memory_space<vmem>>, vector<1x1x16x3xf32>
    %262 = vector.shape_cast %261 : vector<1x1x16x3xf32> to vector<16x3xf32>
    %c144_500 = arith.constant 144 : index
    %c18_501 = arith.constant 18 : index
    %263 = vector.load %arg12[%c144_500, %c18_501] : memref<256x27xf32, #tpu.memory_space<vmem>>, vector<16x3xf32>
    tpu.vector_store %arg12[%c144_500, %c18_501], %262 {strides = array<i32>} : memref<256x27xf32, #tpu.memory_space<vmem>>, vector<16x3xf32>,
    %c0_502 = arith.constant 0 : index
    %c11_503 = arith.constant 11 : index
    %c1_504 = arith.constant 1 : index
    %c0_505 = arith.constant 0 : index
    %264 = vector.load %arg1[%c0_502, %c11_503, %c1_504, %c0_505] : memref<1x18x18x3xf32, #tpu.memory_space<vmem>>, vector<1x1x16x3xf32>
    %265 = vector.shape_cast %264 : vector<1x1x16x3xf32> to vector<16x3xf32>
    %c144_506 = arith.constant 144 : index
    %c21_507 = arith.constant 21 : index
    %266 = vector.load %arg12[%c144_506, %c21_507] : memref<256x27xf32, #tpu.memory_space<vmem>>, vector<16x3xf32>
    tpu.vector_store %arg12[%c144_506, %c21_507], %265 {strides = array<i32>} : memref<256x27xf32, #tpu.memory_space<vmem>>, vector<16x3xf32>,
    %c0_508 = arith.constant 0 : index
    %c11_509 = arith.constant 11 : index
    %c2_510 = arith.constant 2 : index
    %c0_511 = arith.constant 0 : index
    %267 = vector.load %arg1[%c0_508, %c11_509, %c2_510, %c0_511] : memref<1x18x18x3xf32, #tpu.memory_space<vmem>>, vector<1x1x16x3xf32>
    %268 = vector.shape_cast %267 : vector<1x1x16x3xf32> to vector<16x3xf32>
    %c144_512 = arith.constant 144 : index
    %c24_513 = arith.constant 24 : index
    %269 = vector.load %arg12[%c144_512, %c24_513] : memref<256x27xf32, #tpu.memory_space<vmem>>, vector<16x3xf32>
    tpu.vector_store %arg12[%c144_512, %c24_513], %268 {strides = array<i32>} : memref<256x27xf32, #tpu.memory_space<vmem>>, vector<16x3xf32>,
    %c0_514 = arith.constant 0 : index
    %c10_515 = arith.constant 10 : index
    %c0_516 = arith.constant 0 : index
    %c0_517 = arith.constant 0 : index
    %270 = vector.load %arg1[%c0_514, %c10_515, %c0_516, %c0_517] : memref<1x18x18x3xf32, #tpu.memory_space<vmem>>, vector<1x1x16x3xf32>
    %271 = vector.shape_cast %270 : vector<1x1x16x3xf32> to vector<16x3xf32>
    %c160 = arith.constant 160 : index
    %c0_518 = arith.constant 0 : index
    %272 = vector.load %arg12[%c160, %c0_518] : memref<256x27xf32, #tpu.memory_space<vmem>>, vector<16x3xf32>
    tpu.vector_store %arg12[%c160, %c0_518], %271 {strides = array<i32>} : memref<256x27xf32, #tpu.memory_space<vmem>>, vector<16x3xf32>,
    %c0_519 = arith.constant 0 : index
    %c10_520 = arith.constant 10 : index
    %c1_521 = arith.constant 1 : index
    %c0_522 = arith.constant 0 : index
    %273 = vector.load %arg1[%c0_519, %c10_520, %c1_521, %c0_522] : memref<1x18x18x3xf32, #tpu.memory_space<vmem>>, vector<1x1x16x3xf32>
    %274 = vector.shape_cast %273 : vector<1x1x16x3xf32> to vector<16x3xf32>
    %c160_523 = arith.constant 160 : index
    %c3_524 = arith.constant 3 : index
    %275 = vector.load %arg12[%c160_523, %c3_524] : memref<256x27xf32, #tpu.memory_space<vmem>>, vector<16x3xf32>
    tpu.vector_store %arg12[%c160_523, %c3_524], %274 {strides = array<i32>} : memref<256x27xf32, #tpu.memory_space<vmem>>, vector<16x3xf32>,
    %c0_525 = arith.constant 0 : index
    %c10_526 = arith.constant 10 : index
    %c2_527 = arith.constant 2 : index
    %c0_528 = arith.constant 0 : index
    %276 = vector.load %arg1[%c0_525, %c10_526, %c2_527, %c0_528] : memref<1x18x18x3xf32, #tpu.memory_space<vmem>>, vector<1x1x16x3xf32>
    %277 = vector.shape_cast %276 : vector<1x1x16x3xf32> to vector<16x3xf32>
    %c160_529 = arith.constant 160 : index
    %c6_530 = arith.constant 6 : index
    %278 = vector.load %arg12[%c160_529, %c6_530] : memref<256x27xf32, #tpu.memory_space<vmem>>, vector<16x3xf32>
    tpu.vector_store %arg12[%c160_529, %c6_530], %277 {strides = array<i32>} : memref<256x27xf32, #tpu.memory_space<vmem>>, vector<16x3xf32>,
    %c0_531 = arith.constant 0 : index
    %c11_532 = arith.constant 11 : index
    %c0_533 = arith.constant 0 : index
    %c0_534 = arith.constant 0 : index
    %279 = vector.load %arg1[%c0_531, %c11_532, %c0_533, %c0_534] : memref<1x18x18x3xf32, #tpu.memory_space<vmem>>, vector<1x1x16x3xf32>
    %280 = vector.shape_cast %279 : vector<1x1x16x3xf32> to vector<16x3xf32>
    %c160_535 = arith.constant 160 : index
    %c9_536 = arith.constant 9 : index
    %281 = vector.load %arg12[%c160_535, %c9_536] : memref<256x27xf32, #tpu.memory_space<vmem>>, vector<16x3xf32>
    tpu.vector_store %arg12[%c160_535, %c9_536], %280 {strides = array<i32>} : memref<256x27xf32, #tpu.memory_space<vmem>>, vector<16x3xf32>,
    %c0_537 = arith.constant 0 : index
    %c11_538 = arith.constant 11 : index
    %c1_539 = arith.constant 1 : index
    %c0_540 = arith.constant 0 : index
    %282 = vector.load %arg1[%c0_537, %c11_538, %c1_539, %c0_540] : memref<1x18x18x3xf32, #tpu.memory_space<vmem>>, vector<1x1x16x3xf32>
    %283 = vector.shape_cast %282 : vector<1x1x16x3xf32> to vector<16x3xf32>
    %c160_541 = arith.constant 160 : index
    %c12_542 = arith.constant 12 : index
    %284 = vector.load %arg12[%c160_541, %c12_542] : memref<256x27xf32, #tpu.memory_space<vmem>>, vector<16x3xf32>
    tpu.vector_store %arg12[%c160_541, %c12_542], %283 {strides = array<i32>} : memref<256x27xf32, #tpu.memory_space<vmem>>, vector<16x3xf32>,
    %c0_543 = arith.constant 0 : index
    %c11_544 = arith.constant 11 : index
    %c2_545 = arith.constant 2 : index
    %c0_546 = arith.constant 0 : index
    %285 = vector.load %arg1[%c0_543, %c11_544, %c2_545, %c0_546] : memref<1x18x18x3xf32, #tpu.memory_space<vmem>>, vector<1x1x16x3xf32>
    %286 = vector.shape_cast %285 : vector<1x1x16x3xf32> to vector<16x3xf32>
    %c160_547 = arith.constant 160 : index
    %c15_548 = arith.constant 15 : index
    %287 = vector.load %arg12[%c160_547, %c15_548] : memref<256x27xf32, #tpu.memory_space<vmem>>, vector<16x3xf32>
    tpu.vector_store %arg12[%c160_547, %c15_548], %286 {strides = array<i32>} : memref<256x27xf32, #tpu.memory_space<vmem>>, vector<16x3xf32>,
    %c0_549 = arith.constant 0 : index
    %c12_550 = arith.constant 12 : index
    %c0_551 = arith.constant 0 : index
    %c0_552 = arith.constant 0 : index
    %288 = vector.load %arg1[%c0_549, %c12_550, %c0_551, %c0_552] : memref<1x18x18x3xf32, #tpu.memory_space<vmem>>, vector<1x1x16x3xf32>
    %289 = vector.shape_cast %288 : vector<1x1x16x3xf32> to vector<16x3xf32>
    %c160_553 = arith.constant 160 : index
    %c18_554 = arith.constant 18 : index
    %290 = vector.load %arg12[%c160_553, %c18_554] : memref<256x27xf32, #tpu.memory_space<vmem>>, vector<16x3xf32>
    tpu.vector_store %arg12[%c160_553, %c18_554], %289 {strides = array<i32>} : memref<256x27xf32, #tpu.memory_space<vmem>>, vector<16x3xf32>,
    %c0_555 = arith.constant 0 : index
    %c12_556 = arith.constant 12 : index
    %c1_557 = arith.constant 1 : index
    %c0_558 = arith.constant 0 : index
    %291 = vector.load %arg1[%c0_555, %c12_556, %c1_557, %c0_558] : memref<1x18x18x3xf32, #tpu.memory_space<vmem>>, vector<1x1x16x3xf32>
    %292 = vector.shape_cast %291 : vector<1x1x16x3xf32> to vector<16x3xf32>
    %c160_559 = arith.constant 160 : index
    %c21_560 = arith.constant 21 : index
    %293 = vector.load %arg12[%c160_559, %c21_560] : memref<256x27xf32, #tpu.memory_space<vmem>>, vector<16x3xf32>
    tpu.vector_store %arg12[%c160_559, %c21_560], %292 {strides = array<i32>} : memref<256x27xf32, #tpu.memory_space<vmem>>, vector<16x3xf32>,
    %c0_561 = arith.constant 0 : index
    %c12_562 = arith.constant 12 : index
    %c2_563 = arith.constant 2 : index
    %c0_564 = arith.constant 0 : index
    %294 = vector.load %arg1[%c0_561, %c12_562, %c2_563, %c0_564] : memref<1x18x18x3xf32, #tpu.memory_space<vmem>>, vector<1x1x16x3xf32>
    %295 = vector.shape_cast %294 : vector<1x1x16x3xf32> to vector<16x3xf32>
    %c160_565 = arith.constant 160 : index
    %c24_566 = arith.constant 24 : index
    %296 = vector.load %arg12[%c160_565, %c24_566] : memref<256x27xf32, #tpu.memory_space<vmem>>, vector<16x3xf32>
    tpu.vector_store %arg12[%c160_565, %c24_566], %295 {strides = array<i32>} : memref<256x27xf32, #tpu.memory_space<vmem>>, vector<16x3xf32>,
    %c0_567 = arith.constant 0 : index
    %c11_568 = arith.constant 11 : index
    %c0_569 = arith.constant 0 : index
    %c0_570 = arith.constant 0 : index
    %297 = vector.load %arg1[%c0_567, %c11_568, %c0_569, %c0_570] : memref<1x18x18x3xf32, #tpu.memory_space<vmem>>, vector<1x1x16x3xf32>
    %298 = vector.shape_cast %297 : vector<1x1x16x3xf32> to vector<16x3xf32>
    %c176 = arith.constant 176 : index
    %c0_571 = arith.constant 0 : index
    %299 = vector.load %arg12[%c176, %c0_571] : memref<256x27xf32, #tpu.memory_space<vmem>>, vector<16x3xf32>
    tpu.vector_store %arg12[%c176, %c0_571], %298 {strides = array<i32>} : memref<256x27xf32, #tpu.memory_space<vmem>>, vector<16x3xf32>,
    %c0_572 = arith.constant 0 : index
    %c11_573 = arith.constant 11 : index
    %c1_574 = arith.constant 1 : index
    %c0_575 = arith.constant 0 : index
    %300 = vector.load %arg1[%c0_572, %c11_573, %c1_574, %c0_575] : memref<1x18x18x3xf32, #tpu.memory_space<vmem>>, vector<1x1x16x3xf32>
    %301 = vector.shape_cast %300 : vector<1x1x16x3xf32> to vector<16x3xf32>
    %c176_576 = arith.constant 176 : index
    %c3_577 = arith.constant 3 : index
    %302 = vector.load %arg12[%c176_576, %c3_577] : memref<256x27xf32, #tpu.memory_space<vmem>>, vector<16x3xf32>
    tpu.vector_store %arg12[%c176_576, %c3_577], %301 {strides = array<i32>} : memref<256x27xf32, #tpu.memory_space<vmem>>, vector<16x3xf32>,
    %c0_578 = arith.constant 0 : index
    %c11_579 = arith.constant 11 : index
    %c2_580 = arith.constant 2 : index
    %c0_581 = arith.constant 0 : index
    %303 = vector.load %arg1[%c0_578, %c11_579, %c2_580, %c0_581] : memref<1x18x18x3xf32, #tpu.memory_space<vmem>>, vector<1x1x16x3xf32>
    %304 = vector.shape_cast %303 : vector<1x1x16x3xf32> to vector<16x3xf32>
    %c176_582 = arith.constant 176 : index
    %c6_583 = arith.constant 6 : index
    %305 = vector.load %arg12[%c176_582, %c6_583] : memref<256x27xf32, #tpu.memory_space<vmem>>, vector<16x3xf32>
    tpu.vector_store %arg12[%c176_582, %c6_583], %304 {strides = array<i32>} : memref<256x27xf32, #tpu.memory_space<vmem>>, vector<16x3xf32>,
    %c0_584 = arith.constant 0 : index
    %c12_585 = arith.constant 12 : index
    %c0_586 = arith.constant 0 : index
    %c0_587 = arith.constant 0 : index
    %306 = vector.load %arg1[%c0_584, %c12_585, %c0_586, %c0_587] : memref<1x18x18x3xf32, #tpu.memory_space<vmem>>, vector<1x1x16x3xf32>
    %307 = vector.shape_cast %306 : vector<1x1x16x3xf32> to vector<16x3xf32>
    %c176_588 = arith.constant 176 : index
    %c9_589 = arith.constant 9 : index
    %308 = vector.load %arg12[%c176_588, %c9_589] : memref<256x27xf32, #tpu.memory_space<vmem>>, vector<16x3xf32>
    tpu.vector_store %arg12[%c176_588, %c9_589], %307 {strides = array<i32>} : memref<256x27xf32, #tpu.memory_space<vmem>>, vector<16x3xf32>,
    %c0_590 = arith.constant 0 : index
    %c12_591 = arith.constant 12 : index
    %c1_592 = arith.constant 1 : index
    %c0_593 = arith.constant 0 : index
    %309 = vector.load %arg1[%c0_590, %c12_591, %c1_592, %c0_593] : memref<1x18x18x3xf32, #tpu.memory_space<vmem>>, vector<1x1x16x3xf32>
    %310 = vector.shape_cast %309 : vector<1x1x16x3xf32> to vector<16x3xf32>
    %c176_594 = arith.constant 176 : index
    %c12_595 = arith.constant 12 : index
    %311 = vector.load %arg12[%c176_594, %c12_595] : memref<256x27xf32, #tpu.memory_space<vmem>>, vector<16x3xf32>
    tpu.vector_store %arg12[%c176_594, %c12_595], %310 {strides = array<i32>} : memref<256x27xf32, #tpu.memory_space<vmem>>, vector<16x3xf32>,
    %c0_596 = arith.constant 0 : index
    %c12_597 = arith.constant 12 : index
    %c2_598 = arith.constant 2 : index
    %c0_599 = arith.constant 0 : index
    %312 = vector.load %arg1[%c0_596, %c12_597, %c2_598, %c0_599] : memref<1x18x18x3xf32, #tpu.memory_space<vmem>>, vector<1x1x16x3xf32>
    %313 = vector.shape_cast %312 : vector<1x1x16x3xf32> to vector<16x3xf32>
    %c176_600 = arith.constant 176 : index
    %c15_601 = arith.constant 15 : index
    %314 = vector.load %arg12[%c176_600, %c15_601] : memref<256x27xf32, #tpu.memory_space<vmem>>, vector<16x3xf32>
    tpu.vector_store %arg12[%c176_600, %c15_601], %313 {strides = array<i32>} : memref<256x27xf32, #tpu.memory_space<vmem>>, vector<16x3xf32>,
    %c0_602 = arith.constant 0 : index
    %c13 = arith.constant 13 : index
    %c0_603 = arith.constant 0 : index
    %c0_604 = arith.constant 0 : index
    %315 = vector.load %arg1[%c0_602, %c13, %c0_603, %c0_604] : memref<1x18x18x3xf32, #tpu.memory_space<vmem>>, vector<1x1x16x3xf32>
    %316 = vector.shape_cast %315 : vector<1x1x16x3xf32> to vector<16x3xf32>
    %c176_605 = arith.constant 176 : index
    %c18_606 = arith.constant 18 : index
    %317 = vector.load %arg12[%c176_605, %c18_606] : memref<256x27xf32, #tpu.memory_space<vmem>>, vector<16x3xf32>
    tpu.vector_store %arg12[%c176_605, %c18_606], %316 {strides = array<i32>} : memref<256x27xf32, #tpu.memory_space<vmem>>, vector<16x3xf32>,
    %c0_607 = arith.constant 0 : index
    %c13_608 = arith.constant 13 : index
    %c1_609 = arith.constant 1 : index
    %c0_610 = arith.constant 0 : index
    %318 = vector.load %arg1[%c0_607, %c13_608, %c1_609, %c0_610] : memref<1x18x18x3xf32, #tpu.memory_space<vmem>>, vector<1x1x16x3xf32>
    %319 = vector.shape_cast %318 : vector<1x1x16x3xf32> to vector<16x3xf32>
    %c176_611 = arith.constant 176 : index
    %c21_612 = arith.constant 21 : index
    %320 = vector.load %arg12[%c176_611, %c21_612] : memref<256x27xf32, #tpu.memory_space<vmem>>, vector<16x3xf32>
    tpu.vector_store %arg12[%c176_611, %c21_612], %319 {strides = array<i32>} : memref<256x27xf32, #tpu.memory_space<vmem>>, vector<16x3xf32>,
    %c0_613 = arith.constant 0 : index
    %c13_614 = arith.constant 13 : index
    %c2_615 = arith.constant 2 : index
    %c0_616 = arith.constant 0 : index
    %321 = vector.load %arg1[%c0_613, %c13_614, %c2_615, %c0_616] : memref<1x18x18x3xf32, #tpu.memory_space<vmem>>, vector<1x1x16x3xf32>
    %322 = vector.shape_cast %321 : vector<1x1x16x3xf32> to vector<16x3xf32>
    %c176_617 = arith.constant 176 : index
    %c24_618 = arith.constant 24 : index
    %323 = vector.load %arg12[%c176_617, %c24_618] : memref<256x27xf32, #tpu.memory_space<vmem>>, vector<16x3xf32>
    tpu.vector_store %arg12[%c176_617, %c24_618], %322 {strides = array<i32>} : memref<256x27xf32, #tpu.memory_space<vmem>>, vector<16x3xf32>,
    %c0_619 = arith.constant 0 : index
    %c12_620 = arith.constant 12 : index
    %c0_621 = arith.constant 0 : index
    %c0_622 = arith.constant 0 : index
    %324 = vector.load %arg1[%c0_619, %c12_620, %c0_621, %c0_622] : memref<1x18x18x3xf32, #tpu.memory_space<vmem>>, vector<1x1x16x3xf32>
    %325 = vector.shape_cast %324 : vector<1x1x16x3xf32> to vector<16x3xf32>
    %c192 = arith.constant 192 : index
    %c0_623 = arith.constant 0 : index
    %326 = vector.load %arg12[%c192, %c0_623] : memref<256x27xf32, #tpu.memory_space<vmem>>, vector<16x3xf32>
    tpu.vector_store %arg12[%c192, %c0_623], %325 {strides = array<i32>} : memref<256x27xf32, #tpu.memory_space<vmem>>, vector<16x3xf32>,
    %c0_624 = arith.constant 0 : index
    %c12_625 = arith.constant 12 : index
    %c1_626 = arith.constant 1 : index
    %c0_627 = arith.constant 0 : index
    %327 = vector.load %arg1[%c0_624, %c12_625, %c1_626, %c0_627] : memref<1x18x18x3xf32, #tpu.memory_space<vmem>>, vector<1x1x16x3xf32>
    %328 = vector.shape_cast %327 : vector<1x1x16x3xf32> to vector<16x3xf32>
    %c192_628 = arith.constant 192 : index
    %c3_629 = arith.constant 3 : index
    %329 = vector.load %arg12[%c192_628, %c3_629] : memref<256x27xf32, #tpu.memory_space<vmem>>, vector<16x3xf32>
    tpu.vector_store %arg12[%c192_628, %c3_629], %328 {strides = array<i32>} : memref<256x27xf32, #tpu.memory_space<vmem>>, vector<16x3xf32>,
    %c0_630 = arith.constant 0 : index
    %c12_631 = arith.constant 12 : index
    %c2_632 = arith.constant 2 : index
    %c0_633 = arith.constant 0 : index
    %330 = vector.load %arg1[%c0_630, %c12_631, %c2_632, %c0_633] : memref<1x18x18x3xf32, #tpu.memory_space<vmem>>, vector<1x1x16x3xf32>
    %331 = vector.shape_cast %330 : vector<1x1x16x3xf32> to vector<16x3xf32>
    %c192_634 = arith.constant 192 : index
    %c6_635 = arith.constant 6 : index
    %332 = vector.load %arg12[%c192_634, %c6_635] : memref<256x27xf32, #tpu.memory_space<vmem>>, vector<16x3xf32>
    tpu.vector_store %arg12[%c192_634, %c6_635], %331 {strides = array<i32>} : memref<256x27xf32, #tpu.memory_space<vmem>>, vector<16x3xf32>,
    %c0_636 = arith.constant 0 : index
    %c13_637 = arith.constant 13 : index
    %c0_638 = arith.constant 0 : index
    %c0_639 = arith.constant 0 : index
    %333 = vector.load %arg1[%c0_636, %c13_637, %c0_638, %c0_639] : memref<1x18x18x3xf32, #tpu.memory_space<vmem>>, vector<1x1x16x3xf32>
    %334 = vector.shape_cast %333 : vector<1x1x16x3xf32> to vector<16x3xf32>
    %c192_640 = arith.constant 192 : index
    %c9_641 = arith.constant 9 : index
    %335 = vector.load %arg12[%c192_640, %c9_641] : memref<256x27xf32, #tpu.memory_space<vmem>>, vector<16x3xf32>
    tpu.vector_store %arg12[%c192_640, %c9_641], %334 {strides = array<i32>} : memref<256x27xf32, #tpu.memory_space<vmem>>, vector<16x3xf32>,
    %c0_642 = arith.constant 0 : index
    %c13_643 = arith.constant 13 : index
    %c1_644 = arith.constant 1 : index
    %c0_645 = arith.constant 0 : index
    %336 = vector.load %arg1[%c0_642, %c13_643, %c1_644, %c0_645] : memref<1x18x18x3xf32, #tpu.memory_space<vmem>>, vector<1x1x16x3xf32>
    %337 = vector.shape_cast %336 : vector<1x1x16x3xf32> to vector<16x3xf32>
    %c192_646 = arith.constant 192 : index
    %c12_647 = arith.constant 12 : index
    %338 = vector.load %arg12[%c192_646, %c12_647] : memref<256x27xf32, #tpu.memory_space<vmem>>, vector<16x3xf32>
    tpu.vector_store %arg12[%c192_646, %c12_647], %337 {strides = array<i32>} : memref<256x27xf32, #tpu.memory_space<vmem>>, vector<16x3xf32>,
    %c0_648 = arith.constant 0 : index
    %c13_649 = arith.constant 13 : index
    %c2_650 = arith.constant 2 : index
    %c0_651 = arith.constant 0 : index
    %339 = vector.load %arg1[%c0_648, %c13_649, %c2_650, %c0_651] : memref<1x18x18x3xf32, #tpu.memory_space<vmem>>, vector<1x1x16x3xf32>
    %340 = vector.shape_cast %339 : vector<1x1x16x3xf32> to vector<16x3xf32>
    %c192_652 = arith.constant 192 : index
    %c15_653 = arith.constant 15 : index
    %341 = vector.load %arg12[%c192_652, %c15_653] : memref<256x27xf32, #tpu.memory_space<vmem>>, vector<16x3xf32>
    tpu.vector_store %arg12[%c192_652, %c15_653], %340 {strides = array<i32>} : memref<256x27xf32, #tpu.memory_space<vmem>>, vector<16x3xf32>,
    %c0_654 = arith.constant 0 : index
    %c14 = arith.constant 14 : index
    %c0_655 = arith.constant 0 : index
    %c0_656 = arith.constant 0 : index
    %342 = vector.load %arg1[%c0_654, %c14, %c0_655, %c0_656] : memref<1x18x18x3xf32, #tpu.memory_space<vmem>>, vector<1x1x16x3xf32>
    %343 = vector.shape_cast %342 : vector<1x1x16x3xf32> to vector<16x3xf32>
    %c192_657 = arith.constant 192 : index
    %c18_658 = arith.constant 18 : index
    %344 = vector.load %arg12[%c192_657, %c18_658] : memref<256x27xf32, #tpu.memory_space<vmem>>, vector<16x3xf32>
    tpu.vector_store %arg12[%c192_657, %c18_658], %343 {strides = array<i32>} : memref<256x27xf32, #tpu.memory_space<vmem>>, vector<16x3xf32>,
    %c0_659 = arith.constant 0 : index
    %c14_660 = arith.constant 14 : index
    %c1_661 = arith.constant 1 : index
    %c0_662 = arith.constant 0 : index
    %345 = vector.load %arg1[%c0_659, %c14_660, %c1_661, %c0_662] : memref<1x18x18x3xf32, #tpu.memory_space<vmem>>, vector<1x1x16x3xf32>
    %346 = vector.shape_cast %345 : vector<1x1x16x3xf32> to vector<16x3xf32>
    %c192_663 = arith.constant 192 : index
    %c21_664 = arith.constant 21 : index
    %347 = vector.load %arg12[%c192_663, %c21_664] : memref<256x27xf32, #tpu.memory_space<vmem>>, vector<16x3xf32>
    tpu.vector_store %arg12[%c192_663, %c21_664], %346 {strides = array<i32>} : memref<256x27xf32, #tpu.memory_space<vmem>>, vector<16x3xf32>,
    %c0_665 = arith.constant 0 : index
    %c14_666 = arith.constant 14 : index
    %c2_667 = arith.constant 2 : index
    %c0_668 = arith.constant 0 : index
    %348 = vector.load %arg1[%c0_665, %c14_666, %c2_667, %c0_668] : memref<1x18x18x3xf32, #tpu.memory_space<vmem>>, vector<1x1x16x3xf32>
    %349 = vector.shape_cast %348 : vector<1x1x16x3xf32> to vector<16x3xf32>
    %c192_669 = arith.constant 192 : index
    %c24_670 = arith.constant 24 : index
    %350 = vector.load %arg12[%c192_669, %c24_670] : memref<256x27xf32, #tpu.memory_space<vmem>>, vector<16x3xf32>
    tpu.vector_store %arg12[%c192_669, %c24_670], %349 {strides = array<i32>} : memref<256x27xf32, #tpu.memory_space<vmem>>, vector<16x3xf32>,
    %c0_671 = arith.constant 0 : index
    %c13_672 = arith.constant 13 : index
    %c0_673 = arith.constant 0 : index
    %c0_674 = arith.constant 0 : index
    %351 = vector.load %arg1[%c0_671, %c13_672, %c0_673, %c0_674] : memref<1x18x18x3xf32, #tpu.memory_space<vmem>>, vector<1x1x16x3xf32>
    %352 = vector.shape_cast %351 : vector<1x1x16x3xf32> to vector<16x3xf32>
    %c208 = arith.constant 208 : index
    %c0_675 = arith.constant 0 : index
    %353 = vector.load %arg12[%c208, %c0_675] : memref<256x27xf32, #tpu.memory_space<vmem>>, vector<16x3xf32>
    tpu.vector_store %arg12[%c208, %c0_675], %352 {strides = array<i32>} : memref<256x27xf32, #tpu.memory_space<vmem>>, vector<16x3xf32>,
    %c0_676 = arith.constant 0 : index
    %c13_677 = arith.constant 13 : index
    %c1_678 = arith.constant 1 : index
    %c0_679 = arith.constant 0 : index
    %354 = vector.load %arg1[%c0_676, %c13_677, %c1_678, %c0_679] : memref<1x18x18x3xf32, #tpu.memory_space<vmem>>, vector<1x1x16x3xf32>
    %355 = vector.shape_cast %354 : vector<1x1x16x3xf32> to vector<16x3xf32>
    %c208_680 = arith.constant 208 : index
    %c3_681 = arith.constant 3 : index
    %356 = vector.load %arg12[%c208_680, %c3_681] : memref<256x27xf32, #tpu.memory_space<vmem>>, vector<16x3xf32>
    tpu.vector_store %arg12[%c208_680, %c3_681], %355 {strides = array<i32>} : memref<256x27xf32, #tpu.memory_space<vmem>>, vector<16x3xf32>,
    %c0_682 = arith.constant 0 : index
    %c13_683 = arith.constant 13 : index
    %c2_684 = arith.constant 2 : index
    %c0_685 = arith.constant 0 : index
    %357 = vector.load %arg1[%c0_682, %c13_683, %c2_684, %c0_685] : memref<1x18x18x3xf32, #tpu.memory_space<vmem>>, vector<1x1x16x3xf32>
    %358 = vector.shape_cast %357 : vector<1x1x16x3xf32> to vector<16x3xf32>
    %c208_686 = arith.constant 208 : index
    %c6_687 = arith.constant 6 : index
    %359 = vector.load %arg12[%c208_686, %c6_687] : memref<256x27xf32, #tpu.memory_space<vmem>>, vector<16x3xf32>
    tpu.vector_store %arg12[%c208_686, %c6_687], %358 {strides = array<i32>} : memref<256x27xf32, #tpu.memory_space<vmem>>, vector<16x3xf32>,
    %c0_688 = arith.constant 0 : index
    %c14_689 = arith.constant 14 : index
    %c0_690 = arith.constant 0 : index
    %c0_691 = arith.constant 0 : index
    %360 = vector.load %arg1[%c0_688, %c14_689, %c0_690, %c0_691] : memref<1x18x18x3xf32, #tpu.memory_space<vmem>>, vector<1x1x16x3xf32>
    %361 = vector.shape_cast %360 : vector<1x1x16x3xf32> to vector<16x3xf32>
    %c208_692 = arith.constant 208 : index
    %c9_693 = arith.constant 9 : index
    %362 = vector.load %arg12[%c208_692, %c9_693] : memref<256x27xf32, #tpu.memory_space<vmem>>, vector<16x3xf32>
    tpu.vector_store %arg12[%c208_692, %c9_693], %361 {strides = array<i32>} : memref<256x27xf32, #tpu.memory_space<vmem>>, vector<16x3xf32>,
    %c0_694 = arith.constant 0 : index
    %c14_695 = arith.constant 14 : index
    %c1_696 = arith.constant 1 : index
    %c0_697 = arith.constant 0 : index
    %363 = vector.load %arg1[%c0_694, %c14_695, %c1_696, %c0_697] : memref<1x18x18x3xf32, #tpu.memory_space<vmem>>, vector<1x1x16x3xf32>
    %364 = vector.shape_cast %363 : vector<1x1x16x3xf32> to vector<16x3xf32>
    %c208_698 = arith.constant 208 : index
    %c12_699 = arith.constant 12 : index
    %365 = vector.load %arg12[%c208_698, %c12_699] : memref<256x27xf32, #tpu.memory_space<vmem>>, vector<16x3xf32>
    tpu.vector_store %arg12[%c208_698, %c12_699], %364 {strides = array<i32>} : memref<256x27xf32, #tpu.memory_space<vmem>>, vector<16x3xf32>,
    %c0_700 = arith.constant 0 : index
    %c14_701 = arith.constant 14 : index
    %c2_702 = arith.constant 2 : index
    %c0_703 = arith.constant 0 : index
    %366 = vector.load %arg1[%c0_700, %c14_701, %c2_702, %c0_703] : memref<1x18x18x3xf32, #tpu.memory_space<vmem>>, vector<1x1x16x3xf32>
    %367 = vector.shape_cast %366 : vector<1x1x16x3xf32> to vector<16x3xf32>
    %c208_704 = arith.constant 208 : index
    %c15_705 = arith.constant 15 : index
    %368 = vector.load %arg12[%c208_704, %c15_705] : memref<256x27xf32, #tpu.memory_space<vmem>>, vector<16x3xf32>
    tpu.vector_store %arg12[%c208_704, %c15_705], %367 {strides = array<i32>} : memref<256x27xf32, #tpu.memory_space<vmem>>, vector<16x3xf32>,
    %c0_706 = arith.constant 0 : index
    %c15_707 = arith.constant 15 : index
    %c0_708 = arith.constant 0 : index
    %c0_709 = arith.constant 0 : index
    %369 = vector.load %arg1[%c0_706, %c15_707, %c0_708, %c0_709] : memref<1x18x18x3xf32, #tpu.memory_space<vmem>>, vector<1x1x16x3xf32>
    %370 = vector.shape_cast %369 : vector<1x1x16x3xf32> to vector<16x3xf32>
    %c208_710 = arith.constant 208 : index
    %c18_711 = arith.constant 18 : index
    %371 = vector.load %arg12[%c208_710, %c18_711] : memref<256x27xf32, #tpu.memory_space<vmem>>, vector<16x3xf32>
    tpu.vector_store %arg12[%c208_710, %c18_711], %370 {strides = array<i32>} : memref<256x27xf32, #tpu.memory_space<vmem>>, vector<16x3xf32>,
    %c0_712 = arith.constant 0 : index
    %c15_713 = arith.constant 15 : index
    %c1_714 = arith.constant 1 : index
    %c0_715 = arith.constant 0 : index
    %372 = vector.load %arg1[%c0_712, %c15_713, %c1_714, %c0_715] : memref<1x18x18x3xf32, #tpu.memory_space<vmem>>, vector<1x1x16x3xf32>
    %373 = vector.shape_cast %372 : vector<1x1x16x3xf32> to vector<16x3xf32>
    %c208_716 = arith.constant 208 : index
    %c21_717 = arith.constant 21 : index
    %374 = vector.load %arg12[%c208_716, %c21_717] : memref<256x27xf32, #tpu.memory_space<vmem>>, vector<16x3xf32>
    tpu.vector_store %arg12[%c208_716, %c21_717], %373 {strides = array<i32>} : memref<256x27xf32, #tpu.memory_space<vmem>>, vector<16x3xf32>,
    %c0_718 = arith.constant 0 : index
    %c15_719 = arith.constant 15 : index
    %c2_720 = arith.constant 2 : index
    %c0_721 = arith.constant 0 : index
    %375 = vector.load %arg1[%c0_718, %c15_719, %c2_720, %c0_721] : memref<1x18x18x3xf32, #tpu.memory_space<vmem>>, vector<1x1x16x3xf32>
    %376 = vector.shape_cast %375 : vector<1x1x16x3xf32> to vector<16x3xf32>
    %c208_722 = arith.constant 208 : index
    %c24_723 = arith.constant 24 : index
    %377 = vector.load %arg12[%c208_722, %c24_723] : memref<256x27xf32, #tpu.memory_space<vmem>>, vector<16x3xf32>
    tpu.vector_store %arg12[%c208_722, %c24_723], %376 {strides = array<i32>} : memref<256x27xf32, #tpu.memory_space<vmem>>, vector<16x3xf32>,
    %c0_724 = arith.constant 0 : index
    %c14_725 = arith.constant 14 : index
    %c0_726 = arith.constant 0 : index
    %c0_727 = arith.constant 0 : index
    %378 = vector.load %arg1[%c0_724, %c14_725, %c0_726, %c0_727] : memref<1x18x18x3xf32, #tpu.memory_space<vmem>>, vector<1x1x16x3xf32>
    %379 = vector.shape_cast %378 : vector<1x1x16x3xf32> to vector<16x3xf32>
    %c224 = arith.constant 224 : index
    %c0_728 = arith.constant 0 : index
    %380 = vector.load %arg12[%c224, %c0_728] : memref<256x27xf32, #tpu.memory_space<vmem>>, vector<16x3xf32>
    tpu.vector_store %arg12[%c224, %c0_728], %379 {strides = array<i32>} : memref<256x27xf32, #tpu.memory_space<vmem>>, vector<16x3xf32>,
    %c0_729 = arith.constant 0 : index
    %c14_730 = arith.constant 14 : index
    %c1_731 = arith.constant 1 : index
    %c0_732 = arith.constant 0 : index
    %381 = vector.load %arg1[%c0_729, %c14_730, %c1_731, %c0_732] : memref<1x18x18x3xf32, #tpu.memory_space<vmem>>, vector<1x1x16x3xf32>
    %382 = vector.shape_cast %381 : vector<1x1x16x3xf32> to vector<16x3xf32>
    %c224_733 = arith.constant 224 : index
    %c3_734 = arith.constant 3 : index
    %383 = vector.load %arg12[%c224_733, %c3_734] : memref<256x27xf32, #tpu.memory_space<vmem>>, vector<16x3xf32>
    tpu.vector_store %arg12[%c224_733, %c3_734], %382 {strides = array<i32>} : memref<256x27xf32, #tpu.memory_space<vmem>>, vector<16x3xf32>,
    %c0_735 = arith.constant 0 : index
    %c14_736 = arith.constant 14 : index
    %c2_737 = arith.constant 2 : index
    %c0_738 = arith.constant 0 : index
    %384 = vector.load %arg1[%c0_735, %c14_736, %c2_737, %c0_738] : memref<1x18x18x3xf32, #tpu.memory_space<vmem>>, vector<1x1x16x3xf32>
    %385 = vector.shape_cast %384 : vector<1x1x16x3xf32> to vector<16x3xf32>
    %c224_739 = arith.constant 224 : index
    %c6_740 = arith.constant 6 : index
    %386 = vector.load %arg12[%c224_739, %c6_740] : memref<256x27xf32, #tpu.memory_space<vmem>>, vector<16x3xf32>
    tpu.vector_store %arg12[%c224_739, %c6_740], %385 {strides = array<i32>} : memref<256x27xf32, #tpu.memory_space<vmem>>, vector<16x3xf32>,
    %c0_741 = arith.constant 0 : index
    %c15_742 = arith.constant 15 : index
    %c0_743 = arith.constant 0 : index
    %c0_744 = arith.constant 0 : index
    %387 = vector.load %arg1[%c0_741, %c15_742, %c0_743, %c0_744] : memref<1x18x18x3xf32, #tpu.memory_space<vmem>>, vector<1x1x16x3xf32>
    %388 = vector.shape_cast %387 : vector<1x1x16x3xf32> to vector<16x3xf32>
    %c224_745 = arith.constant 224 : index
    %c9_746 = arith.constant 9 : index
    %389 = vector.load %arg12[%c224_745, %c9_746] : memref<256x27xf32, #tpu.memory_space<vmem>>, vector<16x3xf32>
    tpu.vector_store %arg12[%c224_745, %c9_746], %388 {strides = array<i32>} : memref<256x27xf32, #tpu.memory_space<vmem>>, vector<16x3xf32>,
    %c0_747 = arith.constant 0 : index
    %c15_748 = arith.constant 15 : index
    %c1_749 = arith.constant 1 : index
    %c0_750 = arith.constant 0 : index
    %390 = vector.load %arg1[%c0_747, %c15_748, %c1_749, %c0_750] : memref<1x18x18x3xf32, #tpu.memory_space<vmem>>, vector<1x1x16x3xf32>
    %391 = vector.shape_cast %390 : vector<1x1x16x3xf32> to vector<16x3xf32>
    %c224_751 = arith.constant 224 : index
    %c12_752 = arith.constant 12 : index
    %392 = vector.load %arg12[%c224_751, %c12_752] : memref<256x27xf32, #tpu.memory_space<vmem>>, vector<16x3xf32>
    tpu.vector_store %arg12[%c224_751, %c12_752], %391 {strides = array<i32>} : memref<256x27xf32, #tpu.memory_space<vmem>>, vector<16x3xf32>,
    %c0_753 = arith.constant 0 : index
    %c15_754 = arith.constant 15 : index
    %c2_755 = arith.constant 2 : index
    %c0_756 = arith.constant 0 : index
    %393 = vector.load %arg1[%c0_753, %c15_754, %c2_755, %c0_756] : memref<1x18x18x3xf32, #tpu.memory_space<vmem>>, vector<1x1x16x3xf32>
    %394 = vector.shape_cast %393 : vector<1x1x16x3xf32> to vector<16x3xf32>
    %c224_757 = arith.constant 224 : index
    %c15_758 = arith.constant 15 : index
    %395 = vector.load %arg12[%c224_757, %c15_758] : memref<256x27xf32, #tpu.memory_space<vmem>>, vector<16x3xf32>
    tpu.vector_store %arg12[%c224_757, %c15_758], %394 {strides = array<i32>} : memref<256x27xf32, #tpu.memory_space<vmem>>, vector<16x3xf32>,
    %c0_759 = arith.constant 0 : index
    %c16_760 = arith.constant 16 : index
    %c0_761 = arith.constant 0 : index
    %c0_762 = arith.constant 0 : index
    %396 = vector.load %arg1[%c0_759, %c16_760, %c0_761, %c0_762] : memref<1x18x18x3xf32, #tpu.memory_space<vmem>>, vector<1x1x16x3xf32>
    %397 = vector.shape_cast %396 : vector<1x1x16x3xf32> to vector<16x3xf32>
    %c224_763 = arith.constant 224 : index
    %c18_764 = arith.constant 18 : index
    %398 = vector.load %arg12[%c224_763, %c18_764] : memref<256x27xf32, #tpu.memory_space<vmem>>, vector<16x3xf32>
    tpu.vector_store %arg12[%c224_763, %c18_764], %397 {strides = array<i32>} : memref<256x27xf32, #tpu.memory_space<vmem>>, vector<16x3xf32>,
    %c0_765 = arith.constant 0 : index
    %c16_766 = arith.constant 16 : index
    %c1_767 = arith.constant 1 : index
    %c0_768 = arith.constant 0 : index
    %399 = vector.load %arg1[%c0_765, %c16_766, %c1_767, %c0_768] : memref<1x18x18x3xf32, #tpu.memory_space<vmem>>, vector<1x1x16x3xf32>
    %400 = vector.shape_cast %399 : vector<1x1x16x3xf32> to vector<16x3xf32>
    %c224_769 = arith.constant 224 : index
    %c21_770 = arith.constant 21 : index
    %401 = vector.load %arg12[%c224_769, %c21_770] : memref<256x27xf32, #tpu.memory_space<vmem>>, vector<16x3xf32>
    tpu.vector_store %arg12[%c224_769, %c21_770], %400 {strides = array<i32>} : memref<256x27xf32, #tpu.memory_space<vmem>>, vector<16x3xf32>,
    %c0_771 = arith.constant 0 : index
    %c16_772 = arith.constant 16 : index
    %c2_773 = arith.constant 2 : index
    %c0_774 = arith.constant 0 : index
    %402 = vector.load %arg1[%c0_771, %c16_772, %c2_773, %c0_774] : memref<1x18x18x3xf32, #tpu.memory_space<vmem>>, vector<1x1x16x3xf32>
    %403 = vector.shape_cast %402 : vector<1x1x16x3xf32> to vector<16x3xf32>
    %c224_775 = arith.constant 224 : index
    %c24_776 = arith.constant 24 : index
    %404 = vector.load %arg12[%c224_775, %c24_776] : memref<256x27xf32, #tpu.memory_space<vmem>>, vector<16x3xf32>
    tpu.vector_store %arg12[%c224_775, %c24_776], %403 {strides = array<i32>} : memref<256x27xf32, #tpu.memory_space<vmem>>, vector<16x3xf32>,
    %c0_777 = arith.constant 0 : index
    %c15_778 = arith.constant 15 : index
    %c0_779 = arith.constant 0 : index
    %c0_780 = arith.constant 0 : index
    %405 = vector.load %arg1[%c0_777, %c15_778, %c0_779, %c0_780] : memref<1x18x18x3xf32, #tpu.memory_space<vmem>>, vector<1x1x16x3xf32>
    %406 = vector.shape_cast %405 : vector<1x1x16x3xf32> to vector<16x3xf32>
    %c240 = arith.constant 240 : index
    %c0_781 = arith.constant 0 : index
    %407 = vector.load %arg12[%c240, %c0_781] : memref<256x27xf32, #tpu.memory_space<vmem>>, vector<16x3xf32>
    tpu.vector_store %arg12[%c240, %c0_781], %406 {strides = array<i32>} : memref<256x27xf32, #tpu.memory_space<vmem>>, vector<16x3xf32>,
    %c0_782 = arith.constant 0 : index
    %c15_783 = arith.constant 15 : index
    %c1_784 = arith.constant 1 : index
    %c0_785 = arith.constant 0 : index
    %408 = vector.load %arg1[%c0_782, %c15_783, %c1_784, %c0_785] : memref<1x18x18x3xf32, #tpu.memory_space<vmem>>, vector<1x1x16x3xf32>
    %409 = vector.shape_cast %408 : vector<1x1x16x3xf32> to vector<16x3xf32>
    %c240_786 = arith.constant 240 : index
    %c3_787 = arith.constant 3 : index
    %410 = vector.load %arg12[%c240_786, %c3_787] : memref<256x27xf32, #tpu.memory_space<vmem>>, vector<16x3xf32>
    tpu.vector_store %arg12[%c240_786, %c3_787], %409 {strides = array<i32>} : memref<256x27xf32, #tpu.memory_space<vmem>>, vector<16x3xf32>,
    %c0_788 = arith.constant 0 : index
    %c15_789 = arith.constant 15 : index
    %c2_790 = arith.constant 2 : index
    %c0_791 = arith.constant 0 : index
    %411 = vector.load %arg1[%c0_788, %c15_789, %c2_790, %c0_791] : memref<1x18x18x3xf32, #tpu.memory_space<vmem>>, vector<1x1x16x3xf32>
    %412 = vector.shape_cast %411 : vector<1x1x16x3xf32> to vector<16x3xf32>
    %c240_792 = arith.constant 240 : index
    %c6_793 = arith.constant 6 : index
    %413 = vector.load %arg12[%c240_792, %c6_793] : memref<256x27xf32, #tpu.memory_space<vmem>>, vector<16x3xf32>
    tpu.vector_store %arg12[%c240_792, %c6_793], %412 {strides = array<i32>} : memref<256x27xf32, #tpu.memory_space<vmem>>, vector<16x3xf32>,
    %c0_794 = arith.constant 0 : index
    %c16_795 = arith.constant 16 : index
    %c0_796 = arith.constant 0 : index
    %c0_797 = arith.constant 0 : index
    %414 = vector.load %arg1[%c0_794, %c16_795, %c0_796, %c0_797] : memref<1x18x18x3xf32, #tpu.memory_space<vmem>>, vector<1x1x16x3xf32>
    %415 = vector.shape_cast %414 : vector<1x1x16x3xf32> to vector<16x3xf32>
    %c240_798 = arith.constant 240 : index
    %c9_799 = arith.constant 9 : index
    %416 = vector.load %arg12[%c240_798, %c9_799] : memref<256x27xf32, #tpu.memory_space<vmem>>, vector<16x3xf32>
    tpu.vector_store %arg12[%c240_798, %c9_799], %415 {strides = array<i32>} : memref<256x27xf32, #tpu.memory_space<vmem>>, vector<16x3xf32>,
    %c0_800 = arith.constant 0 : index
    %c16_801 = arith.constant 16 : index
    %c1_802 = arith.constant 1 : index
    %c0_803 = arith.constant 0 : index
    %417 = vector.load %arg1[%c0_800, %c16_801, %c1_802, %c0_803] : memref<1x18x18x3xf32, #tpu.memory_space<vmem>>, vector<1x1x16x3xf32>
    %418 = vector.shape_cast %417 : vector<1x1x16x3xf32> to vector<16x3xf32>
    %c240_804 = arith.constant 240 : index
    %c12_805 = arith.constant 12 : index
    %419 = vector.load %arg12[%c240_804, %c12_805] : memref<256x27xf32, #tpu.memory_space<vmem>>, vector<16x3xf32>
    tpu.vector_store %arg12[%c240_804, %c12_805], %418 {strides = array<i32>} : memref<256x27xf32, #tpu.memory_space<vmem>>, vector<16x3xf32>,
    %c0_806 = arith.constant 0 : index
    %c16_807 = arith.constant 16 : index
    %c2_808 = arith.constant 2 : index
    %c0_809 = arith.constant 0 : index
    %420 = vector.load %arg1[%c0_806, %c16_807, %c2_808, %c0_809] : memref<1x18x18x3xf32, #tpu.memory_space<vmem>>, vector<1x1x16x3xf32>
    %421 = vector.shape_cast %420 : vector<1x1x16x3xf32> to vector<16x3xf32>
    %c240_810 = arith.constant 240 : index
    %c15_811 = arith.constant 15 : index
    %422 = vector.load %arg12[%c240_810, %c15_811] : memref<256x27xf32, #tpu.memory_space<vmem>>, vector<16x3xf32>
    tpu.vector_store %arg12[%c240_810, %c15_811], %421 {strides = array<i32>} : memref<256x27xf32, #tpu.memory_space<vmem>>, vector<16x3xf32>,
    %c0_812 = arith.constant 0 : index
    %c17 = arith.constant 17 : index
    %c0_813 = arith.constant 0 : index
    %c0_814 = arith.constant 0 : index
    %423 = vector.load %arg1[%c0_812, %c17, %c0_813, %c0_814] : memref<1x18x18x3xf32, #tpu.memory_space<vmem>>, vector<1x1x16x3xf32>
    %424 = vector.shape_cast %423 : vector<1x1x16x3xf32> to vector<16x3xf32>
    %c240_815 = arith.constant 240 : index
    %c18_816 = arith.constant 18 : index
    %425 = vector.load %arg12[%c240_815, %c18_816] : memref<256x27xf32, #tpu.memory_space<vmem>>, vector<16x3xf32>
    tpu.vector_store %arg12[%c240_815, %c18_816], %424 {strides = array<i32>} : memref<256x27xf32, #tpu.memory_space<vmem>>, vector<16x3xf32>,
    %c0_817 = arith.constant 0 : index
    %c17_818 = arith.constant 17 : index
    %c1_819 = arith.constant 1 : index
    %c0_820 = arith.constant 0 : index
    %426 = vector.load %arg1[%c0_817, %c17_818, %c1_819, %c0_820] : memref<1x18x18x3xf32, #tpu.memory_space<vmem>>, vector<1x1x16x3xf32>
    %427 = vector.shape_cast %426 : vector<1x1x16x3xf32> to vector<16x3xf32>
    %c240_821 = arith.constant 240 : index
    %c21_822 = arith.constant 21 : index
    %428 = vector.load %arg12[%c240_821, %c21_822] : memref<256x27xf32, #tpu.memory_space<vmem>>, vector<16x3xf32>
    tpu.vector_store %arg12[%c240_821, %c21_822], %427 {strides = array<i32>} : memref<256x27xf32, #tpu.memory_space<vmem>>, vector<16x3xf32>,
    %c0_823 = arith.constant 0 : index
    %c17_824 = arith.constant 17 : index
    %c2_825 = arith.constant 2 : index
    %c0_826 = arith.constant 0 : index
    %429 = vector.load %arg1[%c0_823, %c17_824, %c2_825, %c0_826] : memref<1x18x18x3xf32, #tpu.memory_space<vmem>>, vector<1x1x16x3xf32>
    %430 = vector.shape_cast %429 : vector<1x1x16x3xf32> to vector<16x3xf32>
    %c240_827 = arith.constant 240 : index
    %c24_828 = arith.constant 24 : index
    %431 = vector.load %arg12[%c240_827, %c24_828] : memref<256x27xf32, #tpu.memory_space<vmem>>, vector<16x3xf32>
    tpu.vector_store %arg12[%c240_827, %c24_828], %430 {strides = array<i32>} : memref<256x27xf32, #tpu.memory_space<vmem>>, vector<16x3xf32>,
    %c0_829 = arith.constant 0 : index
    %c0_830 = arith.constant 0 : index
    %432 = vector.load %arg12[%c0_829, %c0_830] : memref<256x27xf32, #tpu.memory_space<vmem>>, vector<256x27xf32>
    %433 = arith.truncf %432 : vector<256x27xf32> to vector<256x27xbf16>
    %c0_831 = arith.constant 0 : index
    %c0_832 = arith.constant 0 : index
    %434 = vector.load %arg2[%c0_831, %c0_832] : memref<27x10xbf16, #tpu.memory_space<vmem>>, vector<27x10xbf16>
    %cst = arith.constant dense<0.000000e+00> : vector<256x10xf32>
    %435 = tpu.matmul %433, %434, %cst {dimension_numbers = #tpu.dot_dimension_numbers<[1], [0], [0], [1], [0, 0, 1, 1], [], []>} : vector<256x27xbf16>, vector<27x10xbf16>, vector<256x10xf32> -> vector<256x10xf32>
    %c0_833 = arith.constant 0 : index
    %c0_834 = arith.constant 0 : index
    %436 = vector.load %arg3[%c0_833, %c0_834] : memref<2x10xf32, #tpu.memory_space<vmem>>, vector<1x10xf32>
    %437 = vector.broadcast %436 : vector<1x10xf32> to vector<256x10xf32>
    %438 = arith.addf %435, %437 : vector<256x10xf32>
    %cst_835 = arith.constant 0.000000e+00 : f32
    %439 = vector.broadcast %cst_835 : f32 to vector<256x10xf32>
    %440 = arith.cmpf oge, %438, %439 : vector<256x10xf32>
    %c1_836 = arith.constant 1 : index
    %c0_837 = arith.constant 0 : index
    %441 = vector.load %arg3[%c1_836, %c0_837] : memref<2x10xf32, #tpu.memory_space<vmem>>, vector<1x10xf32>
    %442 = vector.broadcast %441 : vector<1x10xf32> to vector<256x10xf32>
    %443 = arith.mulf %442, %438 : vector<256x10xf32>
    %444 = arith.select %440, %438, %443 : vector<256x10xi1>, vector<256x10xf32>
    %c0_838 = arith.constant 0 : index
    %c0_839 = arith.constant 0 : index
    %445 = vector.load %arg13[%c0_838, %c0_839] : memref<256x10xf32, #tpu.memory_space<vmem>>, vector<256x10xf32>
    tpu.vector_store %arg13[%c0_838, %c0_839], %444 {strides = array<i32>} : memref<256x10xf32, #tpu.memory_space<vmem>>, vector<256x10xf32>,
    %c0_840 = arith.constant 0 : index
    %c0_841 = arith.constant 0 : index
    %446 = vector.load %arg13[%c0_840, %c0_841] : memref<256x10xf32, #tpu.memory_space<vmem>>, vector<16x10xf32>
    %c16_842 = arith.constant 16 : index
    %c0_843 = arith.constant 0 : index
    %447 = vector.load %arg13[%c16_842, %c0_843] : memref<256x10xf32, #tpu.memory_space<vmem>>, vector<16x10xf32>
    %c32_844 = arith.constant 32 : index
    %c0_845 = arith.constant 0 : index
    %448 = vector.load %arg13[%c32_844, %c0_845] : memref<256x10xf32, #tpu.memory_space<vmem>>, vector<16x10xf32>
    %449 = arith.maximumf %446, %447 : vector<16x10xf32>
    %450 = arith.maximumf %449, %448 : vector<16x10xf32>
    %451 = vector.extract_strided_slice %450 {offsets = [0, 0], sizes = [14, 10], strides = [1, 1]} : vector<16x10xf32> to vector<14x10xf32>
    %452 = vector.extract_strided_slice %450 {offsets = [1, 0], sizes = [14, 10], strides = [1, 1]} : vector<16x10xf32> to vector<14x10xf32>
    %453 = arith.maximumf %451, %452 : vector<14x10xf32>
    %454 = vector.extract_strided_slice %450 {offsets = [2, 0], sizes = [14, 10], strides = [1, 1]} : vector<16x10xf32> to vector<14x10xf32>
    %455 = arith.maximumf %453, %454 : vector<14x10xf32>
    %456 = vector.extract_strided_slice %455 {offsets = [0, 0], sizes = [1, 10], strides = [1, 1]} : vector<14x10xf32> to vector<1x10xf32>
    %c0_846 = arith.constant 0 : index
    %c0_847 = arith.constant 0 : index
    %457 = vector.load %arg14[%c0_846, %c0_847] : memref<49x10xf32, #tpu.memory_space<vmem>>, vector<1x10xf32>
    tpu.vector_store %arg14[%c0_846, %c0_847], %456 {strides = array<i32>} : memref<49x10xf32, #tpu.memory_space<vmem>>, vector<1x10xf32>,
    %458 = vector.extract_strided_slice %455 {offsets = [2, 0], sizes = [1, 10], strides = [1, 1]} : vector<14x10xf32> to vector<1x10xf32>
    %c1_848 = arith.constant 1 : index
    %c0_849 = arith.constant 0 : index
    %459 = vector.load %arg14[%c1_848, %c0_849] : memref<49x10xf32, #tpu.memory_space<vmem>>, vector<1x10xf32>
    tpu.vector_store %arg14[%c1_848, %c0_849], %458 {strides = array<i32>} : memref<49x10xf32, #tpu.memory_space<vmem>>, vector<1x10xf32>,
    %460 = vector.extract_strided_slice %455 {offsets = [4, 0], sizes = [1, 10], strides = [1, 1]} : vector<14x10xf32> to vector<1x10xf32>
    %c2_850 = arith.constant 2 : index
    %c0_851 = arith.constant 0 : index
    %461 = vector.load %arg14[%c2_850, %c0_851] : memref<49x10xf32, #tpu.memory_space<vmem>>, vector<1x10xf32>
    tpu.vector_store %arg14[%c2_850, %c0_851], %460 {strides = array<i32>} : memref<49x10xf32, #tpu.memory_space<vmem>>, vector<1x10xf32>,
    %462 = vector.extract_strided_slice %455 {offsets = [6, 0], sizes = [1, 10], strides = [1, 1]} : vector<14x10xf32> to vector<1x10xf32>
    %c3_852 = arith.constant 3 : index
    %c0_853 = arith.constant 0 : index
    %463 = vector.load %arg14[%c3_852, %c0_853] : memref<49x10xf32, #tpu.memory_space<vmem>>, vector<1x10xf32>
    tpu.vector_store %arg14[%c3_852, %c0_853], %462 {strides = array<i32>} : memref<49x10xf32, #tpu.memory_space<vmem>>, vector<1x10xf32>,
    %464 = vector.extract_strided_slice %455 {offsets = [8, 0], sizes = [1, 10], strides = [1, 1]} : vector<14x10xf32> to vector<1x10xf32>
    %c4_854 = arith.constant 4 : index
    %c0_855 = arith.constant 0 : index
    %465 = vector.load %arg14[%c4_854, %c0_855] : memref<49x10xf32, #tpu.memory_space<vmem>>, vector<1x10xf32>
    tpu.vector_store %arg14[%c4_854, %c0_855], %464 {strides = array<i32>} : memref<49x10xf32, #tpu.memory_space<vmem>>, vector<1x10xf32>,
    %466 = vector.extract_strided_slice %455 {offsets = [10, 0], sizes = [1, 10], strides = [1, 1]} : vector<14x10xf32> to vector<1x10xf32>
    %c5_856 = arith.constant 5 : index
    %c0_857 = arith.constant 0 : index
    %467 = vector.load %arg14[%c5_856, %c0_857] : memref<49x10xf32, #tpu.memory_space<vmem>>, vector<1x10xf32>
    tpu.vector_store %arg14[%c5_856, %c0_857], %466 {strides = array<i32>} : memref<49x10xf32, #tpu.memory_space<vmem>>, vector<1x10xf32>,
    %468 = vector.extract_strided_slice %455 {offsets = [12, 0], sizes = [1, 10], strides = [1, 1]} : vector<14x10xf32> to vector<1x10xf32>
    %c6_858 = arith.constant 6 : index
    %c0_859 = arith.constant 0 : index
    %469 = vector.load %arg14[%c6_858, %c0_859] : memref<49x10xf32, #tpu.memory_space<vmem>>, vector<1x10xf32>
    tpu.vector_store %arg14[%c6_858, %c0_859], %468 {strides = array<i32>} : memref<49x10xf32, #tpu.memory_space<vmem>>, vector<1x10xf32>,
    %c32_860 = arith.constant 32 : index
    %c0_861 = arith.constant 0 : index
    %470 = vector.load %arg13[%c32_860, %c0_861] : memref<256x10xf32, #tpu.memory_space<vmem>>, vector<16x10xf32>
    %c48_862 = arith.constant 48 : index
    %c0_863 = arith.constant 0 : index
    %471 = vector.load %arg13[%c48_862, %c0_863] : memref<256x10xf32, #tpu.memory_space<vmem>>, vector<16x10xf32>
    %c64_864 = arith.constant 64 : index
    %c0_865 = arith.constant 0 : index
    %472 = vector.load %arg13[%c64_864, %c0_865] : memref<256x10xf32, #tpu.memory_space<vmem>>, vector<16x10xf32>
    %473 = arith.maximumf %470, %471 : vector<16x10xf32>
    %474 = arith.maximumf %473, %472 : vector<16x10xf32>
    %475 = vector.extract_strided_slice %474 {offsets = [0, 0], sizes = [14, 10], strides = [1, 1]} : vector<16x10xf32> to vector<14x10xf32>
    %476 = vector.extract_strided_slice %474 {offsets = [1, 0], sizes = [14, 10], strides = [1, 1]} : vector<16x10xf32> to vector<14x10xf32>
    %477 = arith.maximumf %475, %476 : vector<14x10xf32>
    %478 = vector.extract_strided_slice %474 {offsets = [2, 0], sizes = [14, 10], strides = [1, 1]} : vector<16x10xf32> to vector<14x10xf32>
    %479 = arith.maximumf %477, %478 : vector<14x10xf32>
    %480 = vector.extract_strided_slice %479 {offsets = [0, 0], sizes = [1, 10], strides = [1, 1]} : vector<14x10xf32> to vector<1x10xf32>
    %c7_866 = arith.constant 7 : index
    %c0_867 = arith.constant 0 : index
    %481 = vector.load %arg14[%c7_866, %c0_867] : memref<49x10xf32, #tpu.memory_space<vmem>>, vector<1x10xf32>
    tpu.vector_store %arg14[%c7_866, %c0_867], %480 {strides = array<i32>} : memref<49x10xf32, #tpu.memory_space<vmem>>, vector<1x10xf32>,
    %482 = vector.extract_strided_slice %479 {offsets = [2, 0], sizes = [1, 10], strides = [1, 1]} : vector<14x10xf32> to vector<1x10xf32>
    %c8_868 = arith.constant 8 : index
    %c0_869 = arith.constant 0 : index
    %483 = vector.load %arg14[%c8_868, %c0_869] : memref<49x10xf32, #tpu.memory_space<vmem>>, vector<1x10xf32>
    tpu.vector_store %arg14[%c8_868, %c0_869], %482 {strides = array<i32>} : memref<49x10xf32, #tpu.memory_space<vmem>>, vector<1x10xf32>,
    %484 = vector.extract_strided_slice %479 {offsets = [4, 0], sizes = [1, 10], strides = [1, 1]} : vector<14x10xf32> to vector<1x10xf32>
    %c9_870 = arith.constant 9 : index
    %c0_871 = arith.constant 0 : index
    %485 = vector.load %arg14[%c9_870, %c0_871] : memref<49x10xf32, #tpu.memory_space<vmem>>, vector<1x10xf32>
    tpu.vector_store %arg14[%c9_870, %c0_871], %484 {strides = array<i32>} : memref<49x10xf32, #tpu.memory_space<vmem>>, vector<1x10xf32>,
    %486 = vector.extract_strided_slice %479 {offsets = [6, 0], sizes = [1, 10], strides = [1, 1]} : vector<14x10xf32> to vector<1x10xf32>
    %c10_872 = arith.constant 10 : index
    %c0_873 = arith.constant 0 : index
    %487 = vector.load %arg14[%c10_872, %c0_873] : memref<49x10xf32, #tpu.memory_space<vmem>>, vector<1x10xf32>
    tpu.vector_store %arg14[%c10_872, %c0_873], %486 {strides = array<i32>} : memref<49x10xf32, #tpu.memory_space<vmem>>, vector<1x10xf32>,
    %488 = vector.extract_strided_slice %479 {offsets = [8, 0], sizes = [1, 10], strides = [1, 1]} : vector<14x10xf32> to vector<1x10xf32>
    %c11_874 = arith.constant 11 : index
    %c0_875 = arith.constant 0 : index
    %489 = vector.load %arg14[%c11_874, %c0_875] : memref<49x10xf32, #tpu.memory_space<vmem>>, vector<1x10xf32>
    tpu.vector_store %arg14[%c11_874, %c0_875], %488 {strides = array<i32>} : memref<49x10xf32, #tpu.memory_space<vmem>>, vector<1x10xf32>,
    %490 = vector.extract_strided_slice %479 {offsets = [10, 0], sizes = [1, 10], strides = [1, 1]} : vector<14x10xf32> to vector<1x10xf32>
    %c12_876 = arith.constant 12 : index
    %c0_877 = arith.constant 0 : index
    %491 = vector.load %arg14[%c12_876, %c0_877] : memref<49x10xf32, #tpu.memory_space<vmem>>, vector<1x10xf32>
    tpu.vector_store %arg14[%c12_876, %c0_877], %490 {strides = array<i32>} : memref<49x10xf32, #tpu.memory_space<vmem>>, vector<1x10xf32>,
    %492 = vector.extract_strided_slice %479 {offsets = [12, 0], sizes = [1, 10], strides = [1, 1]} : vector<14x10xf32> to vector<1x10xf32>
    %c13_878 = arith.constant 13 : index
    %c0_879 = arith.constant 0 : index
    %493 = vector.load %arg14[%c13_878, %c0_879] : memref<49x10xf32, #tpu.memory_space<vmem>>, vector<1x10xf32>
    tpu.vector_store %arg14[%c13_878, %c0_879], %492 {strides = array<i32>} : memref<49x10xf32, #tpu.memory_space<vmem>>, vector<1x10xf32>,
    %c64_880 = arith.constant 64 : index
    %c0_881 = arith.constant 0 : index
    %494 = vector.load %arg13[%c64_880, %c0_881] : memref<256x10xf32, #tpu.memory_space<vmem>>, vector<16x10xf32>
    %c80_882 = arith.constant 80 : index
    %c0_883 = arith.constant 0 : index
    %495 = vector.load %arg13[%c80_882, %c0_883] : memref<256x10xf32, #tpu.memory_space<vmem>>, vector<16x10xf32>
    %c96_884 = arith.constant 96 : index
    %c0_885 = arith.constant 0 : index
    %496 = vector.load %arg13[%c96_884, %c0_885] : memref<256x10xf32, #tpu.memory_space<vmem>>, vector<16x10xf32>
    %497 = arith.maximumf %494, %495 : vector<16x10xf32>
    %498 = arith.maximumf %497, %496 : vector<16x10xf32>
    %499 = vector.extract_strided_slice %498 {offsets = [0, 0], sizes = [14, 10], strides = [1, 1]} : vector<16x10xf32> to vector<14x10xf32>
    %500 = vector.extract_strided_slice %498 {offsets = [1, 0], sizes = [14, 10], strides = [1, 1]} : vector<16x10xf32> to vector<14x10xf32>
    %501 = arith.maximumf %499, %500 : vector<14x10xf32>
    %502 = vector.extract_strided_slice %498 {offsets = [2, 0], sizes = [14, 10], strides = [1, 1]} : vector<16x10xf32> to vector<14x10xf32>
    %503 = arith.maximumf %501, %502 : vector<14x10xf32>
    %504 = vector.extract_strided_slice %503 {offsets = [0, 0], sizes = [1, 10], strides = [1, 1]} : vector<14x10xf32> to vector<1x10xf32>
    %c14_886 = arith.constant 14 : index
    %c0_887 = arith.constant 0 : index
    %505 = vector.load %arg14[%c14_886, %c0_887] : memref<49x10xf32, #tpu.memory_space<vmem>>, vector<1x10xf32>
    tpu.vector_store %arg14[%c14_886, %c0_887], %504 {strides = array<i32>} : memref<49x10xf32, #tpu.memory_space<vmem>>, vector<1x10xf32>,
    %506 = vector.extract_strided_slice %503 {offsets = [2, 0], sizes = [1, 10], strides = [1, 1]} : vector<14x10xf32> to vector<1x10xf32>
    %c15_888 = arith.constant 15 : index
    %c0_889 = arith.constant 0 : index
    %507 = vector.load %arg14[%c15_888, %c0_889] : memref<49x10xf32, #tpu.memory_space<vmem>>, vector<1x10xf32>
    tpu.vector_store %arg14[%c15_888, %c0_889], %506 {strides = array<i32>} : memref<49x10xf32, #tpu.memory_space<vmem>>, vector<1x10xf32>,
    %508 = vector.extract_strided_slice %503 {offsets = [4, 0], sizes = [1, 10], strides = [1, 1]} : vector<14x10xf32> to vector<1x10xf32>
    %c16_890 = arith.constant 16 : index
    %c0_891 = arith.constant 0 : index
    %509 = vector.load %arg14[%c16_890, %c0_891] : memref<49x10xf32, #tpu.memory_space<vmem>>, vector<1x10xf32>
    tpu.vector_store %arg14[%c16_890, %c0_891], %508 {strides = array<i32>} : memref<49x10xf32, #tpu.memory_space<vmem>>, vector<1x10xf32>,
    %510 = vector.extract_strided_slice %503 {offsets = [6, 0], sizes = [1, 10], strides = [1, 1]} : vector<14x10xf32> to vector<1x10xf32>
    %c17_892 = arith.constant 17 : index
    %c0_893 = arith.constant 0 : index
    %511 = vector.load %arg14[%c17_892, %c0_893] : memref<49x10xf32, #tpu.memory_space<vmem>>, vector<1x10xf32>
    tpu.vector_store %arg14[%c17_892, %c0_893], %510 {strides = array<i32>} : memref<49x10xf32, #tpu.memory_space<vmem>>, vector<1x10xf32>,
    %512 = vector.extract_strided_slice %503 {offsets = [8, 0], sizes = [1, 10], strides = [1, 1]} : vector<14x10xf32> to vector<1x10xf32>
    %c18_894 = arith.constant 18 : index
    %c0_895 = arith.constant 0 : index
    %513 = vector.load %arg14[%c18_894, %c0_895] : memref<49x10xf32, #tpu.memory_space<vmem>>, vector<1x10xf32>
    tpu.vector_store %arg14[%c18_894, %c0_895], %512 {strides = array<i32>} : memref<49x10xf32, #tpu.memory_space<vmem>>, vector<1x10xf32>,
    %514 = vector.extract_strided_slice %503 {offsets = [10, 0], sizes = [1, 10], strides = [1, 1]} : vector<14x10xf32> to vector<1x10xf32>
    %c19 = arith.constant 19 : index
    %c0_896 = arith.constant 0 : index
    %515 = vector.load %arg14[%c19, %c0_896] : memref<49x10xf32, #tpu.memory_space<vmem>>, vector<1x10xf32>
    tpu.vector_store %arg14[%c19, %c0_896], %514 {strides = array<i32>} : memref<49x10xf32, #tpu.memory_space<vmem>>, vector<1x10xf32>,
    %516 = vector.extract_strided_slice %503 {offsets = [12, 0], sizes = [1, 10], strides = [1, 1]} : vector<14x10xf32> to vector<1x10xf32>
    %c20 = arith.constant 20 : index
    %c0_897 = arith.constant 0 : index
    %517 = vector.load %arg14[%c20, %c0_897] : memref<49x10xf32, #tpu.memory_space<vmem>>, vector<1x10xf32>
    tpu.vector_store %arg14[%c20, %c0_897], %516 {strides = array<i32>} : memref<49x10xf32, #tpu.memory_space<vmem>>, vector<1x10xf32>,
    %c96_898 = arith.constant 96 : index
    %c0_899 = arith.constant 0 : index
    %518 = vector.load %arg13[%c96_898, %c0_899] : memref<256x10xf32, #tpu.memory_space<vmem>>, vector<16x10xf32>
    %c112_900 = arith.constant 112 : index
    %c0_901 = arith.constant 0 : index
    %519 = vector.load %arg13[%c112_900, %c0_901] : memref<256x10xf32, #tpu.memory_space<vmem>>, vector<16x10xf32>
    %c128_902 = arith.constant 128 : index
    %c0_903 = arith.constant 0 : index
    %520 = vector.load %arg13[%c128_902, %c0_903] : memref<256x10xf32, #tpu.memory_space<vmem>>, vector<16x10xf32>
    %521 = arith.maximumf %518, %519 : vector<16x10xf32>
    %522 = arith.maximumf %521, %520 : vector<16x10xf32>
    %523 = vector.extract_strided_slice %522 {offsets = [0, 0], sizes = [14, 10], strides = [1, 1]} : vector<16x10xf32> to vector<14x10xf32>
    %524 = vector.extract_strided_slice %522 {offsets = [1, 0], sizes = [14, 10], strides = [1, 1]} : vector<16x10xf32> to vector<14x10xf32>
    %525 = arith.maximumf %523, %524 : vector<14x10xf32>
    %526 = vector.extract_strided_slice %522 {offsets = [2, 0], sizes = [14, 10], strides = [1, 1]} : vector<16x10xf32> to vector<14x10xf32>
    %527 = arith.maximumf %525, %526 : vector<14x10xf32>
    %528 = vector.extract_strided_slice %527 {offsets = [0, 0], sizes = [1, 10], strides = [1, 1]} : vector<14x10xf32> to vector<1x10xf32>
    %c21_904 = arith.constant 21 : index
    %c0_905 = arith.constant 0 : index
    %529 = vector.load %arg14[%c21_904, %c0_905] : memref<49x10xf32, #tpu.memory_space<vmem>>, vector<1x10xf32>
    tpu.vector_store %arg14[%c21_904, %c0_905], %528 {strides = array<i32>} : memref<49x10xf32, #tpu.memory_space<vmem>>, vector<1x10xf32>,
    %530 = vector.extract_strided_slice %527 {offsets = [2, 0], sizes = [1, 10], strides = [1, 1]} : vector<14x10xf32> to vector<1x10xf32>
    %c22 = arith.constant 22 : index
    %c0_906 = arith.constant 0 : index
    %531 = vector.load %arg14[%c22, %c0_906] : memref<49x10xf32, #tpu.memory_space<vmem>>, vector<1x10xf32>
    tpu.vector_store %arg14[%c22, %c0_906], %530 {strides = array<i32>} : memref<49x10xf32, #tpu.memory_space<vmem>>, vector<1x10xf32>,
    %532 = vector.extract_strided_slice %527 {offsets = [4, 0], sizes = [1, 10], strides = [1, 1]} : vector<14x10xf32> to vector<1x10xf32>
    %c23 = arith.constant 23 : index
    %c0_907 = arith.constant 0 : index
    %533 = vector.load %arg14[%c23, %c0_907] : memref<49x10xf32, #tpu.memory_space<vmem>>, vector<1x10xf32>
    tpu.vector_store %arg14[%c23, %c0_907], %532 {strides = array<i32>} : memref<49x10xf32, #tpu.memory_space<vmem>>, vector<1x10xf32>,
    %534 = vector.extract_strided_slice %527 {offsets = [6, 0], sizes = [1, 10], strides = [1, 1]} : vector<14x10xf32> to vector<1x10xf32>
    %c24_908 = arith.constant 24 : index
    %c0_909 = arith.constant 0 : index
    %535 = vector.load %arg14[%c24_908, %c0_909] : memref<49x10xf32, #tpu.memory_space<vmem>>, vector<1x10xf32>
    tpu.vector_store %arg14[%c24_908, %c0_909], %534 {strides = array<i32>} : memref<49x10xf32, #tpu.memory_space<vmem>>, vector<1x10xf32>,
    %536 = vector.extract_strided_slice %527 {offsets = [8, 0], sizes = [1, 10], strides = [1, 1]} : vector<14x10xf32> to vector<1x10xf32>
    %c25 = arith.constant 25 : index
    %c0_910 = arith.constant 0 : index
    %537 = vector.load %arg14[%c25, %c0_910] : memref<49x10xf32, #tpu.memory_space<vmem>>, vector<1x10xf32>
    tpu.vector_store %arg14[%c25, %c0_910], %536 {strides = array<i32>} : memref<49x10xf32, #tpu.memory_space<vmem>>, vector<1x10xf32>,
    %538 = vector.extract_strided_slice %527 {offsets = [10, 0], sizes = [1, 10], strides = [1, 1]} : vector<14x10xf32> to vector<1x10xf32>
    %c26 = arith.constant 26 : index
    %c0_911 = arith.constant 0 : index
    %539 = vector.load %arg14[%c26, %c0_911] : memref<49x10xf32, #tpu.memory_space<vmem>>, vector<1x10xf32>
    tpu.vector_store %arg14[%c26, %c0_911], %538 {strides = array<i32>} : memref<49x10xf32, #tpu.memory_space<vmem>>, vector<1x10xf32>,
    %540 = vector.extract_strided_slice %527 {offsets = [12, 0], sizes = [1, 10], strides = [1, 1]} : vector<14x10xf32> to vector<1x10xf32>
    %c27 = arith.constant 27 : index
    %c0_912 = arith.constant 0 : index
    %541 = vector.load %arg14[%c27, %c0_912] : memref<49x10xf32, #tpu.memory_space<vmem>>, vector<1x10xf32>
    tpu.vector_store %arg14[%c27, %c0_912], %540 {strides = array<i32>} : memref<49x10xf32, #tpu.memory_space<vmem>>, vector<1x10xf32>,
    %c128_913 = arith.constant 128 : index
    %c0_914 = arith.constant 0 : index
    %542 = vector.load %arg13[%c128_913, %c0_914] : memref<256x10xf32, #tpu.memory_space<vmem>>, vector<16x10xf32>
    %c144_915 = arith.constant 144 : index
    %c0_916 = arith.constant 0 : index
    %543 = vector.load %arg13[%c144_915, %c0_916] : memref<256x10xf32, #tpu.memory_space<vmem>>, vector<16x10xf32>
    %c160_917 = arith.constant 160 : index
    %c0_918 = arith.constant 0 : index
    %544 = vector.load %arg13[%c160_917, %c0_918] : memref<256x10xf32, #tpu.memory_space<vmem>>, vector<16x10xf32>
    %545 = arith.maximumf %542, %543 : vector<16x10xf32>
    %546 = arith.maximumf %545, %544 : vector<16x10xf32>
    %547 = vector.extract_strided_slice %546 {offsets = [0, 0], sizes = [14, 10], strides = [1, 1]} : vector<16x10xf32> to vector<14x10xf32>
    %548 = vector.extract_strided_slice %546 {offsets = [1, 0], sizes = [14, 10], strides = [1, 1]} : vector<16x10xf32> to vector<14x10xf32>
    %549 = arith.maximumf %547, %548 : vector<14x10xf32>
    %550 = vector.extract_strided_slice %546 {offsets = [2, 0], sizes = [14, 10], strides = [1, 1]} : vector<16x10xf32> to vector<14x10xf32>
    %551 = arith.maximumf %549, %550 : vector<14x10xf32>
    %552 = vector.extract_strided_slice %551 {offsets = [0, 0], sizes = [1, 10], strides = [1, 1]} : vector<14x10xf32> to vector<1x10xf32>
    %c28 = arith.constant 28 : index
    %c0_919 = arith.constant 0 : index
    %553 = vector.load %arg14[%c28, %c0_919] : memref<49x10xf32, #tpu.memory_space<vmem>>, vector<1x10xf32>
    tpu.vector_store %arg14[%c28, %c0_919], %552 {strides = array<i32>} : memref<49x10xf32, #tpu.memory_space<vmem>>, vector<1x10xf32>,
    %554 = vector.extract_strided_slice %551 {offsets = [2, 0], sizes = [1, 10], strides = [1, 1]} : vector<14x10xf32> to vector<1x10xf32>
    %c29 = arith.constant 29 : index
    %c0_920 = arith.constant 0 : index
    %555 = vector.load %arg14[%c29, %c0_920] : memref<49x10xf32, #tpu.memory_space<vmem>>, vector<1x10xf32>
    tpu.vector_store %arg14[%c29, %c0_920], %554 {strides = array<i32>} : memref<49x10xf32, #tpu.memory_space<vmem>>, vector<1x10xf32>,
    %556 = vector.extract_strided_slice %551 {offsets = [4, 0], sizes = [1, 10], strides = [1, 1]} : vector<14x10xf32> to vector<1x10xf32>
    %c30 = arith.constant 30 : index
    %c0_921 = arith.constant 0 : index
    %557 = vector.load %arg14[%c30, %c0_921] : memref<49x10xf32, #tpu.memory_space<vmem>>, vector<1x10xf32>
    tpu.vector_store %arg14[%c30, %c0_921], %556 {strides = array<i32>} : memref<49x10xf32, #tpu.memory_space<vmem>>, vector<1x10xf32>,
    %558 = vector.extract_strided_slice %551 {offsets = [6, 0], sizes = [1, 10], strides = [1, 1]} : vector<14x10xf32> to vector<1x10xf32>
    %c31 = arith.constant 31 : index
    %c0_922 = arith.constant 0 : index
    %559 = vector.load %arg14[%c31, %c0_922] : memref<49x10xf32, #tpu.memory_space<vmem>>, vector<1x10xf32>
    tpu.vector_store %arg14[%c31, %c0_922], %558 {strides = array<i32>} : memref<49x10xf32, #tpu.memory_space<vmem>>, vector<1x10xf32>,
    %560 = vector.extract_strided_slice %551 {offsets = [8, 0], sizes = [1, 10], strides = [1, 1]} : vector<14x10xf32> to vector<1x10xf32>
    %c32_923 = arith.constant 32 : index
    %c0_924 = arith.constant 0 : index
    %561 = vector.load %arg14[%c32_923, %c0_924] : memref<49x10xf32, #tpu.memory_space<vmem>>, vector<1x10xf32>
    tpu.vector_store %arg14[%c32_923, %c0_924], %560 {strides = array<i32>} : memref<49x10xf32, #tpu.memory_space<vmem>>, vector<1x10xf32>,
    %562 = vector.extract_strided_slice %551 {offsets = [10, 0], sizes = [1, 10], strides = [1, 1]} : vector<14x10xf32> to vector<1x10xf32>
    %c33 = arith.constant 33 : index
    %c0_925 = arith.constant 0 : index
    %563 = vector.load %arg14[%c33, %c0_925] : memref<49x10xf32, #tpu.memory_space<vmem>>, vector<1x10xf32>
    tpu.vector_store %arg14[%c33, %c0_925], %562 {strides = array<i32>} : memref<49x10xf32, #tpu.memory_space<vmem>>, vector<1x10xf32>,
    %564 = vector.extract_strided_slice %551 {offsets = [12, 0], sizes = [1, 10], strides = [1, 1]} : vector<14x10xf32> to vector<1x10xf32>
    %c34 = arith.constant 34 : index
    %c0_926 = arith.constant 0 : index
    %565 = vector.load %arg14[%c34, %c0_926] : memref<49x10xf32, #tpu.memory_space<vmem>>, vector<1x10xf32>
    tpu.vector_store %arg14[%c34, %c0_926], %564 {strides = array<i32>} : memref<49x10xf32, #tpu.memory_space<vmem>>, vector<1x10xf32>,
    %c160_927 = arith.constant 160 : index
    %c0_928 = arith.constant 0 : index
    %566 = vector.load %arg13[%c160_927, %c0_928] : memref<256x10xf32, #tpu.memory_space<vmem>>, vector<16x10xf32>
    %c176_929 = arith.constant 176 : index
    %c0_930 = arith.constant 0 : index
    %567 = vector.load %arg13[%c176_929, %c0_930] : memref<256x10xf32, #tpu.memory_space<vmem>>, vector<16x10xf32>
    %c192_931 = arith.constant 192 : index
    %c0_932 = arith.constant 0 : index
    %568 = vector.load %arg13[%c192_931, %c0_932] : memref<256x10xf32, #tpu.memory_space<vmem>>, vector<16x10xf32>
    %569 = arith.maximumf %566, %567 : vector<16x10xf32>
    %570 = arith.maximumf %569, %568 : vector<16x10xf32>
    %571 = vector.extract_strided_slice %570 {offsets = [0, 0], sizes = [14, 10], strides = [1, 1]} : vector<16x10xf32> to vector<14x10xf32>
    %572 = vector.extract_strided_slice %570 {offsets = [1, 0], sizes = [14, 10], strides = [1, 1]} : vector<16x10xf32> to vector<14x10xf32>
    %573 = arith.maximumf %571, %572 : vector<14x10xf32>
    %574 = vector.extract_strided_slice %570 {offsets = [2, 0], sizes = [14, 10], strides = [1, 1]} : vector<16x10xf32> to vector<14x10xf32>
    %575 = arith.maximumf %573, %574 : vector<14x10xf32>
    %576 = vector.extract_strided_slice %575 {offsets = [0, 0], sizes = [1, 10], strides = [1, 1]} : vector<14x10xf32> to vector<1x10xf32>
    %c35 = arith.constant 35 : index
    %c0_933 = arith.constant 0 : index
    %577 = vector.load %arg14[%c35, %c0_933] : memref<49x10xf32, #tpu.memory_space<vmem>>, vector<1x10xf32>
    tpu.vector_store %arg14[%c35, %c0_933], %576 {strides = array<i32>} : memref<49x10xf32, #tpu.memory_space<vmem>>, vector<1x10xf32>,
    %578 = vector.extract_strided_slice %575 {offsets = [2, 0], sizes = [1, 10], strides = [1, 1]} : vector<14x10xf32> to vector<1x10xf32>
    %c36 = arith.constant 36 : index
    %c0_934 = arith.constant 0 : index
    %579 = vector.load %arg14[%c36, %c0_934] : memref<49x10xf32, #tpu.memory_space<vmem>>, vector<1x10xf32>
    tpu.vector_store %arg14[%c36, %c0_934], %578 {strides = array<i32>} : memref<49x10xf32, #tpu.memory_space<vmem>>, vector<1x10xf32>,
    %580 = vector.extract_strided_slice %575 {offsets = [4, 0], sizes = [1, 10], strides = [1, 1]} : vector<14x10xf32> to vector<1x10xf32>
    %c37 = arith.constant 37 : index
    %c0_935 = arith.constant 0 : index
    %581 = vector.load %arg14[%c37, %c0_935] : memref<49x10xf32, #tpu.memory_space<vmem>>, vector<1x10xf32>
    tpu.vector_store %arg14[%c37, %c0_935], %580 {strides = array<i32>} : memref<49x10xf32, #tpu.memory_space<vmem>>, vector<1x10xf32>,
    %582 = vector.extract_strided_slice %575 {offsets = [6, 0], sizes = [1, 10], strides = [1, 1]} : vector<14x10xf32> to vector<1x10xf32>
    %c38 = arith.constant 38 : index
    %c0_936 = arith.constant 0 : index
    %583 = vector.load %arg14[%c38, %c0_936] : memref<49x10xf32, #tpu.memory_space<vmem>>, vector<1x10xf32>
    tpu.vector_store %arg14[%c38, %c0_936], %582 {strides = array<i32>} : memref<49x10xf32, #tpu.memory_space<vmem>>, vector<1x10xf32>,
    %584 = vector.extract_strided_slice %575 {offsets = [8, 0], sizes = [1, 10], strides = [1, 1]} : vector<14x10xf32> to vector<1x10xf32>
    %c39 = arith.constant 39 : index
    %c0_937 = arith.constant 0 : index
    %585 = vector.load %arg14[%c39, %c0_937] : memref<49x10xf32, #tpu.memory_space<vmem>>, vector<1x10xf32>
    tpu.vector_store %arg14[%c39, %c0_937], %584 {strides = array<i32>} : memref<49x10xf32, #tpu.memory_space<vmem>>, vector<1x10xf32>,
    %586 = vector.extract_strided_slice %575 {offsets = [10, 0], sizes = [1, 10], strides = [1, 1]} : vector<14x10xf32> to vector<1x10xf32>
    %c40 = arith.constant 40 : index
    %c0_938 = arith.constant 0 : index
    %587 = vector.load %arg14[%c40, %c0_938] : memref<49x10xf32, #tpu.memory_space<vmem>>, vector<1x10xf32>
    tpu.vector_store %arg14[%c40, %c0_938], %586 {strides = array<i32>} : memref<49x10xf32, #tpu.memory_space<vmem>>, vector<1x10xf32>,
    %588 = vector.extract_strided_slice %575 {offsets = [12, 0], sizes = [1, 10], strides = [1, 1]} : vector<14x10xf32> to vector<1x10xf32>
    %c41 = arith.constant 41 : index
    %c0_939 = arith.constant 0 : index
    %589 = vector.load %arg14[%c41, %c0_939] : memref<49x10xf32, #tpu.memory_space<vmem>>, vector<1x10xf32>
    tpu.vector_store %arg14[%c41, %c0_939], %588 {strides = array<i32>} : memref<49x10xf32, #tpu.memory_space<vmem>>, vector<1x10xf32>,
    %c192_940 = arith.constant 192 : index
    %c0_941 = arith.constant 0 : index
    %590 = vector.load %arg13[%c192_940, %c0_941] : memref<256x10xf32, #tpu.memory_space<vmem>>, vector<16x10xf32>
    %c208_942 = arith.constant 208 : index
    %c0_943 = arith.constant 0 : index
    %591 = vector.load %arg13[%c208_942, %c0_943] : memref<256x10xf32, #tpu.memory_space<vmem>>, vector<16x10xf32>
    %c224_944 = arith.constant 224 : index
    %c0_945 = arith.constant 0 : index
    %592 = vector.load %arg13[%c224_944, %c0_945] : memref<256x10xf32, #tpu.memory_space<vmem>>, vector<16x10xf32>
    %593 = arith.maximumf %590, %591 : vector<16x10xf32>
    %594 = arith.maximumf %593, %592 : vector<16x10xf32>
    %595 = vector.extract_strided_slice %594 {offsets = [0, 0], sizes = [14, 10], strides = [1, 1]} : vector<16x10xf32> to vector<14x10xf32>
    %596 = vector.extract_strided_slice %594 {offsets = [1, 0], sizes = [14, 10], strides = [1, 1]} : vector<16x10xf32> to vector<14x10xf32>
    %597 = arith.maximumf %595, %596 : vector<14x10xf32>
    %598 = vector.extract_strided_slice %594 {offsets = [2, 0], sizes = [14, 10], strides = [1, 1]} : vector<16x10xf32> to vector<14x10xf32>
    %599 = arith.maximumf %597, %598 : vector<14x10xf32>
    %600 = vector.extract_strided_slice %599 {offsets = [0, 0], sizes = [1, 10], strides = [1, 1]} : vector<14x10xf32> to vector<1x10xf32>
    %c42 = arith.constant 42 : index
    %c0_946 = arith.constant 0 : index
    %601 = vector.load %arg14[%c42, %c0_946] : memref<49x10xf32, #tpu.memory_space<vmem>>, vector<1x10xf32>
    tpu.vector_store %arg14[%c42, %c0_946], %600 {strides = array<i32>} : memref<49x10xf32, #tpu.memory_space<vmem>>, vector<1x10xf32>,
    %602 = vector.extract_strided_slice %599 {offsets = [2, 0], sizes = [1, 10], strides = [1, 1]} : vector<14x10xf32> to vector<1x10xf32>
    %c43 = arith.constant 43 : index
    %c0_947 = arith.constant 0 : index
    %603 = vector.load %arg14[%c43, %c0_947] : memref<49x10xf32, #tpu.memory_space<vmem>>, vector<1x10xf32>
    tpu.vector_store %arg14[%c43, %c0_947], %602 {strides = array<i32>} : memref<49x10xf32, #tpu.memory_space<vmem>>, vector<1x10xf32>,
    %604 = vector.extract_strided_slice %599 {offsets = [4, 0], sizes = [1, 10], strides = [1, 1]} : vector<14x10xf32> to vector<1x10xf32>
    %c44 = arith.constant 44 : index
    %c0_948 = arith.constant 0 : index
    %605 = vector.load %arg14[%c44, %c0_948] : memref<49x10xf32, #tpu.memory_space<vmem>>, vector<1x10xf32>
    tpu.vector_store %arg14[%c44, %c0_948], %604 {strides = array<i32>} : memref<49x10xf32, #tpu.memory_space<vmem>>, vector<1x10xf32>,
    %606 = vector.extract_strided_slice %599 {offsets = [6, 0], sizes = [1, 10], strides = [1, 1]} : vector<14x10xf32> to vector<1x10xf32>
    %c45 = arith.constant 45 : index
    %c0_949 = arith.constant 0 : index
    %607 = vector.load %arg14[%c45, %c0_949] : memref<49x10xf32, #tpu.memory_space<vmem>>, vector<1x10xf32>
    tpu.vector_store %arg14[%c45, %c0_949], %606 {strides = array<i32>} : memref<49x10xf32, #tpu.memory_space<vmem>>, vector<1x10xf32>,
    %608 = vector.extract_strided_slice %599 {offsets = [8, 0], sizes = [1, 10], strides = [1, 1]} : vector<14x10xf32> to vector<1x10xf32>
    %c46 = arith.constant 46 : index
    %c0_950 = arith.constant 0 : index
    %609 = vector.load %arg14[%c46, %c0_950] : memref<49x10xf32, #tpu.memory_space<vmem>>, vector<1x10xf32>
    tpu.vector_store %arg14[%c46, %c0_950], %608 {strides = array<i32>} : memref<49x10xf32, #tpu.memory_space<vmem>>, vector<1x10xf32>,
    %610 = vector.extract_strided_slice %599 {offsets = [10, 0], sizes = [1, 10], strides = [1, 1]} : vector<14x10xf32> to vector<1x10xf32>
    %c47 = arith.constant 47 : index
    %c0_951 = arith.constant 0 : index
    %611 = vector.load %arg14[%c47, %c0_951] : memref<49x10xf32, #tpu.memory_space<vmem>>, vector<1x10xf32>
    tpu.vector_store %arg14[%c47, %c0_951], %610 {strides = array<i32>} : memref<49x10xf32, #tpu.memory_space<vmem>>, vector<1x10xf32>,
    %612 = vector.extract_strided_slice %599 {offsets = [12, 0], sizes = [1, 10], strides = [1, 1]} : vector<14x10xf32> to vector<1x10xf32>
    %c48_952 = arith.constant 48 : index
    %c0_953 = arith.constant 0 : index
    %613 = vector.load %arg14[%c48_952, %c0_953] : memref<49x10xf32, #tpu.memory_space<vmem>>, vector<1x10xf32>
    tpu.vector_store %arg14[%c48_952, %c0_953], %612 {strides = array<i32>} : memref<49x10xf32, #tpu.memory_space<vmem>>, vector<1x10xf32>,
    %c0_954 = arith.constant 0 : index
    %c0_955 = arith.constant 0 : index
    %614 = vector.load %arg14[%c0_954, %c0_955] : memref<49x10xf32, #tpu.memory_space<vmem>>, vector<5x10xf32>
    %c0_956 = arith.constant 0 : index
    %c0_957 = arith.constant 0 : index
    %615 = vector.load %arg15[%c0_956, %c0_957] : memref<25x90xf32, #tpu.memory_space<vmem>>, vector<5x10xf32>
    tpu.vector_store %arg15[%c0_956, %c0_957], %614 {strides = array<i32>} : memref<25x90xf32, #tpu.memory_space<vmem>>, vector<5x10xf32>,
    %c1_958 = arith.constant 1 : index
    %c0_959 = arith.constant 0 : index
    %616 = vector.load %arg14[%c1_958, %c0_959] : memref<49x10xf32, #tpu.memory_space<vmem>>, vector<5x10xf32>
    %c0_960 = arith.constant 0 : index
    %c10_961 = arith.constant 10 : index
    %617 = vector.load %arg15[%c0_960, %c10_961] : memref<25x90xf32, #tpu.memory_space<vmem>>, vector<5x10xf32>
    tpu.vector_store %arg15[%c0_960, %c10_961], %616 {strides = array<i32>} : memref<25x90xf32, #tpu.memory_space<vmem>>, vector<5x10xf32>,
    %c2_962 = arith.constant 2 : index
    %c0_963 = arith.constant 0 : index
    %618 = vector.load %arg14[%c2_962, %c0_963] : memref<49x10xf32, #tpu.memory_space<vmem>>, vector<5x10xf32>
    %c0_964 = arith.constant 0 : index
    %c20_965 = arith.constant 20 : index
    %619 = vector.load %arg15[%c0_964, %c20_965] : memref<25x90xf32, #tpu.memory_space<vmem>>, vector<5x10xf32>
    tpu.vector_store %arg15[%c0_964, %c20_965], %618 {strides = array<i32>} : memref<25x90xf32, #tpu.memory_space<vmem>>, vector<5x10xf32>,
    %c7_966 = arith.constant 7 : index
    %c0_967 = arith.constant 0 : index
    %620 = vector.load %arg14[%c7_966, %c0_967] : memref<49x10xf32, #tpu.memory_space<vmem>>, vector<5x10xf32>
    %c0_968 = arith.constant 0 : index
    %c30_969 = arith.constant 30 : index
    %621 = vector.load %arg15[%c0_968, %c30_969] : memref<25x90xf32, #tpu.memory_space<vmem>>, vector<5x10xf32>
    tpu.vector_store %arg15[%c0_968, %c30_969], %620 {strides = array<i32>} : memref<25x90xf32, #tpu.memory_space<vmem>>, vector<5x10xf32>,
    %c8_970 = arith.constant 8 : index
    %c0_971 = arith.constant 0 : index
    %622 = vector.load %arg14[%c8_970, %c0_971] : memref<49x10xf32, #tpu.memory_space<vmem>>, vector<5x10xf32>
    %c0_972 = arith.constant 0 : index
    %c40_973 = arith.constant 40 : index
    %623 = vector.load %arg15[%c0_972, %c40_973] : memref<25x90xf32, #tpu.memory_space<vmem>>, vector<5x10xf32>
    tpu.vector_store %arg15[%c0_972, %c40_973], %622 {strides = array<i32>} : memref<25x90xf32, #tpu.memory_space<vmem>>, vector<5x10xf32>,
    %c9_974 = arith.constant 9 : index
    %c0_975 = arith.constant 0 : index
    %624 = vector.load %arg14[%c9_974, %c0_975] : memref<49x10xf32, #tpu.memory_space<vmem>>, vector<5x10xf32>
    %c0_976 = arith.constant 0 : index
    %c50 = arith.constant 50 : index
    %625 = vector.load %arg15[%c0_976, %c50] : memref<25x90xf32, #tpu.memory_space<vmem>>, vector<5x10xf32>
    tpu.vector_store %arg15[%c0_976, %c50], %624 {strides = array<i32>} : memref<25x90xf32, #tpu.memory_space<vmem>>, vector<5x10xf32>,
    %c14_977 = arith.constant 14 : index
    %c0_978 = arith.constant 0 : index
    %626 = vector.load %arg14[%c14_977, %c0_978] : memref<49x10xf32, #tpu.memory_space<vmem>>, vector<5x10xf32>
    %c0_979 = arith.constant 0 : index
    %c60 = arith.constant 60 : index
    %627 = vector.load %arg15[%c0_979, %c60] : memref<25x90xf32, #tpu.memory_space<vmem>>, vector<5x10xf32>
    tpu.vector_store %arg15[%c0_979, %c60], %626 {strides = array<i32>} : memref<25x90xf32, #tpu.memory_space<vmem>>, vector<5x10xf32>,
    %c15_980 = arith.constant 15 : index
    %c0_981 = arith.constant 0 : index
    %628 = vector.load %arg14[%c15_980, %c0_981] : memref<49x10xf32, #tpu.memory_space<vmem>>, vector<5x10xf32>
    %c0_982 = arith.constant 0 : index
    %c70 = arith.constant 70 : index
    %629 = vector.load %arg15[%c0_982, %c70] : memref<25x90xf32, #tpu.memory_space<vmem>>, vector<5x10xf32>
    tpu.vector_store %arg15[%c0_982, %c70], %628 {strides = array<i32>} : memref<25x90xf32, #tpu.memory_space<vmem>>, vector<5x10xf32>,
    %c16_983 = arith.constant 16 : index
    %c0_984 = arith.constant 0 : index
    %630 = vector.load %arg14[%c16_983, %c0_984] : memref<49x10xf32, #tpu.memory_space<vmem>>, vector<5x10xf32>
    %c0_985 = arith.constant 0 : index
    %c80_986 = arith.constant 80 : index
    %631 = vector.load %arg15[%c0_985, %c80_986] : memref<25x90xf32, #tpu.memory_space<vmem>>, vector<5x10xf32>
    tpu.vector_store %arg15[%c0_985, %c80_986], %630 {strides = array<i32>} : memref<25x90xf32, #tpu.memory_space<vmem>>, vector<5x10xf32>,
    %c7_987 = arith.constant 7 : index
    %c0_988 = arith.constant 0 : index
    %632 = vector.load %arg14[%c7_987, %c0_988] : memref<49x10xf32, #tpu.memory_space<vmem>>, vector<5x10xf32>
    %c5_989 = arith.constant 5 : index
    %c0_990 = arith.constant 0 : index
    %633 = vector.load %arg15[%c5_989, %c0_990] : memref<25x90xf32, #tpu.memory_space<vmem>>, vector<5x10xf32>
    tpu.vector_store %arg15[%c5_989, %c0_990], %632 {strides = array<i32>} : memref<25x90xf32, #tpu.memory_space<vmem>>, vector<5x10xf32>,
    %c8_991 = arith.constant 8 : index
    %c0_992 = arith.constant 0 : index
    %634 = vector.load %arg14[%c8_991, %c0_992] : memref<49x10xf32, #tpu.memory_space<vmem>>, vector<5x10xf32>
    %c5_993 = arith.constant 5 : index
    %c10_994 = arith.constant 10 : index
    %635 = vector.load %arg15[%c5_993, %c10_994] : memref<25x90xf32, #tpu.memory_space<vmem>>, vector<5x10xf32>
    tpu.vector_store %arg15[%c5_993, %c10_994], %634 {strides = array<i32>} : memref<25x90xf32, #tpu.memory_space<vmem>>, vector<5x10xf32>,
    %c9_995 = arith.constant 9 : index
    %c0_996 = arith.constant 0 : index
    %636 = vector.load %arg14[%c9_995, %c0_996] : memref<49x10xf32, #tpu.memory_space<vmem>>, vector<5x10xf32>
    %c5_997 = arith.constant 5 : index
    %c20_998 = arith.constant 20 : index
    %637 = vector.load %arg15[%c5_997, %c20_998] : memref<25x90xf32, #tpu.memory_space<vmem>>, vector<5x10xf32>
    tpu.vector_store %arg15[%c5_997, %c20_998], %636 {strides = array<i32>} : memref<25x90xf32, #tpu.memory_space<vmem>>, vector<5x10xf32>,
    %c14_999 = arith.constant 14 : index
    %c0_1000 = arith.constant 0 : index
    %638 = vector.load %arg14[%c14_999, %c0_1000] : memref<49x10xf32, #tpu.memory_space<vmem>>, vector<5x10xf32>
    %c5_1001 = arith.constant 5 : index
    %c30_1002 = arith.constant 30 : index
    %639 = vector.load %arg15[%c5_1001, %c30_1002] : memref<25x90xf32, #tpu.memory_space<vmem>>, vector<5x10xf32>
    tpu.vector_store %arg15[%c5_1001, %c30_1002], %638 {strides = array<i32>} : memref<25x90xf32, #tpu.memory_space<vmem>>, vector<5x10xf32>,
    %c15_1003 = arith.constant 15 : index
    %c0_1004 = arith.constant 0 : index
    %640 = vector.load %arg14[%c15_1003, %c0_1004] : memref<49x10xf32, #tpu.memory_space<vmem>>, vector<5x10xf32>
    %c5_1005 = arith.constant 5 : index
    %c40_1006 = arith.constant 40 : index
    %641 = vector.load %arg15[%c5_1005, %c40_1006] : memref<25x90xf32, #tpu.memory_space<vmem>>, vector<5x10xf32>
    tpu.vector_store %arg15[%c5_1005, %c40_1006], %640 {strides = array<i32>} : memref<25x90xf32, #tpu.memory_space<vmem>>, vector<5x10xf32>,
    %c16_1007 = arith.constant 16 : index
    %c0_1008 = arith.constant 0 : index
    %642 = vector.load %arg14[%c16_1007, %c0_1008] : memref<49x10xf32, #tpu.memory_space<vmem>>, vector<5x10xf32>
    %c5_1009 = arith.constant 5 : index
    %c50_1010 = arith.constant 50 : index
    %643 = vector.load %arg15[%c5_1009, %c50_1010] : memref<25x90xf32, #tpu.memory_space<vmem>>, vector<5x10xf32>
    tpu.vector_store %arg15[%c5_1009, %c50_1010], %642 {strides = array<i32>} : memref<25x90xf32, #tpu.memory_space<vmem>>, vector<5x10xf32>,
    %c21_1011 = arith.constant 21 : index
    %c0_1012 = arith.constant 0 : index
    %644 = vector.load %arg14[%c21_1011, %c0_1012] : memref<49x10xf32, #tpu.memory_space<vmem>>, vector<5x10xf32>
    %c5_1013 = arith.constant 5 : index
    %c60_1014 = arith.constant 60 : index
    %645 = vector.load %arg15[%c5_1013, %c60_1014] : memref<25x90xf32, #tpu.memory_space<vmem>>, vector<5x10xf32>
    tpu.vector_store %arg15[%c5_1013, %c60_1014], %644 {strides = array<i32>} : memref<25x90xf32, #tpu.memory_space<vmem>>, vector<5x10xf32>,
    %c22_1015 = arith.constant 22 : index
    %c0_1016 = arith.constant 0 : index
    %646 = vector.load %arg14[%c22_1015, %c0_1016] : memref<49x10xf32, #tpu.memory_space<vmem>>, vector<5x10xf32>
    %c5_1017 = arith.constant 5 : index
    %c70_1018 = arith.constant 70 : index
    %647 = vector.load %arg15[%c5_1017, %c70_1018] : memref<25x90xf32, #tpu.memory_space<vmem>>, vector<5x10xf32>
    tpu.vector_store %arg15[%c5_1017, %c70_1018], %646 {strides = array<i32>} : memref<25x90xf32, #tpu.memory_space<vmem>>, vector<5x10xf32>,
    %c23_1019 = arith.constant 23 : index
    %c0_1020 = arith.constant 0 : index
    %648 = vector.load %arg14[%c23_1019, %c0_1020] : memref<49x10xf32, #tpu.memory_space<vmem>>, vector<5x10xf32>
    %c5_1021 = arith.constant 5 : index
    %c80_1022 = arith.constant 80 : index
    %649 = vector.load %arg15[%c5_1021, %c80_1022] : memref<25x90xf32, #tpu.memory_space<vmem>>, vector<5x10xf32>
    tpu.vector_store %arg15[%c5_1021, %c80_1022], %648 {strides = array<i32>} : memref<25x90xf32, #tpu.memory_space<vmem>>, vector<5x10xf32>,
    %c14_1023 = arith.constant 14 : index
    %c0_1024 = arith.constant 0 : index
    %650 = vector.load %arg14[%c14_1023, %c0_1024] : memref<49x10xf32, #tpu.memory_space<vmem>>, vector<5x10xf32>
    %c10_1025 = arith.constant 10 : index
    %c0_1026 = arith.constant 0 : index
    %651 = vector.load %arg15[%c10_1025, %c0_1026] : memref<25x90xf32, #tpu.memory_space<vmem>>, vector<5x10xf32>
    tpu.vector_store %arg15[%c10_1025, %c0_1026], %650 {strides = array<i32>} : memref<25x90xf32, #tpu.memory_space<vmem>>, vector<5x10xf32>,
    %c15_1027 = arith.constant 15 : index
    %c0_1028 = arith.constant 0 : index
    %652 = vector.load %arg14[%c15_1027, %c0_1028] : memref<49x10xf32, #tpu.memory_space<vmem>>, vector<5x10xf32>
    %c10_1029 = arith.constant 10 : index
    %c10_1030 = arith.constant 10 : index
    %653 = vector.load %arg15[%c10_1029, %c10_1030] : memref<25x90xf32, #tpu.memory_space<vmem>>, vector<5x10xf32>
    tpu.vector_store %arg15[%c10_1029, %c10_1030], %652 {strides = array<i32>} : memref<25x90xf32, #tpu.memory_space<vmem>>, vector<5x10xf32>,
    %c16_1031 = arith.constant 16 : index
    %c0_1032 = arith.constant 0 : index
    %654 = vector.load %arg14[%c16_1031, %c0_1032] : memref<49x10xf32, #tpu.memory_space<vmem>>, vector<5x10xf32>
    %c10_1033 = arith.constant 10 : index
    %c20_1034 = arith.constant 20 : index
    %655 = vector.load %arg15[%c10_1033, %c20_1034] : memref<25x90xf32, #tpu.memory_space<vmem>>, vector<5x10xf32>
    tpu.vector_store %arg15[%c10_1033, %c20_1034], %654 {strides = array<i32>} : memref<25x90xf32, #tpu.memory_space<vmem>>, vector<5x10xf32>,
    %c21_1035 = arith.constant 21 : index
    %c0_1036 = arith.constant 0 : index
    %656 = vector.load %arg14[%c21_1035, %c0_1036] : memref<49x10xf32, #tpu.memory_space<vmem>>, vector<5x10xf32>
    %c10_1037 = arith.constant 10 : index
    %c30_1038 = arith.constant 30 : index
    %657 = vector.load %arg15[%c10_1037, %c30_1038] : memref<25x90xf32, #tpu.memory_space<vmem>>, vector<5x10xf32>
    tpu.vector_store %arg15[%c10_1037, %c30_1038], %656 {strides = array<i32>} : memref<25x90xf32, #tpu.memory_space<vmem>>, vector<5x10xf32>,
    %c22_1039 = arith.constant 22 : index
    %c0_1040 = arith.constant 0 : index
    %658 = vector.load %arg14[%c22_1039, %c0_1040] : memref<49x10xf32, #tpu.memory_space<vmem>>, vector<5x10xf32>
    %c10_1041 = arith.constant 10 : index
    %c40_1042 = arith.constant 40 : index
    %659 = vector.load %arg15[%c10_1041, %c40_1042] : memref<25x90xf32, #tpu.memory_space<vmem>>, vector<5x10xf32>
    tpu.vector_store %arg15[%c10_1041, %c40_1042], %658 {strides = array<i32>} : memref<25x90xf32, #tpu.memory_space<vmem>>, vector<5x10xf32>,
    %c23_1043 = arith.constant 23 : index
    %c0_1044 = arith.constant 0 : index
    %660 = vector.load %arg14[%c23_1043, %c0_1044] : memref<49x10xf32, #tpu.memory_space<vmem>>, vector<5x10xf32>
    %c10_1045 = arith.constant 10 : index
    %c50_1046 = arith.constant 50 : index
    %661 = vector.load %arg15[%c10_1045, %c50_1046] : memref<25x90xf32, #tpu.memory_space<vmem>>, vector<5x10xf32>
    tpu.vector_store %arg15[%c10_1045, %c50_1046], %660 {strides = array<i32>} : memref<25x90xf32, #tpu.memory_space<vmem>>, vector<5x10xf32>,
    %c28_1047 = arith.constant 28 : index
    %c0_1048 = arith.constant 0 : index
    %662 = vector.load %arg14[%c28_1047, %c0_1048] : memref<49x10xf32, #tpu.memory_space<vmem>>, vector<5x10xf32>
    %c10_1049 = arith.constant 10 : index
    %c60_1050 = arith.constant 60 : index
    %663 = vector.load %arg15[%c10_1049, %c60_1050] : memref<25x90xf32, #tpu.memory_space<vmem>>, vector<5x10xf32>
    tpu.vector_store %arg15[%c10_1049, %c60_1050], %662 {strides = array<i32>} : memref<25x90xf32, #tpu.memory_space<vmem>>, vector<5x10xf32>,
    %c29_1051 = arith.constant 29 : index
    %c0_1052 = arith.constant 0 : index
    %664 = vector.load %arg14[%c29_1051, %c0_1052] : memref<49x10xf32, #tpu.memory_space<vmem>>, vector<5x10xf32>
    %c10_1053 = arith.constant 10 : index
    %c70_1054 = arith.constant 70 : index
    %665 = vector.load %arg15[%c10_1053, %c70_1054] : memref<25x90xf32, #tpu.memory_space<vmem>>, vector<5x10xf32>
    tpu.vector_store %arg15[%c10_1053, %c70_1054], %664 {strides = array<i32>} : memref<25x90xf32, #tpu.memory_space<vmem>>, vector<5x10xf32>,
    %c30_1055 = arith.constant 30 : index
    %c0_1056 = arith.constant 0 : index
    %666 = vector.load %arg14[%c30_1055, %c0_1056] : memref<49x10xf32, #tpu.memory_space<vmem>>, vector<5x10xf32>
    %c10_1057 = arith.constant 10 : index
    %c80_1058 = arith.constant 80 : index
    %667 = vector.load %arg15[%c10_1057, %c80_1058] : memref<25x90xf32, #tpu.memory_space<vmem>>, vector<5x10xf32>
    tpu.vector_store %arg15[%c10_1057, %c80_1058], %666 {strides = array<i32>} : memref<25x90xf32, #tpu.memory_space<vmem>>, vector<5x10xf32>,
    %c21_1059 = arith.constant 21 : index
    %c0_1060 = arith.constant 0 : index
    %668 = vector.load %arg14[%c21_1059, %c0_1060] : memref<49x10xf32, #tpu.memory_space<vmem>>, vector<5x10xf32>
    %c15_1061 = arith.constant 15 : index
    %c0_1062 = arith.constant 0 : index
    %669 = vector.load %arg15[%c15_1061, %c0_1062] : memref<25x90xf32, #tpu.memory_space<vmem>>, vector<5x10xf32>
    tpu.vector_store %arg15[%c15_1061, %c0_1062], %668 {strides = array<i32>} : memref<25x90xf32, #tpu.memory_space<vmem>>, vector<5x10xf32>,
    %c22_1063 = arith.constant 22 : index
    %c0_1064 = arith.constant 0 : index
    %670 = vector.load %arg14[%c22_1063, %c0_1064] : memref<49x10xf32, #tpu.memory_space<vmem>>, vector<5x10xf32>
    %c15_1065 = arith.constant 15 : index
    %c10_1066 = arith.constant 10 : index
    %671 = vector.load %arg15[%c15_1065, %c10_1066] : memref<25x90xf32, #tpu.memory_space<vmem>>, vector<5x10xf32>
    tpu.vector_store %arg15[%c15_1065, %c10_1066], %670 {strides = array<i32>} : memref<25x90xf32, #tpu.memory_space<vmem>>, vector<5x10xf32>,
    %c23_1067 = arith.constant 23 : index
    %c0_1068 = arith.constant 0 : index
    %672 = vector.load %arg14[%c23_1067, %c0_1068] : memref<49x10xf32, #tpu.memory_space<vmem>>, vector<5x10xf32>
    %c15_1069 = arith.constant 15 : index
    %c20_1070 = arith.constant 20 : index
    %673 = vector.load %arg15[%c15_1069, %c20_1070] : memref<25x90xf32, #tpu.memory_space<vmem>>, vector<5x10xf32>
    tpu.vector_store %arg15[%c15_1069, %c20_1070], %672 {strides = array<i32>} : memref<25x90xf32, #tpu.memory_space<vmem>>, vector<5x10xf32>,
    %c28_1071 = arith.constant 28 : index
    %c0_1072 = arith.constant 0 : index
    %674 = vector.load %arg14[%c28_1071, %c0_1072] : memref<49x10xf32, #tpu.memory_space<vmem>>, vector<5x10xf32>
    %c15_1073 = arith.constant 15 : index
    %c30_1074 = arith.constant 30 : index
    %675 = vector.load %arg15[%c15_1073, %c30_1074] : memref<25x90xf32, #tpu.memory_space<vmem>>, vector<5x10xf32>
    tpu.vector_store %arg15[%c15_1073, %c30_1074], %674 {strides = array<i32>} : memref<25x90xf32, #tpu.memory_space<vmem>>, vector<5x10xf32>,
    %c29_1075 = arith.constant 29 : index
    %c0_1076 = arith.constant 0 : index
    %676 = vector.load %arg14[%c29_1075, %c0_1076] : memref<49x10xf32, #tpu.memory_space<vmem>>, vector<5x10xf32>
    %c15_1077 = arith.constant 15 : index
    %c40_1078 = arith.constant 40 : index
    %677 = vector.load %arg15[%c15_1077, %c40_1078] : memref<25x90xf32, #tpu.memory_space<vmem>>, vector<5x10xf32>
    tpu.vector_store %arg15[%c15_1077, %c40_1078], %676 {strides = array<i32>} : memref<25x90xf32, #tpu.memory_space<vmem>>, vector<5x10xf32>,
    %c30_1079 = arith.constant 30 : index
    %c0_1080 = arith.constant 0 : index
    %678 = vector.load %arg14[%c30_1079, %c0_1080] : memref<49x10xf32, #tpu.memory_space<vmem>>, vector<5x10xf32>
    %c15_1081 = arith.constant 15 : index
    %c50_1082 = arith.constant 50 : index
    %679 = vector.load %arg15[%c15_1081, %c50_1082] : memref<25x90xf32, #tpu.memory_space<vmem>>, vector<5x10xf32>
    tpu.vector_store %arg15[%c15_1081, %c50_1082], %678 {strides = array<i32>} : memref<25x90xf32, #tpu.memory_space<vmem>>, vector<5x10xf32>,
    %c35_1083 = arith.constant 35 : index
    %c0_1084 = arith.constant 0 : index
    %680 = vector.load %arg14[%c35_1083, %c0_1084] : memref<49x10xf32, #tpu.memory_space<vmem>>, vector<5x10xf32>
    %c15_1085 = arith.constant 15 : index
    %c60_1086 = arith.constant 60 : index
    %681 = vector.load %arg15[%c15_1085, %c60_1086] : memref<25x90xf32, #tpu.memory_space<vmem>>, vector<5x10xf32>
    tpu.vector_store %arg15[%c15_1085, %c60_1086], %680 {strides = array<i32>} : memref<25x90xf32, #tpu.memory_space<vmem>>, vector<5x10xf32>,
    %c36_1087 = arith.constant 36 : index
    %c0_1088 = arith.constant 0 : index
    %682 = vector.load %arg14[%c36_1087, %c0_1088] : memref<49x10xf32, #tpu.memory_space<vmem>>, vector<5x10xf32>
    %c15_1089 = arith.constant 15 : index
    %c70_1090 = arith.constant 70 : index
    %683 = vector.load %arg15[%c15_1089, %c70_1090] : memref<25x90xf32, #tpu.memory_space<vmem>>, vector<5x10xf32>
    tpu.vector_store %arg15[%c15_1089, %c70_1090], %682 {strides = array<i32>} : memref<25x90xf32, #tpu.memory_space<vmem>>, vector<5x10xf32>,
    %c37_1091 = arith.constant 37 : index
    %c0_1092 = arith.constant 0 : index
    %684 = vector.load %arg14[%c37_1091, %c0_1092] : memref<49x10xf32, #tpu.memory_space<vmem>>, vector<5x10xf32>
    %c15_1093 = arith.constant 15 : index
    %c80_1094 = arith.constant 80 : index
    %685 = vector.load %arg15[%c15_1093, %c80_1094] : memref<25x90xf32, #tpu.memory_space<vmem>>, vector<5x10xf32>
    tpu.vector_store %arg15[%c15_1093, %c80_1094], %684 {strides = array<i32>} : memref<25x90xf32, #tpu.memory_space<vmem>>, vector<5x10xf32>,
    %c28_1095 = arith.constant 28 : index
    %c0_1096 = arith.constant 0 : index
    %686 = vector.load %arg14[%c28_1095, %c0_1096] : memref<49x10xf32, #tpu.memory_space<vmem>>, vector<5x10xf32>
    %c20_1097 = arith.constant 20 : index
    %c0_1098 = arith.constant 0 : index
    %687 = vector.load %arg15[%c20_1097, %c0_1098] : memref<25x90xf32, #tpu.memory_space<vmem>>, vector<5x10xf32>
    tpu.vector_store %arg15[%c20_1097, %c0_1098], %686 {strides = array<i32>} : memref<25x90xf32, #tpu.memory_space<vmem>>, vector<5x10xf32>,
    %c29_1099 = arith.constant 29 : index
    %c0_1100 = arith.constant 0 : index
    %688 = vector.load %arg14[%c29_1099, %c0_1100] : memref<49x10xf32, #tpu.memory_space<vmem>>, vector<5x10xf32>
    %c20_1101 = arith.constant 20 : index
    %c10_1102 = arith.constant 10 : index
    %689 = vector.load %arg15[%c20_1101, %c10_1102] : memref<25x90xf32, #tpu.memory_space<vmem>>, vector<5x10xf32>
    tpu.vector_store %arg15[%c20_1101, %c10_1102], %688 {strides = array<i32>} : memref<25x90xf32, #tpu.memory_space<vmem>>, vector<5x10xf32>,
    %c30_1103 = arith.constant 30 : index
    %c0_1104 = arith.constant 0 : index
    %690 = vector.load %arg14[%c30_1103, %c0_1104] : memref<49x10xf32, #tpu.memory_space<vmem>>, vector<5x10xf32>
    %c20_1105 = arith.constant 20 : index
    %c20_1106 = arith.constant 20 : index
    %691 = vector.load %arg15[%c20_1105, %c20_1106] : memref<25x90xf32, #tpu.memory_space<vmem>>, vector<5x10xf32>
    tpu.vector_store %arg15[%c20_1105, %c20_1106], %690 {strides = array<i32>} : memref<25x90xf32, #tpu.memory_space<vmem>>, vector<5x10xf32>,
    %c35_1107 = arith.constant 35 : index
    %c0_1108 = arith.constant 0 : index
    %692 = vector.load %arg14[%c35_1107, %c0_1108] : memref<49x10xf32, #tpu.memory_space<vmem>>, vector<5x10xf32>
    %c20_1109 = arith.constant 20 : index
    %c30_1110 = arith.constant 30 : index
    %693 = vector.load %arg15[%c20_1109, %c30_1110] : memref<25x90xf32, #tpu.memory_space<vmem>>, vector<5x10xf32>
    tpu.vector_store %arg15[%c20_1109, %c30_1110], %692 {strides = array<i32>} : memref<25x90xf32, #tpu.memory_space<vmem>>, vector<5x10xf32>,
    %c36_1111 = arith.constant 36 : index
    %c0_1112 = arith.constant 0 : index
    %694 = vector.load %arg14[%c36_1111, %c0_1112] : memref<49x10xf32, #tpu.memory_space<vmem>>, vector<5x10xf32>
    %c20_1113 = arith.constant 20 : index
    %c40_1114 = arith.constant 40 : index
    %695 = vector.load %arg15[%c20_1113, %c40_1114] : memref<25x90xf32, #tpu.memory_space<vmem>>, vector<5x10xf32>
    tpu.vector_store %arg15[%c20_1113, %c40_1114], %694 {strides = array<i32>} : memref<25x90xf32, #tpu.memory_space<vmem>>, vector<5x10xf32>,
    %c37_1115 = arith.constant 37 : index
    %c0_1116 = arith.constant 0 : index
    %696 = vector.load %arg14[%c37_1115, %c0_1116] : memref<49x10xf32, #tpu.memory_space<vmem>>, vector<5x10xf32>
    %c20_1117 = arith.constant 20 : index
    %c50_1118 = arith.constant 50 : index
    %697 = vector.load %arg15[%c20_1117, %c50_1118] : memref<25x90xf32, #tpu.memory_space<vmem>>, vector<5x10xf32>
    tpu.vector_store %arg15[%c20_1117, %c50_1118], %696 {strides = array<i32>} : memref<25x90xf32, #tpu.memory_space<vmem>>, vector<5x10xf32>,
    %c42_1119 = arith.constant 42 : index
    %c0_1120 = arith.constant 0 : index
    %698 = vector.load %arg14[%c42_1119, %c0_1120] : memref<49x10xf32, #tpu.memory_space<vmem>>, vector<5x10xf32>
    %c20_1121 = arith.constant 20 : index
    %c60_1122 = arith.constant 60 : index
    %699 = vector.load %arg15[%c20_1121, %c60_1122] : memref<25x90xf32, #tpu.memory_space<vmem>>, vector<5x10xf32>
    tpu.vector_store %arg15[%c20_1121, %c60_1122], %698 {strides = array<i32>} : memref<25x90xf32, #tpu.memory_space<vmem>>, vector<5x10xf32>,
    %c43_1123 = arith.constant 43 : index
    %c0_1124 = arith.constant 0 : index
    %700 = vector.load %arg14[%c43_1123, %c0_1124] : memref<49x10xf32, #tpu.memory_space<vmem>>, vector<5x10xf32>
    %c20_1125 = arith.constant 20 : index
    %c70_1126 = arith.constant 70 : index
    %701 = vector.load %arg15[%c20_1125, %c70_1126] : memref<25x90xf32, #tpu.memory_space<vmem>>, vector<5x10xf32>
    tpu.vector_store %arg15[%c20_1125, %c70_1126], %700 {strides = array<i32>} : memref<25x90xf32, #tpu.memory_space<vmem>>, vector<5x10xf32>,
    %c44_1127 = arith.constant 44 : index
    %c0_1128 = arith.constant 0 : index
    %702 = vector.load %arg14[%c44_1127, %c0_1128] : memref<49x10xf32, #tpu.memory_space<vmem>>, vector<5x10xf32>
    %c20_1129 = arith.constant 20 : index
    %c80_1130 = arith.constant 80 : index
    %703 = vector.load %arg15[%c20_1129, %c80_1130] : memref<25x90xf32, #tpu.memory_space<vmem>>, vector<5x10xf32>
    tpu.vector_store %arg15[%c20_1129, %c80_1130], %702 {strides = array<i32>} : memref<25x90xf32, #tpu.memory_space<vmem>>, vector<5x10xf32>,
    %c0_1131 = arith.constant 0 : index
    %c0_1132 = arith.constant 0 : index
    %704 = vector.load %arg15[%c0_1131, %c0_1132] : memref<25x90xf32, #tpu.memory_space<vmem>>, vector<25x90xf32>
    %705 = arith.truncf %704 : vector<25x90xf32> to vector<25x90xbf16>
    %c0_1133 = arith.constant 0 : index
    %c0_1134 = arith.constant 0 : index
    %706 = vector.load %arg4[%c0_1133, %c0_1134] : memref<90x16xbf16, #tpu.memory_space<vmem>>, vector<90x16xbf16>
    %cst_1135 = arith.constant dense<0.000000e+00> : vector<25x16xf32>
    %707 = tpu.matmul %705, %706, %cst_1135 {dimension_numbers = #tpu.dot_dimension_numbers<[1], [0], [0], [1], [0, 0, 1, 1], [], []>} : vector<25x90xbf16>, vector<90x16xbf16>, vector<25x16xf32> -> vector<25x16xf32>
    %c0_1136 = arith.constant 0 : index
    %c0_1137 = arith.constant 0 : index
    %708 = vector.load %arg5[%c0_1136, %c0_1137] : memref<2x16xf32, #tpu.memory_space<vmem>>, vector<1x16xf32>
    %709 = vector.broadcast %708 : vector<1x16xf32> to vector<25x16xf32>
    %710 = arith.addf %707, %709 : vector<25x16xf32>
    %cst_1138 = arith.constant 0.000000e+00 : f32
    %711 = vector.broadcast %cst_1138 : f32 to vector<25x16xf32>
    %712 = arith.cmpf oge, %710, %711 : vector<25x16xf32>
    %c1_1139 = arith.constant 1 : index
    %c0_1140 = arith.constant 0 : index
    %713 = vector.load %arg5[%c1_1139, %c0_1140] : memref<2x16xf32, #tpu.memory_space<vmem>>, vector<1x16xf32>
    %714 = vector.broadcast %713 : vector<1x16xf32> to vector<25x16xf32>
    %715 = arith.mulf %714, %710 : vector<25x16xf32>
    %716 = arith.select %712, %710, %715 : vector<25x16xi1>, vector<25x16xf32>
    %c0_1141 = arith.constant 0 : index
    %c0_1142 = arith.constant 0 : index
    %717 = vector.load %arg16[%c0_1141, %c0_1142] : memref<25x16xf32, #tpu.memory_space<vmem>>, vector<25x16xf32>
    tpu.vector_store %arg16[%c0_1141, %c0_1142], %716 {strides = array<i32>} : memref<25x16xf32, #tpu.memory_space<vmem>>, vector<25x16xf32>,
    %c0_1143 = arith.constant 0 : index
    %c0_1144 = arith.constant 0 : index
    %718 = vector.load %arg16[%c0_1143, %c0_1144] : memref<25x16xf32, #tpu.memory_space<vmem>>, vector<3x16xf32>
    %c0_1145 = arith.constant 0 : index
    %c0_1146 = arith.constant 0 : index
    %719 = vector.load %arg17[%c0_1145, %c0_1146] : memref<9x144xf32, #tpu.memory_space<vmem>>, vector<3x16xf32>
    tpu.vector_store %arg17[%c0_1145, %c0_1146], %718 {strides = array<i32>} : memref<9x144xf32, #tpu.memory_space<vmem>>, vector<3x16xf32>,
    %c1_1147 = arith.constant 1 : index
    %c0_1148 = arith.constant 0 : index
    %720 = vector.load %arg16[%c1_1147, %c0_1148] : memref<25x16xf32, #tpu.memory_space<vmem>>, vector<3x16xf32>
    %c0_1149 = arith.constant 0 : index
    %c16_1150 = arith.constant 16 : index
    %721 = vector.load %arg17[%c0_1149, %c16_1150] : memref<9x144xf32, #tpu.memory_space<vmem>>, vector<3x16xf32>
    tpu.vector_store %arg17[%c0_1149, %c16_1150], %720 {strides = array<i32>} : memref<9x144xf32, #tpu.memory_space<vmem>>, vector<3x16xf32>,
    %c2_1151 = arith.constant 2 : index
    %c0_1152 = arith.constant 0 : index
    %722 = vector.load %arg16[%c2_1151, %c0_1152] : memref<25x16xf32, #tpu.memory_space<vmem>>, vector<3x16xf32>
    %c0_1153 = arith.constant 0 : index
    %c32_1154 = arith.constant 32 : index
    %723 = vector.load %arg17[%c0_1153, %c32_1154] : memref<9x144xf32, #tpu.memory_space<vmem>>, vector<3x16xf32>
    tpu.vector_store %arg17[%c0_1153, %c32_1154], %722 {strides = array<i32>} : memref<9x144xf32, #tpu.memory_space<vmem>>, vector<3x16xf32>,
    %c5_1155 = arith.constant 5 : index
    %c0_1156 = arith.constant 0 : index
    %724 = vector.load %arg16[%c5_1155, %c0_1156] : memref<25x16xf32, #tpu.memory_space<vmem>>, vector<3x16xf32>
    %c0_1157 = arith.constant 0 : index
    %c48_1158 = arith.constant 48 : index
    %725 = vector.load %arg17[%c0_1157, %c48_1158] : memref<9x144xf32, #tpu.memory_space<vmem>>, vector<3x16xf32>
    tpu.vector_store %arg17[%c0_1157, %c48_1158], %724 {strides = array<i32>} : memref<9x144xf32, #tpu.memory_space<vmem>>, vector<3x16xf32>,
    %c6_1159 = arith.constant 6 : index
    %c0_1160 = arith.constant 0 : index
    %726 = vector.load %arg16[%c6_1159, %c0_1160] : memref<25x16xf32, #tpu.memory_space<vmem>>, vector<3x16xf32>
    %c0_1161 = arith.constant 0 : index
    %c64_1162 = arith.constant 64 : index
    %727 = vector.load %arg17[%c0_1161, %c64_1162] : memref<9x144xf32, #tpu.memory_space<vmem>>, vector<3x16xf32>
    tpu.vector_store %arg17[%c0_1161, %c64_1162], %726 {strides = array<i32>} : memref<9x144xf32, #tpu.memory_space<vmem>>, vector<3x16xf32>,
    %c7_1163 = arith.constant 7 : index
    %c0_1164 = arith.constant 0 : index
    %728 = vector.load %arg16[%c7_1163, %c0_1164] : memref<25x16xf32, #tpu.memory_space<vmem>>, vector<3x16xf32>
    %c0_1165 = arith.constant 0 : index
    %c80_1166 = arith.constant 80 : index
    %729 = vector.load %arg17[%c0_1165, %c80_1166] : memref<9x144xf32, #tpu.memory_space<vmem>>, vector<3x16xf32>
    tpu.vector_store %arg17[%c0_1165, %c80_1166], %728 {strides = array<i32>} : memref<9x144xf32, #tpu.memory_space<vmem>>, vector<3x16xf32>,
    %c10_1167 = arith.constant 10 : index
    %c0_1168 = arith.constant 0 : index
    %730 = vector.load %arg16[%c10_1167, %c0_1168] : memref<25x16xf32, #tpu.memory_space<vmem>>, vector<3x16xf32>
    %c0_1169 = arith.constant 0 : index
    %c96_1170 = arith.constant 96 : index
    %731 = vector.load %arg17[%c0_1169, %c96_1170] : memref<9x144xf32, #tpu.memory_space<vmem>>, vector<3x16xf32>
    tpu.vector_store %arg17[%c0_1169, %c96_1170], %730 {strides = array<i32>} : memref<9x144xf32, #tpu.memory_space<vmem>>, vector<3x16xf32>,
    %c11_1171 = arith.constant 11 : index
    %c0_1172 = arith.constant 0 : index
    %732 = vector.load %arg16[%c11_1171, %c0_1172] : memref<25x16xf32, #tpu.memory_space<vmem>>, vector<3x16xf32>
    %c0_1173 = arith.constant 0 : index
    %c112_1174 = arith.constant 112 : index
    %733 = vector.load %arg17[%c0_1173, %c112_1174] : memref<9x144xf32, #tpu.memory_space<vmem>>, vector<3x16xf32>
    tpu.vector_store %arg17[%c0_1173, %c112_1174], %732 {strides = array<i32>} : memref<9x144xf32, #tpu.memory_space<vmem>>, vector<3x16xf32>,
    %c12_1175 = arith.constant 12 : index
    %c0_1176 = arith.constant 0 : index
    %734 = vector.load %arg16[%c12_1175, %c0_1176] : memref<25x16xf32, #tpu.memory_space<vmem>>, vector<3x16xf32>
    %c0_1177 = arith.constant 0 : index
    %c128_1178 = arith.constant 128 : index
    %735 = vector.load %arg17[%c0_1177, %c128_1178] : memref<9x144xf32, #tpu.memory_space<vmem>>, vector<3x16xf32>
    tpu.vector_store %arg17[%c0_1177, %c128_1178], %734 {strides = array<i32>} : memref<9x144xf32, #tpu.memory_space<vmem>>, vector<3x16xf32>,
    %c5_1179 = arith.constant 5 : index
    %c0_1180 = arith.constant 0 : index
    %736 = vector.load %arg16[%c5_1179, %c0_1180] : memref<25x16xf32, #tpu.memory_space<vmem>>, vector<3x16xf32>
    %c3_1181 = arith.constant 3 : index
    %c0_1182 = arith.constant 0 : index
    %737 = vector.load %arg17[%c3_1181, %c0_1182] : memref<9x144xf32, #tpu.memory_space<vmem>>, vector<3x16xf32>
    tpu.vector_store %arg17[%c3_1181, %c0_1182], %736 {strides = array<i32>} : memref<9x144xf32, #tpu.memory_space<vmem>>, vector<3x16xf32>,
    %c6_1183 = arith.constant 6 : index
    %c0_1184 = arith.constant 0 : index
    %738 = vector.load %arg16[%c6_1183, %c0_1184] : memref<25x16xf32, #tpu.memory_space<vmem>>, vector<3x16xf32>
    %c3_1185 = arith.constant 3 : index
    %c16_1186 = arith.constant 16 : index
    %739 = vector.load %arg17[%c3_1185, %c16_1186] : memref<9x144xf32, #tpu.memory_space<vmem>>, vector<3x16xf32>
    tpu.vector_store %arg17[%c3_1185, %c16_1186], %738 {strides = array<i32>} : memref<9x144xf32, #tpu.memory_space<vmem>>, vector<3x16xf32>,
    %c7_1187 = arith.constant 7 : index
    %c0_1188 = arith.constant 0 : index
    %740 = vector.load %arg16[%c7_1187, %c0_1188] : memref<25x16xf32, #tpu.memory_space<vmem>>, vector<3x16xf32>
    %c3_1189 = arith.constant 3 : index
    %c32_1190 = arith.constant 32 : index
    %741 = vector.load %arg17[%c3_1189, %c32_1190] : memref<9x144xf32, #tpu.memory_space<vmem>>, vector<3x16xf32>
    tpu.vector_store %arg17[%c3_1189, %c32_1190], %740 {strides = array<i32>} : memref<9x144xf32, #tpu.memory_space<vmem>>, vector<3x16xf32>,
    %c10_1191 = arith.constant 10 : index
    %c0_1192 = arith.constant 0 : index
    %742 = vector.load %arg16[%c10_1191, %c0_1192] : memref<25x16xf32, #tpu.memory_space<vmem>>, vector<3x16xf32>
    %c3_1193 = arith.constant 3 : index
    %c48_1194 = arith.constant 48 : index
    %743 = vector.load %arg17[%c3_1193, %c48_1194] : memref<9x144xf32, #tpu.memory_space<vmem>>, vector<3x16xf32>
    tpu.vector_store %arg17[%c3_1193, %c48_1194], %742 {strides = array<i32>} : memref<9x144xf32, #tpu.memory_space<vmem>>, vector<3x16xf32>,
    %c11_1195 = arith.constant 11 : index
    %c0_1196 = arith.constant 0 : index
    %744 = vector.load %arg16[%c11_1195, %c0_1196] : memref<25x16xf32, #tpu.memory_space<vmem>>, vector<3x16xf32>
    %c3_1197 = arith.constant 3 : index
    %c64_1198 = arith.constant 64 : index
    %745 = vector.load %arg17[%c3_1197, %c64_1198] : memref<9x144xf32, #tpu.memory_space<vmem>>, vector<3x16xf32>
    tpu.vector_store %arg17[%c3_1197, %c64_1198], %744 {strides = array<i32>} : memref<9x144xf32, #tpu.memory_space<vmem>>, vector<3x16xf32>,
    %c12_1199 = arith.constant 12 : index
    %c0_1200 = arith.constant 0 : index
    %746 = vector.load %arg16[%c12_1199, %c0_1200] : memref<25x16xf32, #tpu.memory_space<vmem>>, vector<3x16xf32>
    %c3_1201 = arith.constant 3 : index
    %c80_1202 = arith.constant 80 : index
    %747 = vector.load %arg17[%c3_1201, %c80_1202] : memref<9x144xf32, #tpu.memory_space<vmem>>, vector<3x16xf32>
    tpu.vector_store %arg17[%c3_1201, %c80_1202], %746 {strides = array<i32>} : memref<9x144xf32, #tpu.memory_space<vmem>>, vector<3x16xf32>,
    %c15_1203 = arith.constant 15 : index
    %c0_1204 = arith.constant 0 : index
    %748 = vector.load %arg16[%c15_1203, %c0_1204] : memref<25x16xf32, #tpu.memory_space<vmem>>, vector<3x16xf32>
    %c3_1205 = arith.constant 3 : index
    %c96_1206 = arith.constant 96 : index
    %749 = vector.load %arg17[%c3_1205, %c96_1206] : memref<9x144xf32, #tpu.memory_space<vmem>>, vector<3x16xf32>
    tpu.vector_store %arg17[%c3_1205, %c96_1206], %748 {strides = array<i32>} : memref<9x144xf32, #tpu.memory_space<vmem>>, vector<3x16xf32>,
    %c16_1207 = arith.constant 16 : index
    %c0_1208 = arith.constant 0 : index
    %750 = vector.load %arg16[%c16_1207, %c0_1208] : memref<25x16xf32, #tpu.memory_space<vmem>>, vector<3x16xf32>
    %c3_1209 = arith.constant 3 : index
    %c112_1210 = arith.constant 112 : index
    %751 = vector.load %arg17[%c3_1209, %c112_1210] : memref<9x144xf32, #tpu.memory_space<vmem>>, vector<3x16xf32>
    tpu.vector_store %arg17[%c3_1209, %c112_1210], %750 {strides = array<i32>} : memref<9x144xf32, #tpu.memory_space<vmem>>, vector<3x16xf32>,
    %c17_1211 = arith.constant 17 : index
    %c0_1212 = arith.constant 0 : index
    %752 = vector.load %arg16[%c17_1211, %c0_1212] : memref<25x16xf32, #tpu.memory_space<vmem>>, vector<3x16xf32>
    %c3_1213 = arith.constant 3 : index
    %c128_1214 = arith.constant 128 : index
    %753 = vector.load %arg17[%c3_1213, %c128_1214] : memref<9x144xf32, #tpu.memory_space<vmem>>, vector<3x16xf32>
    tpu.vector_store %arg17[%c3_1213, %c128_1214], %752 {strides = array<i32>} : memref<9x144xf32, #tpu.memory_space<vmem>>, vector<3x16xf32>,
    %c10_1215 = arith.constant 10 : index
    %c0_1216 = arith.constant 0 : index
    %754 = vector.load %arg16[%c10_1215, %c0_1216] : memref<25x16xf32, #tpu.memory_space<vmem>>, vector<3x16xf32>
    %c6_1217 = arith.constant 6 : index
    %c0_1218 = arith.constant 0 : index
    %755 = vector.load %arg17[%c6_1217, %c0_1218] : memref<9x144xf32, #tpu.memory_space<vmem>>, vector<3x16xf32>
    tpu.vector_store %arg17[%c6_1217, %c0_1218], %754 {strides = array<i32>} : memref<9x144xf32, #tpu.memory_space<vmem>>, vector<3x16xf32>,
    %c11_1219 = arith.constant 11 : index
    %c0_1220 = arith.constant 0 : index
    %756 = vector.load %arg16[%c11_1219, %c0_1220] : memref<25x16xf32, #tpu.memory_space<vmem>>, vector<3x16xf32>
    %c6_1221 = arith.constant 6 : index
    %c16_1222 = arith.constant 16 : index
    %757 = vector.load %arg17[%c6_1221, %c16_1222] : memref<9x144xf32, #tpu.memory_space<vmem>>, vector<3x16xf32>
    tpu.vector_store %arg17[%c6_1221, %c16_1222], %756 {strides = array<i32>} : memref<9x144xf32, #tpu.memory_space<vmem>>, vector<3x16xf32>,
    %c12_1223 = arith.constant 12 : index
    %c0_1224 = arith.constant 0 : index
    %758 = vector.load %arg16[%c12_1223, %c0_1224] : memref<25x16xf32, #tpu.memory_space<vmem>>, vector<3x16xf32>
    %c6_1225 = arith.constant 6 : index
    %c32_1226 = arith.constant 32 : index
    %759 = vector.load %arg17[%c6_1225, %c32_1226] : memref<9x144xf32, #tpu.memory_space<vmem>>, vector<3x16xf32>
    tpu.vector_store %arg17[%c6_1225, %c32_1226], %758 {strides = array<i32>} : memref<9x144xf32, #tpu.memory_space<vmem>>, vector<3x16xf32>,
    %c15_1227 = arith.constant 15 : index
    %c0_1228 = arith.constant 0 : index
    %760 = vector.load %arg16[%c15_1227, %c0_1228] : memref<25x16xf32, #tpu.memory_space<vmem>>, vector<3x16xf32>
    %c6_1229 = arith.constant 6 : index
    %c48_1230 = arith.constant 48 : index
    %761 = vector.load %arg17[%c6_1229, %c48_1230] : memref<9x144xf32, #tpu.memory_space<vmem>>, vector<3x16xf32>
    tpu.vector_store %arg17[%c6_1229, %c48_1230], %760 {strides = array<i32>} : memref<9x144xf32, #tpu.memory_space<vmem>>, vector<3x16xf32>,
    %c16_1231 = arith.constant 16 : index
    %c0_1232 = arith.constant 0 : index
    %762 = vector.load %arg16[%c16_1231, %c0_1232] : memref<25x16xf32, #tpu.memory_space<vmem>>, vector<3x16xf32>
    %c6_1233 = arith.constant 6 : index
    %c64_1234 = arith.constant 64 : index
    %763 = vector.load %arg17[%c6_1233, %c64_1234] : memref<9x144xf32, #tpu.memory_space<vmem>>, vector<3x16xf32>
    tpu.vector_store %arg17[%c6_1233, %c64_1234], %762 {strides = array<i32>} : memref<9x144xf32, #tpu.memory_space<vmem>>, vector<3x16xf32>,
    %c17_1235 = arith.constant 17 : index
    %c0_1236 = arith.constant 0 : index
    %764 = vector.load %arg16[%c17_1235, %c0_1236] : memref<25x16xf32, #tpu.memory_space<vmem>>, vector<3x16xf32>
    %c6_1237 = arith.constant 6 : index
    %c80_1238 = arith.constant 80 : index
    %765 = vector.load %arg17[%c6_1237, %c80_1238] : memref<9x144xf32, #tpu.memory_space<vmem>>, vector<3x16xf32>
    tpu.vector_store %arg17[%c6_1237, %c80_1238], %764 {strides = array<i32>} : memref<9x144xf32, #tpu.memory_space<vmem>>, vector<3x16xf32>,
    %c20_1239 = arith.constant 20 : index
    %c0_1240 = arith.constant 0 : index
    %766 = vector.load %arg16[%c20_1239, %c0_1240] : memref<25x16xf32, #tpu.memory_space<vmem>>, vector<3x16xf32>
    %c6_1241 = arith.constant 6 : index
    %c96_1242 = arith.constant 96 : index
    %767 = vector.load %arg17[%c6_1241, %c96_1242] : memref<9x144xf32, #tpu.memory_space<vmem>>, vector<3x16xf32>
    tpu.vector_store %arg17[%c6_1241, %c96_1242], %766 {strides = array<i32>} : memref<9x144xf32, #tpu.memory_space<vmem>>, vector<3x16xf32>,
    %c21_1243 = arith.constant 21 : index
    %c0_1244 = arith.constant 0 : index
    %768 = vector.load %arg16[%c21_1243, %c0_1244] : memref<25x16xf32, #tpu.memory_space<vmem>>, vector<3x16xf32>
    %c6_1245 = arith.constant 6 : index
    %c112_1246 = arith.constant 112 : index
    %769 = vector.load %arg17[%c6_1245, %c112_1246] : memref<9x144xf32, #tpu.memory_space<vmem>>, vector<3x16xf32>
    tpu.vector_store %arg17[%c6_1245, %c112_1246], %768 {strides = array<i32>} : memref<9x144xf32, #tpu.memory_space<vmem>>, vector<3x16xf32>,
    %c22_1247 = arith.constant 22 : index
    %c0_1248 = arith.constant 0 : index
    %770 = vector.load %arg16[%c22_1247, %c0_1248] : memref<25x16xf32, #tpu.memory_space<vmem>>, vector<3x16xf32>
    %c6_1249 = arith.constant 6 : index
    %c128_1250 = arith.constant 128 : index
    %771 = vector.load %arg17[%c6_1249, %c128_1250] : memref<9x144xf32, #tpu.memory_space<vmem>>, vector<3x16xf32>
    tpu.vector_store %arg17[%c6_1249, %c128_1250], %770 {strides = array<i32>} : memref<9x144xf32, #tpu.memory_space<vmem>>, vector<3x16xf32>,
    %c0_1251 = arith.constant 0 : index
    %c0_1252 = arith.constant 0 : index
    %772 = vector.load %arg17[%c0_1251, %c0_1252] : memref<9x144xf32, #tpu.memory_space<vmem>>, vector<9x144xf32>
    %773 = arith.truncf %772 : vector<9x144xf32> to vector<9x144xbf16>
    %c0_1253 = arith.constant 0 : index
    %c0_1254 = arith.constant 0 : index
    %774 = vector.load %arg6[%c0_1253, %c0_1254] : memref<144x32xbf16, #tpu.memory_space<vmem>>, vector<144x32xbf16>
    %cst_1255 = arith.constant dense<0.000000e+00> : vector<9x32xf32>
    %775 = tpu.matmul %773, %774, %cst_1255 {dimension_numbers = #tpu.dot_dimension_numbers<[1], [0], [0], [1], [0, 0, 1, 1], [], []>} : vector<9x144xbf16>, vector<144x32xbf16>, vector<9x32xf32> -> vector<9x32xf32>
    %c0_1256 = arith.constant 0 : index
    %c0_1257 = arith.constant 0 : index
    %776 = vector.load %arg7[%c0_1256, %c0_1257] : memref<2x32xf32, #tpu.memory_space<vmem>>, vector<1x32xf32>
    %777 = vector.broadcast %776 : vector<1x32xf32> to vector<9x32xf32>
    %778 = arith.addf %775, %777 : vector<9x32xf32>
    %cst_1258 = arith.constant 0.000000e+00 : f32
    %779 = vector.broadcast %cst_1258 : f32 to vector<9x32xf32>
    %780 = arith.cmpf oge, %778, %779 : vector<9x32xf32>
    %c1_1259 = arith.constant 1 : index
    %c0_1260 = arith.constant 0 : index
    %781 = vector.load %arg7[%c1_1259, %c0_1260] : memref<2x32xf32, #tpu.memory_space<vmem>>, vector<1x32xf32>
    %782 = vector.broadcast %781 : vector<1x32xf32> to vector<9x32xf32>
    %783 = arith.mulf %782, %778 : vector<9x32xf32>
    %784 = arith.select %780, %778, %783 : vector<9x32xi1>, vector<9x32xf32>
    %785 = arith.truncf %784 : vector<9x32xf32> to vector<9x32xbf16>
    %c0_1261 = arith.constant 0 : index
    %c0_1262 = arith.constant 0 : index
    %786 = vector.load %arg8[%c0_1261, %c0_1262] : memref<32x5xbf16, #tpu.memory_space<vmem>>, vector<32x5xbf16>
    %cst_1263 = arith.constant dense<0.000000e+00> : vector<9x5xf32>
    %787 = tpu.matmul %785, %786, %cst_1263 {dimension_numbers = #tpu.dot_dimension_numbers<[1], [0], [0], [1], [0, 0, 1, 1], [], []>} : vector<9x32xbf16>, vector<32x5xbf16>, vector<9x5xf32> -> vector<9x5xf32>
    %c0_1264 = arith.constant 0 : index
    %c0_1265 = arith.constant 0 : index
    %788 = vector.load %arg9[%c0_1264, %c0_1265] : memref<1x5xf32, #tpu.memory_space<vmem>>, vector<1x5xf32>
    %789 = vector.broadcast %788 : vector<1x5xf32> to vector<9x5xf32>
    %790 = arith.addf %787, %789 : vector<9x5xf32>
    %791 = vector.extract_strided_slice %790 {offsets = [0, 0], sizes = [9, 4], strides = [1, 1]} : vector<9x5xf32> to vector<9x4xf32>
    %c0_1266 = arith.constant 0 : index
    %c0_1267 = arith.constant 0 : index
    %c0_1268 = arith.constant 0 : index
    %792 = vector.load %arg10[%c0_1266, %c0_1267, %c0_1268] : memref<1x9x4xf32, #tpu.memory_space<vmem>>, vector<1x9x4xf32>
    %793 = vector.shape_cast %792 : vector<1x9x4xf32> to vector<9x4xf32>
    %794 = vector.shape_cast %791 : vector<9x4xf32> to vector<1x9x4xf32>
    tpu.vector_store %arg10[%c0_1266, %c0_1267, %c0_1268], %794 {strides = array<i32>} : memref<1x9x4xf32, #tpu.memory_space<vmem>>, vector<1x9x4xf32>,
    %795 = vector.extract_strided_slice %790 {offsets = [0, 4], sizes = [9, 1], strides = [1, 1]} : vector<9x5xf32> to vector<9x1xf32>
    %cst_1269 = arith.constant 0.000000e+00 : f32
    %796 = vector.broadcast %cst_1269 : f32 to vector<9x1xf32>
    %797 = arith.subf %796, %795 : vector<9x1xf32>
    %798 = math.exp %797 : vector<9x1xf32>
    %cst_1270 = arith.constant 1.000000e+00 : f32
    %799 = vector.broadcast %cst_1270 : f32 to vector<9x1xf32>
    %800 = arith.addf %799, %798 : vector<9x1xf32>
    %cst_1271 = arith.constant 1.000000e+00 : f32
    %801 = vector.broadcast %cst_1271 : f32 to vector<9x1xf32>
    %802 = arith.divf %801, %800 : vector<9x1xf32>
    %c0_1272 = arith.constant 0 : index
    %c0_1273 = arith.constant 0 : index
    %c0_1274 = arith.constant 0 : index
    %803 = vector.load %arg11[%c0_1272, %c0_1273, %c0_1274] : memref<1x9x1xf32, #tpu.memory_space<vmem>>, vector<1x9x1xf32>
    %804 = vector.shape_cast %803 : vector<1x9x1xf32> to vector<9x1xf32>
    %805 = vector.shape_cast %802 : vector<9x1xf32> to vector<1x9x1xf32>
    tpu.vector_store %arg11[%c0_1272, %c0_1273, %c0_1274], %805 {strides = array<i32>} : memref<1x9x1xf32, #tpu.memory_space<vmem>>, vector<1x9x1xf32>,
    return
  }
  func.func @transform_0(%arg0: i32) -> (i32, i32, i32, i32) {
    %c0_i32 = arith.constant 0 : i32
    %c0_i32_0 = arith.constant 0 : i32
    %c0_i32_1 = arith.constant 0 : i32
    %c0_i32_2 = arith.constant 0 : i32
    return %arg0, %c0_i32, %c0_i32_0, %c0_i32_1 : i32, i32, i32, i32
  }
  func.func @transform_1(%arg0: i32) -> (i32, i32) {
    %c0_i32 = arith.constant 0 : i32
    %c0_i32_0 = arith.constant 0 : i32
    %c0_i32_1 = arith.constant 0 : i32
    return %c0_i32, %c0_i32_0 : i32, i32
  }
  func.func @transform_2(%arg0: i32) -> (i32, i32) {
    %c0_i32 = arith.constant 0 : i32
    %c0_i32_0 = arith.constant 0 : i32
    %c0_i32_1 = arith.constant 0 : i32
    return %c0_i32, %c0_i32_0 : i32, i32
  }
  func.func @transform_3(%arg0: i32) -> (i32, i32) {
    %c0_i32 = arith.constant 0 : i32
    %c0_i32_0 = arith.constant 0 : i32
    %c0_i32_1 = arith.constant 0 : i32
    return %c0_i32, %c0_i32_0 : i32, i32
  }
  func.func @transform_4(%arg0: i32) -> (i32, i32) {
    %c0_i32 = arith.constant 0 : i32
    %c0_i32_0 = arith.constant 0 : i32
    %c0_i32_1 = arith.constant 0 : i32
    return %c0_i32, %c0_i32_0 : i32, i32
  }
  func.func @transform_5(%arg0: i32) -> (i32, i32) {
    %c0_i32 = arith.constant 0 : i32
    %c0_i32_0 = arith.constant 0 : i32
    %c0_i32_1 = arith.constant 0 : i32
    return %c0_i32, %c0_i32_0 : i32, i32
  }
  func.func @transform_6(%arg0: i32) -> (i32, i32) {
    %c0_i32 = arith.constant 0 : i32
    %c0_i32_0 = arith.constant 0 : i32
    %c0_i32_1 = arith.constant 0 : i32
    return %c0_i32, %c0_i32_0 : i32, i32
  }
  func.func @transform_7(%arg0: i32) -> (i32, i32) {
    %c0_i32 = arith.constant 0 : i32
    %c0_i32_0 = arith.constant 0 : i32
    %c0_i32_1 = arith.constant 0 : i32
    return %c0_i32, %c0_i32_0 : i32, i32
  }
  func.func @transform_8(%arg0: i32) -> (i32, i32) {
    %c0_i32 = arith.constant 0 : i32
    %c0_i32_0 = arith.constant 0 : i32
    %c0_i32_1 = arith.constant 0 : i32
    return %c0_i32, %c0_i32_0 : i32, i32
  }
  func.func @transform_9(%arg0: i32) -> (i32, i32, i32) {
    %c0_i32 = arith.constant 0 : i32
    %c0_i32_0 = arith.constant 0 : i32
    %c0_i32_1 = arith.constant 0 : i32
    return %arg0, %c0_i32, %c0_i32_0 : i32, i32, i32
  }
  func.func @transform_10(%arg0: i32) -> (i32, i32, i32) {
    %c0_i32 = arith.constant 0 : i32
    %c0_i32_0 = arith.constant 0 : i32
    %c0_i32_1 = arith.constant 0 : i32
    return %arg0, %c0_i32, %c0_i32_0 : i32, i32, i32
  }
}

</mosaic_0001>

<bundles_post_ra>
// kernel: pnet_forward.1
= control target key start
LH: loop header
LB: loop body
LE: loop exit
PB: predicated region body
PF: predicated region fallthrough
CT: control target
= control target key end

     0   :  { %s4168_s13 = smov 0   ;;  %s5536_s0 = inlined_call_operand.vmem [shape: f32[2,18,18,3], index: 0, kind: input, shape index: {}]   ;;  %s5537_s1 = inlined_call_operand.vmem [shape: bf16[27,10], index: 1, kind: input, shape index: {}]   ;;  %s5538_s2 = inlined_call_operand.vmem [shape: f32[2,10], index: 2, kind: input, shape index: {}]   ;;  %s5539_s3 = inlined_call_operand.vmem [shape: bf16[90,16], index: 3, kind: input, shape index: {}]   ;;  %s5540_s4 = inlined_call_operand.vmem [shape: f32[2,16], index: 4, kind: input, shape index: {}]   ;;  %s5541_s5 = inlined_call_operand.vmem [shape: bf16[144,32], index: 5, kind: input, shape index: {}]   ;;  %s5542_s6 = inlined_call_operand.vmem [shape: f32[2,32], index: 6, kind: input, shape index: {}]   ;;  %s5543_s7 = inlined_call_operand.vmem [shape: bf16[32,5], index: 7, kind: input, shape index: {}]   ;;  %s5544_s8 = inlined_call_operand.vmem [shape: f32[1,5], index: 8, kind: input, shape index: {}]   ;;  %s5545_s9 = inlined_call_operand.vmem [shape: f32[2,9,4], index: 9, kind: output, shape index: {0}]   ;;  %s5546_s10 = inlined_call_operand.vmem [shape: f32[2,9,1], index: 10, kind: output, shape index: {1}]  }
   0x1 LB: > { %s3581_s14 = sadd.s32 4294967295, %s4084_s13   ;;  %p3585_p0 = scmp.ge.s32.totalorder %s4084_s13, 1  ;;  %s4084_s13 = sphi %s4168_s13, %s21_s13  }
   0x2   : > { %p315_p1 = scmp.lt.s32.totalorder %s4084_s13, 3 }
   0x4   : > { %p316_p2 = pnand %p3585_p0, %p315_p1 }
   0x5   : > { %p358_p3 = scmp.lt.s32.totalorder (!%p316_p2), %s3581_s14, 1  ;;  %s4086_s19 = smov (!%p316_p2), 6   ;;  %vm376_vm0 = vcmask (!%p316_p2), 23552   ;;  %v4049_v28 = vld [vmem:[%s5537_s1] sm:$0xff] (!%p316_p2)   ;;  %vm5547_vm1 = vcmask (!%p316_p2), 1044480   ;;  %vm2118_vm2 = vcmask (!%p316_p2), 1045504  }
   0x6   : > { %319 = sbr.rel (%p316_p2) target bundleno = 2016 (0x7e0), region = 56  ;;  %s4087_s20 = smov (!%p316_p2), 3   ;;  %3952 = vmatprep.subr.bf16.mxu0 (!%p316_p2), %v4049_v28  ;;  %v4050_v29 = vld [vmem:[%s5537_s1 + $0x8] sm:$0x3f] (!%p316_p2)   ;;  %v4093_v30 = vmov (!%p316_p2), 65535   ;;  %vm5550_vm3 = vcmask (!%p316_p2), 48152  }
   0x7   : > { %s4088_s21 = smov (!%p316_p2), 9   ;;  %s4089_s22 = smov (!%p316_p2), 12   ;;  %v2119_v31 = vsel (!%p316_p2), %vm5547_vm1, 4294967295, %v4093_v30  ;;  %3953 = vmatpush3.bf16.msra.mxu0 (!%p316_p2), %v4049_v28  ;;  %vm5549_vm4 = vcmask (!%p316_p2), 72752   ;;  %vm5551_vm5 = vcmask (!%p316_p2), 97352   ;;  %vm429_vm6 = vcmask (!%p316_p2), 121952  }
   0x8   : > { %s4090_s23 = smov (!%p316_p2), 15   ;;  %s4091_s24 = smov (!%p316_p2), 18   ;;  %v2120_v32 = vsel (!%p316_p2), %vm2118_vm2, %v2119_v31, 0  ;;  %vm442_vm7 = vcmask (!%p316_p2), 146552   ;;  %vm456_vm8 = vcmask (!%p316_p2), 171152   ;;  %vm469_vm9 = vcmask (!%p316_p2), 195752  }
   0x9   : > { %s4092_s25 = smov (!%p316_p2), 21   ;;  %v2122_v33 = vand.u32 (!%p316_p2), %v4050_v29, %v2120_v32  ;;  %s4094_s30 = smov (!%p316_p2), 24   ;;  %vm5554_vm10 = vcmask (!%p316_p2), 220352   ;;  %vm5552_vm11 = vcmask (!%p316_p2), 220160   ;;  %vm2386_vm13 = vcmask (!%p316_p2), 80896  }
   0xa   : > { %vm5553_vm1 = vcmask (!%p316_p2), 79878   ;;  %s4095_s17 = smov (!%p316_p2), 10   ;;  %s4100_s26 = smov (!%p316_p2), 60  }
   0xb   : > { %3954 = vmatprep.subr.bf16.mxu0 (!%p316_p2), %v2122_v33  ;;  %s4101_s27 = smov (!%p316_p2), 70   ;;  %s4104_s28 = smov (!%p316_p2), 16  }
   0xc   : > { %3955 = vmatpush3.bf16.msra.mxu0 (!%p316_p2), %v2122_v33  ;;  %s4106_s12 = smov (!%p316_p2), 64   ;;  %s4108_s16 = smov (!%p316_p2), 96  }
   0xd   : > { %s5597_s14 = smov (!%p358_p3, %s3581_s14), 1 }
   0xe   : > { %s4013_s15 = smul.u32 432, %s5597_s14 }
  0x10   : > { %s4182_s18 = scalar_lea.vmem %s5536_s0, %s4013_s15  ;;  %s4107_s15 = smov 48  }
  0x11   : > { %v392_v0 = vld [vmem:[%s4182_s18 + $0x2] sm:$0xff]  ;;  %v393_v2 = vld [vmem:[%s4182_s18 + $0xa] sm:$0xff]  ;;  %v3591_v5 = vld [vmem:[%s4182_s18 + $0x18] sm:$0xff] }
  0x12   : > { %v379_v1 = vld [vmem:[%s4182_s18 + $0x1] sm:$0xff]  ;;  %396 = vrot.lane.b32.xlu1 %v392_v0, %s4086_s19  ;;  %v380_v3 = vld [vmem:[%s4182_s18 + $0x9] sm:$0xff]  ;;  %v3610_v6 = vld [vmem:[%s4182_s18 + $0x38] sm:$0xff]  ;;  %487 = vst.msk [vmem:[#allocation2 + $0x10] sm:$0xff] %vm376_vm0, %v3591_v5 }
  0x13   : > { %383 = vrot.lane.b32.xlu0 %v379_v1, %s4087_s20  ;;  %v3592_v4 = vld [vmem:[%s4182_s18 + $0x20] sm:$0xff]  ;;  %v3609_v7 = vld [vmem:[%s4182_s18 + $0x30] sm:$0xff]  ;;  %589 = vst.msk [vmem:[#allocation2 + $0x28] sm:$0xff] %vm376_vm0, %v3610_v6  ;;  %v4206_v11 = vld [vmem:[%s4182_s18 + $0x48] sm:$0xff] }
  0x14   : > { %488 = vst.msk [vmem:[#allocation2 + $0x18] sm:$0xff] %vm376_vm0, %v3592_v4  ;;  %v3606_v8 = vld [vmem:[%s4182_s18 + $0x21] sm:$0xff]  ;;  %588 = vst.msk [vmem:[#allocation2 + $0x20] sm:$0xff] %vm376_vm0, %v3609_v7  ;;  %v3605_v9 = vld [vmem:[%s4182_s18 + $0x19] sm:$0xff] }
  0x15   : > { %v4203_v10 = vld [vmem:[%s4182_s18 + $0x50] sm:$0xff]  ;;  %689 = vst.msk [vmem:[#allocation2 + $0x30] sm:$0xff] %vm376_vm0, %v4206_v11  ;;  %v4213_v12 = vld [vmem:[%s4182_s18 + $0x68] sm:$0xff]  ;;  %v4216_v13 = vld [vmem:[%s4182_s18 + $0x60] sm:$0xff] }
  0x16   : > { %398 = vrot.lane.b32.xlu1 %v393_v2, %s4086_s19  ;;  %690 = vst.msk [vmem:[#allocation2 + $0x38] sm:$0xff] %vm376_vm0, %v4203_v10  ;;  %791 = vst.msk [vmem:[#allocation2 + $0x48] sm:$0xff] %vm376_vm0, %v4213_v12  ;;  %v4225_v14 = vld [vmem:[%s4182_s18 + $0x80] sm:$0xff]  ;;  %v4228_v15 = vld [vmem:[%s4182_s18 + $0x78] sm:$0xff] }
  0x17   : > { %385 = vrot.lane.b32.xlu0 %v380_v3, %s4087_s20  ;;  %790 = vst.msk [vmem:[#allocation2 + $0x40] sm:$0xff] %vm376_vm0, %v4216_v13  ;;  %v374_v16 = vld [vmem:[%s4182_s18] sm:$0xff]  ;;  %v375_v17 = vld [vmem:[%s4182_s18 + $0x8] sm:$0xff]  ;;  %892 = vst.msk [vmem:[#allocation2 + $0x58] sm:$0xff] %vm376_vm0, %v4225_v14 }
  0x18   : > { %891 = vst.msk [vmem:[#allocation2 + $0x50] sm:$0xff] %vm376_vm0, %v4228_v15  ;;  %v3608_v18 = vld [vmem:[%s4182_s18 + $0x22] sm:$0xff]  ;;  %v3607_v19 = vld [vmem:[%s4182_s18 + $0x1a] sm:$0xff]  ;;  %377 = vst.msk [vmem:[#allocation2] sm:$0xff] %vm376_vm0, %v374_v16 }
  0x19   : > { %378 = vst.msk [vmem:[#allocation2 + $0x8] sm:$0xff] %vm376_vm0, %v375_v17  ;;  %v4247_v20 = vld [vmem:[%s4182_s18 + $0x98] sm:$0xff]  ;;  %v4250_v21 = vld [vmem:[%s4182_s18 + $0x90] sm:$0xff]  ;;  %v4276_v27 = vld [vmem:[%s4182_s18 + $0xa8] sm:$0xff] }
  0x1a   : > { %495 = vrot.lane.b32.xlu1 %v3606_v8, %s4087_s20  ;;  %993 = vst.msk [vmem:[#allocation2 + $0x68] sm:$0xff] %vm376_vm0, %v4247_v20  ;;  %992 = vst.msk [vmem:[#allocation2 + $0x60] sm:$0xff] %vm376_vm0, %v4250_v21  ;;  %v3612_v22 = vld [vmem:[%s4182_s18 + $0x39] sm:$0xff]  ;;  %v3611_v23 = vld [vmem:[%s4182_s18 + $0x31] sm:$0xff] }
  0x1b   : > { %493 = vrot.lane.b32.xlu0 %v3605_v9, %s4087_s20  ;;  %v3614_v24 = vld [vmem:[%s4182_s18 + $0x3a] sm:$0xff]  ;;  %v3613_v25 = vld [vmem:[%s4182_s18 + $0x32] sm:$0xff]  ;;  %1093 = vst.msk [vmem:[#allocation2 + $0x70] sm:$0xff] %vm376_vm0, %v4276_v27  ;;  %v3617_v35 = vld [vmem:[%s4182_s18 + $0x49] sm:$0xff] }
  0x1c   : > { %v4273_v26 = vld [vmem:[%s4182_s18 + $0xb0] sm:$0xff]  ;;  %v4319_v38 = vld [vmem:[%s4182_s18 + $0xc8] sm:$0xff]  ;;  %v4322_v39 = vld [vmem:[%s4182_s18 + $0xc0] sm:$0xff] }
  0x1d   : > { %1094 = vst.msk [vmem:[#allocation2 + $0x78] sm:$0xff] %vm376_vm0, %v4273_v26  ;;  %v3618_v34 = vld [vmem:[%s4182_s18 + $0x51] sm:$0xff]  ;;  %1195 = vst.msk [vmem:[#allocation2 + $0x88] sm:$0xff] %vm376_vm0, %v4319_v38  ;;  %v3648_v40 = vld [vmem:[%s4182_s18 + $0x69] sm:$0xff] }
  0x1e   : > { %412 = vrot.lane.b32.xlu1 %v3592_v4, %s4088_s21  ;;  %v3620_v36 = vld [vmem:[%s4182_s18 + $0x52] sm:$0xff]  ;;  %v3619_v37 = vld [vmem:[%s4182_s18 + $0x4a] sm:$0xff]  ;;  %1194 = vst.msk [vmem:[#allocation2 + $0x80] sm:$0xff] %vm376_vm0, %v4322_v39  ;;  %v3647_v41 = vld [vmem:[%s4182_s18 + $0x61] sm:$0xff] }
  0x1f   : > { %410 = vrot.lane.b32.xlu0 %v3591_v5, %s4088_s21  ;;  %v3650_v42 = vld [vmem:[%s4182_s18 + $0x6a] sm:$0xff]  ;;  %v3649_v43 = vld [vmem:[%s4182_s18 + $0x62] sm:$0xff]  ;;  %v4352_v45 = vld [vmem:[%s4182_s18 + $0xd8] sm:$0xff] }
  0x20   : > { %v4349_v44 = vld [vmem:[%s4182_s18 + $0xe0] sm:$0xff]  ;;  %1295 = vst.msk [vmem:[#allocation2 + $0x90] sm:$0xff] %vm376_vm0, %v4352_v45  ;;  %v4446_v17 = vld [vmem:[%s4182_s18 + $0x92] sm:$0xff]  ;;  %v4466_v30 = vld [vmem:[%s4182_s18 + $0x108] sm:$0xff] }
  0x21   : > { %1296 = vst.msk [vmem:[#allocation2 + $0x98] sm:$0xff] %vm376_vm0, %v4349_v44  ;;  %v3654_v48 = vld [vmem:[%s4182_s18 + $0x81] sm:$0xff]  ;;  %v3653_v49 = vld [vmem:[%s4182_s18 + $0x79] sm:$0xff]  ;;  %v4463_v29 = vld [vmem:[%s4182_s18 + $0x110] sm:$0xff] }
  0x22   : > { %507 = vrot.lane.b32.xlu1 %v3608_v18, %s4086_s19  ;;  %v3656_v52 = vld [vmem:[%s4182_s18 + $0x82] sm:$0xff]  ;;  %v3655_v53 = vld [vmem:[%s4182_s18 + $0x7a] sm:$0xff]  ;;  %1498 = vst.msk [vmem:[#allocation2 + $0xb8] sm:$0xff] %vm376_vm0, %v4463_v29  ;;  %1497 = vst.msk [vmem:[#allocation2 + $0xb0] sm:$0xff] %vm376_vm0, %v4466_v30 }
  0x23   : > { %505 = vrot.lane.b32.xlu0 %v3607_v19, %s4086_s19  ;;  %v4443_v16 = vld [vmem:[%s4182_s18 + $0x9a] sm:$0xff]  ;;  %v3690_v33 = vld [vmem:[%s4182_s18 + $0xb1] sm:$0xff] }
  0x26   : > { %425 = vrot.lane.b32.xlu1 %v3606_v8, %s4089_s22 }
  0x27   : > { %423 = vrot.lane.b32.xlu0 %v3605_v9, %s4089_s22 }
  0x2a   : > { %519 = vrot.lane.b32.xlu1 %v3610_v6, %s4088_s21 }
  0x2b   : > { %517 = vrot.lane.b32.xlu0 %v3609_v7, %s4088_s21 }
  0x2e   : > { %438 = vrot.lane.b32.xlu1 %v3608_v18, %s4090_s23 }
  0x2f   : > { %436 = vrot.lane.b32.xlu0 %v3607_v19, %s4090_s23 }
  0x32   : > { %531 = vrot.lane.b32.xlu1 %v3612_v22, %s4089_s22 }
  0x33   : > { %529 = vrot.lane.b32.xlu0 %v3611_v23, %s4089_s22 }
  0x36   : > { %452 = vrot.lane.b32.xlu1 %v3610_v6, %s4091_s24  ;;  %v4407_v6 = vld [vmem:[%s4182_s18 + $0xf8] sm:$0xff] }
  0x37   : > { %450 = vrot.lane.b32.xlu0 %v3609_v7, %s4091_s24  ;;  %v4410_v7 = vld [vmem:[%s4182_s18 + $0xf0] sm:$0xff]  ;;  %1397 = vst.msk [vmem:[#allocation2 + $0xa8] sm:$0xff] %vm376_vm0, %v4407_v6 }
  0x38   : > { %1396 = vst.msk [vmem:[#allocation2 + $0xa0] sm:$0xff] %vm376_vm0, %v4410_v7 }
  0x3a   : > { %543 = vrot.lane.b32.xlu1 %v3614_v24, %s4090_s23 }
  0x3b   : > { %541 = vrot.lane.b32.xlu0 %v3613_v25, %s4090_s23 }
  0x3e   : > { %465 = vrot.lane.b32.xlu1 %v3612_v22, %s4092_s25 }
  0x3f   : > { %463 = vrot.lane.b32.xlu0 %v3611_v23, %s4092_s25 }
  0x42   : > { %556 = vrot.lane.b32.xlu1 %v4203_v10, %s4091_s24 }
  0x43   : > { %554 = vrot.lane.b32.xlu0 %v4206_v11, %s4091_s24 }
  0x46   : > { %478 = vrot.lane.b32.xlu1 %v3614_v24, %s4094_s30 }
  0x47   : > { %476 = vrot.lane.b32.xlu0 %v3613_v25, %s4094_s30 }
  0x4a   : > { %568 = vrot.lane.b32.xlu1 %v3618_v34, %s4092_s25 }
  0x4b   : > { %566 = vrot.lane.b32.xlu0 %v3617_v35, %s4092_s25 }
  0x4e   : > { %580 = vrot.lane.b32.xlu1 %v3620_v36, %s4094_s30 }
  0x4f   : > { %578 = vrot.lane.b32.xlu0 %v3619_v37, %s4094_s30 }
  0x52   : > { %596 = vrot.lane.b32.xlu1 %v3612_v22, %s4087_s20 }
  0x53   : > { %594 = vrot.lane.b32.xlu0 %v3611_v23, %s4087_s20 }
  0x56   : > { %608 = vrot.lane.b32.xlu1 %v3614_v24, %s4086_s19 }
  0x57   : > { %606 = vrot.lane.b32.xlu0 %v3613_v25, %s4086_s19 }
  0x5a   : > { %697 = vrot.lane.b32.xlu1 %v3618_v34, %s4087_s20 }
  0x5b   : > { %695 = vrot.lane.b32.xlu0 %v3617_v35, %s4087_s20 }
  0x5e   : > { %620 = vrot.lane.b32.xlu1 %v4203_v10, %s4088_s21  ;;  %v4425_v10 = vld [vmem:[%s4182_s18 + $0x99] sm:$0xff] }
  0x5f   : > { %618 = vrot.lane.b32.xlu0 %v4206_v11, %s4088_s21  ;;  %v4428_v11 = vld [vmem:[%s4182_s18 + $0x91] sm:$0xff] }
  0x62   : > { %709 = vrot.lane.b32.xlu1 %v3620_v36, %s4086_s19 }
  0x63   : > { %707 = vrot.lane.b32.xlu0 %v3619_v37, %s4086_s19 }
  0x66   : > { %632 = vrot.lane.b32.xlu1 %v3618_v34, %s4089_s22  ;;  %v3689_v34 = vld [vmem:[%s4182_s18 + $0xa9] sm:$0xff] }
  0x67   : > { %630 = vrot.lane.b32.xlu0 %v3617_v35, %s4089_s22 }
  0x6a   : > { %721 = vrot.lane.b32.xlu1 %v4213_v12, %s4088_s21 }
  0x6b   : > { %719 = vrot.lane.b32.xlu0 %v4216_v13, %s4088_s21 }
  0x6e   : > { %644 = vrot.lane.b32.xlu1 %v3620_v36, %s4090_s23 }
  0x6f   : > { %642 = vrot.lane.b32.xlu0 %v3619_v37, %s4090_s23 }
  0x72   : > { %733 = vrot.lane.b32.xlu1 %v3648_v40, %s4089_s22 }
  0x73   : > { %731 = vrot.lane.b32.xlu0 %v3647_v41, %s4089_s22 }
  0x76   : > { %657 = vrot.lane.b32.xlu1 %v4213_v12, %s4091_s24 }
  0x77   : > { %655 = vrot.lane.b32.xlu0 %v4216_v13, %s4091_s24 }
  0x7a   : > { %745 = vrot.lane.b32.xlu1 %v3650_v42, %s4090_s23 }
  0x7b   : > { %743 = vrot.lane.b32.xlu0 %v3649_v43, %s4090_s23 }
  0x7e   : > { %669 = vrot.lane.b32.xlu1 %v3648_v40, %s4092_s25 }
  0x7f   : > { %667 = vrot.lane.b32.xlu0 %v3647_v41, %s4092_s25 }
  0x82   : > { %758 = vrot.lane.b32.xlu1 %v4225_v14, %s4091_s24 }
  0x83   : > { %756 = vrot.lane.b32.xlu0 %v4228_v15, %s4091_s24 }
  0x84   : > { %v397_v46 = vpop.permute.xlu1 %396 }
  0x85   : > { %v384_v47 = vpop.permute.xlu0 %383 }
  0x86   : > { %390 = vst.msk [vmem:[#allocation2] sm:$0xff] %vm5550_vm3, %v384_v47  ;;  %681 = vrot.lane.b32.xlu1 %v3650_v42, %s4094_s30 }
  0x87   : > { %679 = vrot.lane.b32.xlu0 %v3649_v43, %s4094_s30  ;;  %403 = vst.msk [vmem:[#allocation2] sm:$0xff] %vm5549_vm4, %v397_v46 }
  0x88   : > { %v399_v50 = vpop.permute.xlu1 %398 }
  0x89   : > { %v386_v51 = vpop.permute.xlu0 %385 }
  0x8a   : > { %391 = vst.msk [vmem:[#allocation2 + $0x8] sm:$0xff] %vm5550_vm3, %v386_v51  ;;  %770 = vrot.lane.b32.xlu1 %v3654_v48, %s4092_s25 }
  0x8b   : > { %768 = vrot.lane.b32.xlu0 %v3653_v49, %s4092_s25  ;;  %404 = vst.msk [vmem:[#allocation2 + $0x8] sm:$0xff] %vm5549_vm4, %v399_v50 }
  0x8c   : > { %v496_v54 = vpop.permute.xlu1 %495 }
  0x8d   : > { %v494_v55 = vpop.permute.xlu0 %493  ;;  %500 = vst.msk [vmem:[#allocation2 + $0x18] sm:$0xff] %vm5550_vm3, %v496_v54 }
  0x8e   : > { %499 = vst.msk [vmem:[#allocation2 + $0x10] sm:$0xff] %vm5550_vm3, %v494_v55  ;;  %782 = vrot.lane.b32.xlu1 %v3656_v52, %s4094_s30 }
  0x8f   : > { %780 = vrot.lane.b32.xlu0 %v3655_v53, %s4094_s30 }
  0x90   : > { %v413_v56 = vpop.permute.xlu1 %412 }
  0x91   : > { %v411_v57 = vpop.permute.xlu0 %410  ;;  %418 = vst.msk [vmem:[#allocation2 + $0x8] sm:$0xff] %vm5551_vm5, %v413_v56 }
  0x92   : > { %417 = vst.msk [vmem:[#allocation2] sm:$0xff] %vm5551_vm5, %v411_v57  ;;  %798 = vrot.lane.b32.xlu1 %v3648_v40, %s4087_s20 }
  0x93   : > { %796 = vrot.lane.b32.xlu0 %v3647_v41, %s4087_s20 }
  0x94   : > { %v508_v58 = vpop.permute.xlu1 %507 }
  0x95   : > { %v506_v59 = vpop.permute.xlu0 %505  ;;  %512 = vst.msk [vmem:[#allocation2 + $0x18] sm:$0xff] %vm5549_vm4, %v508_v58 }
  0x96   : > { %511 = vst.msk [vmem:[#allocation2 + $0x10] sm:$0xff] %vm5549_vm4, %v506_v59  ;;  %810 = vrot.lane.b32.xlu1 %v3650_v42, %s4086_s19  ;;  %v3692_v42 = vld [vmem:[%s4182_s18 + $0xb2] sm:$0xff] }
  0x97   : > { %808 = vrot.lane.b32.xlu0 %v3649_v43, %s4086_s19  ;;  %v3691_v43 = vld [vmem:[%s4182_s18 + $0xaa] sm:$0xff] }
  0x98   : > { %v426_v60 = vpop.permute.xlu1 %425 }
  0x99   : > { %v424_v61 = vpop.permute.xlu0 %423  ;;  %431 = vst.msk [vmem:[#allocation2 + $0x8] sm:$0xff] %vm429_vm6, %v426_v60  ;;  %v4529_v60 = vld [vmem:[%s4182_s18 + $0x128] sm:$0xff] }
  0x9a   : > { %430 = vst.msk [vmem:[#allocation2] sm:$0xff] %vm429_vm6, %v424_v61  ;;  %899 = vrot.lane.b32.xlu1 %v3654_v48, %s4087_s20  ;;  %v4532_v61 = vld [vmem:[%s4182_s18 + $0x120] sm:$0xff] }
  0x9b   : > { %897 = vrot.lane.b32.xlu0 %v3653_v49, %s4087_s20  ;;  %1599 = vst.msk [vmem:[#allocation2 + $0xc8] sm:$0xff] %vm376_vm0, %v4529_v60  ;;  %1598 = vst.msk [vmem:[#allocation2 + $0xc0] sm:$0xff] %vm376_vm0, %v4532_v61 }
  0x9c   : > { %v520_v62 = vpop.permute.xlu1 %519 }
  0x9d   : > { %v518_v63 = vpop.permute.xlu0 %517  ;;  %524 = vst.msk [vmem:[#allocation2 + $0x18] sm:$0xff] %vm5551_vm5, %v520_v62 }
  0x9e   : > { %523 = vst.msk [vmem:[#allocation2 + $0x10] sm:$0xff] %vm5551_vm5, %v518_v63  ;;  %822 = vrot.lane.b32.xlu1 %v4225_v14, %s4088_s21 }
  0x9f   : > { %820 = vrot.lane.b32.xlu0 %v4228_v15, %s4088_s21 }
  0xa0   : > { %v439_v0 = vpop.permute.xlu1 %438 }
  0xa1   : > { %v437_v1 = vpop.permute.xlu0 %436  ;;  %444 = vst.msk [vmem:[#allocation2 + $0x8] sm:$0xff] %vm442_vm7, %v439_v0  ;;  %v4547_v0 = vld [vmem:[%s4182_s18 + $0xc9] sm:$0xff] }
  0xa2   : > { %443 = vst.msk [vmem:[#allocation2] sm:$0xff] %vm442_vm7, %v437_v1  ;;  %911 = vrot.lane.b32.xlu1 %v3656_v52, %s4086_s19  ;;  %v4550_v1 = vld [vmem:[%s4182_s18 + $0xc1] sm:$0xff] }
  0xa3   : > { %909 = vrot.lane.b32.xlu0 %v3655_v53, %s4086_s19 }
  0xa4   : > { %v532_v2 = vpop.permute.xlu1 %531 }
  0xa5   : > { %v530_v3 = vpop.permute.xlu0 %529  ;;  %536 = vst.msk [vmem:[#allocation2 + $0x18] sm:$0xff] %vm429_vm6, %v532_v2 }
  0xa6   : > { %535 = vst.msk [vmem:[#allocation2 + $0x10] sm:$0xff] %vm429_vm6, %v530_v3  ;;  %834 = vrot.lane.b32.xlu1 %v3654_v48, %s4089_s22 }
  0xa7   : > { %832 = vrot.lane.b32.xlu0 %v3653_v49, %s4089_s22 }
  0xa8   : > { %v453_v4 = vpop.permute.xlu1 %452 }
  0xa9   : > { %v451_v5 = vpop.permute.xlu0 %450  ;;  %458 = vst.msk [vmem:[#allocation2 + $0x8] sm:$0xff] %vm456_vm8, %v453_v4 }
  0xaa   : > { %457 = vst.msk [vmem:[#allocation2] sm:$0xff] %vm456_vm8, %v451_v5  ;;  %923 = vrot.lane.b32.xlu1 %v4247_v20, %s4088_s21 }
  0xab   : > { %921 = vrot.lane.b32.xlu0 %v4250_v21, %s4088_s21 }
  0xac   : > { %v544_v8 = vpop.permute.xlu1 %543 }
  0xad   : > { %v542_v9 = vpop.permute.xlu0 %541  ;;  %548 = vst.msk [vmem:[#allocation2 + $0x18] sm:$0xff] %vm442_vm7, %v544_v8  ;;  %v4565_v8 = vld [vmem:[%s4182_s18 + $0xca] sm:$0xff] }
  0xae   : > { %547 = vst.msk [vmem:[#allocation2 + $0x10] sm:$0xff] %vm442_vm7, %v542_v9  ;;  %846 = vrot.lane.b32.xlu1 %v3656_v52, %s4090_s23  ;;  %v4568_v9 = vld [vmem:[%s4182_s18 + $0xc2] sm:$0xff] }
  0xaf   : > { %844 = vrot.lane.b32.xlu0 %v3655_v53, %s4090_s23 }
  0xb0   : > { %v466_v12 = vpop.permute.xlu1 %465 }
  0xb1   : > { %v464_v13 = vpop.permute.xlu0 %463  ;;  %471 = vst.msk [vmem:[#allocation2 + $0x8] sm:$0xff] %vm469_vm9, %v466_v12 }
  0xb2   : > { %470 = vst.msk [vmem:[#allocation2] sm:$0xff] %vm469_vm9, %v464_v13  ;;  %935 = vrot.lane.b32.xlu1 %v4425_v10, %s4089_s22 }
  0xb3   : > { %933 = vrot.lane.b32.xlu0 %v4428_v11, %s4089_s22 }
  0xb4   : > { %v557_v14 = vpop.permute.xlu1 %556 }
  0xb5   : > { %v555_v15 = vpop.permute.xlu0 %554  ;;  %561 = vst.msk [vmem:[#allocation2 + $0x18] sm:$0xff] %vm456_vm8, %v557_v14 }
  0xb6   : > { %560 = vst.msk [vmem:[#allocation2 + $0x10] sm:$0xff] %vm456_vm8, %v555_v15  ;;  %859 = vrot.lane.b32.xlu1 %v4247_v20, %s4091_s24 }
  0xb7   : > { %857 = vrot.lane.b32.xlu0 %v4250_v21, %s4091_s24 }
  0xb8   : > { %v479_v18 = vpop.permute.xlu1 %478 }
  0xb9   : > { %v477_v19 = vpop.permute.xlu0 %476  ;;  %484 = vst.msk [vmem:[#allocation2 + $0x8] sm:$0xff] %vm5554_vm10, %v479_v18  ;;  %v4588_v18 = vld [vmem:[%s4182_s18 + $0x138] sm:$0xff] }
  0xba   : > { %483 = vst.msk [vmem:[#allocation2] sm:$0xff] %vm5554_vm10, %v477_v19  ;;  %947 = vrot.lane.b32.xlu1 %v4443_v16, %s4090_s23 }
  0xbb   : > { %945 = vrot.lane.b32.xlu0 %v4446_v17, %s4090_s23  ;;  %1699 = vst.msk [vmem:[#allocation2 + $0xd0] sm:$0xff] %vm376_vm0, %v4588_v18 }
  0xbc   : > { %v569_v20 = vpop.permute.xlu1 %568 }
  0xbd   : > { %v567_v21 = vpop.permute.xlu0 %566  ;;  %573 = vst.msk [vmem:[#allocation2 + $0x18] sm:$0xff] %vm469_vm9, %v569_v20 }
  0xbe   : > { %572 = vst.msk [vmem:[#allocation2 + $0x10] sm:$0xff] %vm469_vm9, %v567_v21  ;;  %871 = vrot.lane.b32.xlu1 %v4425_v10, %s4092_s25  ;;  %v3726_v21 = vld [vmem:[%s4182_s18 + $0xe1] sm:$0xff] }
  0xbf   : > { %869 = vrot.lane.b32.xlu0 %v4428_v11, %s4092_s25 }
  0xc0   : > { %v581_v22 = vpop.permute.xlu1 %580  ;;  %v2001_v25 = vld [vmem:[#allocation2 + $0x8] sm:$0xff] }
  0xc1   : > { %v579_v23 = vpop.permute.xlu0 %578  ;;  %v2000_v24 = vld [vmem:[#allocation2] sm:$0xff]  ;;  %585 = vst.msk [vmem:[#allocation2 + $0x18] sm:$0xff] %vm5554_vm10, %v581_v22 }
  0xc2   : > { %584 = vst.msk [vmem:[#allocation2 + $0x10] sm:$0xff] %vm5554_vm10, %v579_v23  ;;  %v2032_v28 = vpack.c.bf16 %v2001_v25, %v2000_v24  ;;  %960 = vrot.lane.b32.xlu1 %v4273_v26, %s4091_s24  ;;  %v3725_v22 = vld [vmem:[%s4182_s18 + $0xd9] sm:$0xff] }
  0xc3   : > { %958 = vrot.lane.b32.xlu0 %v4276_v27, %s4091_s24 }
  0xc4   : > { %3956 = vmatprep.mubr.msk.bf16.mxu0 %vm5552_vm11, %v2032_v28  ;;  %v597_v31 = vpop.permute.xlu1 %596 }
  0xc5   : > { %v595_v32 = vpop.permute.xlu0 %594  ;;  %601 = vst.msk [vmem:[#allocation2 + $0x28] sm:$0xff] %vm5550_vm3, %v597_v31 }
  0xc6   : > { %600 = vst.msk [vmem:[#allocation2 + $0x20] sm:$0xff] %vm5550_vm3, %v595_v32  ;;  %883 = vrot.lane.b32.xlu1 %v4443_v16, %s4094_s30  ;;  %v3728_v32 = vld [vmem:[%s4182_s18 + $0xe2] sm:$0xff] }
  0xc7   : > { %881 = vrot.lane.b32.xlu0 %v4446_v17, %s4094_s30 }
  0xc8   : > { %v609_v35 = vpop.permute.xlu1 %608  ;;  %v2003_v40 = vld [vmem:[#allocation2 + $0x18] sm:$0xff] }
  0xc9   : > { %v607_v36 = vpop.permute.xlu0 %606  ;;  %v2002_v37 = vld [vmem:[#allocation2 + $0x10] sm:$0xff]  ;;  %613 = vst.msk [vmem:[#allocation2 + $0x28] sm:$0xff] %vm5549_vm4, %v609_v35 }
  0xca   : > { %612 = vst.msk [vmem:[#allocation2 + $0x20] sm:$0xff] %vm5549_vm4, %v607_v36  ;;  %v2033_v41 = vpack.c.bf16 %v2003_v40, %v2002_v37  ;;  %972 = vrot.lane.b32.xlu1 %v3690_v33, %s4092_s25 }
  0xcb   : > { %970 = vrot.lane.b32.xlu0 %v3689_v34, %s4092_s25 }
  0xcc   : > { %3957 = vmatmul.mubr.msk.bf16.vlgmr.msra.gmra.mrb[0].mxu0 %vm5552_vm11, %v2033_v41  ;;  %v698_v46 = vpop.permute.xlu1 %697 }
  0xcd   : > { %v696_v47 = vpop.permute.xlu0 %695  ;;  %702 = vst.msk [vmem:[#allocation2 + $0x38] sm:$0xff] %vm5550_vm3, %v698_v46 }
  0xce   : > { %701 = vst.msk [vmem:[#allocation2 + $0x30] sm:$0xff] %vm5550_vm3, %v696_v47  ;;  %984 = vrot.lane.b32.xlu1 %v3692_v42, %s4094_s30 }
  0xcf   : > { %982 = vrot.lane.b32.xlu0 %v3691_v43, %s4094_s30 }
  0xd0   : > { %v621_v48 = vpop.permute.xlu1 %620 }
  0xd1   : > { %v619_v49 = vpop.permute.xlu0 %618  ;;  %625 = vst.msk [vmem:[#allocation2 + $0x28] sm:$0xff] %vm5551_vm5, %v621_v48 }
  0xd2   : > { %624 = vst.msk [vmem:[#allocation2 + $0x20] sm:$0xff] %vm5551_vm5, %v619_v49  ;;  %1000 = vrot.lane.b32.xlu1 %v4425_v10, %s4087_s20 }
  0xd3   : > { %998 = vrot.lane.b32.xlu0 %v4428_v11, %s4087_s20 }
  0xd4   : > { %v710_v50 = vpop.permute.xlu1 %709 }
  0xd5   : > { %v708_v51 = vpop.permute.xlu0 %707  ;;  %714 = vst.msk [vmem:[#allocation2 + $0x38] sm:$0xff] %vm5549_vm4, %v710_v50 }
  0xd6   : > { %713 = vst.msk [vmem:[#allocation2 + $0x30] sm:$0xff] %vm5549_vm4, %v708_v51  ;;  %1012 = vrot.lane.b32.xlu1 %v4443_v16, %s4086_s19 }
  0xd7   : > { %1010 = vrot.lane.b32.xlu0 %v4446_v17, %s4086_s19  ;;  %v4585_v17 = vld [vmem:[%s4182_s18 + $0x140] sm:$0xff] }
  0xd8   : > { %v633_v52 = vpop.permute.xlu1 %632  ;;  %1700 = vst.msk [vmem:[#allocation2 + $0xd8] sm:$0xff] %vm376_vm0, %v4585_v17 }
  0xd9   : > { %v631_v53 = vpop.permute.xlu0 %630  ;;  %637 = vst.msk [vmem:[#allocation2 + $0x28] sm:$0xff] %vm429_vm6, %v633_v52  ;;  %v4655_v52 = vld [vmem:[%s4182_s18 + $0x158] sm:$0xff] }
  0xda   : > { %636 = vst.msk [vmem:[#allocation2 + $0x20] sm:$0xff] %vm429_vm6, %v631_v53  ;;  %1101 = vrot.lane.b32.xlu1 %v3690_v33, %s4087_s20  ;;  %v4658_v53 = vld [vmem:[%s4182_s18 + $0x150] sm:$0xff] }
  0xdb   : > { %1099 = vrot.lane.b32.xlu0 %v3689_v34, %s4087_s20  ;;  %1801 = vst.msk [vmem:[#allocation2 + $0xe8] sm:$0xff] %vm376_vm0, %v4655_v52  ;;  %1800 = vst.msk [vmem:[#allocation2 + $0xe0] sm:$0xff] %vm376_vm0, %v4658_v53 }
  0xdc   : > { %v722_v54 = vpop.permute.xlu1 %721 }
  0xdd   : > { %v720_v55 = vpop.permute.xlu0 %719  ;;  %726 = vst.msk [vmem:[#allocation2 + $0x38] sm:$0xff] %vm5551_vm5, %v722_v54 }
  0xde   : > { %725 = vst.msk [vmem:[#allocation2 + $0x30] sm:$0xff] %vm5551_vm5, %v720_v55  ;;  %1024 = vrot.lane.b32.xlu1 %v4273_v26, %s4088_s21 }
  0xdf   : > { %1022 = vrot.lane.b32.xlu0 %v4276_v27, %s4088_s21 }
  0xe0   : > { %v645_v56 = vpop.permute.xlu1 %644 }
  0xe1   : > { %v643_v57 = vpop.permute.xlu0 %642  ;;  %649 = vst.msk [vmem:[#allocation2 + $0x28] sm:$0xff] %vm442_vm7, %v645_v56  ;;  %v4669_v56 = vld [vmem:[%s4182_s18 + $0xf9] sm:$0xff] }
  0xe2   : > { %648 = vst.msk [vmem:[#allocation2 + $0x20] sm:$0xff] %vm442_vm7, %v643_v57  ;;  %1113 = vrot.lane.b32.xlu1 %v3692_v42, %s4086_s19  ;;  %v4672_v57 = vld [vmem:[%s4182_s18 + $0xf1] sm:$0xff] }
  0xe3   : > { %1111 = vrot.lane.b32.xlu0 %v3691_v43, %s4086_s19 }
  0xe4   : > { %v734_v58 = vpop.permute.xlu1 %733 }
  0xe5   : > { %v732_v59 = vpop.permute.xlu0 %731  ;;  %738 = vst.msk [vmem:[#allocation2 + $0x38] sm:$0xff] %vm429_vm6, %v734_v58 }
  0xe6   : > { %737 = vst.msk [vmem:[#allocation2 + $0x30] sm:$0xff] %vm429_vm6, %v732_v59  ;;  %1036 = vrot.lane.b32.xlu1 %v3690_v33, %s4089_s22  ;;  %v3727_v33 = vld [vmem:[%s4182_s18 + $0xda] sm:$0xff] }
  0xe7   : > { %1034 = vrot.lane.b32.xlu0 %v3689_v34, %s4089_s22 }
  0xe8   : > { %v658_v26 = vpop.permute.xlu1 %657 }
  0xe9   : > { %v656_v27 = vpop.permute.xlu0 %655  ;;  %662 = vst.msk [vmem:[#allocation2 + $0x28] sm:$0xff] %vm456_vm8, %v658_v26 }
  0xea   : > { %661 = vst.msk [vmem:[#allocation2 + $0x20] sm:$0xff] %vm456_vm8, %v656_v27  ;;  %1125 = vrot.lane.b32.xlu1 %v4319_v38, %s4088_s21 }
  0xeb   : > { %1123 = vrot.lane.b32.xlu0 %v4322_v39, %s4088_s21 }
  0xec   : > { %v746_v62 = vpop.permute.xlu1 %745 }
  0xed   : > { %v744_v63 = vpop.permute.xlu0 %743  ;;  %750 = vst.msk [vmem:[#allocation2 + $0x38] sm:$0xff] %vm442_vm7, %v746_v62  ;;  %v4687_v62 = vld [vmem:[%s4182_s18 + $0xfa] sm:$0xff] }
  0xee   : > { %749 = vst.msk [vmem:[#allocation2 + $0x30] sm:$0xff] %vm442_vm7, %v744_v63  ;;  %1048 = vrot.lane.b32.xlu1 %v3692_v42, %s4090_s23  ;;  %v4690_v63 = vld [vmem:[%s4182_s18 + $0xf2] sm:$0xff] }
  0xef   : > { %1046 = vrot.lane.b32.xlu0 %v3691_v43, %s4090_s23 }
  0xf0   : > { %v670_v2 = vpop.permute.xlu1 %669 }
  0xf1   : > { %v668_v3 = vpop.permute.xlu0 %667  ;;  %674 = vst.msk [vmem:[#allocation2 + $0x28] sm:$0xff] %vm469_vm9, %v670_v2 }
  0xf2   : > { %673 = vst.msk [vmem:[#allocation2 + $0x20] sm:$0xff] %vm469_vm9, %v668_v3  ;;  %1137 = vrot.lane.b32.xlu1 %v4547_v0, %s4089_s22 }
  0xf3   : > { %1135 = vrot.lane.b32.xlu0 %v4550_v1, %s4089_s22 }
  0xf4   : > { %v759_v4 = vpop.permute.xlu1 %758 }
  0xf5   : > { %v757_v5 = vpop.permute.xlu0 %756  ;;  %763 = vst.msk [vmem:[#allocation2 + $0x38] sm:$0xff] %vm456_vm8, %v759_v4 }
  0xf6   : > { %762 = vst.msk [vmem:[#allocation2 + $0x30] sm:$0xff] %vm456_vm8, %v757_v5  ;;  %1061 = vrot.lane.b32.xlu1 %v4319_v38, %s4091_s24 }
  0xf7   : > { %1059 = vrot.lane.b32.xlu0 %v4322_v39, %s4091_s24 }
  0xf8   : > { %v682_v10 = vpop.permute.xlu1 %681 }
  0xf9   : > { %v680_v11 = vpop.permute.xlu0 %679  ;;  %686 = vst.msk [vmem:[#allocation2 + $0x28] sm:$0xff] %vm5554_vm10, %v682_v10  ;;  %v4714_v10 = vld [vmem:[%s4182_s18 + $0x168] sm:$0xff] }
  0xfa   : > { %685 = vst.msk [vmem:[#allocation2 + $0x20] sm:$0xff] %vm5554_vm10, %v680_v11  ;;  %1149 = vrot.lane.b32.xlu1 %v4565_v8, %s4090_s23 }
  0xfb   : > { %1147 = vrot.lane.b32.xlu0 %v4568_v9, %s4090_s23  ;;  %1901 = vst.msk [vmem:[#allocation2 + $0xf0] sm:$0xff] %vm376_vm0, %v4714_v10 }
  0xfc   : > { %v771_v38 = vpop.permute.xlu1 %770 }
  0xfd   : > { %v769_v39 = vpop.permute.xlu0 %768  ;;  %775 = vst.msk [vmem:[#allocation2 + $0x38] sm:$0xff] %vm469_vm9, %v771_v38 }
  0xfe   : > { %774 = vst.msk [vmem:[#allocation2 + $0x30] sm:$0xff] %vm469_vm9, %v769_v39  ;;  %1073 = vrot.lane.b32.xlu1 %v4547_v0, %s4092_s25  ;;  %v3762_v39 = vld [vmem:[%s4182_s18 + $0x111] sm:$0xff] }
  0xff   : > { %1071 = vrot.lane.b32.xlu0 %v4550_v1, %s4092_s25 }
 0x100   : > { %v783_v12 = vpop.permute.xlu1 %782  ;;  %v2005_v15 = vld [vmem:[#allocation2 + $0x28] sm:$0xff] }
 0x101   : > { %v781_v13 = vpop.permute.xlu0 %780  ;;  %v2004_v14 = vld [vmem:[#allocation2 + $0x20] sm:$0xff]  ;;  %787 = vst.msk [vmem:[#allocation2 + $0x38] sm:$0xff] %vm5554_vm10, %v783_v12  ;;  %v3761_v12 = vld [vmem:[%s4182_s18 + $0x109] sm:$0xff] }
 0x102   : > { %786 = vst.msk [vmem:[#allocation2 + $0x30] sm:$0xff] %vm5554_vm10, %v781_v13  ;;  %v2034_v16 = vpack.c.bf16 %v2005_v15, %v2004_v14  ;;  %1162 = vrot.lane.b32.xlu1 %v4349_v44, %s4091_s24 }
 0x103   : > { %1160 = vrot.lane.b32.xlu0 %v4352_v45, %s4091_s24 }
 0x104   : > { %3960 = vmatprep.mubr.msk.bf16.mxu0 %vm5552_vm11, %v2034_v16  ;;  %v799_v19 = vpop.permute.xlu1 %798 }
 0x105   : > { %v797_v20 = vpop.permute.xlu0 %796  ;;  %803 = vst.msk [vmem:[#allocation2 + $0x48] sm:$0xff] %vm5550_vm3, %v799_v19 }
 0x106   : > { %802 = vst.msk [vmem:[#allocation2 + $0x40] sm:$0xff] %vm5550_vm3, %v797_v20  ;;  %1085 = vrot.lane.b32.xlu1 %v4565_v8, %s4094_s30  ;;  %v3764_v20 = vld [vmem:[%s4182_s18 + $0x112] sm:$0xff] }
 0x107   : > { %1083 = vrot.lane.b32.xlu0 %v4568_v9, %s4094_s30 }
 0x108   : > { %v811_v23 = vpop.permute.xlu1 %810  ;;  %v2007_v28 = vld [vmem:[#allocation2 + $0x38] sm:$0xff] }
 0x109   : > { %v809_v24 = vpop.permute.xlu0 %808  ;;  %v2006_v25 = vld [vmem:[#allocation2 + $0x30] sm:$0xff]  ;;  %815 = vst.msk [vmem:[#allocation2 + $0x48] sm:$0xff] %vm5549_vm4, %v811_v23 }
 0x10a   : > { %814 = vst.msk [vmem:[#allocation2 + $0x40] sm:$0xff] %vm5549_vm4, %v809_v24  ;;  %v2035_v31 = vpack.c.bf16 %v2007_v28, %v2006_v25  ;;  %1174 = vrot.lane.b32.xlu1 %v3726_v21, %s4092_s25 }
 0x10b   : > { %1172 = vrot.lane.b32.xlu0 %v3725_v22, %s4092_s25 }
 0x10c   : > { %3961 = vmatmul.mubr.msk.bf16.gmra.mrb[4].mxu0 %vm5552_vm11, %v2035_v31  ;;  %v900_v34 = vpop.permute.xlu1 %899 }
 0x10d   : > { %v898_v35 = vpop.permute.xlu0 %897  ;;  %904 = vst.msk [vmem:[#allocation2 + $0x58] sm:$0xff] %vm5550_vm3, %v900_v34 }
 0x10e   : > { %903 = vst.msk [vmem:[#allocation2 + $0x50] sm:$0xff] %vm5550_vm3, %v898_v35  ;;  %1186 = vrot.lane.b32.xlu1 %v3728_v32, %s4094_s30 }
 0x10f   : > { %1184 = vrot.lane.b32.xlu0 %v3727_v33, %s4094_s30 }
 0x110   : > { %v823_v36 = vpop.permute.xlu1 %822 }
 0x111   : > { %v821_v37 = vpop.permute.xlu0 %820  ;;  %827 = vst.msk [vmem:[#allocation2 + $0x48] sm:$0xff] %vm5551_vm5, %v823_v36 }
 0x112   : > { %826 = vst.msk [vmem:[#allocation2 + $0x40] sm:$0xff] %vm5551_vm5, %v821_v37  ;;  %1202 = vrot.lane.b32.xlu1 %v4547_v0, %s4087_s20 }
 0x113   : > { %1200 = vrot.lane.b32.xlu0 %v4550_v1, %s4087_s20 }
 0x114   : > { %v912_v40 = vpop.permute.xlu1 %911 }
 0x115   : > { %v910_v41 = vpop.permute.xlu0 %909  ;;  %916 = vst.msk [vmem:[#allocation2 + $0x58] sm:$0xff] %vm5549_vm4, %v912_v40 }
 0x116   : > { %915 = vst.msk [vmem:[#allocation2 + $0x50] sm:$0xff] %vm5549_vm4, %v910_v41  ;;  %1214 = vrot.lane.b32.xlu1 %v4565_v8, %s4086_s19 }
 0x117   : > { %1212 = vrot.lane.b32.xlu0 %v4568_v9, %s4086_s19  ;;  %v4707_v9 = vld [vmem:[%s4182_s18 + $0x170] sm:$0xff] }
 0x118   : > { %v835_v42 = vpop.permute.xlu1 %834  ;;  %1902 = vst.msk [vmem:[#allocation2 + $0xf8] sm:$0xff] %vm376_vm0, %v4707_v9 }
 0x119   : > { %v833_v43 = vpop.permute.xlu0 %832  ;;  %839 = vst.msk [vmem:[#allocation2 + $0x48] sm:$0xff] %vm429_vm6, %v835_v42 }
 0x11a   : > { %838 = vst.msk [vmem:[#allocation2 + $0x40] sm:$0xff] %vm429_vm6, %v833_v43  ;;  %1303 = vrot.lane.b32.xlu1 %v3726_v21, %s4087_s20 }
 0x11b   : > { %1301 = vrot.lane.b32.xlu0 %v3725_v22, %s4087_s20 }
 0x11c   : > { %v924_v46 = vpop.permute.xlu1 %923 }
 0x11d   : > { %v922_v47 = vpop.permute.xlu0 %921  ;;  %928 = vst.msk [vmem:[#allocation2 + $0x58] sm:$0xff] %vm5551_vm5, %v924_v46  ;;  %v4781_v46 = vld [vmem:[%s4182_s18 + $0x129] sm:$0xff] }
 0x11e   : > { %927 = vst.msk [vmem:[#allocation2 + $0x50] sm:$0xff] %vm5551_vm5, %v922_v47  ;;  %1226 = vrot.lane.b32.xlu1 %v4349_v44, %s4088_s21  ;;  %v4784_v47 = vld [vmem:[%s4182_s18 + $0x121] sm:$0xff] }
 0x11f   : > { %1224 = vrot.lane.b32.xlu0 %v4352_v45, %s4088_s21 }
 0x120   : > { %v847_v48 = vpop.permute.xlu1 %846 }
 0x121   : > { %v845_v49 = vpop.permute.xlu0 %844  ;;  %851 = vst.msk [vmem:[#allocation2 + $0x48] sm:$0xff] %vm442_vm7, %v847_v48 }
 0x122   : > { %850 = vst.msk [vmem:[#allocation2 + $0x40] sm:$0xff] %vm442_vm7, %v845_v49  ;;  %1315 = vrot.lane.b32.xlu1 %v3728_v32, %s4086_s19 }
 0x123   : > { %1313 = vrot.lane.b32.xlu0 %v3727_v33, %s4086_s19 }
 0x124   : > { %v936_v50 = vpop.permute.xlu1 %935 }
 0x125   : > { %v934_v51 = vpop.permute.xlu0 %933  ;;  %940 = vst.msk [vmem:[#allocation2 + $0x58] sm:$0xff] %vm429_vm6, %v936_v50 }
 0x126   : > { %939 = vst.msk [vmem:[#allocation2 + $0x50] sm:$0xff] %vm429_vm6, %v934_v51  ;;  %1238 = vrot.lane.b32.xlu1 %v3726_v21, %s4089_s22  ;;  %v3763_v21 = vld [vmem:[%s4182_s18 + $0x10a] sm:$0xff] }
 0x127   : > { %1236 = vrot.lane.b32.xlu0 %v3725_v22, %s4089_s22 }
 0x128   : > { %v860_v44 = vpop.permute.xlu1 %859 }
 0x129   : > { %v858_v45 = vpop.permute.xlu0 %857  ;;  %864 = vst.msk [vmem:[#allocation2 + $0x48] sm:$0xff] %vm456_vm8, %v860_v44  ;;  %v3794_v44 = vld [vmem:[%s4182_s18 + $0x12a] sm:$0xff] }
 0x12a   : > { %863 = vst.msk [vmem:[#allocation2 + $0x40] sm:$0xff] %vm456_vm8, %v858_v45  ;;  %1327 = vrot.lane.b32.xlu1 %v4407_v6, %s4088_s21  ;;  %v3793_v45 = vld [vmem:[%s4182_s18 + $0x122] sm:$0xff] }
 0x12b   : > { %1325 = vrot.lane.b32.xlu0 %v4410_v7, %s4088_s21 }
 0x12c   : > { %v948_v54 = vpop.permute.xlu1 %947 }
 0x12d   : > { %v946_v55 = vpop.permute.xlu0 %945  ;;  %952 = vst.msk [vmem:[#allocation2 + $0x58] sm:$0xff] %vm442_vm7, %v948_v54 }
 0x12e   : > { %951 = vst.msk [vmem:[#allocation2 + $0x50] sm:$0xff] %vm442_vm7, %v946_v55  ;;  %1250 = vrot.lane.b32.xlu1 %v3728_v32, %s4090_s23 }
 0x12f   : > { %1248 = vrot.lane.b32.xlu0 %v3727_v33, %s4090_s23 }
 0x130   : > { %v872_v58 = vpop.permute.xlu1 %871 }
 0x131   : > { %v870_v59 = vpop.permute.xlu0 %869  ;;  %876 = vst.msk [vmem:[#allocation2 + $0x48] sm:$0xff] %vm469_vm9, %v872_v58 }
 0x132   : > { %875 = vst.msk [vmem:[#allocation2 + $0x40] sm:$0xff] %vm469_vm9, %v870_v59  ;;  %1339 = vrot.lane.b32.xlu1 %v4669_v56, %s4089_s22 }
 0x133   : > { %1337 = vrot.lane.b32.xlu0 %v4672_v57, %s4089_s22 }
 0x134   : > { %v961_v26 = vpop.permute.xlu1 %960 }
 0x135   : > { %v959_v27 = vpop.permute.xlu0 %958  ;;  %965 = vst.msk [vmem:[#allocation2 + $0x58] sm:$0xff] %vm456_vm8, %v961_v26 }
 0x136   : > { %964 = vst.msk [vmem:[#allocation2 + $0x50] sm:$0xff] %vm456_vm8, %v959_v27  ;;  %1263 = vrot.lane.b32.xlu1 %v4407_v6, %s4091_s24 }
 0x137   : > { %1261 = vrot.lane.b32.xlu0 %v4410_v7, %s4091_s24 }
 0x138   : > { %v884_v0 = vpop.permute.xlu1 %883 }
 0x139   : > { %v882_v1 = vpop.permute.xlu0 %881  ;;  %888 = vst.msk [vmem:[#allocation2 + $0x48] sm:$0xff] %vm5554_vm10, %v884_v0  ;;  %v4825_v0 = vld [vmem:[%s4182_s18 + $0x139] sm:$0xff] }
 0x13a   : > { %887 = vst.msk [vmem:[#allocation2 + $0x40] sm:$0xff] %vm5554_vm10, %v882_v1  ;;  %1351 = vrot.lane.b32.xlu1 %v4687_v62, %s4090_s23 }
 0x13b   : > { %1349 = vrot.lane.b32.xlu0 %v4690_v63, %s4090_s23 }
 0x13c   : > { %v973_v6 = vpop.permute.xlu1 %972 }
 0x13d   : > { %v971_v7 = vpop.permute.xlu0 %970  ;;  %977 = vst.msk [vmem:[#allocation2 + $0x58] sm:$0xff] %vm469_vm9, %v973_v6 }
 0x13e   : > { %976 = vst.msk [vmem:[#allocation2 + $0x50] sm:$0xff] %vm469_vm9, %v971_v7  ;;  %1275 = vrot.lane.b32.xlu1 %v4669_v56, %s4092_s25 }
 0x13f   : > { %1273 = vrot.lane.b32.xlu0 %v4672_v57, %s4092_s25 }
 0x140   : > { %v985_v2 = vpop.permute.xlu1 %984  ;;  %v2009_v5 = vld [vmem:[#allocation2 + $0x48] sm:$0xff] }
 0x141   : > { %v983_v3 = vpop.permute.xlu0 %982  ;;  %v2008_v4 = vld [vmem:[#allocation2 + $0x40] sm:$0xff]  ;;  %989 = vst.msk [vmem:[#allocation2 + $0x58] sm:$0xff] %vm5554_vm10, %v985_v2 }
 0x142   : > { %988 = vst.msk [vmem:[#allocation2 + $0x50] sm:$0xff] %vm5554_vm10, %v983_v3  ;;  %v2036_v8 = vpack.c.bf16 %v2009_v5, %v2008_v4  ;;  %1364 = vrot.lane.b32.xlu1 %v4463_v29, %s4091_s24  ;;  %v4835_v4 = vld [vmem:[%s4182_s18 + $0x142] sm:$0xff]  ;;  %v4838_v5 = vld [vmem:[%s4182_s18 + $0x13a] sm:$0xff] }
 0x143   : > { %1362 = vrot.lane.b32.xlu0 %v4466_v30, %s4091_s24 }
 0x144   : > { %3964 = vmatprep.mubr.msk.bf16.mxu0 %vm5552_vm11, %v2036_v8  ;;  %v1001_v11 = vpop.permute.xlu1 %1000 }
 0x145   : > { %v999_v38 = vpop.permute.xlu0 %998  ;;  %1005 = vst.msk [vmem:[#allocation2 + $0x68] sm:$0xff] %vm5550_vm3, %v1001_v11 }
 0x146   : > { %1004 = vst.msk [vmem:[#allocation2 + $0x60] sm:$0xff] %vm5550_vm3, %v999_v38  ;;  %1287 = vrot.lane.b32.xlu1 %v4687_v62, %s4094_s30 }
 0x147   : > { %1285 = vrot.lane.b32.xlu0 %v4690_v63, %s4094_s30 }
 0x148   : > { %v1013_v13 = vpop.permute.xlu1 %1012  ;;  %v2011_v16 = vld [vmem:[#allocation2 + $0x58] sm:$0xff] }
 0x149   : > { %v1011_v14 = vpop.permute.xlu0 %1010  ;;  %v2010_v15 = vld [vmem:[#allocation2 + $0x50] sm:$0xff]  ;;  %1017 = vst.msk [vmem:[#allocation2 + $0x68] sm:$0xff] %vm5549_vm4, %v1013_v13 }
 0x14a   : > { %1016 = vst.msk [vmem:[#allocation2 + $0x60] sm:$0xff] %vm5549_vm4, %v1011_v14  ;;  %v2037_v19 = vpack.c.bf16 %v2011_v16, %v2010_v15  ;;  %1376 = vrot.lane.b32.xlu1 %v3762_v39, %s4092_s25 }
 0x14b   : > { %1374 = vrot.lane.b32.xlu0 %v3761_v12, %s4092_s25 }
 0x14c   : > { %3965 = vmatmul.mubr.msk.bf16.gmra.mrb[8].mxu0 %vm5552_vm11, %v2037_v19  ;;  %v1102_v22 = vpop.permute.xlu1 %1101 }
 0x14d   : > { %v1100_v23 = vpop.permute.xlu0 %1099  ;;  %1106 = vst.msk [vmem:[#allocation2 + $0x78] sm:$0xff] %vm5550_vm3, %v1102_v22  ;;  %v4876_v22 = vld [vmem:[%s5538_s2 + $0x1] ss:$0 sm:$0xff] }
 0x14e   : > { %1105 = vst.msk [vmem:[#allocation2 + $0x70] sm:$0xff] %vm5550_vm3, %v1100_v23  ;;  %1388 = vrot.lane.b32.xlu1 %v3764_v20, %s4094_s30 }
 0x14f   : > { %1386 = vrot.lane.b32.xlu0 %v3763_v21, %s4094_s30 }
 0x150   : > { %v1025_v24 = vpop.permute.xlu1 %1024 }
 0x151   : > { %v1023_v25 = vpop.permute.xlu0 %1022  ;;  %1029 = vst.msk [vmem:[#allocation2 + $0x68] sm:$0xff] %vm5551_vm5, %v1025_v24 }
 0x152   : > { %1028 = vst.msk [vmem:[#allocation2 + $0x60] sm:$0xff] %vm5551_vm5, %v1023_v25  ;;  %1404 = vrot.lane.b32.xlu1 %v4669_v56, %s4087_s20 }
 0x153   : > { %1402 = vrot.lane.b32.xlu0 %v4672_v57, %s4087_s20 }
 0x154   : > { %v1114_v28 = vpop.permute.xlu1 %1113 }
 0x155   : > { %v1112_v31 = vpop.permute.xlu0 %1111  ;;  %1118 = vst.msk [vmem:[#allocation2 + $0x78] sm:$0xff] %vm5549_vm4, %v1114_v28 }
 0x156   : > { %1117 = vst.msk [vmem:[#allocation2 + $0x70] sm:$0xff] %vm5549_vm4, %v1112_v31  ;;  %1416 = vrot.lane.b32.xlu1 %v4687_v62, %s4086_s19 }
 0x157   : > { %1414 = vrot.lane.b32.xlu0 %v4690_v63, %s4086_s19  ;;  %v4822_v63 = vld [vmem:[%s4182_s18 + $0x141] sm:$0xff] }
 0x158   : > { %v1037_v32 = vpop.permute.xlu1 %1036 }
 0x159   : > { %v1035_v33 = vpop.permute.xlu0 %1034  ;;  %1041 = vst.msk [vmem:[#allocation2 + $0x68] sm:$0xff] %vm429_vm6, %v1037_v32 }
 0x15a   : > { %1040 = vst.msk [vmem:[#allocation2 + $0x60] sm:$0xff] %vm429_vm6, %v1035_v33  ;;  %1505 = vrot.lane.b32.xlu1 %v3762_v39, %s4087_s20 }
 0x15b   : > { %1503 = vrot.lane.b32.xlu0 %v3761_v12, %s4087_s20 }
 0x15c   : > { %v1126_v34 = vpop.permute.xlu1 %1125 }
 0x15d   : > { %v1124_v35 = vpop.permute.xlu0 %1123  ;;  %1130 = vst.msk [vmem:[#allocation2 + $0x78] sm:$0xff] %vm5551_vm5, %v1126_v34 }
 0x15e   : > { %1129 = vst.msk [vmem:[#allocation2 + $0x70] sm:$0xff] %vm5551_vm5, %v1124_v35  ;;  %1428 = vrot.lane.b32.xlu1 %v4463_v29, %s4088_s21 }
 0x15f   : > { %1426 = vrot.lane.b32.xlu0 %v4466_v30, %s4088_s21 }
 0x160   : > { %v1049_v36 = vpop.permute.xlu1 %1048 }
 0x161   : > { %v1047_v37 = vpop.permute.xlu0 %1046  ;;  %1053 = vst.msk [vmem:[#allocation2 + $0x68] sm:$0xff] %vm442_vm7, %v1049_v36 }
 0x162   : > { %1052 = vst.msk [vmem:[#allocation2 + $0x60] sm:$0xff] %vm442_vm7, %v1047_v37  ;;  %1517 = vrot.lane.b32.xlu1 %v3764_v20, %s4086_s19 }
 0x163   : > { %1515 = vrot.lane.b32.xlu0 %v3763_v21, %s4086_s19 }
 0x164   : > { %v1138_v40 = vpop.permute.xlu1 %1137 }
 0x165   : > { %v1136_v41 = vpop.permute.xlu0 %1135  ;;  %1142 = vst.msk [vmem:[#allocation2 + $0x78] sm:$0xff] %vm429_vm6, %v1138_v40 }
 0x166   : > { %1141 = vst.msk [vmem:[#allocation2 + $0x70] sm:$0xff] %vm429_vm6, %v1136_v41  ;;  %1440 = vrot.lane.b32.xlu1 %v3762_v39, %s4089_s22 }
 0x167   : > { %1438 = vrot.lane.b32.xlu0 %v3761_v12, %s4089_s22 }
 0x168   : > { %v1062_v29 = vpop.permute.xlu1 %1061 }
 0x169   : > { %v1060_v30 = vpop.permute.xlu0 %1059  ;;  %1066 = vst.msk [vmem:[#allocation2 + $0x68] sm:$0xff] %vm456_vm8, %v1062_v29 }
 0x16a   : > { %1065 = vst.msk [vmem:[#allocation2 + $0x60] sm:$0xff] %vm456_vm8, %v1060_v30  ;;  %1529 = vrot.lane.b32.xlu1 %v4529_v60, %s4088_s21 }
 0x16b   : > { %1527 = vrot.lane.b32.xlu0 %v4532_v61, %s4088_s21 }
 0x16c   : > { %v1150_v42 = vpop.permute.xlu1 %1149 }
 0x16d   : > { %v1148_v43 = vpop.permute.xlu0 %1147  ;;  %1154 = vst.msk [vmem:[#allocation2 + $0x78] sm:$0xff] %vm442_vm7, %v1150_v42 }
 0x16e   : > { %1153 = vst.msk [vmem:[#allocation2 + $0x70] sm:$0xff] %vm442_vm7, %v1148_v43  ;;  %1452 = vrot.lane.b32.xlu1 %v3764_v20, %s4090_s23  ;;  %v4865_v20 = vld [vmem:[%s5538_s2] ss:$0 sm:$0xff] }
 0x16f   : > { %1450 = vrot.lane.b32.xlu0 %v3763_v21, %s4090_s23 }
 0x170   : > { %v1074_v48 = vpop.permute.xlu1 %1073 }
 0x171   : > { %v1072_v49 = vpop.permute.xlu0 %1071  ;;  %1078 = vst.msk [vmem:[#allocation2 + $0x68] sm:$0xff] %vm469_vm9, %v1074_v48 }
 0x172   : > { %1077 = vst.msk [vmem:[#allocation2 + $0x60] sm:$0xff] %vm469_vm9, %v1072_v49  ;;  %1541 = vrot.lane.b32.xlu1 %v4781_v46, %s4089_s22 }
 0x173   : > { %1539 = vrot.lane.b32.xlu0 %v4784_v47, %s4089_s22 }
 0x174   : > { %v1163_v50 = vpop.permute.xlu1 %1162 }
 0x175   : > { %v1161_v51 = vpop.permute.xlu0 %1160  ;;  %1167 = vst.msk [vmem:[#allocation2 + $0x78] sm:$0xff] %vm456_vm8, %v1163_v50  ;;  %v4915_v50 = vld [vmem:[%s4182_s18 + $0x159] sm:$0xff] }
 0x176   : > { %1166 = vst.msk [vmem:[#allocation2 + $0x70] sm:$0xff] %vm456_vm8, %v1161_v51  ;;  %1465 = vrot.lane.b32.xlu1 %v4529_v60, %s4091_s24  ;;  %v4918_v51 = vld [vmem:[%s4182_s18 + $0x151] sm:$0xff] }
 0x177   : > { %1463 = vrot.lane.b32.xlu0 %v4532_v61, %s4091_s24 }
 0x178   : > { %v1086_v54 = vpop.permute.xlu1 %1085 }
 0x179   : > { %v1084_v55 = vpop.permute.xlu0 %1083  ;;  %1090 = vst.msk [vmem:[#allocation2 + $0x68] sm:$0xff] %vm5554_vm10, %v1086_v54 }
 0x17a   : > { %1089 = vst.msk [vmem:[#allocation2 + $0x60] sm:$0xff] %vm5554_vm10, %v1084_v55  ;;  %1553 = vrot.lane.b32.xlu1 %v3794_v44, %s4090_s23 }
 0x17b   : > { %1551 = vrot.lane.b32.xlu0 %v3793_v45, %s4090_s23 }
 0x17c   : > { %v1175_v56 = vpop.permute.xlu1 %1174 }
 0x17d   : > { %v1173_v57 = vpop.permute.xlu0 %1172  ;;  %1179 = vst.msk [vmem:[#allocation2 + $0x78] sm:$0xff] %vm469_vm9, %v1175_v56  ;;  %v3830_v56 = vld [vmem:[%s4182_s18 + $0x15a] sm:$0xff] }
 0x17e   : > { %1178 = vst.msk [vmem:[#allocation2 + $0x70] sm:$0xff] %vm469_vm9, %v1173_v57  ;;  %1477 = vrot.lane.b32.xlu1 %v4781_v46, %s4092_s25  ;;  %v3829_v57 = vld [vmem:[%s4182_s18 + $0x152] sm:$0xff] }
 0x17f   : > { %1475 = vrot.lane.b32.xlu0 %v4784_v47, %s4092_s25 }
 0x180   : > { %v1187_v60 = vpop.permute.xlu1 %1186  ;;  %v2013_v59 = vld [vmem:[#allocation2 + $0x68] sm:$0xff] }
 0x181   : > { %v1185_v61 = vpop.permute.xlu0 %1184  ;;  %v2012_v58 = vld [vmem:[#allocation2 + $0x60] sm:$0xff]  ;;  %1191 = vst.msk [vmem:[#allocation2 + $0x78] sm:$0xff] %vm5554_vm10, %v1187_v60 }
 0x182   : > { %1190 = vst.msk [vmem:[#allocation2 + $0x70] sm:$0xff] %vm5554_vm10, %v1185_v61  ;;  %v2038_v26 = vpack.c.bf16 %v2013_v59, %v2012_v58  ;;  %1566 = vrot.lane.b32.xlu1 %v4585_v17, %s4091_s24 }
 0x183   : > { %1564 = vrot.lane.b32.xlu0 %v4588_v18, %s4091_s24 }
 0x184   : > { %3968 = vmatprep.mubr.msk.bf16.mxu0 %vm5552_vm11, %v2038_v26  ;;  %v1203_v27 = vpop.permute.xlu1 %1202 }
 0x185   : > { %v1201_v62 = vpop.permute.xlu0 %1200  ;;  %1207 = vst.msk [vmem:[#allocation2 + $0x88] sm:$0xff] %vm5550_vm3, %v1203_v27 }
 0x186   : > { %1206 = vst.msk [vmem:[#allocation2 + $0x80] sm:$0xff] %vm5550_vm3, %v1201_v62  ;;  %1489 = vrot.lane.b32.xlu1 %v3794_v44, %s4094_s30 }
 0x187   : > { %1487 = vrot.lane.b32.xlu0 %v3793_v45, %s4094_s30 }
 0x188   : > { %v1215_v1 = vpop.permute.xlu1 %1214  ;;  %v2015_v2 = vld [vmem:[#allocation2 + $0x78] sm:$0xff] }
 0x189   : > { %v1213_v6 = vpop.permute.xlu0 %1212  ;;  %v2014_v7 = vld [vmem:[#allocation2 + $0x70] sm:$0xff]  ;;  %1219 = vst.msk [vmem:[#allocation2 + $0x88] sm:$0xff] %vm5549_vm4, %v1215_v1 }
 0x18a   : > { %1218 = vst.msk [vmem:[#allocation2 + $0x80] sm:$0xff] %vm5549_vm4, %v1213_v6  ;;  %v2039_v3 = vpack.c.bf16 %v2015_v2, %v2014_v7  ;;  %1578 = vrot.lane.b32.xlu1 %v4822_v63, %s4092_s25  ;;  %v4956_v1 = vld [vmem:[%s4182_s18 + $0x171] sm:$0xff]  ;;  %v4959_v6 = vld [vmem:[%s4182_s18 + $0x169] sm:$0xff] }
 0x18b   : > { %1576 = vrot.lane.b32.xlu0 %v4825_v0, %s4092_s25 }
 0x18c   : > { %3969 = vmatmul.mubr.msk.bf16.gmra.mrb[12].mxu0 %vm5552_vm11, %v2039_v3  ;;  %v1304_v8 = vpop.permute.xlu1 %1303 }
 0x18d   : > { %v1302_v11 = vpop.permute.xlu0 %1301  ;;  %1308 = vst.msk [vmem:[#allocation2 + $0x98] sm:$0xff] %vm5550_vm3, %v1304_v8  ;;  %v4969_v8 = vld [vmem:[%s4182_s18 + $0x172] sm:$0xff] }
 0x18e   : > { %1307 = vst.msk [vmem:[#allocation2 + $0x90] sm:$0xff] %vm5550_vm3, %v1302_v11  ;;  %1590 = vrot.lane.b32.xlu1 %v4835_v4, %s4094_s30  ;;  %v4972_v11 = vld [vmem:[%s4182_s18 + $0x16a] sm:$0xff] }
 0x18f   : > { %1588 = vrot.lane.b32.xlu0 %v4838_v5, %s4094_s30 }
 0x190   : > { %v1227_v38 = vpop.permute.xlu1 %1226 }
 0x191   : > { %v1225_v39 = vpop.permute.xlu0 %1224  ;;  %1231 = vst.msk [vmem:[#allocation2 + $0x88] sm:$0xff] %vm5551_vm5, %v1227_v38 }
 0x192   : > { %1230 = vst.msk [vmem:[#allocation2 + $0x80] sm:$0xff] %vm5551_vm5, %v1225_v39  ;;  %1606 = vrot.lane.b32.xlu1 %v4781_v46, %s4087_s20 }
 0x193   : > { %1604 = vrot.lane.b32.xlu0 %v4784_v47, %s4087_s20 }
 0x194   : > { %v1316_v12 = vpop.permute.xlu1 %1315 }
 0x195   : > { %v1314_v13 = vpop.permute.xlu0 %1313  ;;  %1320 = vst.msk [vmem:[#allocation2 + $0x98] sm:$0xff] %vm5549_vm4, %v1316_v12 }
 0x196   : > { %1319 = vst.msk [vmem:[#allocation2 + $0x90] sm:$0xff] %vm5549_vm4, %v1314_v13  ;;  %1618 = vrot.lane.b32.xlu1 %v3794_v44, %s4086_s19 }
 0x197   : > { %1616 = vrot.lane.b32.xlu0 %v3793_v45, %s4086_s19 }
 0x198   : > { %v1239_v14 = vpop.permute.xlu1 %1238 }
 0x199   : > { %v1237_v15 = vpop.permute.xlu0 %1236  ;;  %1243 = vst.msk [vmem:[#allocation2 + $0x88] sm:$0xff] %vm429_vm6, %v1239_v14 }
 0x19a   : > { %1242 = vst.msk [vmem:[#allocation2 + $0x80] sm:$0xff] %vm429_vm6, %v1237_v15  ;;  %1707 = vrot.lane.b32.xlu1 %v4822_v63, %s4087_s20 }
 0x19b   : > { %1705 = vrot.lane.b32.xlu0 %v4825_v0, %s4087_s20 }
 0x19c   : > { %v1328_v16 = vpop.permute.xlu1 %1327 }
 0x19d   : > { %v1326_v19 = vpop.permute.xlu0 %1325  ;;  %1332 = vst.msk [vmem:[#allocation2 + $0x98] sm:$0xff] %vm5551_vm5, %v1328_v16 }
 0x19e   : > { %1331 = vst.msk [vmem:[#allocation2 + $0x90] sm:$0xff] %vm5551_vm5, %v1326_v19  ;;  %1630 = vrot.lane.b32.xlu1 %v4585_v17, %s4088_s21 }
 0x19f   : > { %1628 = vrot.lane.b32.xlu0 %v4588_v18, %s4088_s21  ;;  %v3958_v21 = vpop.f32.mrb[0].mxu0 }
 0x1a0   : > { %v2167_v23 = vadd.f32 %v3958_v21, %v4865_v20  ;;  %v2158_v24 = vpop.f32.mrb[1].mxu0  ;;  %v1251_v28 = vpop.permute.xlu1 %1250 }
 0x1a1   : > { %v2159_v25 = vadd.f32 %v4865_v20, %v2158_v24  ;;  %v1249_v31 = vpop.permute.xlu0 %1248  ;;  %1255 = vst.msk [vmem:[#allocation2 + $0x88] sm:$0xff] %vm442_vm7, %v1251_v28  ;;  %v3959_v17 = vpop.f32.mrb[2].mxu0 }
 0x1a2   : > { %vm2287_vm12 = vcmp.ge.f32.partialorder %v2167_v23, 0.0  ;;  %v2324_v32 = vmul.f32 %v4876_v22, %v2167_v23  ;;  %1254 = vst.msk [vmem:[#allocation2 + $0x80] sm:$0xff] %vm442_vm7, %v1249_v31  ;;  %v2170_v33 = vadd.f32 %v3959_v17, %v4865_v20  ;;  %v2161_v34 = vpop.f32.mrb[3].mxu0  ;;  %1719 = vrot.lane.b32.xlu1 %v4835_v4, %s4086_s19 }
 0x1a3   : > { %vm2285_vm14 = vcmp.ge.f32.partialorder %v2159_v25, 0.0  ;;  %v2322_v18 = vmul.f32 %v4876_v22, %v2159_v25  ;;  %1717 = vrot.lane.b32.xlu0 %v4838_v5, %s4086_s19  ;;  %v2162_v36 = vadd.f32 %v4865_v20, %v2161_v34 }
 0x1a4   : > { %v2356_v35 = vsel %vm2287_vm12, %v2167_v23, %v2324_v32  ;;  %vm2288_vm15 = vcmp.ge.f32.partialorder %v2170_v33, 0.0  ;;  %v2325_v40 = vmul.f32 %v4876_v22, %v2170_v33  ;;  %v1340_v41 = vpop.permute.xlu1 %1339 }
 0x1a5   : > { %2389 = vst.msk [vmem:[#allocation3 + $0x10] sm:$0xff] %vm2386_vm13, %v2356_v35  ;;  %v2354_v37 = vsel %vm2285_vm14, %v2159_v25, %v2322_v18  ;;  %v1338_v29 = vpop.permute.xlu0 %1337  ;;  %vm2286_vm0 = vcmp.ge.f32.partialorder %v2162_v36, 0.0  ;;  %v2323_v30 = vmul.f32 %v4876_v22, %v2162_v36 }
 0x1a6   : > { %2387 = vst.msk [vmem:[#allocation3] sm:$0xff] %vm2386_vm13, %v2354_v37  ;;  %v2357_v42 = vsel %vm2288_vm15, %v2170_v33, %v2325_v40  ;;  %1642 = vrot.lane.b32.xlu1 %v4822_v63, %s4089_s22 }
 0x1a7   : > { %1344 = vst.msk [vmem:[#allocation2 + $0x98] sm:$0xff] %vm429_vm6, %v1340_v41  ;;  %1343 = vst.msk [vmem:[#allocation2 + $0x90] sm:$0xff] %vm429_vm6, %v1338_v29  ;;  %1640 = vrot.lane.b32.xlu0 %v4825_v0, %s4089_s22  ;;  %v2355_v43 = vsel %vm2286_vm0, %v2162_v36, %v2323_v30 }
 0x1a8   : > { %2390 = vst.msk [vmem:[#allocation3 + $0x18] sm:$0xff] %vm2386_vm13, %v2357_v42  ;;  %2388 = vst.msk [vmem:[#allocation3 + $0x8] sm:$0xff] %vm2386_vm13, %v2355_v43  ;;  %v1264_v46 = vpop.permute.xlu1 %1263 }
 0x1a9   : > { %v1262_v47 = vpop.permute.xlu0 %1261  ;;  %1268 = vst.msk [vmem:[#allocation2 + $0x88] sm:$0xff] %vm456_vm8, %v1264_v46  ;;  %v3862_v46 = vld [vmem:[%s4182_s18 + $0x188] sm:$0xff] }
 0x1aa   : > { %1267 = vst.msk [vmem:[#allocation2 + $0x80] sm:$0xff] %vm456_vm8, %v1262_v47  ;;  %1731 = vrot.lane.b32.xlu1 %v4655_v52, %s4088_s21  ;;  %v3861_v47 = vld [vmem:[%s4182_s18 + $0x180] sm:$0xff] }
 0x1ab   : > { %1729 = vrot.lane.b32.xlu0 %v4658_v53, %s4088_s21 }
 0x1ac   : > { %v1352_v48 = vpop.permute.xlu1 %1351 }
 0x1ad   : > { %v1350_v49 = vpop.permute.xlu0 %1349  ;;  %1356 = vst.msk [vmem:[#allocation2 + $0x98] sm:$0xff] %vm442_vm7, %v1352_v48 }
 0x1ae   : > { %1355 = vst.msk [vmem:[#allocation2 + $0x90] sm:$0xff] %vm442_vm7, %v1350_v49  ;;  %1654 = vrot.lane.b32.xlu1 %v4835_v4, %s4090_s23 }
 0x1af   : > { %1652 = vrot.lane.b32.xlu0 %v4838_v5, %s4090_s23 }
 0x1b0   : > { %v1276_v44 = vpop.permute.xlu1 %1275 }
 0x1b1   : > { %v1274_v45 = vpop.permute.xlu0 %1273  ;;  %1280 = vst.msk [vmem:[#allocation2 + $0x88] sm:$0xff] %vm469_vm9, %v1276_v44  ;;  %v2422_v44 = vld [vmem:[#allocation3 + $0x18] sm:$0xff] }
 0x1b2   : > { %1279 = vst.msk [vmem:[#allocation2 + $0x80] sm:$0xff] %vm469_vm9, %v1274_v45  ;;  %1743 = vrot.lane.b32.xlu1 %v4915_v50, %s4089_s22  ;;  %v2420_v45 = vld [vmem:[#allocation3 + $0x8] sm:$0xff] }
 0x1b3   : > { %1741 = vrot.lane.b32.xlu0 %v4918_v51, %s4089_s22 }
 0x1b4   : > { %v1365_v54 = vpop.permute.xlu1 %1364 }
 0x1b5   : > { %v1363_v55 = vpop.permute.xlu0 %1362  ;;  %1369 = vst.msk [vmem:[#allocation2 + $0x98] sm:$0xff] %vm456_vm8, %v1365_v54 }
 0x1b6   : > { %1368 = vst.msk [vmem:[#allocation2 + $0x90] sm:$0xff] %vm456_vm8, %v1363_v55  ;;  %1667 = vrot.lane.b32.xlu1 %v4655_v52, %s4091_s24 }
 0x1b7   : > { %1665 = vrot.lane.b32.xlu0 %v4658_v53, %s4091_s24 }
 0x1b8   : > { %v1288_v60 = vpop.permute.xlu1 %1287 }
 0x1b9   : > { %v1286_v61 = vpop.permute.xlu0 %1285  ;;  %1292 = vst.msk [vmem:[#allocation2 + $0x88] sm:$0xff] %vm5554_vm10, %v1288_v60  ;;  %v2426_v60 = vmax.f32 %v2420_v45, %v2422_v44 }
 0x1ba   : > { %1291 = vst.msk [vmem:[#allocation2 + $0x80] sm:$0xff] %vm5554_vm10, %v1286_v61  ;;  %1755 = vrot.lane.b32.xlu1 %v3830_v56, %s4090_s23 }
 0x1bb   : > { %1753 = vrot.lane.b32.xlu0 %v3829_v57, %s4090_s23 }
 0x1bc   : > { %v1377_v58 = vpop.permute.xlu1 %1376 }
 0x1bd   : > { %v1375_v59 = vpop.permute.xlu0 %1374  ;;  %1381 = vst.msk [vmem:[#allocation2 + $0x98] sm:$0xff] %vm469_vm9, %v1377_v58 }
 0x1be   : > { %1380 = vst.msk [vmem:[#allocation2 + $0x90] sm:$0xff] %vm469_vm9, %v1375_v59  ;;  %1679 = vrot.lane.b32.xlu1 %v4915_v50, %s4092_s25  ;;  %v3864_v59 = vld [vmem:[%s4182_s18 + $0x189] sm:$0xff] }
 0x1bf   : > { %1677 = vrot.lane.b32.xlu0 %v4918_v51, %s4092_s25 }
 0x1c0   : > { %v1389_v52 = vpop.permute.xlu1 %1388  ;;  %v2017_v27 = vld [vmem:[#allocation2 + $0x88] sm:$0xff] }
 0x1c1   : > { %v1387_v53 = vpop.permute.xlu0 %1386  ;;  %v2016_v26 = vld [vmem:[#allocation2 + $0x80] sm:$0xff]  ;;  %1393 = vst.msk [vmem:[#allocation2 + $0x98] sm:$0xff] %vm5554_vm10, %v1389_v52 }
 0x1c2   : > { %1392 = vst.msk [vmem:[#allocation2 + $0x90] sm:$0xff] %vm5554_vm10, %v1387_v53  ;;  %v2040_v62 = vpack.c.bf16 %v2017_v27, %v2016_v26  ;;  %1768 = vrot.lane.b32.xlu1 %v4707_v9, %s4091_s24  ;;  %v3863_v52 = vld [vmem:[%s4182_s18 + $0x181] sm:$0xff] }
 0x1c3   : > { %1766 = vrot.lane.b32.xlu0 %v4714_v10, %s4091_s24 }
 0x1c4   : > { %3972 = vmatprep.mubr.msk.bf16.mxu0 %vm5552_vm11, %v2040_v62  ;;  %v1405_v63 = vpop.permute.xlu1 %1404 }
 0x1c5   : > { %v1403_v0 = vpop.permute.xlu0 %1402  ;;  %1409 = vst.msk [vmem:[#allocation2 + $0xa8] sm:$0xff] %vm5550_vm3, %v1405_v63 }
 0x1c6   : > { %1408 = vst.msk [vmem:[#allocation2 + $0xa0] sm:$0xff] %vm5550_vm3, %v1403_v0  ;;  %1691 = vrot.lane.b32.xlu1 %v3830_v56, %s4094_s30 }
 0x1c7   : > { %1689 = vrot.lane.b32.xlu0 %v3829_v57, %s4094_s30 }
 0x1c8   : > { %v1417_v7 = vpop.permute.xlu1 %1416  ;;  %v2019_v4 = vld [vmem:[#allocation2 + $0x98] sm:$0xff] }
 0x1c9   : > { %v1415_v2 = vpop.permute.xlu0 %1414  ;;  %v2018_v3 = vld [vmem:[#allocation2 + $0x90] sm:$0xff]  ;;  %1421 = vst.msk [vmem:[#allocation2 + $0xa8] sm:$0xff] %vm5549_vm4, %v1417_v7 }
 0x1ca   : > { %1420 = vst.msk [vmem:[#allocation2 + $0xa0] sm:$0xff] %vm5549_vm4, %v1415_v2  ;;  %v2041_v5 = vpack.c.bf16 %v2019_v4, %v2018_v3  ;;  %1780 = vrot.lane.b32.xlu1 %v4956_v1, %s4092_s25 }
 0x1cb   : > { %1778 = vrot.lane.b32.xlu0 %v4959_v6, %s4092_s25 }
 0x1cc   : > { %3973 = vmatmul.mubr.msk.bf16.gmra.mrb[16].mxu0 %vm5552_vm11, %v2041_v5  ;;  %v1506_v38 = vpop.permute.xlu1 %1505 }
 0x1cd   : > { %v1504_v39 = vpop.permute.xlu0 %1503  ;;  %1510 = vst.msk [vmem:[#allocation2 + $0xb8] sm:$0xff] %vm5550_vm3, %v1506_v38  ;;  %v3865_v38 = vld [vmem:[%s4182_s18 + $0x182] sm:$0xff] }
 0x1ce   : > { %1509 = vst.msk [vmem:[#allocation2 + $0xb0] sm:$0xff] %vm5550_vm3, %v1504_v39  ;;  %1792 = vrot.lane.b32.xlu1 %v4969_v8, %s4094_s30 }
 0x1cf   : > { %1790 = vrot.lane.b32.xlu0 %v4972_v11, %s4094_s30 }
 0x1d0   : > { %v1429_v12 = vpop.permute.xlu1 %1428 }
 0x1d1   : > { %v1427_v13 = vpop.permute.xlu0 %1426  ;;  %1433 = vst.msk [vmem:[#allocation2 + $0xa8] sm:$0xff] %vm5551_vm5, %v1429_v12 }
 0x1d2   : > { %1432 = vst.msk [vmem:[#allocation2 + $0xa0] sm:$0xff] %vm5551_vm5, %v1427_v13  ;;  %1808 = vrot.lane.b32.xlu1 %v4915_v50, %s4087_s20  ;;  %v2421_v50 = vld [vmem:[#allocation3 + $0x10] sm:$0xff] }
 0x1d3   : > { %1806 = vrot.lane.b32.xlu0 %v4918_v51, %s4087_s20  ;;  %v2419_v51 = vld [vmem:[#allocation3] sm:$0xff] }
 0x1d4   : > { %v1518_v14 = vpop.permute.xlu1 %1517  ;;  %v2425_v54 = vmax.f32 %v2419_v51, %v2421_v50 }
 0x1d5   : > { %v1516_v15 = vpop.permute.xlu0 %1515  ;;  %1522 = vst.msk [vmem:[#allocation2 + $0xb8] sm:$0xff] %vm5549_vm4, %v1518_v14 }
 0x1d6   : > { %1521 = vst.msk [vmem:[#allocation2 + $0xb0] sm:$0xff] %vm5549_vm4, %v1516_v15  ;;  %1820 = vrot.lane.b32.xlu1 %v3830_v56, %s4086_s19 }
 0x1d7   : > { %1818 = vrot.lane.b32.xlu0 %v3829_v57, %s4086_s19 }
 0x1d8   : > { %v1441_v16 = vpop.permute.xlu1 %1440 }
 0x1d9   : > { %v1439_v19 = vpop.permute.xlu0 %1438  ;;  %1445 = vst.msk [vmem:[#allocation2 + $0xa8] sm:$0xff] %vm429_vm6, %v1441_v16  ;;  %v3868_v16 = vld [vmem:[%s4182_s18 + $0x1a0] sm:$0xff] }
 0x1da   : > { %1444 = vst.msk [vmem:[#allocation2 + $0xa0] sm:$0xff] %vm429_vm6, %v1439_v19  ;;  %1909 = vrot.lane.b32.xlu1 %v4956_v1, %s4087_s20  ;;  %v3867_v19 = vld [vmem:[%s4182_s18 + $0x198] sm:$0xff] }
 0x1db   : > { %1907 = vrot.lane.b32.xlu0 %v4959_v6, %s4087_s20 }
 0x1dc   : > { %v1530_v21 = vpop.permute.xlu1 %1529 }
 0x1dd   : > { %v1528_v23 = vpop.permute.xlu0 %1527  ;;  %1534 = vst.msk [vmem:[#allocation2 + $0xb8] sm:$0xff] %vm5551_vm5, %v1530_v21 }
 0x1de   : > { %1533 = vst.msk [vmem:[#allocation2 + $0xb0] sm:$0xff] %vm5551_vm5, %v1528_v23  ;;  %1832 = vrot.lane.b32.xlu1 %v4707_v9, %s4088_s21 }
 0x1df   : > { %1830 = vrot.lane.b32.xlu0 %v4714_v10, %s4088_s21  ;;  %v3962_v24 = vpop.f32.mrb[4].mxu0 }
 0x1e0   : > { %v2183_v25 = vadd.f32 %v3962_v24, %v4865_v20  ;;  %v2174_v28 = vpop.f32.mrb[5].mxu0  ;;  %v1453_v32 = vpop.permute.xlu1 %1452 }
 0x1e1   : > { %v2175_v31 = vadd.f32 %v4865_v20, %v2174_v28  ;;  %v1451_v17 = vpop.permute.xlu0 %1450  ;;  %1457 = vst.msk [vmem:[#allocation2 + $0xa8] sm:$0xff] %vm442_vm7, %v1453_v32  ;;  %v3963_v33 = vpop.f32.mrb[6].mxu0 }
 0x1e2   : > { %vm2291_vm12 = vcmp.ge.f32.partialorder %v2183_v25, 0.0  ;;  %v2328_v18 = vmul.f32 %v4876_v22, %v2183_v25  ;;  %1456 = vst.msk [vmem:[#allocation2 + $0xa0] sm:$0xff] %vm442_vm7, %v1451_v17  ;;  %v2186_v10 = vadd.f32 %v3963_v33, %v4865_v20  ;;  %v2177_v34 = vpop.f32.mrb[7].mxu0  ;;  %1921 = vrot.lane.b32.xlu1 %v4969_v8, %s4086_s19  ;;  %v3869_v33 = vld [vmem:[%s4182_s18 + $0x199] sm:$0xff] }
 0x1e3   : > { %vm2289_vm14 = vcmp.ge.f32.partialorder %v2175_v31, 0.0  ;;  %v2326_v9 = vmul.f32 %v4876_v22, %v2175_v31  ;;  %1919 = vrot.lane.b32.xlu0 %v4972_v11, %s4086_s19  ;;  %v2178_v36 = vadd.f32 %v4865_v20, %v2177_v34 }
 0x1e4   : > { %v2360_v35 = vsel %vm2291_vm12, %v2183_v25, %v2328_v18  ;;  %vm2292_vm15 = vcmp.ge.f32.partialorder %v2186_v10, 0.0  ;;  %v2329_v40 = vmul.f32 %v4876_v22, %v2186_v10  ;;  %v1542_v41 = vpop.permute.xlu1 %1541  ;;  %vm2431_vm12 = vcmask 1046528   ;;  %v3870_v18 = vld [vmem:[%s4182_s18 + $0x1a1] sm:$0xff] }
 0x1e5   : > { %2393 = vst.msk [vmem:[#allocation3 + $0x30] sm:$0xff] %vm2386_vm13, %v2360_v35  ;;  %v2358_v37 = vsel %vm2289_vm14, %v2175_v31, %v2326_v9  ;;  %v1540_v29 = vpop.permute.xlu0 %1539  ;;  %vm2290_vm0 = vcmp.ge.f32.partialorder %v2178_v36, 0.0  ;;  %v2327_v30 = vmul.f32 %v4876_v22, %v2178_v36  ;;  %vm2446_vm14 = vcmask 73728  }
 0x1e6   : > { %2391 = vst.msk [vmem:[#allocation3 + $0x20] sm:$0xff] %vm2386_vm13, %v2358_v37  ;;  %v2361_v42 = vsel %vm2292_vm15, %v2186_v10, %v2329_v40  ;;  %1844 = vrot.lane.b32.xlu1 %v4956_v1, %s4089_s22  ;;  %vm2448_vm15 = vcmask 75778   ;;  %v3872_v37 = vld [vmem:[%s4182_s18 + $0x1a2] sm:$0xff]  ;;  %v3871_v40 = vld [vmem:[%s4182_s18 + $0x19a] sm:$0xff] }
 0x1e7   : > { %1546 = vst.msk [vmem:[#allocation2 + $0xb8] sm:$0xff] %vm429_vm6, %v1542_v41  ;;  %1545 = vst.msk [vmem:[#allocation2 + $0xb0] sm:$0xff] %vm429_vm6, %v1540_v29  ;;  %1842 = vrot.lane.b32.xlu0 %v4959_v6, %s4089_s22  ;;  %v2359_v43 = vsel %vm2290_vm0, %v2178_v36, %v2327_v30  ;;  %vm5548_vm0 = vcmask 77828  }
 0x1e8   : > { %2394 = vst.msk [vmem:[#allocation3 + $0x38] sm:$0xff] %vm2386_vm13, %v2361_v42  ;;  %2392 = vst.msk [vmem:[#allocation3 + $0x28] sm:$0xff] %vm2386_vm13, %v2359_v43  ;;  %v1466_v48 = vpop.permute.xlu1 %1465 }
 0x1e9   : > { %v1464_v49 = vpop.permute.xlu0 %1463  ;;  %1470 = vst.msk [vmem:[#allocation2 + $0xa8] sm:$0xff] %vm456_vm8, %v1466_v48 }
 0x1ea   : > { %1469 = vst.msk [vmem:[#allocation2 + $0xa0] sm:$0xff] %vm456_vm8, %v1464_v49  ;;  %1933 = vrot.lane.b32.xlu1 %v3862_v46, %s4088_s21 }
 0x1eb   : > { %1931 = vrot.lane.b32.xlu0 %v3861_v47, %s4088_s21 }
 0x1ec   : > { %v1554_v56 = vpop.permute.xlu1 %1553 }
 0x1ed   : > { %v5032_v55 = vld [vmem:[#allocation3 + $0x20] sm:$0xff]  ;;  %v1552_v57 = vpop.permute.xlu0 %1551  ;;  %1558 = vst.msk [vmem:[#allocation2 + $0xb8] sm:$0xff] %vm442_vm7, %v1554_v56 }
 0x1ee   : > { %1557 = vst.msk [vmem:[#allocation2 + $0xb0] sm:$0xff] %vm442_vm7, %v1552_v57  ;;  %v2427_v61 = vmax.f32 %v2425_v54, %v5032_v55  ;;  %1856 = vrot.lane.b32.xlu1 %v4969_v8, %s4090_s23 }
 0x1ef   : > { %1854 = vrot.lane.b32.xlu0 %v4972_v11, %s4090_s23  ;;  %v5041_v58 = vld [vmem:[#allocation3 + $0x28] sm:$0xff] }
 0x1f0   : > { %v2428_v53 = vmax.f32 %v2426_v60, %v5041_v58  ;;  %v1478_v26 = vpop.permute.xlu1 %1477  ;;  %v2432_v62 = vrot.slane %v2427_v61, 1  ;;  %v2439_v1 = vrot.slane %v2427_v61, 2  ;;  %v3866_v11 = vld [vmem:[%s4182_s18 + $0x18a] sm:$0xff]  ;;  %s4096_s18 = smov 20  }
 0x1f1   : > { %v1476_v27 = vpop.permute.xlu0 %1475  ;;  %1482 = vst.msk [vmem:[#allocation2 + $0xa8] sm:$0xff] %vm469_vm9, %v1478_v26 }
 0x1f2   : > { %1481 = vst.msk [vmem:[#allocation2 + $0xa0] sm:$0xff] %vm469_vm9, %v1476_v27  ;;  %v2433_v63 = vrot.slane %v2428_v53, 1  ;;  %1945 = vrot.lane.b32.xlu1 %v3864_v59, %s4089_s22  ;;  %v2440_v0 = vrot.slane %v2428_v53, 2 }
 0x1f3   : > { %1943 = vrot.lane.b32.xlu0 %v3863_v52, %s4089_s22 }
 0x1f4   : > { %v1567_v6 = vpop.permute.xlu1 %1566  ;;  %v2434_v2 = vsel %vm2431_vm12, %v2432_v62, %v2433_v63  ;;  %v2438_v3 = vmax.f32 %v2428_v53, %v2433_v63  ;;  %v2441_v5 = vsel %vm2118_vm2, %v2439_v1, %v2440_v0 }
 0x1f5   : > { %v1565_v7 = vpop.permute.xlu0 %1564  ;;  %1571 = vst.msk [vmem:[#allocation2 + $0xb8] sm:$0xff] %vm456_vm8, %v1567_v6  ;;  %v2437_v4 = vmax.f32 %v2427_v61, %v2434_v2 }
 0x1f6   : > { %1570 = vst.msk [vmem:[#allocation2 + $0xb0] sm:$0xff] %vm456_vm8, %v1565_v7  ;;  %1869 = vrot.lane.b32.xlu1 %v3862_v46, %s4091_s24  ;;  %v2445_v8 = vmax.f32 %v2438_v3, %v2440_v0 }
 0x1f7   : > { %1867 = vrot.lane.b32.xlu0 %v3861_v47, %s4091_s24  ;;  %v2444_v39 = vmax.f32 %v2437_v4, %v2441_v5 }
 0x1f8   : > { %v1490_v12 = vpop.permute.xlu1 %1489  ;;  %2454 = vst.msk [vmem:[#allocation4 + $0x4] sm:$0x1] %vm2446_vm14, %v2445_v8 }
 0x1f9   : > { %v1488_v13 = vpop.permute.xlu0 %1487  ;;  %2455 = vst.msk [vmem:[#allocation4 + $0x3] sm:$0x4] %vm2448_vm15, %v2445_v8  ;;  %2449 = vst.msk [vmem:[#allocation4 - $0x1] sm:$0x4] %vm2448_vm15, %v2444_v39 }
 0x1fa   : > { %2456 = vst.msk [vmem:[#allocation4 + $0x2] sm:$0x10] %vm5548_vm0, %v2445_v8  ;;  %2451 = vst.msk [vmem:[#allocation4 - $0x2] sm:$0x10] %vm5548_vm0, %v2444_v39  ;;  %1957 = vrot.lane.b32.xlu1 %v3866_v11, %s4090_s23  ;;  %vm5555_vm0 = vcmask 77824   ;;  %v2459_v8 = vld [vmem:[#allocation3 + $0x30] sm:$0xff] }
 0x1fb   : > { %1494 = vst.msk [vmem:[#allocation2 + $0xa8] sm:$0xff] %vm5554_vm10, %v1490_v12  ;;  %1493 = vst.msk [vmem:[#allocation2 + $0xa0] sm:$0xff] %vm5554_vm10, %v1488_v13  ;;  %1955 = vrot.lane.b32.xlu0 %v3865_v38, %s4090_s23  ;;  %s4097_s23 = smov 30  }
 0x1fc   : > { %2453 = vst.msk [vmem:[#allocation4 - $0x3] sm:$0x40] %vm5553_vm1, %v2444_v39  ;;  %v1579_v14 = vpop.permute.xlu1 %1578 }
 0x1fd   : > { %2447 = vst.msk [vmem:[#allocation4] sm:$0x1] %vm2446_vm14, %v2444_v39  ;;  %v1577_v15 = vpop.permute.xlu0 %1576 }
 0x1fe   : > { %1583 = vst.msk [vmem:[#allocation2 + $0xb8] sm:$0xff] %vm469_vm9, %v1579_v14  ;;  %1582 = vst.msk [vmem:[#allocation2 + $0xb0] sm:$0xff] %vm469_vm9, %v1577_v15  ;;  %1881 = vrot.lane.b32.xlu1 %v3864_v59, %s4092_s25 }
 0x1ff   : > { %1879 = vrot.lane.b32.xlu0 %v3863_v52, %s4092_s25 }
 0x200   : > { %v1591_v21 = vpop.permute.xlu1 %1590 }
 0x201   : > { %v1589_v23 = vpop.permute.xlu0 %1588  ;;  %1595 = vst.msk [vmem:[#allocation2 + $0xb8] sm:$0xff] %vm5554_vm10, %v1591_v21 }
 0x202   : > { %v2020_v24 = vld [vmem:[#allocation2 + $0xa0] sm:$0xff]  ;;  %v2021_v25 = vld [vmem:[#allocation2 + $0xa8] sm:$0xff]  ;;  %1594 = vst.msk [vmem:[#allocation2 + $0xb0] sm:$0xff] %vm5554_vm10, %v1589_v23  ;;  %1970 = vrot.lane.b32.xlu1 %v3868_v16, %s4091_s24 }
 0x203   : > { %v2042_v28 = vpack.c.bf16 %v2021_v25, %v2020_v24  ;;  %1968 = vrot.lane.b32.xlu0 %v3867_v19, %s4091_s24  ;;  %v2658_v43 = vld [vmem:[#allocation4 + $0x1] sm:$0x1f]  ;;  %s4098_s24 = smov 40  }
 0x204   : > { %v2655_v31 = vld [vmem:[#allocation4] sm:$0x1f]  ;;  %v1607_v32 = vpop.permute.xlu1 %1606 }
 0x205   : > { %2657 = vst.msk [vmem:[#allocation5] sm:$0x1f] %vm5555_vm0, %v2655_v31  ;;  %3976 = vmatprep.mubr.msk.bf16.mxu0 %vm5552_vm11, %v2042_v28  ;;  %v1605_v17 = vpop.permute.xlu0 %1604 }
 0x206   : > { %1611 = vst.msk [vmem:[#allocation2 + $0xc8] sm:$0xff] %vm5550_vm3, %v1607_v32  ;;  %1610 = vst.msk [vmem:[#allocation2 + $0xc0] sm:$0xff] %vm5550_vm3, %v1605_v17  ;;  %1893 = vrot.lane.b32.xlu1 %v3866_v11, %s4094_s30  ;;  %v2460_v11 = vld [vmem:[#allocation3 + $0x38] sm:$0xff] }
 0x207   : > { %1891 = vrot.lane.b32.xlu0 %v3865_v38, %s4094_s30  ;;  %v2463_v38 = vmax.f32 %v5032_v55, %v2459_v8  ;;  %v2464_v14 = vmax.f32 %v5041_v58, %v2460_v11 }
 0x208   : > { %v1619_v9 = vpop.permute.xlu1 %1618  ;;  %v2023_v35 = vld [vmem:[#allocation2 + $0xb8] sm:$0xff] }
 0x209   : > { %v1617_v10 = vpop.permute.xlu0 %1616  ;;  %v2022_v34 = vld [vmem:[#allocation2 + $0xb0] sm:$0xff]  ;;  %1623 = vst.msk [vmem:[#allocation2 + $0xc8] sm:$0xff] %vm5549_vm4, %v1619_v9 }
 0x20a   : > { %1622 = vst.msk [vmem:[#allocation2 + $0xc0] sm:$0xff] %vm5549_vm4, %v1617_v10  ;;  %v2043_v36 = vpack.c.bf16 %v2023_v35, %v2022_v34  ;;  %1982 = vrot.lane.b32.xlu1 %v3870_v18, %s4092_s25 }
 0x20b   : > { %1980 = vrot.lane.b32.xlu0 %v3869_v33, %s4092_s25  ;;  %s4099_s25 = smov 50  }
 0x20c   : > { %3977 = vmatmul.mubr.msk.bf16.gmra.mrb[20].mxu0 %vm5552_vm11, %v2043_v36  ;;  %v1708_v41 = vpop.permute.xlu1 %1707 }
 0x20d   : > { %v1706_v29 = vpop.permute.xlu0 %1705  ;;  %1712 = vst.msk [vmem:[#allocation2 + $0xd8] sm:$0xff] %vm5550_vm3, %v1708_v41 }
 0x20e   : > { %1711 = vst.msk [vmem:[#allocation2 + $0xd0] sm:$0xff] %vm5550_vm3, %v1706_v29  ;;  %1994 = vrot.lane.b32.xlu1 %v3872_v37, %s4094_s30 }
 0x20f   : > { %1992 = vrot.lane.b32.xlu0 %v3871_v40, %s4094_s30  ;;  %s4102_s30 = smov 80  }
 0x210   : > { %v1631_v30 = vpop.permute.xlu1 %1630 }
 0x211   : > { %v1629_v42 = vpop.permute.xlu0 %1628  ;;  %1635 = vst.msk [vmem:[#allocation2 + $0xc8] sm:$0xff] %vm5551_vm5, %v1631_v30 }
 0x212   : > { %1634 = vst.msk [vmem:[#allocation2 + $0xc0] sm:$0xff] %vm5551_vm5, %v1629_v42 }
 0x213   : > { %2660 = vrot.lane.b32.xlu0 %v2658_v43, %s4095_s17 }
 0x214   : > { %v1720_v46 = vpop.permute.xlu1 %1719 }
 0x215   : > { %v1718_v47 = vpop.permute.xlu0 %1717  ;;  %1724 = vst.msk [vmem:[#allocation2 + $0xd8] sm:$0xff] %vm5549_vm4, %v1720_v46 }
 0x216   : > { %1723 = vst.msk [vmem:[#allocation2 + $0xd0] sm:$0xff] %vm5549_vm4, %v1718_v47 }
 0x218   : > { %v1643_v48 = vpop.permute.xlu1 %1642 }
 0x219   : > { %v1641_v49 = vpop.permute.xlu0 %1640  ;;  %1647 = vst.msk [vmem:[#allocation2 + $0xc8] sm:$0xff] %vm429_vm6, %v1643_v48 }
 0x21a   : > { %1646 = vst.msk [vmem:[#allocation2 + $0xc0] sm:$0xff] %vm429_vm6, %v1641_v49 }
 0x21c   : > { %v1732_v50 = vpop.permute.xlu1 %1731 }
 0x21d   : > { %v1730_v51 = vpop.permute.xlu0 %1729  ;;  %1736 = vst.msk [vmem:[#allocation2 + $0xd8] sm:$0xff] %vm5551_vm5, %v1732_v50 }
 0x21e   : > { %1735 = vst.msk [vmem:[#allocation2 + $0xd0] sm:$0xff] %vm5551_vm5, %v1730_v51 }
 0x21f   : > { %v3966_v44 = vpop.f32.mrb[8].mxu0 }
 0x220   : > { %v2199_v45 = vadd.f32 %v3966_v44, %v4865_v20  ;;  %v2190_v54 = vpop.f32.mrb[9].mxu0  ;;  %v1655_v57 = vpop.permute.xlu1 %1654 }
 0x221   : > { %v2191_v56 = vadd.f32 %v4865_v20, %v2190_v54  ;;  %v1653_v60 = vpop.permute.xlu0 %1652  ;;  %1659 = vst.msk [vmem:[#allocation2 + $0xc8] sm:$0xff] %vm442_vm7, %v1655_v57  ;;  %v3967_v59 = vpop.f32.mrb[10].mxu0 }
 0x222   : > { %vm2295_vm4 = vcmp.ge.f32.partialorder %v2199_v45, 0.0  ;;  %v2332_v61 = vmul.f32 %v4876_v22, %v2199_v45  ;;  %1658 = vst.msk [vmem:[#allocation2 + $0xc0] sm:$0xff] %vm442_vm7, %v1653_v60  ;;  %v2202_v53 = vadd.f32 %v3967_v59, %v4865_v20  ;;  %v2193_v26 = vpop.f32.mrb[11].mxu0 }
 0x223   : > { %vm2293_vm3 = vcmp.ge.f32.partialorder %v2191_v56, 0.0  ;;  %v2330_v52 = vmul.f32 %v4876_v22, %v2191_v56  ;;  %v2194_v62 = vadd.f32 %v4865_v20, %v2193_v26 }
 0x224   : > { %v2364_v27 = vsel %vm2295_vm4, %v2199_v45, %v2332_v61  ;;  %vm2296_vm5 = vcmp.ge.f32.partialorder %v2202_v53, 0.0  ;;  %v2333_v0 = vmul.f32 %v4876_v22, %v2202_v53  ;;  %v1744_v1 = vpop.permute.xlu1 %1743 }
 0x225   : > { %2397 = vst.msk [vmem:[#allocation3 + $0x50] sm:$0xff] %vm2386_vm13, %v2364_v27  ;;  %v2362_v63 = vsel %vm2293_vm3, %v2191_v56, %v2330_v52  ;;  %v1742_v6 = vpop.permute.xlu0 %1741  ;;  %vm2294_vm11 = vcmp.ge.f32.partialorder %v2194_v62, 0.0  ;;  %v2331_v7 = vmul.f32 %v4876_v22, %v2194_v62  ;;  %vm5556_vm3 = vcmask 77828  }
 0x226   : > { %2395 = vst.msk [vmem:[#allocation3 + $0x40] sm:$0xff] %vm2386_vm13, %v2362_v63  ;;  %v2365_v2 = vsel %vm2296_vm5, %v2202_v53, %v2333_v0  ;;  %vm5557_vm4 = vmmov %vm5556_vm3  ;;  %vm5558_vm5 = vcmask 220160  }
 0x227   : > { %1748 = vst.msk [vmem:[#allocation2 + $0xd8] sm:$0xff] %vm429_vm6, %v1744_v1  ;;  %1747 = vst.msk [vmem:[#allocation2 + $0xd0] sm:$0xff] %vm429_vm6, %v1742_v6  ;;  %v2363_v3 = vsel %vm2294_vm11, %v2194_v62, %v2331_v7  ;;  %vm5559_vm11 = vcmask 48152  }
 0x228   : > { %2398 = vst.msk [vmem:[#allocation3 + $0x58] sm:$0xff] %vm2386_vm13, %v2365_v2  ;;  %2396 = vst.msk [vmem:[#allocation3 + $0x48] sm:$0xff] %vm2386_vm13, %v2363_v3  ;;  %v1668_v4 = vpop.permute.xlu1 %1667 }
 0x229   : > { %v1666_v5 = vpop.permute.xlu0 %1665  ;;  %1672 = vst.msk [vmem:[#allocation2 + $0xc8] sm:$0xff] %vm456_vm8, %v1668_v4 }
 0x22a   : > { %1671 = vst.msk [vmem:[#allocation2 + $0xc0] sm:$0xff] %vm456_vm8, %v1666_v5 }
 0x22c   : > { %v1756_v12 = vpop.permute.xlu1 %1755 }
 0x22d   : > { %v5126_v39 = vld [vmem:[#allocation3 + $0x40] sm:$0xff]  ;;  %v1754_v13 = vpop.permute.xlu0 %1753  ;;  %1760 = vst.msk [vmem:[#allocation2 + $0xd8] sm:$0xff] %vm442_vm7, %v1756_v12 }
 0x22e   : > { %1759 = vst.msk [vmem:[#allocation2 + $0xd0] sm:$0xff] %vm442_vm7, %v1754_v13  ;;  %v2465_v15 = vmax.f32 %v2463_v38, %v5126_v39 }
 0x22f   : > { %v5132_v16 = vld [vmem:[#allocation3 + $0x48] sm:$0xff] }
 0x230   : > { %v2466_v19 = vmax.f32 %v2464_v14, %v5132_v16  ;;  %v1680_v21 = vpop.permute.xlu1 %1679  ;;  %v2469_v55 = vrot.slane %v2465_v15, 1  ;;  %v2476_v28 = vrot.slane %v2465_v15, 2 }
 0x231   : > { %v1678_v23 = vpop.permute.xlu0 %1677  ;;  %1684 = vst.msk [vmem:[#allocation2 + $0xc8] sm:$0xff] %vm469_vm9, %v1680_v21 }
 0x232   : > { %1683 = vst.msk [vmem:[#allocation2 + $0xc0] sm:$0xff] %vm469_vm9, %v1678_v23  ;;  %v2470_v24 = vrot.slane %v2466_v19, 1  ;;  %v2477_v25 = vrot.slane %v2466_v19, 2 }
 0x234   : > { %v1769_v31 = vpop.permute.xlu1 %1768  ;;  %v2471_v58 = vsel %vm2431_vm12, %v2469_v55, %v2470_v24  ;;  %v2475_v17 = vmax.f32 %v2466_v19, %v2470_v24  ;;  %v2478_v33 = vsel %vm2118_vm2, %v2476_v28, %v2477_v25  ;;  %v2492_v24 = vld [vmem:[#allocation3 + $0x50] sm:$0xff] }
 0x235   : > { %v1767_v32 = vpop.permute.xlu0 %1766  ;;  %1773 = vst.msk [vmem:[#allocation2 + $0xd8] sm:$0xff] %vm456_vm8, %v1769_v31  ;;  %v2474_v18 = vmax.f32 %v2465_v15, %v2471_v58 }
 0x236   : > { %1772 = vst.msk [vmem:[#allocation2 + $0xd0] sm:$0xff] %vm456_vm8, %v1767_v32  ;;  %v2482_v9 = vmax.f32 %v2475_v17, %v2477_v25  ;;  %v2493_v25 = vld [vmem:[#allocation3 + $0x58] sm:$0xff] }
 0x237   : > { %v2481_v10 = vmax.f32 %v2474_v18, %v2478_v33  ;;  %v2497_v58 = vmax.f32 %v5132_v16, %v2493_v25 }
 0x238   : > { %v1692_v34 = vpop.permute.xlu1 %1691  ;;  %2487 = vst.msk [vmem:[#allocation4 + $0xb] sm:$0x1] %vm2446_vm14, %v2482_v9 }
 0x239   : > { %v1690_v35 = vpop.permute.xlu0 %1689  ;;  %2488 = vst.msk [vmem:[#allocation4 + $0xa] sm:$0x4] %vm2448_vm15, %v2482_v9  ;;  %2484 = vst.msk [vmem:[#allocation4 + $0x6] sm:$0x4] %vm2448_vm15, %v2481_v10 }
 0x23a   : > { %2489 = vst.msk [vmem:[#allocation4 + $0x9] sm:$0x10] %vm5556_vm3, %v2482_v9  ;;  %vm5560_vm3 = vmmov %vm5559_vm11 }
 0x23b   : > { %1696 = vst.msk [vmem:[#allocation2 + $0xc8] sm:$0xff] %vm5554_vm10, %v1692_v34  ;;  %1695 = vst.msk [vmem:[#allocation2 + $0xc0] sm:$0xff] %vm5554_vm10, %v1690_v35 }
 0x23c   : > { %2485 = vst.msk [vmem:[#allocation4 + $0x5] sm:$0x10] %vm5557_vm4, %v2481_v10  ;;  %v1781_v36 = vpop.permute.xlu1 %1780  ;;  %vm5561_vm4 = vcmask 72752  }
 0x23d   : > { %2486 = vst.msk [vmem:[#allocation4 + $0x4] sm:$0x40] %vm5553_vm1, %v2481_v10  ;;  %v1779_v37 = vpop.permute.xlu0 %1778  ;;  %vm5562_vm1 = vmmov %vm5561_vm4 }
 0x23e   : > { %2483 = vst.msk [vmem:[#allocation4 + $0x7] sm:$0x1] %vm2446_vm14, %v2481_v10 }
 0x23f   : > { %1785 = vst.msk [vmem:[#allocation2 + $0xd8] sm:$0xff] %vm469_vm9, %v1781_v36  ;;  %1784 = vst.msk [vmem:[#allocation2 + $0xd0] sm:$0xff] %vm469_vm9, %v1779_v37 }
 0x240   : > { %v1793_v40 = vpop.permute.xlu1 %1792 }
 0x241   : > { %v1791_v41 = vpop.permute.xlu0 %1790  ;;  %1797 = vst.msk [vmem:[#allocation2 + $0xd8] sm:$0xff] %vm5554_vm10, %v1793_v40 }
 0x242   : > { %v2024_v30 = vld [vmem:[#allocation2 + $0xc0] sm:$0xff]  ;;  %v2025_v42 = vld [vmem:[#allocation2 + $0xc8] sm:$0xff]  ;;  %1796 = vst.msk [vmem:[#allocation2 + $0xd0] sm:$0xff] %vm5554_vm10, %v1791_v41  ;;  %vm5563_vm10 = vmmov %vm5558_vm5 }
 0x243   : > { %v2044_v43 = vpack.c.bf16 %v2025_v42, %v2024_v30 }
 0x244   : > { %v2716_v29 = vld [vmem:[#allocation4 + $0x8] sm:$0x1f]  ;;  %v1809_v47 = vpop.permute.xlu1 %1808 }
 0x245   : > { %2718 = vrot.lane.b32.xlu1 %v2716_v29, %s4095_s17  ;;  %v2714_v46 = vld [vmem:[#allocation4 + $0x7] sm:$0x1f]  ;;  %3980 = vmatprep.mubr.msk.bf16.mxu0 %vm5558_vm5, %v2044_v43  ;;  %v1807_v48 = vpop.permute.xlu0 %1806  ;;  %1813 = vst.msk [vmem:[#allocation2 + $0xe8] sm:$0xff] %vm5559_vm11, %v1809_v47  ;;  %vm5564_vm5 = vmmov %vm5560_vm3  ;;  %vm5566_vm11 = vcmask 97352  }
 0x246   : > { %2715 = vst.msk [vmem:[#allocation5 + $0x5] sm:$0x1f] %vm5555_vm0, %v2714_v46  ;;  %vm5565_vm0 = vmmov %vm5560_vm3 }
 0x247   : > { %1812 = vst.msk [vmem:[#allocation2 + $0xe0] sm:$0xff] %vm5560_vm3, %v1807_v48  ;;  %vm5567_vm3 = vmmov %vm5566_vm11 }
 0x248   : > { %v1821_v49 = vpop.permute.xlu1 %1820  ;;  %v2027_v44 = vld [vmem:[#allocation2 + $0xd8] sm:$0xff] }
 0x249   : > { %v1819_v50 = vpop.permute.xlu0 %1818  ;;  %v2026_v51 = vld [vmem:[#allocation2 + $0xd0] sm:$0xff]  ;;  %1825 = vst.msk [vmem:[#allocation2 + $0xe8] sm:$0xff] %vm5561_vm4, %v1821_v49  ;;  %vm5568_vm4 = vmmov %vm5562_vm1 }
 0x24a   : > { %1824 = vst.msk [vmem:[#allocation2 + $0xe0] sm:$0xff] %vm5562_vm1, %v1819_v50  ;;  %v2045_v45 = vpack.c.bf16 %v2027_v44, %v2026_v51 }
 0x24c   : > { %3981 = vmatmul.mubr.msk.bf16.gmra.mrb[24].mxu0 %vm5563_vm10, %v2045_v45  ;;  %v1910_v54 = vpop.permute.xlu1 %1909  ;;  %vm5569_vm10 = vmmov %vm5567_vm3 }
 0x24d   : > { %v1908_v56 = vpop.permute.xlu0 %1907  ;;  %1914 = vst.msk [vmem:[#allocation2 + $0xf8] sm:$0xff] %vm5564_vm5, %v1910_v54 }
 0x24e   : > { %1913 = vst.msk [vmem:[#allocation2 + $0xf0] sm:$0xff] %vm5565_vm0, %v1908_v56  ;;  %vm5570_vm0 = vmmov %vm5567_vm3 }
 0x250   : > { %v1833_v57 = vpop.permute.xlu1 %1832 }
 0x251   : > { %v1831_v60 = vpop.permute.xlu0 %1830  ;;  %1837 = vst.msk [vmem:[#allocation2 + $0xe8] sm:$0xff] %vm5566_vm11, %v1833_v57 }
 0x252   : > { %1836 = vst.msk [vmem:[#allocation2 + $0xe0] sm:$0xff] %vm5567_vm3, %v1831_v60  ;;  %v2665_v60 = vld [vmem:[#allocation4 + $0x2] sm:$0x1f] }
 0x254   : > { %v1922_v61 = vpop.permute.xlu1 %1921 }
 0x255   : > { %v1920_v59 = vpop.permute.xlu0 %1919  ;;  %1926 = vst.msk [vmem:[#allocation2 + $0xf8] sm:$0xff] %vm5568_vm4, %v1922_v61 }
 0x256   : > { %1925 = vst.msk [vmem:[#allocation2 + $0xf0] sm:$0xff] %vm5562_vm1, %v1920_v59 }
 0x258   : > { %v1845_v52 = vpop.permute.xlu1 %1844 }
 0x259   : > { %v1843_v53 = vpop.permute.xlu0 %1842  ;;  %1849 = vst.msk [vmem:[#allocation2 + $0xe8] sm:$0xff] %vm429_vm6, %v1845_v52 }
 0x25a   : > { %1848 = vst.msk [vmem:[#allocation2 + $0xe0] sm:$0xff] %vm429_vm6, %v1843_v53 }
 0x25c   : > { %v1934_v26 = vpop.permute.xlu1 %1933 }
 0x25d   : > { %v1932_v27 = vpop.permute.xlu0 %1931  ;;  %1938 = vst.msk [vmem:[#allocation2 + $0xf8] sm:$0xff] %vm5569_vm10, %v1934_v26  ;;  %vm5575_vm10 = vcmask 79878  }
 0x25e   : > { %1937 = vst.msk [vmem:[#allocation2 + $0xf0] sm:$0xff] %vm5570_vm0, %v1932_v27 }
 0x25f   : > { %v3970_v62 = vpop.f32.mrb[12].mxu0 }
 0x260   : > { %v2215_v63 = vadd.f32 %v3970_v62, %v4865_v20  ;;  %v2206_v0 = vpop.f32.mrb[13].mxu0  ;;  %v1857_v6 = vpop.permute.xlu1 %1856  ;;  %v5229_v62 = vld [vmem:[%s5538_s2] ss:$0 sm:$0xff] }
 0x261   : > { %v2207_v1 = vadd.f32 %v4865_v20, %v2206_v0  ;;  %v1855_v7 = vpop.permute.xlu0 %1854  ;;  %1861 = vst.msk [vmem:[#allocation2 + $0xe8] sm:$0xff] %vm442_vm7, %v1857_v6  ;;  %v3971_v3 = vpop.f32.mrb[14].mxu0 }
 0x262   : > { %vm2299_vm5 = vcmp.ge.f32.partialorder %v2215_v63, 0.0  ;;  %v2336_v2 = vmul.f32 %v4876_v22, %v2215_v63  ;;  %1860 = vst.msk [vmem:[#allocation2 + $0xe0] sm:$0xff] %vm442_vm7, %v1855_v7  ;;  %v2218_v5 = vadd.f32 %v3971_v3, %v4865_v20  ;;  %v2209_v8 = vpop.f32.mrb[15].mxu0  ;;  %v5236_v7 = vld [vmem:[%s5538_s2 + $0x1] ss:$0 sm:$0xff] }
 0x263   : > { %vm2297_vm11 = vcmp.ge.f32.partialorder %v2207_v1, 0.0  ;;  %v2334_v4 = vmul.f32 %v4876_v22, %v2207_v1  ;;  %v2210_v38 = vadd.f32 %v4865_v20, %v2209_v8 }
 0x264   : > { %v2368_v11 = vsel %vm2299_vm5, %v2215_v63, %v2336_v2  ;;  %vm2300_vm3 = vcmp.ge.f32.partialorder %v2218_v5, 0.0  ;;  %v2337_v13 = vmul.f32 %v4876_v22, %v2218_v5  ;;  %v1946_v14 = vpop.permute.xlu1 %1945 }
 0x265   : > { %2401 = vst.msk [vmem:[#allocation3 + $0x70] sm:$0xff] %vm2386_vm13, %v2368_v11  ;;  %v2366_v12 = vsel %vm2297_vm11, %v2207_v1, %v2334_v4  ;;  %v1944_v15 = vpop.permute.xlu0 %1943  ;;  %vm2298_vm4 = vcmp.ge.f32.partialorder %v2210_v38, 0.0  ;;  %v2335_v19 = vmul.f32 %v4876_v22, %v2210_v38  ;;  %v2496_v22 = vmax.f32 %v5126_v39, %v2492_v24 }
 0x266   : > { %2399 = vst.msk [vmem:[#allocation3 + $0x60] sm:$0xff] %vm2386_vm13, %v2366_v12  ;;  %v2369_v21 = vsel %vm2300_vm3, %v2218_v5, %v2337_v13  ;;  %vm2663_vm11 = vcmask 159824   ;;  %vm5578_vm3 = vcmask 77824  }
 0x267   : > { %1950 = vst.msk [vmem:[#allocation2 + $0xf8] sm:$0xff] %vm429_vm6, %v1946_v14  ;;  %1949 = vst.msk [vmem:[#allocation2 + $0xf0] sm:$0xff] %vm429_vm6, %v1944_v15  ;;  %v2367_v20 = vsel %vm2298_vm4, %v2210_v38, %v2335_v19  ;;  %vm5571_vm6 = vcmask 77828   ;;  %vm5579_vm4 = vcmask 220160  }
 0x268   : > { %2402 = vst.msk [vmem:[#allocation3 + $0x78] sm:$0xff] %vm2386_vm13, %v2369_v21  ;;  %2400 = vst.msk [vmem:[#allocation3 + $0x68] sm:$0xff] %vm2386_vm13, %v2367_v20  ;;  %v1870_v23 = vpop.permute.xlu1 %1869 }
 0x269   : > { %v1868_v55 = vpop.permute.xlu0 %1867  ;;  %1874 = vst.msk [vmem:[#allocation2 + $0xe8] sm:$0xff] %vm456_vm8, %v1870_v23 }
 0x26a   : > { %1873 = vst.msk [vmem:[#allocation2 + $0xe0] sm:$0xff] %vm456_vm8, %v1868_v55 }
 0x26c   : > { %v1958_v31 = vpop.permute.xlu1 %1957  ;;  %v2525_v19 = vld [vmem:[#allocation3 + $0x70] sm:$0xff] }
 0x26d   : > { %v5191_v28 = vld [vmem:[#allocation3 + $0x60] sm:$0xff]  ;;  %v1956_v32 = vpop.permute.xlu0 %1955  ;;  %1962 = vst.msk [vmem:[#allocation2 + $0xf8] sm:$0xff] %vm442_vm7, %v1958_v31 }
 0x26e   : > { %1961 = vst.msk [vmem:[#allocation2 + $0xf0] sm:$0xff] %vm442_vm7, %v1956_v32  ;;  %v2498_v17 = vmax.f32 %v2496_v22, %v5191_v28  ;;  %vm5572_vm7 = vcmask 220352   ;;  %v2529_v20 = vmax.f32 %v5191_v28, %v2525_v19 }
 0x26f   : > { %v5197_v18 = vld [vmem:[#allocation3 + $0x68] sm:$0xff]  ;;  %vm5573_vm1 = vmmov %vm5572_vm7  ;;  %v2526_v21 = vld [vmem:[#allocation3 + $0x78] sm:$0xff] }
 0x270   : > { %v2499_v33 = vmax.f32 %v2497_v58, %v5197_v18  ;;  %v1882_v9 = vpop.permute.xlu1 %1881  ;;  %v2502_v39 = vrot.slane %v2498_v17, 1  ;;  %v2509_v36 = vrot.slane %v2498_v17, 2  ;;  %vm5576_vm0 = vmmov %vm5573_vm1  ;;  %v2530_v55 = vmax.f32 %v5197_v18, %v2526_v21 }
 0x271   : > { %v1880_v10 = vpop.permute.xlu0 %1879  ;;  %1886 = vst.msk [vmem:[#allocation2 + $0xe8] sm:$0xff] %vm469_vm9, %v1882_v9  ;;  %vm5577_vm5 = vmmov %vm5576_vm0 }
 0x272   : > { %1885 = vst.msk [vmem:[#allocation2 + $0xe0] sm:$0xff] %vm469_vm9, %v1880_v10  ;;  %v2503_v34 = vrot.slane %v2499_v33, 1  ;;  %v2510_v35 = vrot.slane %v2499_v33, 2 }
 0x274   : > { %v1971_v37 = vpop.permute.xlu1 %1970  ;;  %v2504_v16 = vsel %vm2431_vm12, %v2502_v39, %v2503_v34  ;;  %v2508_v41 = vmax.f32 %v2499_v33, %v2503_v34  ;;  %v2511_v30 = vsel %vm2118_vm2, %v2509_v36, %v2510_v35 }
 0x275   : > { %v1969_v40 = vpop.permute.xlu0 %1968  ;;  %1975 = vst.msk [vmem:[#allocation2 + $0xf8] sm:$0xff] %vm456_vm8, %v1971_v37  ;;  %v2507_v29 = vmax.f32 %v2498_v17, %v2504_v16  ;;  %v2722_v37 = vld [vmem:[#allocation4 + $0x9] sm:$0x1f] }
 0x276   : > { %1974 = vst.msk [vmem:[#allocation2 + $0xf0] sm:$0xff] %vm456_vm8, %v1969_v40  ;;  %v2515_v42 = vmax.f32 %v2508_v41, %v2510_v35  ;;  %vm5574_vm8 = vmmov %vm5571_vm6  ;;  %v2672_v16 = vld [vmem:[#allocation4 + $0x7] sm:$0x1f] }
 0x277   : > { %v2514_v43 = vmax.f32 %v2507_v29, %v2511_v30 }
 0x278   : > { %v1894_v46 = vpop.permute.xlu1 %1893  ;;  %2520 = vst.msk [vmem:[#allocation4 + $0x12] sm:$0x1] %vm2446_vm14, %v2515_v42 }
 0x279   : > { %v1892_v47 = vpop.permute.xlu0 %1891  ;;  %2521 = vst.msk [vmem:[#allocation4 + $0x11] sm:$0x4] %vm2448_vm15, %v2515_v42  ;;  %2517 = vst.msk [vmem:[#allocation4 + $0xd] sm:$0x4] %vm2448_vm15, %v2514_v43 }
 0x27a   : > { %2522 = vst.msk [vmem:[#allocation4 + $0x10] sm:$0x10] %vm5571_vm6, %v2515_v42 }
 0x27b   : > { %1898 = vst.msk [vmem:[#allocation2 + $0xe8] sm:$0xff] %vm5572_vm7, %v1894_v46 }
 0x27c   : > { %1897 = vst.msk [vmem:[#allocation2 + $0xe0] sm:$0xff] %vm5573_vm1, %v1892_v47  ;;  %v1983_v48 = vpop.permute.xlu1 %1982 }
 0x27d   : > { %2518 = vst.msk [vmem:[#allocation4 + $0xc] sm:$0x10] %vm5574_vm8, %v2514_v43  ;;  %v1981_v49 = vpop.permute.xlu0 %1980 }
 0x27e   : > { %2519 = vst.msk [vmem:[#allocation4 + $0xb] sm:$0x40] %vm5575_vm10, %v2514_v43  ;;  %vm5581_vm10 = vcmask 77828  }
 0x27f   : > { %2516 = vst.msk [vmem:[#allocation4 + $0xe] sm:$0x1] %vm2446_vm14, %v2514_v43 }
 0x280   : > { %1987 = vst.msk [vmem:[#allocation2 + $0xf8] sm:$0xff] %vm469_vm9, %v1983_v48  ;;  %1986 = vst.msk [vmem:[#allocation2 + $0xf0] sm:$0xff] %vm469_vm9, %v1981_v49  ;;  %v1995_v50 = vpop.permute.xlu1 %1994 }
 0x281   : > { %v1993_v51 = vpop.permute.xlu0 %1992  ;;  %1999 = vst.msk [vmem:[#allocation2 + $0xf8] sm:$0xff] %vm5576_vm0, %v1995_v50  ;;  %vm5580_vm9 = vmmov %vm5579_vm4 }
 0x282   : > { %v2029_v54 = vld [vmem:[#allocation2 + $0xe8] sm:$0xff]  ;;  %1998 = vst.msk [vmem:[#allocation2 + $0xf0] sm:$0xff] %vm5577_vm5, %v1993_v51  ;;  %vm5582_vm0 = vmmov %vm5581_vm10  ;;  %vm5583_vm5 = vcmask 79878  }
 0x283   : > { %v2028_v45 = vld [vmem:[#allocation2 + $0xe0] sm:$0xff] }
 0x284   : > { %v2046_v56 = vpack.c.bf16 %v2029_v54, %v2028_v45 }
 0x285   : > { %v2766_v44 = vld [vmem:[#allocation4 + $0xf] sm:$0x1f]  ;;  %v2661_v61 = vpop.permute.xlu0 %2660 }
 0x286   : > { %2768 = vrot.lane.b32.xlu0 %v2766_v44, %s4095_s17  ;;  %v2764_v57 = vld [vmem:[#allocation4 + $0xe] sm:$0x1f]  ;;  %3984 = vmatprep.mubr.msk.bf16.mxu0 %vm5579_vm4, %v2046_v56  ;;  %2664 = vst.msk [vmem:[#allocation5] sm:$0x1f] %vm2663_vm11, %v2661_v61 }
 0x287   : > { %2765 = vst.msk [vmem:[#allocation5 + $0xa] sm:$0x1f] %vm5578_vm3, %v2764_v57  ;;  %v2772_v59 = vld [vmem:[#allocation4 + $0x10] sm:$0x1f] }
 0x288   : > { %v2031_v53 = vld [vmem:[#allocation2 + $0xf8] sm:$0xff] }
 0x289   : > { %v2030_v52 = vld [vmem:[#allocation2 + $0xf0] sm:$0xff] }
 0x28a   : > { %2667 = vrot.lane.b32.xlu0 %v2665_v60, %s4096_s18  ;;  %v2047_v26 = vpack.c.bf16 %v2031_v53, %v2030_v52 }
 0x28c   : > { %3985 = vmatmul.mubr.msk.bf16.gmra.mrb[28].mxu0 %vm5580_vm9, %v2047_v26 }
 0x28e   : > { %2774 = vrot.lane.b32.xlu0 %v2772_v59, %s4096_s18 }
 0x29f   : > { %v3974_v27 = vpop.f32.mrb[16].mxu0 }
 0x2a0   : > { %v2231_v63 = vadd.f32 %v5229_v62, %v3974_v27  ;;  %v2222_v0 = vpop.f32.mrb[17].mxu0 }
 0x2a1   : > { %v2223_v1 = vadd.f32 %v5229_v62, %v2222_v0  ;;  %v3975_v6 = vpop.f32.mrb[18].mxu0 }
 0x2a2   : > { %vm2303_vm6 = vcmp.ge.f32.partialorder %v2231_v63, 0.0  ;;  %v2340_v2 = vmul.f32 %v5236_v7, %v2231_v63  ;;  %v2234_v3 = vadd.f32 %v5229_v62, %v3975_v6  ;;  %v2225_v4 = vpop.f32.mrb[19].mxu0 }
 0x2a3   : > { %vm2301_vm7 = vcmp.ge.f32.partialorder %v2223_v1, 0.0  ;;  %v2338_v5 = vmul.f32 %v5236_v7, %v2223_v1  ;;  %v2226_v8 = vadd.f32 %v5229_v62, %v2225_v4 }
 0x2a4   : > { %v2372_v11 = vsel %vm2303_vm6, %v2231_v63, %v2340_v2  ;;  %vm2304_vm1 = vcmp.ge.f32.partialorder %v2234_v3, 0.0  ;;  %v2341_v38 = vmul.f32 %v5236_v7, %v2234_v3 }
 0x2a5   : > { %2405 = vst.msk [vmem:[#allocation3 + $0x90] sm:$0xff] %vm2386_vm13, %v2372_v11  ;;  %v2370_v12 = vsel %vm2301_vm7, %v2223_v1, %v2338_v5  ;;  %vm2302_vm8 = vcmp.ge.f32.partialorder %v2226_v8, 0.0  ;;  %v2339_v13 = vmul.f32 %v5236_v7, %v2226_v8 }
 0x2a6   : > { %2403 = vst.msk [vmem:[#allocation3 + $0x80] sm:$0xff] %vm2386_vm13, %v2370_v12  ;;  %v2373_v14 = vsel %vm2304_vm1, %v2234_v3, %v2341_v38  ;;  %vm2670_vm1 = vcmask 241824  }
 0x2a7   : > { %2406 = vst.msk [vmem:[#allocation3 + $0x98] sm:$0xff] %vm2386_vm13, %v2373_v14  ;;  %v2371_v15 = vsel %vm2302_vm8, %v2226_v8, %v2339_v13  ;;  %vm5584_vm8 = vmmov %vm5582_vm0 }
 0x2a8   : > { %2404 = vst.msk [vmem:[#allocation3 + $0x88] sm:$0xff] %vm2386_vm13, %v2371_v15 }
 0x2ac   : > { %v2558_v61 = vld [vmem:[#allocation3 + $0x90] sm:$0xff] }
 0x2ad   : > { %v5249_v23 = vld [vmem:[#allocation3 + $0x80] sm:$0xff] }
 0x2ae   : > { %v2531_v24 = vmax.f32 %v2529_v20, %v5249_v23  ;;  %v2559_v59 = vld [vmem:[#allocation3 + $0x98] sm:$0xff]  ;;  %v2562_v52 = vmax.f32 %v5249_v23, %v2558_v61  ;;  %v2734_v23 = vld [vmem:[#allocation4 + $0xf] sm:$0x1f] }
 0x2af   : > { %v5253_v25 = vld [vmem:[#allocation3 + $0x88] sm:$0xff] }
 0x2b0   : > { %v2532_v22 = vmax.f32 %v2530_v55, %v5253_v25  ;;  %v2535_v31 = vrot.slane %v2531_v24, 1  ;;  %v2542_v17 = vrot.slane %v2531_v24, 2  ;;  %v2563_v26 = vmax.f32 %v5253_v25, %v2559_v59  ;;  %v2728_v55 = vld [vmem:[#allocation4 + $0xe] sm:$0x1f] }
 0x2b2   : > { %v2536_v32 = vrot.slane %v2532_v22, 1  ;;  %v2543_v58 = vrot.slane %v2532_v22, 2 }
 0x2b4   : > { %v2537_v9 = vsel %vm2431_vm12, %v2535_v31, %v2536_v32  ;;  %v2541_v10 = vmax.f32 %v2532_v22, %v2536_v32  ;;  %v2544_v39 = vsel %vm2118_vm2, %v2542_v17, %v2543_v58  ;;  %v2686_v22 = vld [vmem:[#allocation4 + $0x9] sm:$0x1f] }
 0x2b5   : > { %v2540_v28 = vmax.f32 %v2531_v24, %v2537_v9  ;;  %v2679_v31 = vld [vmem:[#allocation4 + $0x8] sm:$0x1f] }
 0x2b6   : > { %v2548_v18 = vmax.f32 %v2541_v10, %v2543_v58 }
 0x2b7   : > { %v2719_v33 = vpop.permute.xlu1 %2718  ;;  %v2547_v34 = vmax.f32 %v2540_v28, %v2544_v39 }
 0x2b8   : > { %2721 = vst.msk [vmem:[#allocation5 + $0x5] sm:$0x1f] %vm2663_vm11, %v2719_v33 }
 0x2b9   : > { %2553 = vst.msk [vmem:[#allocation4 + $0x19] sm:$0x1] %vm2446_vm14, %v2548_v18  ;;  %2549 = vst.msk [vmem:[#allocation4 + $0x15] sm:$0x1] %vm2446_vm14, %v2547_v34 }
 0x2ba   : > { %2554 = vst.msk [vmem:[#allocation4 + $0x18] sm:$0x4] %vm2448_vm15, %v2548_v18  ;;  %2550 = vst.msk [vmem:[#allocation4 + $0x14] sm:$0x4] %vm2448_vm15, %v2547_v34 }
 0x2bb   : > { %2555 = vst.msk [vmem:[#allocation4 + $0x17] sm:$0x10] %vm5581_vm10, %v2548_v18  ;;  %vm5585_vm10 = vmmov %vm5582_vm0 }
 0x2bc   : > { %2551 = vst.msk [vmem:[#allocation4 + $0x13] sm:$0x10] %vm5582_vm0, %v2547_v34  ;;  %vm5586_vm0 = vmmov %vm5583_vm5 }
 0x2bd   : > { %2552 = vst.msk [vmem:[#allocation4 + $0x12] sm:$0x40] %vm5583_vm5, %v2547_v34  ;;  %vm5587_vm5 = vmmov %vm5578_vm3 }
 0x2c4   : > { %v2816_v35 = vld [vmem:[#allocation4 + $0x16] sm:$0x1f] }
 0x2c5   : > { %2818 = vrot.lane.b32.xlu1 %v2816_v35, %s4095_s17  ;;  %v2814_v36 = vld [vmem:[#allocation4 + $0x15] sm:$0x1f] }
 0x2c6   : > { %2815 = vst.msk [vmem:[#allocation5 + $0xf] sm:$0x1f] %vm5578_vm3, %v2814_v36  ;;  %v2822_v40 = vld [vmem:[#allocation4 + $0x17] sm:$0x1f] }
 0x2c7   : > { %v2778_v41 = vld [vmem:[#allocation4 + $0x15] sm:$0x1f] }
 0x2c8   : > { %v2790_v32 = vld [vmem:[#allocation4 + $0x17] sm:$0x1f] }
 0x2c9   : > { %2724 = vrot.lane.b32.xlu1 %v2722_v37, %s4096_s18  ;;  %v2784_v58 = vld [vmem:[#allocation4 + $0x16] sm:$0x1f] }
 0x2cd   : > { %2824 = vrot.lane.b32.xlu1 %v2822_v40, %s4096_s18 }
 0x2d1   : > { %2674 = vrot.lane.b32.xlu1 %v2672_v16, %s4097_s23 }
 0x2d5   : > { %2780 = vrot.lane.b32.xlu1 %v2778_v41, %s4097_s23 }
 0x2df   : > { %v3978_v29 = vpop.f32.mrb[20].mxu0 }
 0x2e0   : > { %v2247_v30 = vadd.f32 %v5229_v62, %v3978_v29  ;;  %v2238_v42 = vpop.f32.mrb[21].mxu0 }
 0x2e1   : > { %v2239_v43 = vadd.f32 %v5229_v62, %v2238_v42  ;;  %v3979_v46 = vpop.f32.mrb[22].mxu0 }
 0x2e2   : > { %vm2307_vm4 = vcmp.ge.f32.partialorder %v2247_v30, 0.0  ;;  %v2344_v47 = vmul.f32 %v5236_v7, %v2247_v30  ;;  %v2250_v48 = vadd.f32 %v5229_v62, %v3979_v46  ;;  %v2241_v49 = vpop.f32.mrb[23].mxu0 }
 0x2e3   : > { %vm2305_vm9 = vcmp.ge.f32.partialorder %v2239_v43, 0.0  ;;  %v2342_v50 = vmul.f32 %v5236_v7, %v2239_v43  ;;  %v2242_v51 = vadd.f32 %v5229_v62, %v2241_v49 }
 0x2e4   : > { %v2376_v44 = vsel %vm2307_vm4, %v2247_v30, %v2344_v47  ;;  %vm2308_vm6 = vcmp.ge.f32.partialorder %v2250_v48, 0.0  ;;  %v2345_v45 = vmul.f32 %v5236_v7, %v2250_v48 }
 0x2e5   : > { %2409 = vst.msk [vmem:[#allocation3 + $0xb0] sm:$0xff] %vm2386_vm13, %v2376_v44  ;;  %v2374_v54 = vsel %vm2305_vm9, %v2239_v43, %v2342_v50  ;;  %vm2306_vm7 = vcmp.ge.f32.partialorder %v2242_v51, 0.0  ;;  %v2343_v56 = vmul.f32 %v5236_v7, %v2242_v51 }
 0x2e6   : > { %2407 = vst.msk [vmem:[#allocation3 + $0xa0] sm:$0xff] %vm2386_vm13, %v2374_v54  ;;  %v2377_v57 = vsel %vm2308_vm6, %v2250_v48, %v2345_v45 }
 0x2e7   : > { %2410 = vst.msk [vmem:[#allocation3 + $0xb8] sm:$0xff] %vm2386_vm13, %v2377_v57  ;;  %v2375_v60 = vsel %vm2306_vm7, %v2242_v51, %v2343_v56  ;;  %vm5588_vm7 = vmmov %vm5584_vm8 }
 0x2e8   : > { %2408 = vst.msk [vmem:[#allocation3 + $0xa8] sm:$0xff] %vm2386_vm13, %v2375_v60 }
 0x2ec   : > { %v2591_v42 = vld [vmem:[#allocation3 + $0xb0] sm:$0xff] }
 0x2ed   : > { %v5285_v53 = vld [vmem:[#allocation3 + $0xa0] sm:$0xff] }
 0x2ee   : > { %v2564_v27 = vmax.f32 %v2562_v52, %v5285_v53  ;;  %v2592_v43 = vld [vmem:[#allocation3 + $0xb8] sm:$0xff]  ;;  %v2595_v46 = vmax.f32 %v5285_v53, %v2591_v42 }
 0x2ef   : > { %v5289_v63 = vld [vmem:[#allocation3 + $0xa8] sm:$0xff] }
 0x2f0   : > { %v2565_v0 = vmax.f32 %v2563_v26, %v5289_v63  ;;  %v2568_v1 = vrot.slane %v2564_v27, 1  ;;  %v2575_v3 = vrot.slane %v2564_v27, 2  ;;  %v2596_v48 = vmax.f32 %v5289_v63, %v2592_v43 }
 0x2f2   : > { %v2569_v6 = vrot.slane %v2565_v0, 1  ;;  %v2576_v2 = vrot.slane %v2565_v0, 2 }
 0x2f4   : > { %v2570_v5 = vsel %vm2431_vm12, %v2568_v1, %v2569_v6  ;;  %v2574_v8 = vmax.f32 %v2565_v0, %v2569_v6  ;;  %v2577_v38 = vsel %vm2118_vm2, %v2575_v3, %v2576_v2  ;;  %v2746_v3 = vld [vmem:[#allocation4 + $0x15] sm:$0x1f] }
 0x2f5   : > { %v2573_v11 = vmax.f32 %v2564_v27, %v2570_v5 }
 0x2f6   : > { %v2581_v12 = vmax.f32 %v2574_v8, %v2576_v2 }
 0x2f7   : > { %v2580_v13 = vmax.f32 %v2573_v11, %v2577_v38  ;;  %v2700_v11 = vld [vmem:[#allocation4 + $0xf] sm:$0x1f] }
 0x2f8   : > { %v2769_v4 = vpop.permute.xlu0 %2768  ;;  %2586 = vst.msk [vmem:[#allocation4 + $0x20] sm:$0x1] %vm2446_vm14, %v2581_v12  ;;  %v2693_v38 = vld [vmem:[#allocation4 + $0xe] sm:$0x1f] }
 0x2f9   : > { %2771 = vst.msk [vmem:[#allocation5 + $0xa] sm:$0x1f] %vm2663_vm11, %v2769_v4  ;;  %v2740_v4 = vld [vmem:[#allocation4 + $0x10] sm:$0x1f] }
 0x2fa   : > { %2587 = vst.msk [vmem:[#allocation4 + $0x1f] sm:$0x4] %vm2448_vm15, %v2581_v12  ;;  %2583 = vst.msk [vmem:[#allocation4 + $0x1b] sm:$0x4] %vm2448_vm15, %v2580_v13 }
 0x2fb   : > { %2588 = vst.msk [vmem:[#allocation4 + $0x1e] sm:$0x10] %vm5584_vm8, %v2581_v12  ;;  %vm5589_vm8 = vmmov %vm5588_vm7 }
 0x2fc   : > { %v2668_v14 = vpop.permute.xlu0 %2667  ;;  %2584 = vst.msk [vmem:[#allocation4 + $0x1a] sm:$0x10] %vm5585_vm10, %v2580_v13  ;;  %vm5590_vm10 = vmmov %vm5586_vm0 }
 0x2fd   : > { %2671 = vst.msk [vmem:[#allocation5] sm:$0x1f] %vm2670_vm1, %v2668_v14 }
 0x2fe   : > { %2585 = vst.msk [vmem:[#allocation4 + $0x19] sm:$0x40] %vm5586_vm0, %v2580_v13  ;;  %vm2677_vm0 = vcmask 323824  }
 0x2ff   : > { %2582 = vst.msk [vmem:[#allocation4 + $0x1c] sm:$0x1] %vm2446_vm14, %v2580_v13 }
 0x300   : > { %v2775_v15 = vpop.permute.xlu0 %2774 }
 0x301   : > { %2777 = vst.msk [vmem:[#allocation5 + $0xa] sm:$0x1f] %vm2670_vm1, %v2775_v15  ;;  %v2752_v15 = vld [vmem:[#allocation4 + $0x16] sm:$0x1f] }
 0x305   : > { %v2872_v19 = vld [vmem:[#allocation4 + $0x1e] sm:$0x1f] }
 0x306   : > { %v2866_v21 = vld [vmem:[#allocation4 + $0x1d] sm:$0x1f]  ;;  %2874 = vrot.lane.b32.xlu1 %v2872_v19, %s4096_s18 }
 0x307   : > { %2868 = vrot.lane.b32.xlu0 %v2866_v21, %s4095_s17  ;;  %v2864_v20 = vld [vmem:[#allocation4 + $0x1c] sm:$0x1f] }
 0x308   : > { %2865 = vst.msk [vmem:[#allocation5 + $0x14] sm:$0x1f] %vm5587_vm5, %v2864_v20  ;;  %v2834_v24 = vld [vmem:[#allocation4 + $0x1d] sm:$0x1f] }
 0x309   : > { %v2828_v25 = vld [vmem:[#allocation4 + $0x1c] sm:$0x1f] }
 0x30a   : > { %2736 = vrot.lane.b32.xlu1 %v2734_v23, %s4098_s24  ;;  %v2840_v8 = vld [vmem:[#allocation4 + $0x1e] sm:$0x1f] }
 0x30b   : > { %2730 = vrot.lane.b32.xlu0 %v2728_v55, %s4097_s23  ;;  %v2802_v12 = vld [vmem:[#allocation4 + $0x1d] sm:$0x1f]  ;;  %v2707_v55 = vld [vmem:[#allocation4 + $0x10] sm:$0x1f] }
 0x30c   : > { %v2796_v13 = vld [vmem:[#allocation4 + $0x1c] sm:$0x1f] }
 0x30d   : > { %v4051_v19 = vld [vmem:[%s5539_s3] sm:$0xff]  }
 0x30e   : > { %2836 = vrot.lane.b32.xlu1 %v2834_v24, %s4098_s24  ;;  %3988 = vmatprep.subr.bf16.mxu1 %v4051_v19 }
 0x30f   : > { %2830 = vrot.lane.b32.xlu0 %v2828_v25, %s4097_s23  ;;  %3989 = vmatpush3.bf16.msra.mxu1 %v4051_v19 }
 0x312   : > { %2688 = vrot.lane.b32.xlu1 %v2686_v22, %s4099_s25 }
 0x313   : > { %2681 = vrot.lane.b32.xlu0 %v2679_v31, %s4098_s24 }
 0x316   : > { %2792 = vrot.lane.b32.xlu1 %v2790_v32, %s4099_s25 }
 0x317   : > { %2786 = vrot.lane.b32.xlu0 %v2784_v58, %s4098_s24  ;;  %v2808_v58 = vld [vmem:[#allocation4 + $0x1e] sm:$0x1f] }
 0x31f   : > { %v3982_v17 = vpop.f32.mrb[24].mxu0 }
 0x320   : > { %v2263_v33 = vadd.f32 %v5229_v62, %v3982_v17  ;;  %v2254_v9 = vpop.f32.mrb[25].mxu0 }
 0x321   : > { %v2255_v10 = vadd.f32 %v5229_v62, %v2254_v9  ;;  %v3983_v28 = vpop.f32.mrb[26].mxu0 }
 0x322   : > { %vm2311_vm3 = vcmp.ge.f32.partialorder %v2263_v33, 0.0  ;;  %v2348_v39 = vmul.f32 %v5236_v7, %v2263_v33  ;;  %v2266_v18 = vadd.f32 %v5229_v62, %v3983_v28  ;;  %v2257_v34 = vpop.f32.mrb[27].mxu0 }
 0x323   : > { %vm2309_vm4 = vcmp.ge.f32.partialorder %v2255_v10, 0.0  ;;  %v2346_v35 = vmul.f32 %v5236_v7, %v2255_v10  ;;  %v2258_v36 = vadd.f32 %v5229_v62, %v2257_v34 }
 0x324   : > { %v2380_v37 = vsel %vm2311_vm3, %v2263_v33, %v2348_v39  ;;  %vm2312_vm9 = vcmp.ge.f32.partialorder %v2266_v18, 0.0  ;;  %v2349_v40 = vmul.f32 %v5236_v7, %v2266_v18 }
 0x325   : > { %2413 = vst.msk [vmem:[#allocation3 + $0xd0] sm:$0xff] %vm2386_vm13, %v2380_v37  ;;  %v2378_v16 = vsel %vm2309_vm4, %v2255_v10, %v2346_v35  ;;  %vm2310_vm6 = vcmp.ge.f32.partialorder %v2258_v36, 0.0  ;;  %v2347_v41 = vmul.f32 %v5236_v7, %v2258_v36  ;;  %vm2698_vm4 = vcmask 569824  }
 0x326   : > { %2411 = vst.msk [vmem:[#allocation3 + $0xc0] sm:$0xff] %vm2386_vm13, %v2378_v16  ;;  %v2381_v29 = vsel %vm2312_vm9, %v2266_v18, %v2349_v40  ;;  %vm2705_vm9 = vcmask 651824  }
 0x327   : > { %2414 = vst.msk [vmem:[#allocation3 + $0xd8] sm:$0xff] %vm2386_vm13, %v2381_v29  ;;  %v2379_v30 = vsel %vm2310_vm6, %v2258_v36, %v2347_v41  ;;  %vm2712_vm6 = vcmask 733824  }
 0x328   : > { %2412 = vst.msk [vmem:[#allocation3 + $0xc8] sm:$0xff] %vm2386_vm13, %v2379_v30 }
 0x32c   : > { %v2624_v10 = vld [vmem:[#allocation3 + $0xd0] sm:$0xff] }
 0x32d   : > { %v5328_v47 = vld [vmem:[#allocation3 + $0xc0] sm:$0xff] }
 0x32e   : > { %v2597_v49 = vmax.f32 %v2595_v46, %v5328_v47  ;;  %v2625_v28 = vld [vmem:[#allocation3 + $0xd8] sm:$0xff]  ;;  %v2628_v39 = vmax.f32 %v5328_v47, %v2624_v10  ;;  %v4052_v46 = vld [vmem:[%s5539_s3 + $0x8] sm:$0xff]  }
 0x32f   : > { %v5332_v50 = vld [vmem:[#allocation3 + $0xc8] sm:$0xff]  ;;  %3990 = vmatprep.subr.bf16.mxu1 %v4052_v46 }
 0x330   : > { %v2598_v51 = vmax.f32 %v2596_v48, %v5332_v50  ;;  %v2601_v44 = vrot.slane %v2597_v49, 1  ;;  %v2608_v57 = vrot.slane %v2597_v49, 2  ;;  %v2629_v34 = vmax.f32 %v5332_v50, %v2625_v28  ;;  %3991 = vmatpush3.bf16.msra.mxu1 %v4052_v46  ;;  %v3893_v28 = vld [vmem:[%s5540_s4] ss:$0 sm:$0xff] }
 0x332   : > { %v2602_v45 = vrot.slane %v2598_v51, 1  ;;  %v2609_v54 = vrot.slane %v2598_v51, 2 }
 0x334   : > { %v2603_v60 = vsel %vm2431_vm12, %v2601_v44, %v2602_v45  ;;  %v2607_v61 = vmax.f32 %v2598_v51, %v2602_v45  ;;  %v2610_v52 = vsel %vm2118_vm2, %v2608_v57, %v2609_v54  ;;  %v4053_v44 = vld [vmem:[%s5539_s3 + $0x10] sm:$0xff]  }
 0x335   : > { %v2606_v59 = vmax.f32 %v2597_v49, %v2603_v60  ;;  %3992 = vmatprep.subr.bf16.mxu1 %v4053_v44 }
 0x336   : > { %v2614_v53 = vmax.f32 %v2607_v61, %v2609_v54  ;;  %3993 = vmatpush3.bf16.msra.mxu1 %v4053_v44 }
 0x337   : > { %v2819_v56 = vpop.permute.xlu1 %2818  ;;  %v2613_v27 = vmax.f32 %v2606_v59, %v2610_v52  ;;  %v4055_v52 = vld [vmem:[%s5539_s3 + $0x20] sm:$0xff]  }
 0x338   : > { %2821 = vst.msk [vmem:[#allocation5 + $0xf] sm:$0x1f] %vm2663_vm11, %v2819_v56  ;;  %v4054_v56 = vld [vmem:[%s5539_s3 + $0x18] sm:$0xff]  }
 0x339   : > { %2619 = vst.msk [vmem:[#allocation4 + $0x27] sm:$0x1] %vm2446_vm14, %v2614_v53  ;;  %2615 = vst.msk [vmem:[#allocation4 + $0x23] sm:$0x1] %vm2446_vm14, %v2613_v27  ;;  %3994 = vmatprep.subr.bf16.mxu1 %v4054_v56 }
 0x33a   : > { %2620 = vst.msk [vmem:[#allocation4 + $0x26] sm:$0x4] %vm2448_vm15, %v2614_v53  ;;  %2616 = vst.msk [vmem:[#allocation4 + $0x22] sm:$0x4] %vm2448_vm15, %v2613_v27  ;;  %3995 = vmatpush3.bf16.msra.mxu1 %v4054_v56 }
 0x33b   : > { %v2725_v26 = vpop.permute.xlu1 %2724  ;;  %2621 = vst.msk [vmem:[#allocation4 + $0x25] sm:$0x10] %vm5588_vm7, %v2614_v53  ;;  %v4056_v53 = vld [vmem:[%s5539_s3 + $0x28] sm:$0x1f]   ;;  %3996 = vmatprep.subr.bf16.mxu1 %v4055_v52 }
 0x33c   : > { %2727 = vst.msk [vmem:[#allocation5 + $0x5] sm:$0x1f] %vm2670_vm1, %v2725_v26 }
 0x33d   : > { %2617 = vst.msk [vmem:[#allocation4 + $0x21] sm:$0x10] %vm5589_vm8, %v2613_v27 }
 0x33e   : > { %2618 = vst.msk [vmem:[#allocation4 + $0x20] sm:$0x40] %vm5590_vm10, %v2613_v27  ;;  %3997 = vmatpush3.bf16.msra.mxu1 %v4055_v52 }
 0x33f   : > { %v2825_v63 = vpop.permute.xlu1 %2824 }
 0x340   : > { %2827 = vst.msk [vmem:[#allocation5 + $0xf] sm:$0x1f] %vm2670_vm1, %v2825_v63  ;;  %v2758_v63 = vld [vmem:[#allocation4 + $0x17] sm:$0x1f] }
 0x343   : > { %v2675_v0 = vpop.permute.xlu1 %2674 }
 0x344   : > { %2678 = vst.msk [vmem:[#allocation5] sm:$0x1f] %vm2677_vm0, %v2675_v0 }
 0x345   : > { %v2884_v1 = vld [vmem:[#allocation4 + $0x24] sm:$0x1f] }
 0x346   : > { %v2878_v6 = vld [vmem:[#allocation4 + $0x23] sm:$0x1f]  ;;  %2886 = vrot.lane.b32.xlu1 %v2884_v1, %s4098_s24  ;;  %s3921_s24 = sshll.u32 %s5597_s14, 4 }
 0x347   : > { %2880 = vrot.lane.b32.xlu0 %v2878_v6, %s4097_s23  ;;  %v2781_v2 = vpop.permute.xlu1 %2780  ;;  %v2846_v5 = vld [vmem:[#allocation4 + $0x23] sm:$0x1f]  ;;  %s4109_s23 = smov 112   ;;  %s367_s11 = scalar_lea.vmem %s5545_s9, %s3921_s24 }
 0x348   : > { %2783 = vst.msk [vmem:[#allocation5 + $0xa] sm:$0x1f] %vm2677_vm0, %v2781_v2  ;;  %v2890_v14 = vld [vmem:[#allocation4 + $0x25] sm:$0x1f]  ;;  %s372_s18 = scalar_lea.vmem %s5546_s10, %s3921_s24 }
 0x349   : > { %v2852_v21 = vld [vmem:[#allocation4 + $0x24] sm:$0x1f] }
 0x34a   : > { %2748 = vrot.lane.b32.xlu1 %v2746_v3, %s4100_s26  ;;  %v2858_v1 = vld [vmem:[#allocation4 + $0x25] sm:$0x1f] }
 0x34b   : > { %2742 = vrot.lane.b32.xlu0 %v2740_v4, %s4099_s25 }
 0x34e   : > { %2848 = vrot.lane.b32.xlu1 %v2846_v5, %s4100_s26 }
 0x34f   : > { %2842 = vrot.lane.b32.xlu0 %v2840_v8, %s4099_s25 }
 0x352   : > { %2702 = vrot.lane.b32.xlu1 %v2700_v11, %s4101_s27 }
 0x353   : > { %2695 = vrot.lane.b32.xlu0 %v2693_v38, %s4100_s26 }
 0x356   : > { %2804 = vrot.lane.b32.xlu1 %v2802_v12, %s4101_s27 }
 0x357   : > { %2798 = vrot.lane.b32.xlu0 %v2796_v13, %s4100_s26 }
 0x35b   : > { %2892 = vrot.lane.b32.xlu0 %v2890_v14, %s4099_s25 }
 0x35f   : > { %2754 = vrot.lane.b32.xlu0 %v2752_v15, %s4101_s27  ;;  %v3986_v20 = vpop.f32.mrb[28].mxu0 }
 0x360   : > { %v2270_v23 = vpop.f32.mrb[29].mxu0 }
 0x361   : > { %v2271_v24 = vadd.f32 %v5229_v62, %v2270_v23  ;;  %v3987_v25 = vpop.f32.mrb[30].mxu0 }
 0x362   : > { %v2273_v22 = vpop.f32.mrb[31].mxu0 }
 0x363   : > { %2854 = vrot.lane.b32.xlu0 %v2852_v21, %s4101_s27  ;;  %vm2313_vm5 = vcmp.ge.f32.partialorder %v2271_v24, 0.0  ;;  %v2350_v31 = vmul.f32 %v5236_v7, %v2271_v24  ;;  %v2274_v32 = vadd.f32 %v5229_v62, %v2273_v22 }
 0x365   : > { %v2382_v17 = vsel %vm2313_vm5, %v2271_v24, %v2350_v31  ;;  %vm2314_vm3 = vcmp.ge.f32.partialorder %v2274_v32, 0.0  ;;  %v2351_v33 = vmul.f32 %v5236_v7, %v2274_v32 }
 0x366   : > { %2415 = vst.msk [vmem:[#allocation3 + $0xe0] sm:$0xff] %vm2386_vm13, %v2382_v17 }
 0x367   : > { %2709 = vrot.lane.b32.xlu0 %v2707_v55, %s4102_s30  ;;  %v2383_v9 = vsel %vm2314_vm3, %v2274_v32, %v2351_v33  ;;  %vm3052_vm3 = vcmask 122880  }
 0x368   : > { %2416 = vst.msk [vmem:[#allocation3 + $0xe8] sm:$0xff] %vm2386_vm13, %v2383_v9  ;;  %vm2684_vm13 = vcmask 405824  }
 0x36b   : > { %2810 = vrot.lane.b32.xlu0 %v2808_v58, %s4102_s30 }
 0x36d   : > { %v2626_v18 = vld [vmem:[#allocation3 + $0xe0] sm:$0xff] }
 0x36e   : > { %v2630_v62 = vmax.f32 %v2628_v39, %v2626_v18  ;;  %v3902_v18 = vld [vmem:[%s5540_s4 + $0x1] ss:$0 sm:$0xff] }
 0x36f   : > { %v2627_v35 = vld [vmem:[#allocation3 + $0xe8] sm:$0xff] }
 0x370   : > { %v2631_v36 = vmax.f32 %v2629_v34, %v2627_v35  ;;  %v2634_v37 = vrot.slane %v2630_v62, 1  ;;  %v2641_v29 = vrot.slane %v2630_v62, 2 }
 0x372   : > { %v2635_v40 = vrot.slane %v2631_v36, 1  ;;  %v2642_v7 = vrot.slane %v2631_v36, 2 }
 0x374   : > { %v2636_v30 = vsel %vm2431_vm12, %v2634_v37, %v2635_v40  ;;  %v2640_v42 = vmax.f32 %v2631_v36, %v2635_v40  ;;  %v2643_v47 = vsel %vm2118_vm2, %v2641_v29, %v2642_v7  ;;  %vm5591_vm12 = vmmov %vm5588_vm7 }
 0x375   : > { %v2639_v43 = vmax.f32 %v2630_v62, %v2636_v30  ;;  %vm5592_vm2 = vmmov %vm5588_vm7  ;;  %vm2972_vm7 = vcmask 736256  }
 0x376   : > { %v2647_v48 = vmax.f32 %v2640_v42, %v2642_v7 }
 0x377   : > { %v2646_v51 = vmax.f32 %v2639_v43, %v2643_v47 }
 0x378   : > { %v2875_v16 = vpop.permute.xlu1 %2874  ;;  %2652 = vst.msk [vmem:[#allocation4 + $0x2e] sm:$0x1] %vm2446_vm14, %v2647_v48 }
 0x379   : > { %v2869_v41 = vpop.permute.xlu0 %2868  ;;  %2653 = vst.msk [vmem:[#allocation4 + $0x2d] sm:$0x4] %vm2448_vm15, %v2647_v48  ;;  %2649 = vst.msk [vmem:[#allocation4 + $0x29] sm:$0x4] %vm2448_vm15, %v2646_v51 }
 0x37a   : > { %2871 = vst.msk [vmem:[#allocation5 + $0x14] sm:$0x1f] %vm2663_vm11, %v2869_v41  ;;  %vm5593_vm11 = vmmov %vm5590_vm10  ;;  %vm3048_vm10 = vcmask 130048  }
 0x37b   : > { %2877 = vst.msk [vmem:[#allocation5 + $0x14] sm:$0x1f] %vm2670_vm1, %v2875_v16  ;;  %vm2691_vm1 = vcmask 487824  }
 0x37c   : > { %v2737_v49 = vpop.permute.xlu1 %2736  ;;  %2654 = vst.msk [vmem:[#allocation4 + $0x2c] sm:$0x10] %vm5591_vm12, %v2647_v48  ;;  %vm3112_vm12 = vcmask 128003  }
 0x37d   : > { %v2731_v50 = vpop.permute.xlu0 %2730  ;;  %2648 = vst.msk [vmem:[#allocation4 + $0x2a] sm:$0x1] %vm2446_vm14, %v2646_v51  ;;  %vm5594_vm14 = vcmask 1044480  }
 0x37e   : > { %2733 = vst.msk [vmem:[#allocation5 + $0x5] sm:$0x1f] %vm2677_vm0, %v2731_v50  ;;  %4012 = vmatprep.subr.msk.bf16.mxu1 %vm5594_vm14, %v4056_v53  ;;  %vm5595_vm15 = vmmov %vm5594_vm14  ;;  %vm3069_vm14 = vcmask 387328  }
 0x37f   : > { %2739 = vst.msk [vmem:[#allocation5 + $0x5] sm:$0x1f] %vm2684_vm13, %v2737_v49  ;;  %v2980_v0 = vsel %vm5595_vm15, %v4056_v53, 0  ;;  %vm3076_vm15 = vcmask 518528  }
 0x380   : > { %2650 = vst.msk [vmem:[#allocation4 + $0x28] sm:$0x10] %vm5592_vm2, %v2646_v51  ;;  %v2837_v45 = vpop.permute.xlu1 %2836  ;;  %3999 = vmatpush3.bf16.msra.mxu1 %v2980_v0  ;;  %vm3179_vm2 = vcmask 130054  }
 0x381   : > { %2651 = vst.msk [vmem:[#allocation4 + $0x27] sm:$0x40] %vm5593_vm11, %v2646_v51  ;;  %v2831_v54 = vpop.permute.xlu0 %2830  ;;  %vm3055_vm11 = vcmask 124928  }
 0x382   : > { %2833 = vst.msk [vmem:[#allocation5 + $0xf] sm:$0x1f] %vm2677_vm0, %v2831_v54 }
 0x383   : > { %2839 = vst.msk [vmem:[#allocation5 + $0xf] sm:$0x1f] %vm2684_vm13, %v2837_v45 }
 0x384   : > { %v2689_v57 = vpop.permute.xlu1 %2688 }
 0x385   : > { %v2682_v60 = vpop.permute.xlu0 %2681 }
 0x386   : > { %2685 = vst.msk [vmem:[#allocation5] sm:$0x1f] %vm2684_vm13, %v2682_v60  ;;  %v4105_v60 = vmov 0  }
 0x387   : > { %2692 = vst.msk [vmem:[#allocation5] sm:$0x1f] %vm2691_vm1, %v2689_v57  ;;  %3344 = vmatprep.subr.bf16.mxu1 %v4105_v60 }
 0x388   : > { %v2896_v61 = vld [vmem:[#allocation4 + $0x2a] sm:$0x1f]  ;;  %v2793_v26 = vpop.permute.xlu1 %2792 }
 0x389   : > { %v2902_v59 = vld [vmem:[#allocation4 + $0x2b] sm:$0x1f]  ;;  %2898 = vrot.lane.b32.xlu1 %v2896_v61, %s4100_s26  ;;  %v2787_v27 = vpop.permute.xlu0 %2786  ;;  %v4057_v61 = vld [vmem:[%s5541_s5] sm:$0xff]  }
 0x38a   : > { %2904 = vrot.lane.b32.xlu0 %v2902_v59, %s4101_s27  ;;  %2789 = vst.msk [vmem:[#allocation5 + $0xa] sm:$0x1f] %vm2684_vm13, %v2787_v27  ;;  %v2908_v6 = vld [vmem:[#allocation4 + $0x2c] sm:$0x1f]  ;;  %s4103_s27 = smov 32  }
 0x38b   : > { %2795 = vst.msk [vmem:[#allocation5 + $0xa] sm:$0x1f] %vm2691_vm1, %v2793_v26 }
 0x38d   : > { %2760 = vrot.lane.b32.xlu1 %v2758_v63, %s4102_s30 }
 0x391   : > { %2860 = vrot.lane.b32.xlu1 %v2858_v1, %s4102_s30  ;;  %v4058_v1 = vld [vmem:[%s5541_s5 + $0x8] sm:$0xff]  }
 0x395   : > { %2910 = vrot.lane.b32.xlu1 %v2908_v6, %s4102_s30 }
 0x3b8   : > { %v2887_v2 = vpop.permute.xlu1 %2886 }
 0x3b9   : > { %v2881_v3 = vpop.permute.xlu0 %2880 }
 0x3ba   : > { %2883 = vst.msk [vmem:[#allocation5 + $0x14] sm:$0x1f] %vm2677_vm0, %v2881_v3 }
 0x3bb   : > { %2889 = vst.msk [vmem:[#allocation5 + $0x14] sm:$0x1f] %vm2684_vm13, %v2887_v2 }
 0x3bc   : > { %v2749_v4 = vpop.permute.xlu1 %2748 }
 0x3bd   : > { %v2743_v5 = vpop.permute.xlu0 %2742 }
 0x3be   : > { %2745 = vst.msk [vmem:[#allocation5 + $0x5] sm:$0x1f] %vm2691_vm1, %v2743_v5 }
 0x3bf   : > { %2751 = vst.msk [vmem:[#allocation5 + $0x5] sm:$0x1f] %vm2698_vm4, %v2749_v4 }
 0x3c0   : > { %v2849_v8 = vpop.permute.xlu1 %2848 }
 0x3c1   : > { %v2843_v11 = vpop.permute.xlu0 %2842 }
 0x3c2   : > { %2845 = vst.msk [vmem:[#allocation5 + $0xf] sm:$0x1f] %vm2691_vm1, %v2843_v11 }
 0x3c3   : > { %2851 = vst.msk [vmem:[#allocation5 + $0xf] sm:$0x1f] %vm2698_vm4, %v2849_v8 }
 0x3c4   : > { %v2703_v38 = vpop.permute.xlu1 %2702 }
 0x3c5   : > { %v2696_v12 = vpop.permute.xlu0 %2695 }
 0x3c6   : > { %2699 = vst.msk [vmem:[#allocation5] sm:$0x1f] %vm2698_vm4, %v2696_v12 }
 0x3c7   : > { %2706 = vst.msk [vmem:[#allocation5] sm:$0x1f] %vm2705_vm9, %v2703_v38  ;;  %v4059_v38 = vld [vmem:[%s5541_s5 + $0x10] sm:$0xff]  }
 0x3c8   : > { %v2805_v13 = vpop.permute.xlu1 %2804 }
 0x3c9   : > { %v2799_v14 = vpop.permute.xlu0 %2798 }
 0x3ca   : > { %2801 = vst.msk [vmem:[#allocation5 + $0xa] sm:$0x1f] %vm2698_vm4, %v2799_v14 }
 0x3cb   : > { %2807 = vst.msk [vmem:[#allocation5 + $0xa] sm:$0x1f] %vm2705_vm9, %v2805_v13 }
 0x3cd   : > { %v2893_v15 = vpop.permute.xlu0 %2892 }
 0x3ce   : > { %2895 = vst.msk [vmem:[#allocation5 + $0x14] sm:$0x1f] %vm2691_vm1, %v2893_v15  ;;  %vm3062_vm1 = vcmask 256128  }
 0x3d1   : > { %v2755_v19 = vpop.permute.xlu0 %2754 }
 0x3d2   : > { %2757 = vst.msk [vmem:[#allocation5 + $0x5] sm:$0x1f] %vm2705_vm9, %v2755_v19 }
 0x3d5   : > { %v2855_v21 = vpop.permute.xlu0 %2854 }
 0x3d6   : > { %2857 = vst.msk [vmem:[#allocation5 + $0xf] sm:$0x1f] %vm2705_vm9, %v2855_v21  ;;  %v4060_v21 = vld [vmem:[%s5541_s5 + $0x18] sm:$0xff]  }
 0x3d9   : > { %v2710_v20 = vpop.permute.xlu0 %2709 }
 0x3da   : > { %2713 = vst.msk [vmem:[#allocation5] sm:$0x1f] %vm2712_vm6, %v2710_v20 }
 0x3dd   : > { %v2811_v23 = vpop.permute.xlu0 %2810 }
 0x3de   : > { %2813 = vst.msk [vmem:[#allocation5 + $0xa] sm:$0x1f] %vm2712_vm6, %v2811_v23 }
 0x3fb   : > { %v2899_v55 = vpop.permute.xlu1 %2898 }
 0x3fc   : > { %v2905_v24 = vpop.permute.xlu0 %2904  ;;  %2901 = vst.msk [vmem:[#allocation5 + $0x14] sm:$0x1f] %vm2698_vm4, %v2899_v55  ;;  %vm3083_vm4 = vcmask 649728  }
 0x3fd   : > { %2907 = vst.msk [vmem:[#allocation5 + $0x14] sm:$0x1f] %vm2705_vm9, %v2905_v24  ;;  %vm3090_vm9 = vcmask 780928  }
 0x3ff   : > { %v2761_v25 = vpop.permute.xlu1 %2760 }
 0x400   : > { %2763 = vst.msk [vmem:[#allocation5 + $0x5] sm:$0x1f] %vm2712_vm6, %v2761_v25  ;;  %v4061_v25 = vld [vmem:[%s5541_s5 + $0x20] sm:$0xff]  }
 0x403   : > { %v2861_v22 = vpop.permute.xlu1 %2860 }
 0x404   : > { %2863 = vst.msk [vmem:[#allocation5 + $0xf] sm:$0x1f] %vm2712_vm6, %v2861_v22 }
 0x407   : > { %v2911_v31 = vpop.permute.xlu1 %2910  ;;  %v2914_v32 = vld [vmem:[#allocation5] sm:$0xff] }
 0x408   : > { %2913 = vst.msk [vmem:[#allocation5 + $0x14] sm:$0x1f] %vm2712_vm6, %v2911_v31  ;;  %vm3097_vm6 = vcmask 912128  }
 0x40b   : > { %v2915_v58 = vld [vmem:[#allocation5 + $0x8] sm:$0xff] }
 0x40c   : > { %v2918_v17 = vpack.c.bf16 %v2915_v58, %v2914_v32 }
 0x40e   : > { %4000 = vmatprep.mubr.msk.bf16.mxu1 %vm2972_vm7, %v2918_v17  ;;  %v4062_v17 = vld [vmem:[%s5541_s5 + $0x28] sm:$0xff]  }
 0x40f   : > { %v2916_v33 = vld [vmem:[#allocation5 + $0x10] sm:$0xff]  ;;  %v2917_v9 = vld [vmem:[#allocation5 + $0x18] sm:$0x1] }
 0x410   : > { %v2919_v10 = vpack.c.bf16 %v2917_v9, %v2916_v33 }
 0x412   : > { %4001 = vmatmul.mubr.msk.bf16.vlgmr.msra.gmra.mrb[0].mxu1 %vm2972_vm7, %v2919_v10  ;;  %vm3104_vm7 = vcmask 1043328  }
 0x413   : > { %3345 = vmatpush1.bf16.msra.mxu1 %v4057_v61 }
 0x414   : > { %3346 = vmatprep.subr.bf16.mxu1 %v4105_v60 }
 0x417   : > { %3347 = vmatpush1.bf16.msra.mxu1 %v4058_v1  ;;  %v4110_v1 = vmov 0.0  }
 0x418   : > { %3348 = vmatprep.subr.bf16.mxu1 %v4105_v60 }
 0x41b   : > { %3349 = vmatpush1.bf16.msra.mxu1 %v4059_v38 }
 0x41c   : > { %3350 = vmatprep.subr.bf16.mxu1 %v4105_v60 }
 0x41f   : > { %3351 = vmatpush1.bf16.msra.mxu1 %v4060_v21 }
 0x420   : > { %3352 = vmatprep.subr.bf16.mxu1 %v4105_v60 }
 0x423   : > { %3353 = vmatpush1.bf16.msra.mxu1 %v4061_v25 }
 0x424   : > { %3354 = vmatprep.subr.bf16.mxu1 %v4105_v60 }
 0x427   : > { %3355 = vmatpush1.bf16.msra.mxu1 %v4062_v17 }
 0x428   : > { %3356 = vmatprep.subr.bf16.mxu1 %v4105_v60 }
 0x4e5   : > { %v4002_v39 = vpop.f32.mrb[0].mxu1 }
 0x4e6   : > { %v3025_v34 = vadd.f32 %v4002_v39, %v3893_v28  ;;  %v3016_v62 = vpop.f32.mrb[1].mxu1  ;;  %v4063_v39 = vld [vmem:[%s5541_s5 + $0x30] sm:$0xff]  }
 0x4e7   : > { %v3017_v35 = vadd.f32 %v3893_v28, %v3016_v62  ;;  %v4003_v36 = vpop.f32.mrb[2].mxu1  ;;  %3357 = vmatpush1.bf16.msra.mxu1 %v4063_v39 }
 0x4e8   : > { %vm3033_vm8 = vcmp.ge.f32.partialorder %v3025_v34, 0.0  ;;  %v3042_v37 = vmul.f32 %v3902_v18, %v3025_v34  ;;  %v3028_v40 = vadd.f32 %v4003_v36, %v3893_v28  ;;  %v3019_v7 = vpop.f32.mrb[3].mxu1  ;;  %v4064_v36 = vld [vmem:[%s5541_s5 + $0x38] sm:$0xff]   ;;  %3358 = vmatprep.subr.bf16.mxu1 %v4105_v60 }
 0x4e9   : > { %vm3031_vm0 = vcmp.ge.f32.partialorder %v3017_v35, 0.0  ;;  %v3040_v16 = vmul.f32 %v3902_v18, %v3017_v35  ;;  %v3020_v41 = vadd.f32 %v3893_v28, %v3019_v7 }
 0x4ea   : > { %v3046_v29 = vsel %vm3033_vm8, %v3025_v34, %v3042_v37  ;;  %vm3034_vm5 = vcmp.ge.f32.partialorder %v3028_v40, 0.0  ;;  %v3043_v30 = vmul.f32 %v3902_v18, %v3028_v40  ;;  %vm3120_vm8 = vcmask 259203  }
 0x4eb   : > { %3051 = vst.msk [vmem:[#allocation6 + $0x10] sm:$0xff] %vm3048_vm10, %v3046_v29  ;;  %v3044_v42 = vsel %vm3031_vm0, %v3017_v35, %v3040_v16  ;;  %vm3032_vm13 = vcmp.ge.f32.partialorder %v3020_v41, 0.0  ;;  %v3041_v43 = vmul.f32 %v3902_v18, %v3020_v41  ;;  %3359 = vmatpush1.bf16.msra.mxu1 %v4064_v36  ;;  %v4065_v16 = vld [vmem:[%s5541_s5 + $0x40] sm:$0xff]   ;;  %vm3190_vm0 = vcmask 254080  }
 0x4ec   : > { %3049 = vst.msk [vmem:[#allocation6] sm:$0xff] %vm3048_vm10, %v3044_v42  ;;  %v3047_v46 = vsel %vm3034_vm5, %v3028_v40, %v3043_v30  ;;  %3360 = vmatprep.subr.bf16.mxu1 %v4105_v60  ;;  %vm3198_vm5 = vcmask 392454  }
 0x4ed   : > { %3053 = vst.msk [vmem:[#allocation6 + $0x18] sm:$0x1] %vm3052_vm3, %v3047_v46  ;;  %v3045_v47 = vsel %vm3032_vm13, %v3020_v41, %v3041_v43  ;;  %vm3128_vm13 = vcmask 390403  }
 0x4ee   : > { %3050 = vst.msk [vmem:[#allocation6 + $0x8] sm:$0xff] %vm3048_vm10, %v3045_v47 }
 0x4ef   : > { %3361 = vmatpush1.bf16.msra.mxu1 %v4065_v16 }
 0x4f0   : > { %4004 = vmatprep.subr.bf16.mxu1 %v4110_v1 }
 0x4f2   : > { %v3170_v48 = vld [vmem:[#allocation6 + $0x11] sm:$0x7]  ;;  %v3232_v52 = vld [vmem:[#allocation6 + $0x14] sm:$0x7] }
 0x4f3   : > { %v3212_v49 = vld [vmem:[#allocation6 + $0x10] sm:$0x7]  ;;  %v3172_v50 = vrot.slane %v3170_v48, 5  ;;  %v3064_v51 = vld [vmem:[#allocation6 + $0x2] sm:$0x7]  ;;  %v3234_v26 = vrot.slane %v3232_v52, 2 }
 0x4f4   : > { %v3057_v44 = vld [vmem:[#allocation6 + $0x1] sm:$0x7]  ;;  %v3252_v45 = vld [vmem:[#allocation6 + $0x16] sm:$0x7]  ;;  %3066 = vrot.lane.b32.xlu1 %v3064_v51, %s4103_s27  ;;  %v3214_v57 = vrot.slane %v3212_v49, 2 }
 0x4f5   : > { %3059 = vrot.lane.b32.xlu0 %v3057_v44, %s4104_s28  ;;  %3174 = vst.msk [vmem:[#allocation7 + $0x8] sm:$0x38] %vm3112_vm12, %v3172_v50  ;;  %v3254_v54 = vrot.slane %v3252_v45, 2  ;;  %v3106_v56 = vld [vmem:[#allocation6 + $0xc] sm:$0x7] }
 0x4f6   : > { %3107 = vst.msk [vmem:[#allocation7 + $0x8] sm:$0x7] %vm3055_vm11, %v3106_v56  ;;  %v3071_v59 = vld [vmem:[#allocation6 + $0x5] sm:$0x7]  ;;  %v3222_v53 = vld [vmem:[#allocation6 + $0x11] sm:$0x7] }
 0x4f7   : > { %3256 = vst.msk [vmem:[#allocation7 + $0x8] sm:$0xc0] %vm3179_vm2, %v3254_v54  ;;  %v3224_v27 = vrot.slane %v3222_v53, 2  ;;  %v3078_v63 = vld [vmem:[#allocation6 + $0x6] sm:$0x7] }
 0x4f8   : > { %3257 = vst.msk [vmem:[#allocation7 + $0x18] sm:$0x1] %vm3052_vm3, %v3254_v54  ;;  %3215 = vrot.lane.b32.xlu1 %v3214_v57, %s4106_s12  ;;  %v3054_v0 = vld [vmem:[#allocation6] sm:$0x7]  ;;  %v3108_v3 = vld [vmem:[#allocation6 + $0x5] sm:$0x7] }
 0x4f9   : > { %3073 = vrot.lane.b32.xlu0 %v3071_v59, %s4107_s15  ;;  %3056 = vst.msk [vmem:[#allocation7] sm:$0x7] %vm3055_vm11, %v3054_v0  ;;  %v3085_v4 = vld [vmem:[#allocation6 + $0x7] sm:$0x7]  ;;  %v3110_v8 = vrot.slane %v3108_v3, 5  ;;  %vm3210_vm11 = vcmask 516480  }
 0x4fa   : > { %v3175_v11 = vld [vmem:[#allocation6 + $0xa] sm:$0x7]  ;;  %v3114_v15 = vld [vmem:[#allocation6 + $0x6] sm:$0x7]  ;;  %v3202_v58 = vld [vmem:[#allocation6 + $0xf] sm:$0x7] }
 0x4fb   : > { %v3177_v12 = vrot.slane %v3175_v11, 2  ;;  %3113 = vst.msk [vmem:[#allocation7] sm:$0x38] %vm3112_vm12, %v3110_v8  ;;  %v3092_v13 = vld [vmem:[#allocation6 + $0xa] sm:$0x7]  ;;  %v3116_v20 = vrot.slane %v3114_v15, 5 }
 0x4fc   : > { %3235 = vrot.lane.b32.xlu1 %v3234_v26, %s4108_s16  ;;  %v3099_v14 = vld [vmem:[#allocation6 + $0xb] sm:$0x7]  ;;  %v3122_v24 = vld [vmem:[#allocation6 + $0x7] sm:$0x7]  ;;  %v3204_v9 = vrot.slane %v3202_v58, 2  ;;  %vm3136_vm12 = vcmask 521603  }
 0x4fd   : > { %3225 = vrot.lane.b32.xlu0 %v3224_v27, %s4102_s30  ;;  %3180 = vst.msk [vmem:[#allocation7] sm:$0xc0] %vm3179_vm2, %v3177_v12  ;;  %v3182_v19 = vld [vmem:[#allocation6 + $0xb] sm:$0x7]  ;;  %v3124_v31 = vrot.slane %v3122_v24, 5  ;;  %vm3208_vm2 = vcmask 523654  }
 0x4fe   : > { %v3259_v6 = vld [vmem:[#allocation7 + $0x8] sm:$0xff]  ;;  %3181 = vst.msk [vmem:[#allocation7 + $0x10] sm:$0x1] %vm3052_vm3, %v3177_v12  ;;  %v3184_v23 = vrot.slane %v3182_v19, 2  ;;  %v3162_v62 = vld [vmem:[#allocation6 + $0x10] sm:$0x7] }
 0x4ff   : > { %v3261_v2 = vld [vmem:[#allocation7 + $0x18] sm:$0x1]  ;;  %v3192_v55 = vld [vmem:[#allocation6 + $0xc] sm:$0x7]  ;;  %v3154_v35 = vld [vmem:[#allocation6 + $0xf] sm:$0x7] }
 0x500   : > { %v3263_v5 = vpack.c.bf16 %v3261_v2, %v3259_v6  ;;  %3080 = vrot.lane.b32.xlu1 %v3078_v63, %s4106_s12  ;;  %v3194_v22 = vrot.slane %v3192_v55, 2  ;;  %v3130_v32 = vld [vmem:[#allocation6 + $0xa] sm:$0x7]  ;;  %v3164_v37 = vrot.slane %v3162_v62, 5  ;;  %v3156_v40 = vrot.slane %v3154_v35, 5  ;;  %v4067_v2 = vld [vmem:[%s5543_s7 + $0x8] sm:$0xff]  }
 0x501   : > { %3087 = vrot.lane.b32.xlu0 %v3085_v4, %s4102_s30  ;;  %v3132_v33 = vrot.slane %v3130_v32, 5  ;;  %v3146_v10 = vld [vmem:[#allocation6 + $0xc] sm:$0x7]  ;;  %v3242_v7 = vld [vmem:[#allocation6 + $0x15] sm:$0x7]  ;;  %vm3200_vm3 = vcmask 385280  }
 0x502   : > { %3913 = vmatprep.mubr.msk.bf16.mxu1 %vm3048_vm10, %v3263_v5  ;;  %v3138_v28 = vld [vmem:[#allocation6 + $0xb] sm:$0x7]  ;;  %v3148_v18 = vrot.slane %v3146_v10, 5  ;;  %v3244_v41 = vrot.slane %v3242_v7, 2  ;;  %vm3188_vm10 = vcmask 261254  }
 0x503   : > { %v3140_v34 = vrot.slane %v3138_v28, 5  ;;  %v4066_v6 = vld [vmem:[%s5543_s7] sm:$0xff]  }
 0x504   : > { %3094 = vrot.lane.b32.xlu1 %v3092_v13, %s4108_s16  ;;  %v3903_v3 = vld [vmem:[%s5542_s6] ss:$0 sm:$0xff]  ;;  %v3914_v5 = vld [vmem:[%s5542_s6 + $0x1] ss:$0 sm:$0xff] }
 0x505   : > { %3101 = vrot.lane.b32.xlu0 %v3099_v14, %s4109_s23 }
 0x508   : > { %3117 = vrot.lane.b32.xlu1 %v3116_v20, %s4104_s28 }
 0x509   : > { %3185 = vrot.lane.b32.xlu0 %v3184_v23, %s4104_s28  ;;  %v3915_v23 = vld [vmem:[%s5544_s8] ss:$0 sm:$0xff] }
 0x50c   : > { %3195 = vrot.lane.b32.xlu1 %v3194_v22, %s4103_s27 }
 0x50d   : > { %3125 = vrot.lane.b32.xlu0 %v3124_v31, %s4103_s27  ;;  %s4112_s27 = smov 124  }
 0x510   : > { %3133 = vrot.lane.b32.xlu1 %v3132_v33, %s4107_s15 }
 0x511   : > { %3205 = vrot.lane.b32.xlu0 %v3204_v9, %s4107_s15 }
 0x514   : > { %3149 = vrot.lane.b32.xlu1 %v3148_v18, %s4102_s30 }
 0x515   : > { %3141 = vrot.lane.b32.xlu0 %v3140_v34, %s4106_s12 }
 0x518   : > { %3165 = vrot.lane.b32.xlu1 %v3164_v37, %s4109_s23 }
 0x519   : > { %3157 = vrot.lane.b32.xlu0 %v3156_v40, %s4108_s16 }
 0x51d   : > { %3245 = vrot.lane.b32.xlu0 %v3244_v41, %s4109_s23 }
 0x566   : > { %v3067_v29 = vpop.permute.xlu1 %3066 }
 0x567   : > { %v3060_v30 = vpop.permute.xlu0 %3059 }
 0x568   : > { %3063 = vst.msk [vmem:[#allocation7] sm:$0x7] %vm3062_vm1, %v3060_v30  ;;  %vm3218_vm1 = vcmask 654854  }
 0x569   : > { %3070 = vst.msk [vmem:[#allocation7] sm:$0x7] %vm3069_vm14, %v3067_v29  ;;  %vm3220_vm14 = vcmask 647680  }
 0x56a   : > { %v3216_v42 = vpop.permute.xlu1 %3215 }
 0x56b   : > { %v3074_v43 = vpop.permute.xlu0 %3073 }
 0x56c   : > { %3077 = vst.msk [vmem:[#allocation7] sm:$0x7] %vm3076_vm15, %v3074_v43  ;;  %vm3228_vm15 = vcmask 786054  }
 0x56e   : > { %v3236_v46 = vpop.permute.xlu1 %3235 }
 0x56f   : > { %v3226_v47 = vpop.permute.xlu0 %3225 }
 0x572   : > { %v3081_v48 = vpop.permute.xlu1 %3080 }
 0x573   : > { %v3088_v49 = vpop.permute.xlu0 %3087  ;;  %3084 = vst.msk [vmem:[#allocation7] sm:$0x7] %vm3083_vm4, %v3081_v48  ;;  %vm3230_vm4 = vcmask 778880  }
 0x574   : > { %3091 = vst.msk [vmem:[#allocation7] sm:$0x7] %vm3090_vm9, %v3088_v49  ;;  %vm3238_vm9 = vcmask 917254  }
 0x576   : > { %v3095_v50 = vpop.permute.xlu1 %3094 }
 0x577   : > { %v3102_v51 = vpop.permute.xlu0 %3101  ;;  %3098 = vst.msk [vmem:[#allocation7] sm:$0x7] %vm3097_vm6, %v3095_v50  ;;  %vm3240_vm6 = vcmask 910080  }
 0x578   : > { %3105 = vst.msk [vmem:[#allocation7] sm:$0x7] %vm3104_vm7, %v3102_v51  ;;  %vm3144_vm7 = vcmask 652803  }
 0x57a   : > { %v3118_v44 = vpop.permute.xlu1 %3117 }
 0x57b   : > { %v3186_v45 = vpop.permute.xlu0 %3185  ;;  %3121 = vst.msk [vmem:[#allocation7] sm:$0x38] %vm3120_vm8, %v3118_v44  ;;  %vm3152_vm8 = vcmask 784003  }
 0x57c   : > { %3189 = vst.msk [vmem:[#allocation7] sm:$0xc0] %vm3188_vm10, %v3186_v45  ;;  %vm3160_vm10 = vcmask 915203  }
 0x57d   : > { %3191 = vst.msk [vmem:[#allocation7 + $0x10] sm:$0x1] %vm3190_vm0, %v3186_v45  ;;  %vm3168_vm0 = vcmask 1046403  }
 0x57e   : > { %v3196_v54 = vpop.permute.xlu1 %3195 }
 0x57f   : > { %v3126_v56 = vpop.permute.xlu0 %3125  ;;  %3199 = vst.msk [vmem:[#allocation7] sm:$0xc0] %vm3198_vm5, %v3196_v54  ;;  %vm3248_vm5 = vcmask 1048454  }
 0x580   : > { %3201 = vst.msk [vmem:[#allocation7 + $0x10] sm:$0x1] %vm3200_vm3, %v3196_v54  ;;  %vm3250_vm3 = vcmask 1041280  }
 0x581   : > { %3129 = vst.msk [vmem:[#allocation7] sm:$0x38] %vm3128_vm13, %v3126_v56  ;;  %vm4111_vm13 = vmmov 0  }
 0x582   : > { %v3134_v57 = vpop.permute.xlu1 %3133 }
 0x583   : > { %v3206_v60 = vpop.permute.xlu0 %3205  ;;  %3137 = vst.msk [vmem:[#allocation7] sm:$0x38] %vm3136_vm12, %v3134_v57 }
 0x584   : > { %3209 = vst.msk [vmem:[#allocation7] sm:$0xc0] %vm3208_vm2, %v3206_v60 }
 0x585   : > { %3211 = vst.msk [vmem:[#allocation7 + $0x10] sm:$0x1] %vm3210_vm11, %v3206_v60  ;;  %vm3420_vm11 = vcmask 261120  }
 0x586   : > { %3219 = vst.msk [vmem:[#allocation7] sm:$0xc0] %vm3218_vm1, %v3216_v42  ;;  %v3150_v61 = vpop.permute.xlu1 %3149  ;;  %vm3465_vm1 = vcmask 31744  }
 0x587   : > { %3221 = vst.msk [vmem:[#allocation7 + $0x10] sm:$0x1] %vm3220_vm14, %v3216_v42  ;;  %v3142_v59 = vpop.permute.xlu0 %3141  ;;  %vm3467_vm14 = vcmask 24576  }
 0x588   : > { %3229 = vst.msk [vmem:[#allocation7] sm:$0xc0] %vm3228_vm15, %v3226_v47  ;;  %vm3489_vm15 = vcmask 7168  }
 0x589   : > { %3231 = vst.msk [vmem:[#allocation7 + $0x10] sm:$0x1] %vm3230_vm4, %v3226_v47  ;;  %vm3491_vm4 = vcmask 0  }
 0x58a   : > { %3239 = vst.msk [vmem:[#allocation7] sm:$0xc0] %vm3238_vm9, %v3236_v46  ;;  %v3166_v52 = vpop.permute.xlu1 %3165 }
 0x58b   : > { %3241 = vst.msk [vmem:[#allocation7 + $0x10] sm:$0x1] %vm3240_vm6, %v3236_v46  ;;  %v3158_v53 = vpop.permute.xlu0 %3157 }
 0x58c   : > { %3145 = vst.msk [vmem:[#allocation7] sm:$0x38] %vm3144_vm7, %v3142_v59 }
 0x58d   : > { %3153 = vst.msk [vmem:[#allocation7] sm:$0x38] %vm3152_vm8, %v3150_v61 }
 0x58e   : > { %3161 = vst.msk [vmem:[#allocation7] sm:$0x38] %vm3160_vm10, %v3158_v53 }
 0x58f   : > { %3169 = vst.msk [vmem:[#allocation7] sm:$0x38] %vm3168_vm0, %v3166_v52  ;;  %v3246_v26 = vpop.permute.xlu0 %3245 }
 0x590   : > { %3249 = vst.msk [vmem:[#allocation7] sm:$0xc0] %vm3248_vm5, %v3246_v26 }
 0x591   : > { %3251 = vst.msk [vmem:[#allocation7 + $0x10] sm:$0x1] %vm3250_vm3, %v3246_v26 }
 0x597   : > { %v3258_v27 = vld [vmem:[#allocation7] sm:$0xff] }
 0x598   : > { %v3260_v63 = vld [vmem:[#allocation7 + $0x10] sm:$0x1] }
 0x599   : > { %v3262_v0 = vpack.c.bf16 %v3260_v63, %v3258_v27 }
 0x59b   : > { %3377 = vmatmul.mubr.bf16.vlgmr.msra.gmra.mrb[4].mxu1 %v3262_v0 }
 0x59c   : > { %4008 = vmatprep.mubr.msk.bf16.mxu1 %vm4111_vm13, %v4110_v1  ;;  %4005 = vmatpush3.bf16.msra.mxu1 %v4066_v6 }
 0x59d   : > { %4006 = vmatprep.subr.bf16.mxu1 %v4110_v1 }
 0x5a0   : > { %4007 = vmatpush3.bf16.msra.mxu1 %v4067_v2 }
 0x66e   : > { %v3378_v4 = vpop.f32.mrb[4].mxu1 }
 0x66f   : > { %v3379_v8 = vadd.f32 %v3903_v3, %v3378_v4  ;;  %v3380_v11 = vpop.f32.mrb[5].mxu1 }
 0x670   : > { %v3381_v38 = vpop.f32.mrb[6].mxu1 }
 0x671   : > { %v3392_v12 = vmul.f32 %v3914_v5, %v3379_v8  ;;  %v3382_v13 = vadd.f32 %v3903_v3, %v3381_v38  ;;  %v3383_v14 = vpop.f32.mrb[7].mxu1  ;;  %vm3385_vm12 = vcmp.ge.f32.partialorder %v3379_v8, 0.0 }
 0x673   : > { %vm3386_vm2 = vcmp.ge.f32.partialorder %v3382_v13, 0.0  ;;  %v3393_v15 = vmul.f32 %v3914_v5, %v3382_v13  ;;  %v3394_v19 = vsel %vm3385_vm12, %v3379_v8, %v3392_v12 }
 0x675   : > { %v3395_v21 = vsel %vm3386_vm2, %v3382_v13, %v3393_v15 }
 0x676   : > { %v3396_v20 = vpack.c.bf16 %v3395_v21, %v3394_v19 }
 0x678   : > { %4009 = vmatmul.mubr.msk.bf16.vlgmr.msra.gmra.mrb[8].mxu1 %vm3420_vm11, %v3396_v20 }
 0x74b   : > { %v3458_v55 = vpop.f32.mrb[8].mxu1 }
 0x74c   : > { %v3459_v24 = vadd.f32 %v3915_v23, %v3458_v55  ;;  %v4010_v25 = vpop.f32.mrb[9].mxu1 }
 0x74d   : > { %v3461_v22 = vpop.f32.mrb[10].mxu1 }
 0x74e   : > { %3466 = vst.msk [vmem:[%s367_s11] sm:$0xff] %vm3465_vm1, %v3459_v24  ;;  %v3469_v31 = vsub.f32 0.0, %v3459_v24  ;;  %v3462_v32 = vadd.f32 %v3915_v23, %v3461_v22  ;;  %v4011_v58 = vpop.f32.mrb[11].mxu1 }
 0x750   : > { %v3471_v17 = vmul.f32 1.442695, %v3469_v31  ;;  %3468 = vst.msk [vmem:[%s367_s11 + $0x8] sm:$0x1] %vm3467_vm14, %v3462_v32  ;;  %v3470_v33 = vsub.f32 0.0, %v3462_v32 }
 0x752   : > { %4068 = vpow2.f32 %v3471_v17  ;;  %v3473_v9 = vmul.f32 1.442695, %v3470_v33 }
 0x754   : > { %4070 = vpow2.f32 %v3473_v9 }
 0x75c   : > { %v4069_v10 = vpop.eup %4068 }
 0x75d   : > { %v3475_v28 = vadd.f32 1.0, %v4069_v10 }
 0x75e   : > { %v4071_v39 = vpop.eup %4070 }
 0x75f   : > { %4072 = vrcp.f32 %v3475_v28  ;;  %v3476_v18 = vadd.f32 1.0, %v4071_v39 }
 0x761   : > { %4074 = vrcp.f32 %v3476_v18 }
 0x769   : > { %v4073_v34 = vpop.eup %4072 }
 0x76a   : > { %3483 = vrot.lane.b32.xlu1 %v4073_v34, %s4112_s27 }
 0x76b   : > { %v4075_v62 = vpop.eup %4074 }
 0x76c   : > { %3485 = vrot.lane.b32.xlu0 %v4075_v62, %s4112_s27 }
 0x7dc   : > { %v3484_v35 = vpop.permute.xlu1 %3483 }
 0x7dd   : > { %3490 = vst.msk [vmem:[%s372_s18] sm:$0xff] %vm3489_vm15, %v3484_v35 }
 0x7de   : > { %v3486_v36 = vpop.permute.xlu0 %3485 }
 0x7df   : > { %3492 = vst.msk [vmem:[%s372_s18 + $0x8] sm:$0x1] %vm3491_vm4, %v3486_v36 }
 0x7e0 PF: > { %s21_s13 = sadd.s32 1, %s4084_s13  }
 0x7e1   : > { %p18_p4 = scmp.ge.s32.totalorder %s21_s13, 4  }
 0x7e3   :  { %20 = sbr.rel (!%p18_p4) target bundleno = 1 (0x1), region = 115 }

</bundles_post_ra>
